<compile_context>
chip_gen: v5e
topology: v5e:2x2
jax: 0.10.0
libtpu: 0.0.40
codegen_flags: <defaults>
</compile_context>

<pallas_src>
import jax
import jax.numpy as jnp
import numpy as np
from jax import lax
from jax.experimental import pallas as pl
from jax.experimental.pallas import tpu as pltpu


def _round_up(x, m):
    return ((x + m - 1) // m) * m


def make_lstm_kernel(*, nb_layer, seq_len, t_chunk, b_blk, h_pad,
                     mxu_dtype=jnp.bfloat16, unroll=True):
    n_chunks = -(-seq_len // t_chunk)
    f32 = jnp.float32

    def kernel(g0_ref, *rest):
        # rest = [w_hh0] + [w_ih_l, w_hh_l, b_l for l in 1..L-1]
        #        + [fc_w, fc_b, out_ref, gates_scr, hseq_scr]
        w_hh0_ref = rest[0]
        upper = rest[1:1 + 3 * (nb_layer - 1)]
        fc_w_ref, fc_b_ref, out_ref, gates_scr, hseq_scr = rest[1 + 3 * (nb_layer - 1):]

        h = None
        for l in range(nb_layer):
            if l == 0:
                w_ih, bias = None, None
                w_hh = w_hh0_ref[...]                 # (h_pad, 4*h_pad) bf16
            else:
                w_ih = upper[3 * (l - 1)][...]        # (h_pad, 4*h_pad) bf16
                w_hh = upper[3 * (l - 1) + 1][...]    # (h_pad, 4*h_pad) bf16
                bias = upper[3 * (l - 1) + 2][...]    # (1, 4*h_pad) f32 (b_ih + b_hh)
            write_h = l < nb_layer - 1                # last layer only needs final h

            h = jnp.zeros((b_blk, h_pad), f32)
            c = jnp.zeros((b_blk, h_pad), f32)

            for ck in range(n_chunks):                # static chunk loop over time
                t0 = ck * t_chunk
                tlen = min(t_chunk, seq_len - t0)

                if l > 0:
                    # One batched (tlen*B, H) x (H, 4H) MXU matmul per chunk (bias folded
                    # in once), so the serial critical path below is only h @ W_hh.
                    xin = hseq_scr[t0:t0 + tlen].reshape(tlen * b_blk, h_pad)
                    gates_scr[0:tlen] = (
                        jnp.dot(xin.astype(mxu_dtype), w_ih,
                                preferred_element_type=f32) + bias
                    ).reshape(tlen, b_blk, 4 * h_pad)

                def step(tl, carry, l=l, t0=t0, w_hh=w_hh, write_h=write_h):
                    h, c = carry
                    if l == 0:
                        g_in = g0_ref[t0 + tl]        # embedding-folded gates (f32)
                    else:
                        g_in = gates_scr[tl]
                    g = g_in + jnp.dot(h.astype(mxu_dtype), w_hh,
                                       preferred_element_type=f32)
                    # PyTorch gate order i, f, g, o; each slice is 128-lane aligned.
                    # Gate nonlinearities kept fp32 (v5e EUP has no bf16 path).
                    i_g = jax.nn.sigmoid(g[:, 0 * h_pad:1 * h_pad])
                    f_g = jax.nn.sigmoid(g[:, 1 * h_pad:2 * h_pad])
                    g_g = jnp.tanh(g[:, 2 * h_pad:3 * h_pad])
                    o_g = jax.nn.sigmoid(g[:, 3 * h_pad:4 * h_pad])
                    c_n = f_g * c + i_g * g_g
                    h_n = o_g * jnp.tanh(c_n)
                    if write_h:
                        hseq_scr[t0 + tl] = h_n
                    return (h_n, c_n)

                h, c = lax.fori_loop(0, tlen, step, (h, c), unroll=unroll)

        # Last-timestep FC; output block is lane-dense (B_BLK x C_pad) -> unmasked stores.
        out_ref[...] = (
            jnp.dot(h.astype(mxu_dtype), fc_w_ref[...], preferred_element_type=f32)
            + fc_b_ref[...]
        )

    return kernel


def lstm_net_forward(tokens, params, *, seq_length, in_size, hidden, nb_layer,
                     nb_classes, t_chunk=None, mxu_dtype=jnp.bfloat16):
    """tokens: int32 (B, seq_length). Returns (B, nb_classes) float32 logits."""
    B = tokens.shape[0]
    f32 = jnp.float32

    # --- tiling ---------------------------------------------------------------
    B_BLK = min(_round_up(max(B, 1), 8), 128)          # wide LHS -> real MXU row use
    if B >= 16 and _round_up(B, B_BLK) // B_BLK < 2:
        B_BLK = _round_up((B + 1) // 2, 8)             # keep >=2 blocks for v7x's 2 TCs
    B_pad = _round_up(B, B_BLK)
    H_pad = _round_up(hidden, 128)
    C_pad = _round_up(nb_classes, 128)
    G_pad = 4 * H_pad
    if t_chunk is None:
        t_chunk = min(seq_length, 64)                  # bounds gates scratch for long seqs
    unroll = True if seq_length <= 32 else 4           # partial unroll for long sequences

    # --- weight packing (gate-aligned 128-lane blocks, zero padding is inert) --
    def gate_align_cols(mat):
        # mat: (rows, 4*hidden) -> (rows, 4*H_pad), each gate column block lane-aligned.
        out = jnp.zeros((mat.shape[0], G_pad), f32)
        for k in range(4):
            out = out.at[:, k * H_pad:k * H_pad + hidden].set(
                mat[:, k * hidden:(k + 1) * hidden])
        return out

    def pack_gate_weight(w, in_dim, in_dim_pad):
        # w: (4H, in_dim) torch layout -> (in_dim_pad, 4*H_pad) bf16.
        wt = gate_align_cols(jnp.asarray(w, f32).T)              # (in_dim, 4*H_pad)
        return (jnp.zeros((in_dim_pad, G_pad), f32)
                .at[:in_dim].set(wt).astype(mxu_dtype))

    # --- layer 0: fold embedding + input projection + biases into a gate table --
    w_ih0, w_hh0, b_ih0, b_hh0 = params["layers"][0]
    table = (jnp.asarray(params["emb"], f32) @ jnp.asarray(w_ih0, f32).T
             + jnp.asarray(b_ih0 + b_hh0, f32))                  # (vocab, 4*hidden) f32
    table = gate_align_cols(table)                               # (vocab, 4*H_pad)
    g0 = jnp.take(table, tokens.T, axis=0)                       # (S, B, 4*H_pad) time-major
    g0 = jnp.pad(g0, ((0, 0), (0, B_pad - B), (0, 0)))           # padded rows stay exactly 0

    kernel_args = [g0, pack_gate_weight(w_hh0, hidden, H_pad)]
    for l in range(1, nb_layer):
        w_ih, w_hh, b_ih, b_hh = params["layers"][l]
        kernel_args.append(pack_gate_weight(w_ih, hidden, H_pad))
        kernel_args.append(pack_gate_weight(w_hh, hidden, H_pad))
        kernel_args.append(gate_align_cols(jnp.asarray(b_ih + b_hh, f32)[None, :]))

    fc_w_p = (jnp.zeros((H_pad, C_pad), f32)
              .at[:hidden, :nb_classes].set(jnp.asarray(params["fc_w"], f32).T)
              .astype(mxu_dtype))
    fc_b_p = jnp.zeros((1, C_pad), f32).at[0, :nb_classes].set(
        jnp.asarray(params["fc_b"], f32))
    kernel_args += [fc_w_p, fc_b_p]

    gates_rows = t_chunk if nb_layer > 1 else 1
    hseq_rows = seq_length if nb_layer > 1 else 1

    kernel = make_lstm_kernel(nb_layer=nb_layer, seq_len=seq_length, t_chunk=t_chunk,
                              b_blk=B_BLK, h_pad=H_pad, mxu_dtype=mxu_dtype,
                              unroll=unroll)

    def run(single_buffer_weights):
        def const_spec(shape):
            if single_buffer_weights:
                # Grid-invariant operands: no need to double-buffer their VMEM.
                return pl.BlockSpec(shape, lambda b: (0, 0),
                                    pipeline_mode=pl.Buffered(1))
            return pl.BlockSpec(shape, lambda b: (0, 0))

        in_specs = [pl.BlockSpec((seq_length, B_BLK, G_pad), lambda b: (0, b, 0))]
        in_specs += [const_spec(a.shape) for a in kernel_args[1:]]

        # Resident VMEM estimate -> explicit limit (scoped defaults: 16 MiB v5e, 32 MiB v6e/v7x).
        wbuf = 1 if single_buffer_weights else 2
        weight_bytes = sum(int(a.size) * a.dtype.itemsize for a in kernel_args[1:])
        g0_block = seq_length * B_BLK * G_pad * 4
        out_block = B_BLK * C_pad * 4
        scratch = (gates_rows * B_BLK * G_pad + hseq_rows * B_BLK * H_pad) * 4
        resident = wbuf * weight_bytes + 2 * g0_block + 2 * out_block + scratch
        vmem_limit = int(min(max(1.4 * resident + (2 << 20), 32 << 20), 100 << 20))

        fn = pl.pallas_call(
            kernel,
            out_shape=jax.ShapeDtypeStruct((B_pad, C_pad), f32),
            grid_spec=pltpu.PrefetchScalarGridSpec(
                num_scalar_prefetch=0,
                grid=(B_pad // B_BLK,),                   # independent batch blocks
                in_specs=in_specs,
                out_specs=pl.BlockSpec((B_BLK, C_pad), lambda b: (b, 0)),
                scratch_shapes=[
                    pltpu.VMEM((gates_rows, B_BLK, G_pad), f32),  # chunked input projection
                    pltpu.VMEM((hseq_rows, B_BLK, H_pad), f32),   # hidden seq -> next layer
                ],
            ),
            compiler_params=pltpu.CompilerParams(
                dimension_semantics=("parallel",),        # batch blocks -> both TCs on v7x
                vmem_limit_bytes=vmem_limit,
            ),
        )
        return fn(*kernel_args)

    # TODO(synk): for very deep / very wide models whose stacked weights exceed per-core
    # VMEM, stream per-layer weights (stacked (nb_layer, ...) arrays + manual
    # double-buffered DMA hidden behind the recurrence) instead of keeping all layers
    # resident.
    try:
        out = jax.block_until_ready(run(True))
    except Exception:  # pl.Buffered(1)/pipeline_mode unsupported -> default buffering
        out = jax.block_until_ready(run(False))

    return out[:B, :nb_classes]


def lstm_net_reference(tokens, params):
    """Pure-JAX fp32 reference mirroring torch semantics (eval mode)."""
    x = jnp.take(params["emb"], tokens, axis=0).astype(jnp.float32)  # (B, S, in)
    B = x.shape[0]
    inp = x
    for (w_ih, w_hh, b_ih, b_hh) in params["layers"]:
        H = w_hh.shape[1]

        def step(carry, x_t, w_ih=w_ih, w_hh=w_hh, b_ih=b_ih, b_hh=b_hh):
            h, c = carry
            gates = x_t @ w_ih.T + b_ih + h @ w_hh.T + b_hh
            i, f, g, o = jnp.split(gates, 4, axis=-1)
            i, f, o = jax.nn.sigmoid(i), jax.nn.sigmoid(f), jax.nn.sigmoid(o)
            g = jnp.tanh(g)
            c = f * c + i * g
            h = o * jnp.tanh(c)
            return (h, c), h

        h0 = jnp.zeros((B, H), jnp.float32)
        c0 = jnp.zeros((B, H), jnp.float32)
        _, outs = lax.scan(step, (h0, c0), jnp.swapaxes(inp, 0, 1))
        inp = jnp.swapaxes(outs, 0, 1)
    last = inp[:, -1, :]
    return last @ params["fc_w"].T + params["fc_b"]


def init_params(key, *, in_size, hidden, nb_layer, nb_classes):
    keys = jax.random.split(key, 3 + 4 * nb_layer)
    k_iter = iter(keys)
    params = {}
    params["emb"] = jax.random.normal(next(k_iter), (nb_classes, in_size), jnp.float32)
    layers = []
    bound = 1.0 / np.sqrt(hidden)
    for _ in range(nb_layer):
        in_dim = in_size if not layers else hidden
        w_ih = jax.random.uniform(next(k_iter), (4 * hidden, in_dim), jnp.float32, -bound, bound)
        w_hh = jax.random.uniform(next(k_iter), (4 * hidden, hidden), jnp.float32, -bound, bound)
        b_ih = jax.random.uniform(next(k_iter), (4 * hidden,), jnp.float32, -bound, bound)
        b_hh = jax.random.uniform(next(k_iter), (4 * hidden,), jnp.float32, -bound, bound)
        layers.append((w_ih, w_hh, b_ih, b_hh))
    params["layers"] = layers
    fb = 1.0 / np.sqrt(hidden)
    params["fc_w"] = jax.random.uniform(next(k_iter), (nb_classes, hidden), jnp.float32, -fb, fb)
    params["fc_b"] = jax.random.uniform(next(k_iter), (nb_classes,), jnp.float32, -fb, fb)
    return params


if __name__ == "__main__":
    # Small config consistent with the module's __init__:
    #   in_size=16, hidden_size=32, nb_layer=2, nb_classes=16, seq_length=8, dropout=0.0
    BATCH, SEQ, IN_SIZE, HIDDEN, NB_LAYER, NB_CLASSES = 2, 8, 16, 32, 2, 16

    key = jax.random.PRNGKey(0)
    k_param, k_tok = jax.random.split(key)
    params = init_params(k_param, in_size=IN_SIZE, hidden=HIDDEN,
                         nb_layer=NB_LAYER, nb_classes=NB_CLASSES)
    tokens = jax.random.randint(k_tok, (BATCH, SEQ), 0, NB_CLASSES, dtype=jnp.int32)

    out = lstm_net_forward(tokens, params, seq_length=SEQ, in_size=IN_SIZE,
                           hidden=HIDDEN, nb_layer=NB_LAYER, nb_classes=NB_CLASSES)
    out = jax.block_until_ready(out)

    ref = jax.block_until_ready(lstm_net_reference(tokens, params))
    # bf16 MXU operands (f32 accumulate) vs. the fp32 reference -> loosened tolerance.
    np.testing.assert_allclose(np.asarray(out), np.asarray(ref), rtol=5e-2, atol=5e-2)

    print("KERNEL_OK")
</pallas_src>

<mosaic_0001>
module attributes {stable_mosaic.version = 11 : i64} {
  func.func @kernel(%arg0: i32, %arg1: memref<8x8x512xf32, #tpu.memory_space<vmem>>, %arg2: memref<128x512xbf16, #tpu.memory_space<vmem>>, %arg3: memref<128x512xbf16, #tpu.memory_space<vmem>>, %arg4: memref<128x512xbf16, #tpu.memory_space<vmem>>, %arg5: memref<1x512xf32, #tpu.memory_space<vmem>>, %arg6: memref<128x128xbf16, #tpu.memory_space<vmem>>, %arg7: memref<1x128xf32, #tpu.memory_space<vmem>>, %arg8: memref<8x128xf32, #tpu.memory_space<vmem>>, %arg9: memref<8x8x512xf32, #tpu.memory_space<vmem>>, %arg10: memref<8x8x128xf32, #tpu.memory_space<vmem>>) attributes {dimension_semantics = [#tpu.dimension_semantics<parallel>], iteration_bounds = array<i64: 1>, scalar_prefetch = 0 : i64, scratch_operands = 2 : i64, tpu.core_type = #tpu.core_type<tc>, window_params = [{transform_indices = @transform_0, window_bounds = array<i64: 8, 8, 512>}, {pipeline_mode = #tpu.pipeline_mode<synchronous>, transform_indices = @transform_1, window_bounds = array<i64: 128, 512>}, {pipeline_mode = #tpu.pipeline_mode<synchronous>, transform_indices = @transform_2, window_bounds = array<i64: 128, 512>}, {pipeline_mode = #tpu.pipeline_mode<synchronous>, transform_indices = @transform_3, window_bounds = array<i64: 128, 512>}, {pipeline_mode = #tpu.pipeline_mode<synchronous>, transform_indices = @transform_4, window_bounds = array<i64: 1, 512>}, {pipeline_mode = #tpu.pipeline_mode<synchronous>, transform_indices = @transform_5, window_bounds = array<i64: 128, 128>}, {pipeline_mode = #tpu.pipeline_mode<synchronous>, transform_indices = @transform_6, window_bounds = array<i64: 1, 128>}, {transform_indices = @transform_7, window_bounds = array<i64: 8, 128>}]} {
    %c0 = arith.constant 0 : index
    %c0_0 = arith.constant 0 : index
    %0 = vector.load %arg2[%c0, %c0_0] : memref<128x512xbf16, #tpu.memory_space<vmem>>, vector<128x512xbf16>
    %cst = arith.constant 0.000000e+00 : f32
    %1 = vector.broadcast %cst : f32 to vector<8x128xf32>
    %cst_1 = arith.constant 0.000000e+00 : f32
    %2 = vector.broadcast %cst_1 : f32 to vector<8x128xf32>
    %c0_i32 = arith.constant 0 : i32
    %c0_i32_2 = arith.constant 0 : i32
    %3 = arith.addi %c0_i32_2, %c0_i32 : i32
    %4 = arith.index_cast %3 : i32 to index
    %c0_3 = arith.constant 0 : index
    %c0_4 = arith.constant 0 : index
    %5 = vector.load %arg1[%4, %c0_3, %c0_4] : memref<8x8x512xf32, #tpu.memory_space<vmem>>, vector<1x8x512xf32>
    %6 = vector.shape_cast %5 : vector<1x8x512xf32> to vector<8x512xf32>
    %7 = arith.truncf %1 : vector<8x128xf32> to vector<8x128xbf16>
    %cst_5 = arith.constant dense<0.000000e+00> : vector<8x512xf32>
    %8 = tpu.matmul %7, %0, %cst_5 {dimension_numbers = #tpu.dot_dimension_numbers<[1], [0], [0], [1], [0, 0, 1, 1], [], []>} : vector<8x128xbf16>, vector<128x512xbf16>, vector<8x512xf32> -> vector<8x512xf32>
    %9 = arith.addf %6, %8 : vector<8x512xf32>
    %10 = vector.extract_strided_slice %9 {offsets = [0, 0], sizes = [8, 128], strides = [1, 1]} : vector<8x512xf32> to vector<8x128xf32>
    %11 = arith.negf %10 : vector<8x128xf32>
    %12 = math.exp %11 : vector<8x128xf32>
    %cst_6 = arith.constant 1.000000e+00 : f32
    %13 = vector.broadcast %cst_6 : f32 to vector<8x128xf32>
    %14 = arith.addf %13, %12 : vector<8x128xf32>
    %15 = arith.divf %13, %14 : vector<8x128xf32>
    %16 = vector.extract_strided_slice %9 {offsets = [0, 128], sizes = [8, 128], strides = [1, 1]} : vector<8x512xf32> to vector<8x128xf32>
    %17 = arith.negf %16 : vector<8x128xf32>
    %18 = math.exp %17 : vector<8x128xf32>
    %cst_7 = arith.constant 1.000000e+00 : f32
    %19 = vector.broadcast %cst_7 : f32 to vector<8x128xf32>
    %20 = arith.addf %19, %18 : vector<8x128xf32>
    %21 = arith.divf %19, %20 : vector<8x128xf32>
    %22 = vector.extract_strided_slice %9 {offsets = [0, 256], sizes = [8, 128], strides = [1, 1]} : vector<8x512xf32> to vector<8x128xf32>
    %23 = math.tanh %22 : vector<8x128xf32>
    %24 = vector.extract_strided_slice %9 {offsets = [0, 384], sizes = [8, 128], strides = [1, 1]} : vector<8x512xf32> to vector<8x128xf32>
    %25 = arith.negf %24 : vector<8x128xf32>
    %26 = math.exp %25 : vector<8x128xf32>
    %cst_8 = arith.constant 1.000000e+00 : f32
    %27 = vector.broadcast %cst_8 : f32 to vector<8x128xf32>
    %28 = arith.addf %27, %26 : vector<8x128xf32>
    %29 = arith.divf %27, %28 : vector<8x128xf32>
    %30 = arith.mulf %21, %2 : vector<8x128xf32>
    %31 = arith.mulf %15, %23 : vector<8x128xf32>
    %32 = arith.addf %30, %31 : vector<8x128xf32>
    %33 = math.tanh %32 : vector<8x128xf32>
    %34 = arith.mulf %29, %33 : vector<8x128xf32>
    %c0_i32_9 = arith.constant 0 : i32
    %35 = arith.addi %c0_i32_9, %c0_i32 : i32
    %36 = arith.index_cast %35 : i32 to index
    %c0_10 = arith.constant 0 : index
    %c0_11 = arith.constant 0 : index
    %37 = vector.load %arg10[%36, %c0_10, %c0_11] : memref<8x8x128xf32, #tpu.memory_space<vmem>>, vector<1x8x128xf32>
    %38 = vector.shape_cast %37 : vector<1x8x128xf32> to vector<8x128xf32>
    %39 = vector.shape_cast %34 : vector<8x128xf32> to vector<1x8x128xf32>
    tpu.vector_store %arg10[%36, %c0_10, %c0_11], %39 {strides = array<i32>} : memref<8x8x128xf32, #tpu.memory_space<vmem>>, vector<1x8x128xf32>,
    %c1_i32 = arith.constant 1 : i32
    %c0_i32_12 = arith.constant 0 : i32
    %40 = arith.addi %c0_i32_12, %c1_i32 : i32
    %41 = arith.index_cast %40 : i32 to index
    %c0_13 = arith.constant 0 : index
    %c0_14 = arith.constant 0 : index
    %42 = vector.load %arg1[%41, %c0_13, %c0_14] : memref<8x8x512xf32, #tpu.memory_space<vmem>>, vector<1x8x512xf32>
    %43 = vector.shape_cast %42 : vector<1x8x512xf32> to vector<8x512xf32>
    %44 = arith.truncf %34 : vector<8x128xf32> to vector<8x128xbf16>
    %cst_15 = arith.constant dense<0.000000e+00> : vector<8x512xf32>
    %45 = tpu.matmul %44, %0, %cst_15 {dimension_numbers = #tpu.dot_dimension_numbers<[1], [0], [0], [1], [0, 0, 1, 1], [], []>} : vector<8x128xbf16>, vector<128x512xbf16>, vector<8x512xf32> -> vector<8x512xf32>
    %46 = arith.addf %43, %45 : vector<8x512xf32>
    %47 = vector.extract_strided_slice %46 {offsets = [0, 0], sizes = [8, 128], strides = [1, 1]} : vector<8x512xf32> to vector<8x128xf32>
    %48 = arith.negf %47 : vector<8x128xf32>
    %49 = math.exp %48 : vector<8x128xf32>
    %cst_16 = arith.constant 1.000000e+00 : f32
    %50 = vector.broadcast %cst_16 : f32 to vector<8x128xf32>
    %51 = arith.addf %50, %49 : vector<8x128xf32>
    %52 = arith.divf %50, %51 : vector<8x128xf32>
    %53 = vector.extract_strided_slice %46 {offsets = [0, 128], sizes = [8, 128], strides = [1, 1]} : vector<8x512xf32> to vector<8x128xf32>
    %54 = arith.negf %53 : vector<8x128xf32>
    %55 = math.exp %54 : vector<8x128xf32>
    %cst_17 = arith.constant 1.000000e+00 : f32
    %56 = vector.broadcast %cst_17 : f32 to vector<8x128xf32>
    %57 = arith.addf %56, %55 : vector<8x128xf32>
    %58 = arith.divf %56, %57 : vector<8x128xf32>
    %59 = vector.extract_strided_slice %46 {offsets = [0, 256], sizes = [8, 128], strides = [1, 1]} : vector<8x512xf32> to vector<8x128xf32>
    %60 = math.tanh %59 : vector<8x128xf32>
    %61 = vector.extract_strided_slice %46 {offsets = [0, 384], sizes = [8, 128], strides = [1, 1]} : vector<8x512xf32> to vector<8x128xf32>
    %62 = arith.negf %61 : vector<8x128xf32>
    %63 = math.exp %62 : vector<8x128xf32>
    %cst_18 = arith.constant 1.000000e+00 : f32
    %64 = vector.broadcast %cst_18 : f32 to vector<8x128xf32>
    %65 = arith.addf %64, %63 : vector<8x128xf32>
    %66 = arith.divf %64, %65 : vector<8x128xf32>
    %67 = arith.mulf %58, %32 : vector<8x128xf32>
    %68 = arith.mulf %52, %60 : vector<8x128xf32>
    %69 = arith.addf %67, %68 : vector<8x128xf32>
    %70 = math.tanh %69 : vector<8x128xf32>
    %71 = arith.mulf %66, %70 : vector<8x128xf32>
    %c0_i32_19 = arith.constant 0 : i32
    %72 = arith.addi %c0_i32_19, %c1_i32 : i32
    %73 = arith.index_cast %72 : i32 to index
    %c0_20 = arith.constant 0 : index
    %c0_21 = arith.constant 0 : index
    %74 = vector.load %arg10[%73, %c0_20, %c0_21] : memref<8x8x128xf32, #tpu.memory_space<vmem>>, vector<1x8x128xf32>
    %75 = vector.shape_cast %74 : vector<1x8x128xf32> to vector<8x128xf32>
    %76 = vector.shape_cast %71 : vector<8x128xf32> to vector<1x8x128xf32>
    tpu.vector_store %arg10[%73, %c0_20, %c0_21], %76 {strides = array<i32>} : memref<8x8x128xf32, #tpu.memory_space<vmem>>, vector<1x8x128xf32>,
    %c2_i32 = arith.constant 2 : i32
    %c0_i32_22 = arith.constant 0 : i32
    %77 = arith.addi %c0_i32_22, %c2_i32 : i32
    %78 = arith.index_cast %77 : i32 to index
    %c0_23 = arith.constant 0 : index
    %c0_24 = arith.constant 0 : index
    %79 = vector.load %arg1[%78, %c0_23, %c0_24] : memref<8x8x512xf32, #tpu.memory_space<vmem>>, vector<1x8x512xf32>
    %80 = vector.shape_cast %79 : vector<1x8x512xf32> to vector<8x512xf32>
    %81 = arith.truncf %71 : vector<8x128xf32> to vector<8x128xbf16>
    %cst_25 = arith.constant dense<0.000000e+00> : vector<8x512xf32>
    %82 = tpu.matmul %81, %0, %cst_25 {dimension_numbers = #tpu.dot_dimension_numbers<[1], [0], [0], [1], [0, 0, 1, 1], [], []>} : vector<8x128xbf16>, vector<128x512xbf16>, vector<8x512xf32> -> vector<8x512xf32>
    %83 = arith.addf %80, %82 : vector<8x512xf32>
    %84 = vector.extract_strided_slice %83 {offsets = [0, 0], sizes = [8, 128], strides = [1, 1]} : vector<8x512xf32> to vector<8x128xf32>
    %85 = arith.negf %84 : vector<8x128xf32>
    %86 = math.exp %85 : vector<8x128xf32>
    %cst_26 = arith.constant 1.000000e+00 : f32
    %87 = vector.broadcast %cst_26 : f32 to vector<8x128xf32>
    %88 = arith.addf %87, %86 : vector<8x128xf32>
    %89 = arith.divf %87, %88 : vector<8x128xf32>
    %90 = vector.extract_strided_slice %83 {offsets = [0, 128], sizes = [8, 128], strides = [1, 1]} : vector<8x512xf32> to vector<8x128xf32>
    %91 = arith.negf %90 : vector<8x128xf32>
    %92 = math.exp %91 : vector<8x128xf32>
    %cst_27 = arith.constant 1.000000e+00 : f32
    %93 = vector.broadcast %cst_27 : f32 to vector<8x128xf32>
    %94 = arith.addf %93, %92 : vector<8x128xf32>
    %95 = arith.divf %93, %94 : vector<8x128xf32>
    %96 = vector.extract_strided_slice %83 {offsets = [0, 256], sizes = [8, 128], strides = [1, 1]} : vector<8x512xf32> to vector<8x128xf32>
    %97 = math.tanh %96 : vector<8x128xf32>
    %98 = vector.extract_strided_slice %83 {offsets = [0, 384], sizes = [8, 128], strides = [1, 1]} : vector<8x512xf32> to vector<8x128xf32>
    %99 = arith.negf %98 : vector<8x128xf32>
    %100 = math.exp %99 : vector<8x128xf32>
    %cst_28 = arith.constant 1.000000e+00 : f32
    %101 = vector.broadcast %cst_28 : f32 to vector<8x128xf32>
    %102 = arith.addf %101, %100 : vector<8x128xf32>
    %103 = arith.divf %101, %102 : vector<8x128xf32>
    %104 = arith.mulf %95, %69 : vector<8x128xf32>
    %105 = arith.mulf %89, %97 : vector<8x128xf32>
    %106 = arith.addf %104, %105 : vector<8x128xf32>
    %107 = math.tanh %106 : vector<8x128xf32>
    %108 = arith.mulf %103, %107 : vector<8x128xf32>
    %c0_i32_29 = arith.constant 0 : i32
    %109 = arith.addi %c0_i32_29, %c2_i32 : i32
    %110 = arith.index_cast %109 : i32 to index
    %c0_30 = arith.constant 0 : index
    %c0_31 = arith.constant 0 : index
    %111 = vector.load %arg10[%110, %c0_30, %c0_31] : memref<8x8x128xf32, #tpu.memory_space<vmem>>, vector<1x8x128xf32>
    %112 = vector.shape_cast %111 : vector<1x8x128xf32> to vector<8x128xf32>
    %113 = vector.shape_cast %108 : vector<8x128xf32> to vector<1x8x128xf32>
    tpu.vector_store %arg10[%110, %c0_30, %c0_31], %113 {strides = array<i32>} : memref<8x8x128xf32, #tpu.memory_space<vmem>>, vector<1x8x128xf32>,
    %c3_i32 = arith.constant 3 : i32
    %c0_i32_32 = arith.constant 0 : i32
    %114 = arith.addi %c0_i32_32, %c3_i32 : i32
    %115 = arith.index_cast %114 : i32 to index
    %c0_33 = arith.constant 0 : index
    %c0_34 = arith.constant 0 : index
    %116 = vector.load %arg1[%115, %c0_33, %c0_34] : memref<8x8x512xf32, #tpu.memory_space<vmem>>, vector<1x8x512xf32>
    %117 = vector.shape_cast %116 : vector<1x8x512xf32> to vector<8x512xf32>
    %118 = arith.truncf %108 : vector<8x128xf32> to vector<8x128xbf16>
    %cst_35 = arith.constant dense<0.000000e+00> : vector<8x512xf32>
    %119 = tpu.matmul %118, %0, %cst_35 {dimension_numbers = #tpu.dot_dimension_numbers<[1], [0], [0], [1], [0, 0, 1, 1], [], []>} : vector<8x128xbf16>, vector<128x512xbf16>, vector<8x512xf32> -> vector<8x512xf32>
    %120 = arith.addf %117, %119 : vector<8x512xf32>
    %121 = vector.extract_strided_slice %120 {offsets = [0, 0], sizes = [8, 128], strides = [1, 1]} : vector<8x512xf32> to vector<8x128xf32>
    %122 = arith.negf %121 : vector<8x128xf32>
    %123 = math.exp %122 : vector<8x128xf32>
    %cst_36 = arith.constant 1.000000e+00 : f32
    %124 = vector.broadcast %cst_36 : f32 to vector<8x128xf32>
    %125 = arith.addf %124, %123 : vector<8x128xf32>
    %126 = arith.divf %124, %125 : vector<8x128xf32>
    %127 = vector.extract_strided_slice %120 {offsets = [0, 128], sizes = [8, 128], strides = [1, 1]} : vector<8x512xf32> to vector<8x128xf32>
    %128 = arith.negf %127 : vector<8x128xf32>
    %129 = math.exp %128 : vector<8x128xf32>
    %cst_37 = arith.constant 1.000000e+00 : f32
    %130 = vector.broadcast %cst_37 : f32 to vector<8x128xf32>
    %131 = arith.addf %130, %129 : vector<8x128xf32>
    %132 = arith.divf %130, %131 : vector<8x128xf32>
    %133 = vector.extract_strided_slice %120 {offsets = [0, 256], sizes = [8, 128], strides = [1, 1]} : vector<8x512xf32> to vector<8x128xf32>
    %134 = math.tanh %133 : vector<8x128xf32>
    %135 = vector.extract_strided_slice %120 {offsets = [0, 384], sizes = [8, 128], strides = [1, 1]} : vector<8x512xf32> to vector<8x128xf32>
    %136 = arith.negf %135 : vector<8x128xf32>
    %137 = math.exp %136 : vector<8x128xf32>
    %cst_38 = arith.constant 1.000000e+00 : f32
    %138 = vector.broadcast %cst_38 : f32 to vector<8x128xf32>
    %139 = arith.addf %138, %137 : vector<8x128xf32>
    %140 = arith.divf %138, %139 : vector<8x128xf32>
    %141 = arith.mulf %132, %106 : vector<8x128xf32>
    %142 = arith.mulf %126, %134 : vector<8x128xf32>
    %143 = arith.addf %141, %142 : vector<8x128xf32>
    %144 = math.tanh %143 : vector<8x128xf32>
    %145 = arith.mulf %140, %144 : vector<8x128xf32>
    %c0_i32_39 = arith.constant 0 : i32
    %146 = arith.addi %c0_i32_39, %c3_i32 : i32
    %147 = arith.index_cast %146 : i32 to index
    %c0_40 = arith.constant 0 : index
    %c0_41 = arith.constant 0 : index
    %148 = vector.load %arg10[%147, %c0_40, %c0_41] : memref<8x8x128xf32, #tpu.memory_space<vmem>>, vector<1x8x128xf32>
    %149 = vector.shape_cast %148 : vector<1x8x128xf32> to vector<8x128xf32>
    %150 = vector.shape_cast %145 : vector<8x128xf32> to vector<1x8x128xf32>
    tpu.vector_store %arg10[%147, %c0_40, %c0_41], %150 {strides = array<i32>} : memref<8x8x128xf32, #tpu.memory_space<vmem>>, vector<1x8x128xf32>,
    %c4_i32 = arith.constant 4 : i32
    %c0_i32_42 = arith.constant 0 : i32
    %151 = arith.addi %c0_i32_42, %c4_i32 : i32
    %152 = arith.index_cast %151 : i32 to index
    %c0_43 = arith.constant 0 : index
    %c0_44 = arith.constant 0 : index
    %153 = vector.load %arg1[%152, %c0_43, %c0_44] : memref<8x8x512xf32, #tpu.memory_space<vmem>>, vector<1x8x512xf32>
    %154 = vector.shape_cast %153 : vector<1x8x512xf32> to vector<8x512xf32>
    %155 = arith.truncf %145 : vector<8x128xf32> to vector<8x128xbf16>
    %cst_45 = arith.constant dense<0.000000e+00> : vector<8x512xf32>
    %156 = tpu.matmul %155, %0, %cst_45 {dimension_numbers = #tpu.dot_dimension_numbers<[1], [0], [0], [1], [0, 0, 1, 1], [], []>} : vector<8x128xbf16>, vector<128x512xbf16>, vector<8x512xf32> -> vector<8x512xf32>
    %157 = arith.addf %154, %156 : vector<8x512xf32>
    %158 = vector.extract_strided_slice %157 {offsets = [0, 0], sizes = [8, 128], strides = [1, 1]} : vector<8x512xf32> to vector<8x128xf32>
    %159 = arith.negf %158 : vector<8x128xf32>
    %160 = math.exp %159 : vector<8x128xf32>
    %cst_46 = arith.constant 1.000000e+00 : f32
    %161 = vector.broadcast %cst_46 : f32 to vector<8x128xf32>
    %162 = arith.addf %161, %160 : vector<8x128xf32>
    %163 = arith.divf %161, %162 : vector<8x128xf32>
    %164 = vector.extract_strided_slice %157 {offsets = [0, 128], sizes = [8, 128], strides = [1, 1]} : vector<8x512xf32> to vector<8x128xf32>
    %165 = arith.negf %164 : vector<8x128xf32>
    %166 = math.exp %165 : vector<8x128xf32>
    %cst_47 = arith.constant 1.000000e+00 : f32
    %167 = vector.broadcast %cst_47 : f32 to vector<8x128xf32>
    %168 = arith.addf %167, %166 : vector<8x128xf32>
    %169 = arith.divf %167, %168 : vector<8x128xf32>
    %170 = vector.extract_strided_slice %157 {offsets = [0, 256], sizes = [8, 128], strides = [1, 1]} : vector<8x512xf32> to vector<8x128xf32>
    %171 = math.tanh %170 : vector<8x128xf32>
    %172 = vector.extract_strided_slice %157 {offsets = [0, 384], sizes = [8, 128], strides = [1, 1]} : vector<8x512xf32> to vector<8x128xf32>
    %173 = arith.negf %172 : vector<8x128xf32>
    %174 = math.exp %173 : vector<8x128xf32>
    %cst_48 = arith.constant 1.000000e+00 : f32
    %175 = vector.broadcast %cst_48 : f32 to vector<8x128xf32>
    %176 = arith.addf %175, %174 : vector<8x128xf32>
    %177 = arith.divf %175, %176 : vector<8x128xf32>
    %178 = arith.mulf %169, %143 : vector<8x128xf32>
    %179 = arith.mulf %163, %171 : vector<8x128xf32>
    %180 = arith.addf %178, %179 : vector<8x128xf32>
    %181 = math.tanh %180 : vector<8x128xf32>
    %182 = arith.mulf %177, %181 : vector<8x128xf32>
    %c0_i32_49 = arith.constant 0 : i32
    %183 = arith.addi %c0_i32_49, %c4_i32 : i32
    %184 = arith.index_cast %183 : i32 to index
    %c0_50 = arith.constant 0 : index
    %c0_51 = arith.constant 0 : index
    %185 = vector.load %arg10[%184, %c0_50, %c0_51] : memref<8x8x128xf32, #tpu.memory_space<vmem>>, vector<1x8x128xf32>
    %186 = vector.shape_cast %185 : vector<1x8x128xf32> to vector<8x128xf32>
    %187 = vector.shape_cast %182 : vector<8x128xf32> to vector<1x8x128xf32>
    tpu.vector_store %arg10[%184, %c0_50, %c0_51], %187 {strides = array<i32>} : memref<8x8x128xf32, #tpu.memory_space<vmem>>, vector<1x8x128xf32>,
    %c5_i32 = arith.constant 5 : i32
    %c0_i32_52 = arith.constant 0 : i32
    %188 = arith.addi %c0_i32_52, %c5_i32 : i32
    %189 = arith.index_cast %188 : i32 to index
    %c0_53 = arith.constant 0 : index
    %c0_54 = arith.constant 0 : index
    %190 = vector.load %arg1[%189, %c0_53, %c0_54] : memref<8x8x512xf32, #tpu.memory_space<vmem>>, vector<1x8x512xf32>
    %191 = vector.shape_cast %190 : vector<1x8x512xf32> to vector<8x512xf32>
    %192 = arith.truncf %182 : vector<8x128xf32> to vector<8x128xbf16>
    %cst_55 = arith.constant dense<0.000000e+00> : vector<8x512xf32>
    %193 = tpu.matmul %192, %0, %cst_55 {dimension_numbers = #tpu.dot_dimension_numbers<[1], [0], [0], [1], [0, 0, 1, 1], [], []>} : vector<8x128xbf16>, vector<128x512xbf16>, vector<8x512xf32> -> vector<8x512xf32>
    %194 = arith.addf %191, %193 : vector<8x512xf32>
    %195 = vector.extract_strided_slice %194 {offsets = [0, 0], sizes = [8, 128], strides = [1, 1]} : vector<8x512xf32> to vector<8x128xf32>
    %196 = arith.negf %195 : vector<8x128xf32>
    %197 = math.exp %196 : vector<8x128xf32>
    %cst_56 = arith.constant 1.000000e+00 : f32
    %198 = vector.broadcast %cst_56 : f32 to vector<8x128xf32>
    %199 = arith.addf %198, %197 : vector<8x128xf32>
    %200 = arith.divf %198, %199 : vector<8x128xf32>
    %201 = vector.extract_strided_slice %194 {offsets = [0, 128], sizes = [8, 128], strides = [1, 1]} : vector<8x512xf32> to vector<8x128xf32>
    %202 = arith.negf %201 : vector<8x128xf32>
    %203 = math.exp %202 : vector<8x128xf32>
    %cst_57 = arith.constant 1.000000e+00 : f32
    %204 = vector.broadcast %cst_57 : f32 to vector<8x128xf32>
    %205 = arith.addf %204, %203 : vector<8x128xf32>
    %206 = arith.divf %204, %205 : vector<8x128xf32>
    %207 = vector.extract_strided_slice %194 {offsets = [0, 256], sizes = [8, 128], strides = [1, 1]} : vector<8x512xf32> to vector<8x128xf32>
    %208 = math.tanh %207 : vector<8x128xf32>
    %209 = vector.extract_strided_slice %194 {offsets = [0, 384], sizes = [8, 128], strides = [1, 1]} : vector<8x512xf32> to vector<8x128xf32>
    %210 = arith.negf %209 : vector<8x128xf32>
    %211 = math.exp %210 : vector<8x128xf32>
    %cst_58 = arith.constant 1.000000e+00 : f32
    %212 = vector.broadcast %cst_58 : f32 to vector<8x128xf32>
    %213 = arith.addf %212, %211 : vector<8x128xf32>
    %214 = arith.divf %212, %213 : vector<8x128xf32>
    %215 = arith.mulf %206, %180 : vector<8x128xf32>
    %216 = arith.mulf %200, %208 : vector<8x128xf32>
    %217 = arith.addf %215, %216 : vector<8x128xf32>
    %218 = math.tanh %217 : vector<8x128xf32>
    %219 = arith.mulf %214, %218 : vector<8x128xf32>
    %c0_i32_59 = arith.constant 0 : i32
    %220 = arith.addi %c0_i32_59, %c5_i32 : i32
    %221 = arith.index_cast %220 : i32 to index
    %c0_60 = arith.constant 0 : index
    %c0_61 = arith.constant 0 : index
    %222 = vector.load %arg10[%221, %c0_60, %c0_61] : memref<8x8x128xf32, #tpu.memory_space<vmem>>, vector<1x8x128xf32>
    %223 = vector.shape_cast %222 : vector<1x8x128xf32> to vector<8x128xf32>
    %224 = vector.shape_cast %219 : vector<8x128xf32> to vector<1x8x128xf32>
    tpu.vector_store %arg10[%221, %c0_60, %c0_61], %224 {strides = array<i32>} : memref<8x8x128xf32, #tpu.memory_space<vmem>>, vector<1x8x128xf32>,
    %c6_i32 = arith.constant 6 : i32
    %c0_i32_62 = arith.constant 0 : i32
    %225 = arith.addi %c0_i32_62, %c6_i32 : i32
    %226 = arith.index_cast %225 : i32 to index
    %c0_63 = arith.constant 0 : index
    %c0_64 = arith.constant 0 : index
    %227 = vector.load %arg1[%226, %c0_63, %c0_64] : memref<8x8x512xf32, #tpu.memory_space<vmem>>, vector<1x8x512xf32>
    %228 = vector.shape_cast %227 : vector<1x8x512xf32> to vector<8x512xf32>
    %229 = arith.truncf %219 : vector<8x128xf32> to vector<8x128xbf16>
    %cst_65 = arith.constant dense<0.000000e+00> : vector<8x512xf32>
    %230 = tpu.matmul %229, %0, %cst_65 {dimension_numbers = #tpu.dot_dimension_numbers<[1], [0], [0], [1], [0, 0, 1, 1], [], []>} : vector<8x128xbf16>, vector<128x512xbf16>, vector<8x512xf32> -> vector<8x512xf32>
    %231 = arith.addf %228, %230 : vector<8x512xf32>
    %232 = vector.extract_strided_slice %231 {offsets = [0, 0], sizes = [8, 128], strides = [1, 1]} : vector<8x512xf32> to vector<8x128xf32>
    %233 = arith.negf %232 : vector<8x128xf32>
    %234 = math.exp %233 : vector<8x128xf32>
    %cst_66 = arith.constant 1.000000e+00 : f32
    %235 = vector.broadcast %cst_66 : f32 to vector<8x128xf32>
    %236 = arith.addf %235, %234 : vector<8x128xf32>
    %237 = arith.divf %235, %236 : vector<8x128xf32>
    %238 = vector.extract_strided_slice %231 {offsets = [0, 128], sizes = [8, 128], strides = [1, 1]} : vector<8x512xf32> to vector<8x128xf32>
    %239 = arith.negf %238 : vector<8x128xf32>
    %240 = math.exp %239 : vector<8x128xf32>
    %cst_67 = arith.constant 1.000000e+00 : f32
    %241 = vector.broadcast %cst_67 : f32 to vector<8x128xf32>
    %242 = arith.addf %241, %240 : vector<8x128xf32>
    %243 = arith.divf %241, %242 : vector<8x128xf32>
    %244 = vector.extract_strided_slice %231 {offsets = [0, 256], sizes = [8, 128], strides = [1, 1]} : vector<8x512xf32> to vector<8x128xf32>
    %245 = math.tanh %244 : vector<8x128xf32>
    %246 = vector.extract_strided_slice %231 {offsets = [0, 384], sizes = [8, 128], strides = [1, 1]} : vector<8x512xf32> to vector<8x128xf32>
    %247 = arith.negf %246 : vector<8x128xf32>
    %248 = math.exp %247 : vector<8x128xf32>
    %cst_68 = arith.constant 1.000000e+00 : f32
    %249 = vector.broadcast %cst_68 : f32 to vector<8x128xf32>
    %250 = arith.addf %249, %248 : vector<8x128xf32>
    %251 = arith.divf %249, %250 : vector<8x128xf32>
    %252 = arith.mulf %243, %217 : vector<8x128xf32>
    %253 = arith.mulf %237, %245 : vector<8x128xf32>
    %254 = arith.addf %252, %253 : vector<8x128xf32>
    %255 = math.tanh %254 : vector<8x128xf32>
    %256 = arith.mulf %251, %255 : vector<8x128xf32>
    %c0_i32_69 = arith.constant 0 : i32
    %257 = arith.addi %c0_i32_69, %c6_i32 : i32
    %258 = arith.index_cast %257 : i32 to index
    %c0_70 = arith.constant 0 : index
    %c0_71 = arith.constant 0 : index
    %259 = vector.load %arg10[%258, %c0_70, %c0_71] : memref<8x8x128xf32, #tpu.memory_space<vmem>>, vector<1x8x128xf32>
    %260 = vector.shape_cast %259 : vector<1x8x128xf32> to vector<8x128xf32>
    %261 = vector.shape_cast %256 : vector<8x128xf32> to vector<1x8x128xf32>
    tpu.vector_store %arg10[%258, %c0_70, %c0_71], %261 {strides = array<i32>} : memref<8x8x128xf32, #tpu.memory_space<vmem>>, vector<1x8x128xf32>,
    %c7_i32 = arith.constant 7 : i32
    %c0_i32_72 = arith.constant 0 : i32
    %262 = arith.addi %c0_i32_72, %c7_i32 : i32
    %263 = arith.index_cast %262 : i32 to index
    %c0_73 = arith.constant 0 : index
    %c0_74 = arith.constant 0 : index
    %264 = vector.load %arg1[%263, %c0_73, %c0_74] : memref<8x8x512xf32, #tpu.memory_space<vmem>>, vector<1x8x512xf32>
    %265 = vector.shape_cast %264 : vector<1x8x512xf32> to vector<8x512xf32>
    %266 = arith.truncf %256 : vector<8x128xf32> to vector<8x128xbf16>
    %cst_75 = arith.constant dense<0.000000e+00> : vector<8x512xf32>
    %267 = tpu.matmul %266, %0, %cst_75 {dimension_numbers = #tpu.dot_dimension_numbers<[1], [0], [0], [1], [0, 0, 1, 1], [], []>} : vector<8x128xbf16>, vector<128x512xbf16>, vector<8x512xf32> -> vector<8x512xf32>
    %268 = arith.addf %265, %267 : vector<8x512xf32>
    %269 = vector.extract_strided_slice %268 {offsets = [0, 0], sizes = [8, 128], strides = [1, 1]} : vector<8x512xf32> to vector<8x128xf32>
    %270 = arith.negf %269 : vector<8x128xf32>
    %271 = math.exp %270 : vector<8x128xf32>
    %cst_76 = arith.constant 1.000000e+00 : f32
    %272 = vector.broadcast %cst_76 : f32 to vector<8x128xf32>
    %273 = arith.addf %272, %271 : vector<8x128xf32>
    %274 = arith.divf %272, %273 : vector<8x128xf32>
    %275 = vector.extract_strided_slice %268 {offsets = [0, 128], sizes = [8, 128], strides = [1, 1]} : vector<8x512xf32> to vector<8x128xf32>
    %276 = arith.negf %275 : vector<8x128xf32>
    %277 = math.exp %276 : vector<8x128xf32>
    %cst_77 = arith.constant 1.000000e+00 : f32
    %278 = vector.broadcast %cst_77 : f32 to vector<8x128xf32>
    %279 = arith.addf %278, %277 : vector<8x128xf32>
    %280 = arith.divf %278, %279 : vector<8x128xf32>
    %281 = vector.extract_strided_slice %268 {offsets = [0, 256], sizes = [8, 128], strides = [1, 1]} : vector<8x512xf32> to vector<8x128xf32>
    %282 = math.tanh %281 : vector<8x128xf32>
    %283 = vector.extract_strided_slice %268 {offsets = [0, 384], sizes = [8, 128], strides = [1, 1]} : vector<8x512xf32> to vector<8x128xf32>
    %284 = arith.negf %283 : vector<8x128xf32>
    %285 = math.exp %284 : vector<8x128xf32>
    %cst_78 = arith.constant 1.000000e+00 : f32
    %286 = vector.broadcast %cst_78 : f32 to vector<8x128xf32>
    %287 = arith.addf %286, %285 : vector<8x128xf32>
    %288 = arith.divf %286, %287 : vector<8x128xf32>
    %289 = arith.mulf %280, %254 : vector<8x128xf32>
    %290 = arith.mulf %274, %282 : vector<8x128xf32>
    %291 = arith.addf %289, %290 : vector<8x128xf32>
    %292 = math.tanh %291 : vector<8x128xf32>
    %293 = arith.mulf %288, %292 : vector<8x128xf32>
    %c0_i32_79 = arith.constant 0 : i32
    %294 = arith.addi %c0_i32_79, %c7_i32 : i32
    %295 = arith.index_cast %294 : i32 to index
    %c0_80 = arith.constant 0 : index
    %c0_81 = arith.constant 0 : index
    %296 = vector.load %arg10[%295, %c0_80, %c0_81] : memref<8x8x128xf32, #tpu.memory_space<vmem>>, vector<1x8x128xf32>
    %297 = vector.shape_cast %296 : vector<1x8x128xf32> to vector<8x128xf32>
    %298 = vector.shape_cast %293 : vector<8x128xf32> to vector<1x8x128xf32>
    tpu.vector_store %arg10[%295, %c0_80, %c0_81], %298 {strides = array<i32>} : memref<8x8x128xf32, #tpu.memory_space<vmem>>, vector<1x8x128xf32>,
    %c8_i32 = arith.constant 8 : i32
    %c0_82 = arith.constant 0 : index
    %c0_83 = arith.constant 0 : index
    %299 = vector.load %arg3[%c0_82, %c0_83] : memref<128x512xbf16, #tpu.memory_space<vmem>>, vector<128x512xbf16>
    %c0_84 = arith.constant 0 : index
    %c0_85 = arith.constant 0 : index
    %300 = vector.load %arg4[%c0_84, %c0_85] : memref<128x512xbf16, #tpu.memory_space<vmem>>, vector<128x512xbf16>
    %c0_86 = arith.constant 0 : index
    %c0_87 = arith.constant 0 : index
    %301 = vector.load %arg5[%c0_86, %c0_87] : memref<1x512xf32, #tpu.memory_space<vmem>>, vector<1x512xf32>
    %cst_88 = arith.constant 0.000000e+00 : f32
    %302 = vector.broadcast %cst_88 : f32 to vector<8x128xf32>
    %cst_89 = arith.constant 0.000000e+00 : f32
    %303 = vector.broadcast %cst_89 : f32 to vector<8x128xf32>
    %c0_90 = arith.constant 0 : index
    %c0_91 = arith.constant 0 : index
    %c0_92 = arith.constant 0 : index
    %304 = vector.load %arg10[%c0_90, %c0_91, %c0_92] : memref<8x8x128xf32, #tpu.memory_space<vmem>>, vector<8x8x128xf32>
    %305 = vector.shape_cast %304 : vector<8x8x128xf32> to vector<64x128xf32>
    %306 = arith.truncf %305 : vector<64x128xf32> to vector<64x128xbf16>
    %cst_93 = arith.constant dense<0.000000e+00> : vector<64x512xf32>
    %307 = tpu.matmul %306, %299, %cst_93 {dimension_numbers = #tpu.dot_dimension_numbers<[1], [0], [0], [1], [0, 0, 1, 1], [], []>} : vector<64x128xbf16>, vector<128x512xbf16>, vector<64x512xf32> -> vector<64x512xf32>
    %308 = vector.broadcast %301 : vector<1x512xf32> to vector<64x512xf32>
    %309 = arith.addf %307, %308 : vector<64x512xf32>
    %310 = vector.shape_cast %309 : vector<64x512xf32> to vector<8x8x512xf32>
    %c0_94 = arith.constant 0 : index
    %c0_95 = arith.constant 0 : index
    %c0_96 = arith.constant 0 : index
    %311 = vector.load %arg9[%c0_94, %c0_95, %c0_96] : memref<8x8x512xf32, #tpu.memory_space<vmem>>, vector<8x8x512xf32>
    tpu.vector_store %arg9[%c0_94, %c0_95, %c0_96], %310 {strides = array<i32>} : memref<8x8x512xf32, #tpu.memory_space<vmem>>, vector<8x8x512xf32>,
    %c0_i32_97 = arith.constant 0 : i32
    %312 = arith.index_cast %c0_i32_97 : i32 to index
    %c0_98 = arith.constant 0 : index
    %c0_99 = arith.constant 0 : index
    %313 = vector.load %arg9[%312, %c0_98, %c0_99] : memref<8x8x512xf32, #tpu.memory_space<vmem>>, vector<1x8x512xf32>
    %314 = vector.shape_cast %313 : vector<1x8x512xf32> to vector<8x512xf32>
    %315 = arith.truncf %302 : vector<8x128xf32> to vector<8x128xbf16>
    %cst_100 = arith.constant dense<0.000000e+00> : vector<8x512xf32>
    %316 = tpu.matmul %315, %300, %cst_100 {dimension_numbers = #tpu.dot_dimension_numbers<[1], [0], [0], [1], [0, 0, 1, 1], [], []>} : vector<8x128xbf16>, vector<128x512xbf16>, vector<8x512xf32> -> vector<8x512xf32>
    %317 = arith.addf %314, %316 : vector<8x512xf32>
    %318 = vector.extract_strided_slice %317 {offsets = [0, 0], sizes = [8, 128], strides = [1, 1]} : vector<8x512xf32> to vector<8x128xf32>
    %319 = arith.negf %318 : vector<8x128xf32>
    %320 = math.exp %319 : vector<8x128xf32>
    %cst_101 = arith.constant 1.000000e+00 : f32
    %321 = vector.broadcast %cst_101 : f32 to vector<8x128xf32>
    %322 = arith.addf %321, %320 : vector<8x128xf32>
    %323 = arith.divf %321, %322 : vector<8x128xf32>
    %324 = vector.extract_strided_slice %317 {offsets = [0, 128], sizes = [8, 128], strides = [1, 1]} : vector<8x512xf32> to vector<8x128xf32>
    %325 = arith.negf %324 : vector<8x128xf32>
    %326 = math.exp %325 : vector<8x128xf32>
    %cst_102 = arith.constant 1.000000e+00 : f32
    %327 = vector.broadcast %cst_102 : f32 to vector<8x128xf32>
    %328 = arith.addf %327, %326 : vector<8x128xf32>
    %329 = arith.divf %327, %328 : vector<8x128xf32>
    %330 = vector.extract_strided_slice %317 {offsets = [0, 256], sizes = [8, 128], strides = [1, 1]} : vector<8x512xf32> to vector<8x128xf32>
    %331 = math.tanh %330 : vector<8x128xf32>
    %332 = vector.extract_strided_slice %317 {offsets = [0, 384], sizes = [8, 128], strides = [1, 1]} : vector<8x512xf32> to vector<8x128xf32>
    %333 = arith.negf %332 : vector<8x128xf32>
    %334 = math.exp %333 : vector<8x128xf32>
    %cst_103 = arith.constant 1.000000e+00 : f32
    %335 = vector.broadcast %cst_103 : f32 to vector<8x128xf32>
    %336 = arith.addf %335, %334 : vector<8x128xf32>
    %337 = arith.divf %335, %336 : vector<8x128xf32>
    %338 = arith.mulf %329, %303 : vector<8x128xf32>
    %339 = arith.mulf %323, %331 : vector<8x128xf32>
    %340 = arith.addf %338, %339 : vector<8x128xf32>
    %341 = math.tanh %340 : vector<8x128xf32>
    %342 = arith.mulf %337, %341 : vector<8x128xf32>
    %c1_i32_104 = arith.constant 1 : i32
    %343 = arith.index_cast %c1_i32_104 : i32 to index
    %c0_105 = arith.constant 0 : index
    %c0_106 = arith.constant 0 : index
    %344 = vector.load %arg9[%343, %c0_105, %c0_106] : memref<8x8x512xf32, #tpu.memory_space<vmem>>, vector<1x8x512xf32>
    %345 = vector.shape_cast %344 : vector<1x8x512xf32> to vector<8x512xf32>
    %346 = arith.truncf %342 : vector<8x128xf32> to vector<8x128xbf16>
    %cst_107 = arith.constant dense<0.000000e+00> : vector<8x512xf32>
    %347 = tpu.matmul %346, %300, %cst_107 {dimension_numbers = #tpu.dot_dimension_numbers<[1], [0], [0], [1], [0, 0, 1, 1], [], []>} : vector<8x128xbf16>, vector<128x512xbf16>, vector<8x512xf32> -> vector<8x512xf32>
    %348 = arith.addf %345, %347 : vector<8x512xf32>
    %349 = vector.extract_strided_slice %348 {offsets = [0, 0], sizes = [8, 128], strides = [1, 1]} : vector<8x512xf32> to vector<8x128xf32>
    %350 = arith.negf %349 : vector<8x128xf32>
    %351 = math.exp %350 : vector<8x128xf32>
    %cst_108 = arith.constant 1.000000e+00 : f32
    %352 = vector.broadcast %cst_108 : f32 to vector<8x128xf32>
    %353 = arith.addf %352, %351 : vector<8x128xf32>
    %354 = arith.divf %352, %353 : vector<8x128xf32>
    %355 = vector.extract_strided_slice %348 {offsets = [0, 128], sizes = [8, 128], strides = [1, 1]} : vector<8x512xf32> to vector<8x128xf32>
    %356 = arith.negf %355 : vector<8x128xf32>
    %357 = math.exp %356 : vector<8x128xf32>
    %cst_109 = arith.constant 1.000000e+00 : f32
    %358 = vector.broadcast %cst_109 : f32 to vector<8x128xf32>
    %359 = arith.addf %358, %357 : vector<8x128xf32>
    %360 = arith.divf %358, %359 : vector<8x128xf32>
    %361 = vector.extract_strided_slice %348 {offsets = [0, 256], sizes = [8, 128], strides = [1, 1]} : vector<8x512xf32> to vector<8x128xf32>
    %362 = math.tanh %361 : vector<8x128xf32>
    %363 = vector.extract_strided_slice %348 {offsets = [0, 384], sizes = [8, 128], strides = [1, 1]} : vector<8x512xf32> to vector<8x128xf32>
    %364 = arith.negf %363 : vector<8x128xf32>
    %365 = math.exp %364 : vector<8x128xf32>
    %cst_110 = arith.constant 1.000000e+00 : f32
    %366 = vector.broadcast %cst_110 : f32 to vector<8x128xf32>
    %367 = arith.addf %366, %365 : vector<8x128xf32>
    %368 = arith.divf %366, %367 : vector<8x128xf32>
    %369 = arith.mulf %360, %340 : vector<8x128xf32>
    %370 = arith.mulf %354, %362 : vector<8x128xf32>
    %371 = arith.addf %369, %370 : vector<8x128xf32>
    %372 = math.tanh %371 : vector<8x128xf32>
    %373 = arith.mulf %368, %372 : vector<8x128xf32>
    %c2_i32_111 = arith.constant 2 : i32
    %374 = arith.index_cast %c2_i32_111 : i32 to index
    %c0_112 = arith.constant 0 : index
    %c0_113 = arith.constant 0 : index
    %375 = vector.load %arg9[%374, %c0_112, %c0_113] : memref<8x8x512xf32, #tpu.memory_space<vmem>>, vector<1x8x512xf32>
    %376 = vector.shape_cast %375 : vector<1x8x512xf32> to vector<8x512xf32>
    %377 = arith.truncf %373 : vector<8x128xf32> to vector<8x128xbf16>
    %cst_114 = arith.constant dense<0.000000e+00> : vector<8x512xf32>
    %378 = tpu.matmul %377, %300, %cst_114 {dimension_numbers = #tpu.dot_dimension_numbers<[1], [0], [0], [1], [0, 0, 1, 1], [], []>} : vector<8x128xbf16>, vector<128x512xbf16>, vector<8x512xf32> -> vector<8x512xf32>
    %379 = arith.addf %376, %378 : vector<8x512xf32>
    %380 = vector.extract_strided_slice %379 {offsets = [0, 0], sizes = [8, 128], strides = [1, 1]} : vector<8x512xf32> to vector<8x128xf32>
    %381 = arith.negf %380 : vector<8x128xf32>
    %382 = math.exp %381 : vector<8x128xf32>
    %cst_115 = arith.constant 1.000000e+00 : f32
    %383 = vector.broadcast %cst_115 : f32 to vector<8x128xf32>
    %384 = arith.addf %383, %382 : vector<8x128xf32>
    %385 = arith.divf %383, %384 : vector<8x128xf32>
    %386 = vector.extract_strided_slice %379 {offsets = [0, 128], sizes = [8, 128], strides = [1, 1]} : vector<8x512xf32> to vector<8x128xf32>
    %387 = arith.negf %386 : vector<8x128xf32>
    %388 = math.exp %387 : vector<8x128xf32>
    %cst_116 = arith.constant 1.000000e+00 : f32
    %389 = vector.broadcast %cst_116 : f32 to vector<8x128xf32>
    %390 = arith.addf %389, %388 : vector<8x128xf32>
    %391 = arith.divf %389, %390 : vector<8x128xf32>
    %392 = vector.extract_strided_slice %379 {offsets = [0, 256], sizes = [8, 128], strides = [1, 1]} : vector<8x512xf32> to vector<8x128xf32>
    %393 = math.tanh %392 : vector<8x128xf32>
    %394 = vector.extract_strided_slice %379 {offsets = [0, 384], sizes = [8, 128], strides = [1, 1]} : vector<8x512xf32> to vector<8x128xf32>
    %395 = arith.negf %394 : vector<8x128xf32>
    %396 = math.exp %395 : vector<8x128xf32>
    %cst_117 = arith.constant 1.000000e+00 : f32
    %397 = vector.broadcast %cst_117 : f32 to vector<8x128xf32>
    %398 = arith.addf %397, %396 : vector<8x128xf32>
    %399 = arith.divf %397, %398 : vector<8x128xf32>
    %400 = arith.mulf %391, %371 : vector<8x128xf32>
    %401 = arith.mulf %385, %393 : vector<8x128xf32>
    %402 = arith.addf %400, %401 : vector<8x128xf32>
    %403 = math.tanh %402 : vector<8x128xf32>
    %404 = arith.mulf %399, %403 : vector<8x128xf32>
    %c3_i32_118 = arith.constant 3 : i32
    %405 = arith.index_cast %c3_i32_118 : i32 to index
    %c0_119 = arith.constant 0 : index
    %c0_120 = arith.constant 0 : index
    %406 = vector.load %arg9[%405, %c0_119, %c0_120] : memref<8x8x512xf32, #tpu.memory_space<vmem>>, vector<1x8x512xf32>
    %407 = vector.shape_cast %406 : vector<1x8x512xf32> to vector<8x512xf32>
    %408 = arith.truncf %404 : vector<8x128xf32> to vector<8x128xbf16>
    %cst_121 = arith.constant dense<0.000000e+00> : vector<8x512xf32>
    %409 = tpu.matmul %408, %300, %cst_121 {dimension_numbers = #tpu.dot_dimension_numbers<[1], [0], [0], [1], [0, 0, 1, 1], [], []>} : vector<8x128xbf16>, vector<128x512xbf16>, vector<8x512xf32> -> vector<8x512xf32>
    %410 = arith.addf %407, %409 : vector<8x512xf32>
    %411 = vector.extract_strided_slice %410 {offsets = [0, 0], sizes = [8, 128], strides = [1, 1]} : vector<8x512xf32> to vector<8x128xf32>
    %412 = arith.negf %411 : vector<8x128xf32>
    %413 = math.exp %412 : vector<8x128xf32>
    %cst_122 = arith.constant 1.000000e+00 : f32
    %414 = vector.broadcast %cst_122 : f32 to vector<8x128xf32>
    %415 = arith.addf %414, %413 : vector<8x128xf32>
    %416 = arith.divf %414, %415 : vector<8x128xf32>
    %417 = vector.extract_strided_slice %410 {offsets = [0, 128], sizes = [8, 128], strides = [1, 1]} : vector<8x512xf32> to vector<8x128xf32>
    %418 = arith.negf %417 : vector<8x128xf32>
    %419 = math.exp %418 : vector<8x128xf32>
    %cst_123 = arith.constant 1.000000e+00 : f32
    %420 = vector.broadcast %cst_123 : f32 to vector<8x128xf32>
    %421 = arith.addf %420, %419 : vector<8x128xf32>
    %422 = arith.divf %420, %421 : vector<8x128xf32>
    %423 = vector.extract_strided_slice %410 {offsets = [0, 256], sizes = [8, 128], strides = [1, 1]} : vector<8x512xf32> to vector<8x128xf32>
    %424 = math.tanh %423 : vector<8x128xf32>
    %425 = vector.extract_strided_slice %410 {offsets = [0, 384], sizes = [8, 128], strides = [1, 1]} : vector<8x512xf32> to vector<8x128xf32>
    %426 = arith.negf %425 : vector<8x128xf32>
    %427 = math.exp %426 : vector<8x128xf32>
    %cst_124 = arith.constant 1.000000e+00 : f32
    %428 = vector.broadcast %cst_124 : f32 to vector<8x128xf32>
    %429 = arith.addf %428, %427 : vector<8x128xf32>
    %430 = arith.divf %428, %429 : vector<8x128xf32>
    %431 = arith.mulf %422, %402 : vector<8x128xf32>
    %432 = arith.mulf %416, %424 : vector<8x128xf32>
    %433 = arith.addf %431, %432 : vector<8x128xf32>
    %434 = math.tanh %433 : vector<8x128xf32>
    %435 = arith.mulf %430, %434 : vector<8x128xf32>
    %c4_i32_125 = arith.constant 4 : i32
    %436 = arith.index_cast %c4_i32_125 : i32 to index
    %c0_126 = arith.constant 0 : index
    %c0_127 = arith.constant 0 : index
    %437 = vector.load %arg9[%436, %c0_126, %c0_127] : memref<8x8x512xf32, #tpu.memory_space<vmem>>, vector<1x8x512xf32>
    %438 = vector.shape_cast %437 : vector<1x8x512xf32> to vector<8x512xf32>
    %439 = arith.truncf %435 : vector<8x128xf32> to vector<8x128xbf16>
    %cst_128 = arith.constant dense<0.000000e+00> : vector<8x512xf32>
    %440 = tpu.matmul %439, %300, %cst_128 {dimension_numbers = #tpu.dot_dimension_numbers<[1], [0], [0], [1], [0, 0, 1, 1], [], []>} : vector<8x128xbf16>, vector<128x512xbf16>, vector<8x512xf32> -> vector<8x512xf32>
    %441 = arith.addf %438, %440 : vector<8x512xf32>
    %442 = vector.extract_strided_slice %441 {offsets = [0, 0], sizes = [8, 128], strides = [1, 1]} : vector<8x512xf32> to vector<8x128xf32>
    %443 = arith.negf %442 : vector<8x128xf32>
    %444 = math.exp %443 : vector<8x128xf32>
    %cst_129 = arith.constant 1.000000e+00 : f32
    %445 = vector.broadcast %cst_129 : f32 to vector<8x128xf32>
    %446 = arith.addf %445, %444 : vector<8x128xf32>
    %447 = arith.divf %445, %446 : vector<8x128xf32>
    %448 = vector.extract_strided_slice %441 {offsets = [0, 128], sizes = [8, 128], strides = [1, 1]} : vector<8x512xf32> to vector<8x128xf32>
    %449 = arith.negf %448 : vector<8x128xf32>
    %450 = math.exp %449 : vector<8x128xf32>
    %cst_130 = arith.constant 1.000000e+00 : f32
    %451 = vector.broadcast %cst_130 : f32 to vector<8x128xf32>
    %452 = arith.addf %451, %450 : vector<8x128xf32>
    %453 = arith.divf %451, %452 : vector<8x128xf32>
    %454 = vector.extract_strided_slice %441 {offsets = [0, 256], sizes = [8, 128], strides = [1, 1]} : vector<8x512xf32> to vector<8x128xf32>
    %455 = math.tanh %454 : vector<8x128xf32>
    %456 = vector.extract_strided_slice %441 {offsets = [0, 384], sizes = [8, 128], strides = [1, 1]} : vector<8x512xf32> to vector<8x128xf32>
    %457 = arith.negf %456 : vector<8x128xf32>
    %458 = math.exp %457 : vector<8x128xf32>
    %cst_131 = arith.constant 1.000000e+00 : f32
    %459 = vector.broadcast %cst_131 : f32 to vector<8x128xf32>
    %460 = arith.addf %459, %458 : vector<8x128xf32>
    %461 = arith.divf %459, %460 : vector<8x128xf32>
    %462 = arith.mulf %453, %433 : vector<8x128xf32>
    %463 = arith.mulf %447, %455 : vector<8x128xf32>
    %464 = arith.addf %462, %463 : vector<8x128xf32>
    %465 = math.tanh %464 : vector<8x128xf32>
    %466 = arith.mulf %461, %465 : vector<8x128xf32>
    %c5_i32_132 = arith.constant 5 : i32
    %467 = arith.index_cast %c5_i32_132 : i32 to index
    %c0_133 = arith.constant 0 : index
    %c0_134 = arith.constant 0 : index
    %468 = vector.load %arg9[%467, %c0_133, %c0_134] : memref<8x8x512xf32, #tpu.memory_space<vmem>>, vector<1x8x512xf32>
    %469 = vector.shape_cast %468 : vector<1x8x512xf32> to vector<8x512xf32>
    %470 = arith.truncf %466 : vector<8x128xf32> to vector<8x128xbf16>
    %cst_135 = arith.constant dense<0.000000e+00> : vector<8x512xf32>
    %471 = tpu.matmul %470, %300, %cst_135 {dimension_numbers = #tpu.dot_dimension_numbers<[1], [0], [0], [1], [0, 0, 1, 1], [], []>} : vector<8x128xbf16>, vector<128x512xbf16>, vector<8x512xf32> -> vector<8x512xf32>
    %472 = arith.addf %469, %471 : vector<8x512xf32>
    %473 = vector.extract_strided_slice %472 {offsets = [0, 0], sizes = [8, 128], strides = [1, 1]} : vector<8x512xf32> to vector<8x128xf32>
    %474 = arith.negf %473 : vector<8x128xf32>
    %475 = math.exp %474 : vector<8x128xf32>
    %cst_136 = arith.constant 1.000000e+00 : f32
    %476 = vector.broadcast %cst_136 : f32 to vector<8x128xf32>
    %477 = arith.addf %476, %475 : vector<8x128xf32>
    %478 = arith.divf %476, %477 : vector<8x128xf32>
    %479 = vector.extract_strided_slice %472 {offsets = [0, 128], sizes = [8, 128], strides = [1, 1]} : vector<8x512xf32> to vector<8x128xf32>
    %480 = arith.negf %479 : vector<8x128xf32>
    %481 = math.exp %480 : vector<8x128xf32>
    %cst_137 = arith.constant 1.000000e+00 : f32
    %482 = vector.broadcast %cst_137 : f32 to vector<8x128xf32>
    %483 = arith.addf %482, %481 : vector<8x128xf32>
    %484 = arith.divf %482, %483 : vector<8x128xf32>
    %485 = vector.extract_strided_slice %472 {offsets = [0, 256], sizes = [8, 128], strides = [1, 1]} : vector<8x512xf32> to vector<8x128xf32>
    %486 = math.tanh %485 : vector<8x128xf32>
    %487 = vector.extract_strided_slice %472 {offsets = [0, 384], sizes = [8, 128], strides = [1, 1]} : vector<8x512xf32> to vector<8x128xf32>
    %488 = arith.negf %487 : vector<8x128xf32>
    %489 = math.exp %488 : vector<8x128xf32>
    %cst_138 = arith.constant 1.000000e+00 : f32
    %490 = vector.broadcast %cst_138 : f32 to vector<8x128xf32>
    %491 = arith.addf %490, %489 : vector<8x128xf32>
    %492 = arith.divf %490, %491 : vector<8x128xf32>
    %493 = arith.mulf %484, %464 : vector<8x128xf32>
    %494 = arith.mulf %478, %486 : vector<8x128xf32>
    %495 = arith.addf %493, %494 : vector<8x128xf32>
    %496 = math.tanh %495 : vector<8x128xf32>
    %497 = arith.mulf %492, %496 : vector<8x128xf32>
    %c6_i32_139 = arith.constant 6 : i32
    %498 = arith.index_cast %c6_i32_139 : i32 to index
    %c0_140 = arith.constant 0 : index
    %c0_141 = arith.constant 0 : index
    %499 = vector.load %arg9[%498, %c0_140, %c0_141] : memref<8x8x512xf32, #tpu.memory_space<vmem>>, vector<1x8x512xf32>
    %500 = vector.shape_cast %499 : vector<1x8x512xf32> to vector<8x512xf32>
    %501 = arith.truncf %497 : vector<8x128xf32> to vector<8x128xbf16>
    %cst_142 = arith.constant dense<0.000000e+00> : vector<8x512xf32>
    %502 = tpu.matmul %501, %300, %cst_142 {dimension_numbers = #tpu.dot_dimension_numbers<[1], [0], [0], [1], [0, 0, 1, 1], [], []>} : vector<8x128xbf16>, vector<128x512xbf16>, vector<8x512xf32> -> vector<8x512xf32>
    %503 = arith.addf %500, %502 : vector<8x512xf32>
    %504 = vector.extract_strided_slice %503 {offsets = [0, 0], sizes = [8, 128], strides = [1, 1]} : vector<8x512xf32> to vector<8x128xf32>
    %505 = arith.negf %504 : vector<8x128xf32>
    %506 = math.exp %505 : vector<8x128xf32>
    %cst_143 = arith.constant 1.000000e+00 : f32
    %507 = vector.broadcast %cst_143 : f32 to vector<8x128xf32>
    %508 = arith.addf %507, %506 : vector<8x128xf32>
    %509 = arith.divf %507, %508 : vector<8x128xf32>
    %510 = vector.extract_strided_slice %503 {offsets = [0, 128], sizes = [8, 128], strides = [1, 1]} : vector<8x512xf32> to vector<8x128xf32>
    %511 = arith.negf %510 : vector<8x128xf32>
    %512 = math.exp %511 : vector<8x128xf32>
    %cst_144 = arith.constant 1.000000e+00 : f32
    %513 = vector.broadcast %cst_144 : f32 to vector<8x128xf32>
    %514 = arith.addf %513, %512 : vector<8x128xf32>
    %515 = arith.divf %513, %514 : vector<8x128xf32>
    %516 = vector.extract_strided_slice %503 {offsets = [0, 256], sizes = [8, 128], strides = [1, 1]} : vector<8x512xf32> to vector<8x128xf32>
    %517 = math.tanh %516 : vector<8x128xf32>
    %518 = vector.extract_strided_slice %503 {offsets = [0, 384], sizes = [8, 128], strides = [1, 1]} : vector<8x512xf32> to vector<8x128xf32>
    %519 = arith.negf %518 : vector<8x128xf32>
    %520 = math.exp %519 : vector<8x128xf32>
    %cst_145 = arith.constant 1.000000e+00 : f32
    %521 = vector.broadcast %cst_145 : f32 to vector<8x128xf32>
    %522 = arith.addf %521, %520 : vector<8x128xf32>
    %523 = arith.divf %521, %522 : vector<8x128xf32>
    %524 = arith.mulf %515, %495 : vector<8x128xf32>
    %525 = arith.mulf %509, %517 : vector<8x128xf32>
    %526 = arith.addf %524, %525 : vector<8x128xf32>
    %527 = math.tanh %526 : vector<8x128xf32>
    %528 = arith.mulf %523, %527 : vector<8x128xf32>
    %c7_i32_146 = arith.constant 7 : i32
    %529 = arith.index_cast %c7_i32_146 : i32 to index
    %c0_147 = arith.constant 0 : index
    %c0_148 = arith.constant 0 : index
    %530 = vector.load %arg9[%529, %c0_147, %c0_148] : memref<8x8x512xf32, #tpu.memory_space<vmem>>, vector<1x8x512xf32>
    %531 = vector.shape_cast %530 : vector<1x8x512xf32> to vector<8x512xf32>
    %532 = arith.truncf %528 : vector<8x128xf32> to vector<8x128xbf16>
    %cst_149 = arith.constant dense<0.000000e+00> : vector<8x512xf32>
    %533 = tpu.matmul %532, %300, %cst_149 {dimension_numbers = #tpu.dot_dimension_numbers<[1], [0], [0], [1], [0, 0, 1, 1], [], []>} : vector<8x128xbf16>, vector<128x512xbf16>, vector<8x512xf32> -> vector<8x512xf32>
    %534 = arith.addf %531, %533 : vector<8x512xf32>
    %535 = vector.extract_strided_slice %534 {offsets = [0, 0], sizes = [8, 128], strides = [1, 1]} : vector<8x512xf32> to vector<8x128xf32>
    %536 = arith.negf %535 : vector<8x128xf32>
    %537 = math.exp %536 : vector<8x128xf32>
    %cst_150 = arith.constant 1.000000e+00 : f32
    %538 = vector.broadcast %cst_150 : f32 to vector<8x128xf32>
    %539 = arith.addf %538, %537 : vector<8x128xf32>
    %540 = arith.divf %538, %539 : vector<8x128xf32>
    %541 = vector.extract_strided_slice %534 {offsets = [0, 128], sizes = [8, 128], strides = [1, 1]} : vector<8x512xf32> to vector<8x128xf32>
    %542 = arith.negf %541 : vector<8x128xf32>
    %543 = math.exp %542 : vector<8x128xf32>
    %cst_151 = arith.constant 1.000000e+00 : f32
    %544 = vector.broadcast %cst_151 : f32 to vector<8x128xf32>
    %545 = arith.addf %544, %543 : vector<8x128xf32>
    %546 = arith.divf %544, %545 : vector<8x128xf32>
    %547 = vector.extract_strided_slice %534 {offsets = [0, 256], sizes = [8, 128], strides = [1, 1]} : vector<8x512xf32> to vector<8x128xf32>
    %548 = math.tanh %547 : vector<8x128xf32>
    %549 = vector.extract_strided_slice %534 {offsets = [0, 384], sizes = [8, 128], strides = [1, 1]} : vector<8x512xf32> to vector<8x128xf32>
    %550 = arith.negf %549 : vector<8x128xf32>
    %551 = math.exp %550 : vector<8x128xf32>
    %cst_152 = arith.constant 1.000000e+00 : f32
    %552 = vector.broadcast %cst_152 : f32 to vector<8x128xf32>
    %553 = arith.addf %552, %551 : vector<8x128xf32>
    %554 = arith.divf %552, %553 : vector<8x128xf32>
    %555 = arith.mulf %546, %526 : vector<8x128xf32>
    %556 = arith.mulf %540, %548 : vector<8x128xf32>
    %557 = arith.addf %555, %556 : vector<8x128xf32>
    %558 = math.tanh %557 : vector<8x128xf32>
    %559 = arith.mulf %554, %558 : vector<8x128xf32>
    %c8_i32_153 = arith.constant 8 : i32
    %560 = arith.truncf %559 : vector<8x128xf32> to vector<8x128xbf16>
    %c0_154 = arith.constant 0 : index
    %c0_155 = arith.constant 0 : index
    %561 = vector.load %arg6[%c0_154, %c0_155] : memref<128x128xbf16, #tpu.memory_space<vmem>>, vector<128x128xbf16>
    %cst_156 = arith.constant dense<0.000000e+00> : vector<8x128xf32>
    %562 = tpu.matmul %560, %561, %cst_156 {dimension_numbers = #tpu.dot_dimension_numbers<[1], [0], [0], [1], [0, 0, 1, 1], [], []>} : vector<8x128xbf16>, vector<128x128xbf16>, vector<8x128xf32> -> vector<8x128xf32>
    %c0_157 = arith.constant 0 : index
    %c0_158 = arith.constant 0 : index
    %563 = vector.load %arg7[%c0_157, %c0_158] : memref<1x128xf32, #tpu.memory_space<vmem>>, vector<1x128xf32>
    %564 = vector.broadcast %563 : vector<1x128xf32> to vector<8x128xf32>
    %565 = arith.addf %562, %564 : vector<8x128xf32>
    %c0_159 = arith.constant 0 : index
    %c0_160 = arith.constant 0 : index
    %566 = vector.load %arg8[%c0_159, %c0_160] : memref<8x128xf32, #tpu.memory_space<vmem>>, vector<8x128xf32>
    tpu.vector_store %arg8[%c0_159, %c0_160], %565 {strides = array<i32>} : memref<8x128xf32, #tpu.memory_space<vmem>>, vector<8x128xf32>,
    return
  }
  func.func @transform_0(%arg0: i32) -> (i32, i32, i32) {
    %c0_i32 = arith.constant 0 : i32
    %c0_i32_0 = arith.constant 0 : i32
    %c0_i32_1 = arith.constant 0 : i32
    return %c0_i32, %arg0, %c0_i32_0 : i32, i32, i32
  }
  func.func @transform_1(%arg0: i32) -> (i32, i32) {
    %c0_i32 = arith.constant 0 : i32
    %c0_i32_0 = arith.constant 0 : i32
    %c0_i32_1 = arith.constant 0 : i32
    return %c0_i32, %c0_i32_0 : i32, i32
  }
  func.func @transform_2(%arg0: i32) -> (i32, i32) {
    %c0_i32 = arith.constant 0 : i32
    %c0_i32_0 = arith.constant 0 : i32
    %c0_i32_1 = arith.constant 0 : i32
    return %c0_i32, %c0_i32_0 : i32, i32
  }
  func.func @transform_3(%arg0: i32) -> (i32, i32) {
    %c0_i32 = arith.constant 0 : i32
    %c0_i32_0 = arith.constant 0 : i32
    %c0_i32_1 = arith.constant 0 : i32
    return %c0_i32, %c0_i32_0 : i32, i32
  }
  func.func @transform_4(%arg0: i32) -> (i32, i32) {
    %c0_i32 = arith.constant 0 : i32
    %c0_i32_0 = arith.constant 0 : i32
    %c0_i32_1 = arith.constant 0 : i32
    return %c0_i32, %c0_i32_0 : i32, i32
  }
  func.func @transform_5(%arg0: i32) -> (i32, i32) {
    %c0_i32 = arith.constant 0 : i32
    %c0_i32_0 = arith.constant 0 : i32
    %c0_i32_1 = arith.constant 0 : i32
    return %c0_i32, %c0_i32_0 : i32, i32
  }
  func.func @transform_6(%arg0: i32) -> (i32, i32) {
    %c0_i32 = arith.constant 0 : i32
    %c0_i32_0 = arith.constant 0 : i32
    %c0_i32_1 = arith.constant 0 : i32
    return %c0_i32, %c0_i32_0 : i32, i32
  }
  func.func @transform_7(%arg0: i32) -> (i32, i32) {
    %c0_i32 = arith.constant 0 : i32
    %c0_i32_0 = arith.constant 0 : i32
    return %arg0, %c0_i32 : i32, i32
  }
}

module attributes {stable_mosaic.version = 11 : i64} {
  func.func @kernel(%arg0: i32, %arg1: memref<8x8x512xf32, #tpu.memory_space<vmem>>, %arg2: memref<128x512xbf16, #tpu.memory_space<vmem>>, %arg3: memref<128x512xbf16, #tpu.memory_space<vmem>>, %arg4: memref<128x512xbf16, #tpu.memory_space<vmem>>, %arg5: memref<1x512xf32, #tpu.memory_space<vmem>>, %arg6: memref<128x128xbf16, #tpu.memory_space<vmem>>, %arg7: memref<1x128xf32, #tpu.memory_space<vmem>>, %arg8: memref<8x128xf32, #tpu.memory_space<vmem>>, %arg9: memref<8x8x512xf32, #tpu.memory_space<vmem>>, %arg10: memref<8x8x128xf32, #tpu.memory_space<vmem>>) attributes {dimension_semantics = [#tpu.dimension_semantics<parallel>], iteration_bounds = array<i64: 1>, scalar_prefetch = 0 : i64, scratch_operands = 2 : i64, tpu.core_type = #tpu.core_type<tc>, window_params = [{transform_indices = @transform_0, window_bounds = array<i64: 8, 8, 512>}, {pipeline_mode = #tpu.pipeline_mode<synchronous>, transform_indices = @transform_1, window_bounds = array<i64: 128, 512>}, {pipeline_mode = #tpu.pipeline_mode<synchronous>, transform_indices = @transform_2, window_bounds = array<i64: 128, 512>}, {pipeline_mode = #tpu.pipeline_mode<synchronous>, transform_indices = @transform_3, window_bounds = array<i64: 128, 512>}, {pipeline_mode = #tpu.pipeline_mode<synchronous>, transform_indices = @transform_4, window_bounds = array<i64: 1, 512>}, {pipeline_mode = #tpu.pipeline_mode<synchronous>, transform_indices = @transform_5, window_bounds = array<i64: 128, 128>}, {pipeline_mode = #tpu.pipeline_mode<synchronous>, transform_indices = @transform_6, window_bounds = array<i64: 1, 128>}, {transform_indices = @transform_7, window_bounds = array<i64: 8, 128>}]} {
    %c0 = arith.constant 0 : index
    %c0_0 = arith.constant 0 : index
    %0 = vector.load %arg2[%c0, %c0_0] : memref<128x512xbf16, #tpu.memory_space<vmem>>, vector<128x512xbf16>
    %cst = arith.constant 0.000000e+00 : f32
    %1 = vector.broadcast %cst : f32 to vector<8x128xf32>
    %cst_1 = arith.constant 0.000000e+00 : f32
    %2 = vector.broadcast %cst_1 : f32 to vector<8x128xf32>
    %c0_i32 = arith.constant 0 : i32
    %c0_i32_2 = arith.constant 0 : i32
    %3 = arith.addi %c0_i32_2, %c0_i32 : i32
    %4 = arith.index_cast %3 : i32 to index
    %c0_3 = arith.constant 0 : index
    %c0_4 = arith.constant 0 : index
    %5 = vector.load %arg1[%4, %c0_3, %c0_4] : memref<8x8x512xf32, #tpu.memory_space<vmem>>, vector<1x8x512xf32>
    %6 = vector.shape_cast %5 : vector<1x8x512xf32> to vector<8x512xf32>
    %7 = arith.truncf %1 : vector<8x128xf32> to vector<8x128xbf16>
    %cst_5 = arith.constant dense<0.000000e+00> : vector<8x512xf32>
    %8 = tpu.matmul %7, %0, %cst_5 {dimension_numbers = #tpu.dot_dimension_numbers<[1], [0], [0], [1], [0, 0, 1, 1], [], []>} : vector<8x128xbf16>, vector<128x512xbf16>, vector<8x512xf32> -> vector<8x512xf32>
    %9 = arith.addf %6, %8 : vector<8x512xf32>
    %10 = vector.extract_strided_slice %9 {offsets = [0, 0], sizes = [8, 128], strides = [1, 1]} : vector<8x512xf32> to vector<8x128xf32>
    %11 = arith.negf %10 : vector<8x128xf32>
    %12 = math.exp %11 : vector<8x128xf32>
    %cst_6 = arith.constant 1.000000e+00 : f32
    %13 = vector.broadcast %cst_6 : f32 to vector<8x128xf32>
    %14 = arith.addf %13, %12 : vector<8x128xf32>
    %15 = arith.divf %13, %14 : vector<8x128xf32>
    %16 = vector.extract_strided_slice %9 {offsets = [0, 128], sizes = [8, 128], strides = [1, 1]} : vector<8x512xf32> to vector<8x128xf32>
    %17 = arith.negf %16 : vector<8x128xf32>
    %18 = math.exp %17 : vector<8x128xf32>
    %cst_7 = arith.constant 1.000000e+00 : f32
    %19 = vector.broadcast %cst_7 : f32 to vector<8x128xf32>
    %20 = arith.addf %19, %18 : vector<8x128xf32>
    %21 = arith.divf %19, %20 : vector<8x128xf32>
    %22 = vector.extract_strided_slice %9 {offsets = [0, 256], sizes = [8, 128], strides = [1, 1]} : vector<8x512xf32> to vector<8x128xf32>
    %23 = math.tanh %22 : vector<8x128xf32>
    %24 = vector.extract_strided_slice %9 {offsets = [0, 384], sizes = [8, 128], strides = [1, 1]} : vector<8x512xf32> to vector<8x128xf32>
    %25 = arith.negf %24 : vector<8x128xf32>
    %26 = math.exp %25 : vector<8x128xf32>
    %cst_8 = arith.constant 1.000000e+00 : f32
    %27 = vector.broadcast %cst_8 : f32 to vector<8x128xf32>
    %28 = arith.addf %27, %26 : vector<8x128xf32>
    %29 = arith.divf %27, %28 : vector<8x128xf32>
    %30 = arith.mulf %21, %2 : vector<8x128xf32>
    %31 = arith.mulf %15, %23 : vector<8x128xf32>
    %32 = arith.addf %30, %31 : vector<8x128xf32>
    %33 = math.tanh %32 : vector<8x128xf32>
    %34 = arith.mulf %29, %33 : vector<8x128xf32>
    %c0_i32_9 = arith.constant 0 : i32
    %35 = arith.addi %c0_i32_9, %c0_i32 : i32
    %36 = arith.index_cast %35 : i32 to index
    %c0_10 = arith.constant 0 : index
    %c0_11 = arith.constant 0 : index
    %37 = vector.load %arg10[%36, %c0_10, %c0_11] : memref<8x8x128xf32, #tpu.memory_space<vmem>>, vector<1x8x128xf32>
    %38 = vector.shape_cast %37 : vector<1x8x128xf32> to vector<8x128xf32>
    %39 = vector.shape_cast %34 : vector<8x128xf32> to vector<1x8x128xf32>
    tpu.vector_store %arg10[%36, %c0_10, %c0_11], %39 {strides = array<i32>} : memref<8x8x128xf32, #tpu.memory_space<vmem>>, vector<1x8x128xf32>,
    %c1_i32 = arith.constant 1 : i32
    %c0_i32_12 = arith.constant 0 : i32
    %40 = arith.addi %c0_i32_12, %c1_i32 : i32
    %41 = arith.index_cast %40 : i32 to index
    %c0_13 = arith.constant 0 : index
    %c0_14 = arith.constant 0 : index
    %42 = vector.load %arg1[%41, %c0_13, %c0_14] : memref<8x8x512xf32, #tpu.memory_space<vmem>>, vector<1x8x512xf32>
    %43 = vector.shape_cast %42 : vector<1x8x512xf32> to vector<8x512xf32>
    %44 = arith.truncf %34 : vector<8x128xf32> to vector<8x128xbf16>
    %cst_15 = arith.constant dense<0.000000e+00> : vector<8x512xf32>
    %45 = tpu.matmul %44, %0, %cst_15 {dimension_numbers = #tpu.dot_dimension_numbers<[1], [0], [0], [1], [0, 0, 1, 1], [], []>} : vector<8x128xbf16>, vector<128x512xbf16>, vector<8x512xf32> -> vector<8x512xf32>
    %46 = arith.addf %43, %45 : vector<8x512xf32>
    %47 = vector.extract_strided_slice %46 {offsets = [0, 0], sizes = [8, 128], strides = [1, 1]} : vector<8x512xf32> to vector<8x128xf32>
    %48 = arith.negf %47 : vector<8x128xf32>
    %49 = math.exp %48 : vector<8x128xf32>
    %cst_16 = arith.constant 1.000000e+00 : f32
    %50 = vector.broadcast %cst_16 : f32 to vector<8x128xf32>
    %51 = arith.addf %50, %49 : vector<8x128xf32>
    %52 = arith.divf %50, %51 : vector<8x128xf32>
    %53 = vector.extract_strided_slice %46 {offsets = [0, 128], sizes = [8, 128], strides = [1, 1]} : vector<8x512xf32> to vector<8x128xf32>
    %54 = arith.negf %53 : vector<8x128xf32>
    %55 = math.exp %54 : vector<8x128xf32>
    %cst_17 = arith.constant 1.000000e+00 : f32
    %56 = vector.broadcast %cst_17 : f32 to vector<8x128xf32>
    %57 = arith.addf %56, %55 : vector<8x128xf32>
    %58 = arith.divf %56, %57 : vector<8x128xf32>
    %59 = vector.extract_strided_slice %46 {offsets = [0, 256], sizes = [8, 128], strides = [1, 1]} : vector<8x512xf32> to vector<8x128xf32>
    %60 = math.tanh %59 : vector<8x128xf32>
    %61 = vector.extract_strided_slice %46 {offsets = [0, 384], sizes = [8, 128], strides = [1, 1]} : vector<8x512xf32> to vector<8x128xf32>
    %62 = arith.negf %61 : vector<8x128xf32>
    %63 = math.exp %62 : vector<8x128xf32>
    %cst_18 = arith.constant 1.000000e+00 : f32
    %64 = vector.broadcast %cst_18 : f32 to vector<8x128xf32>
    %65 = arith.addf %64, %63 : vector<8x128xf32>
    %66 = arith.divf %64, %65 : vector<8x128xf32>
    %67 = arith.mulf %58, %32 : vector<8x128xf32>
    %68 = arith.mulf %52, %60 : vector<8x128xf32>
    %69 = arith.addf %67, %68 : vector<8x128xf32>
    %70 = math.tanh %69 : vector<8x128xf32>
    %71 = arith.mulf %66, %70 : vector<8x128xf32>
    %c0_i32_19 = arith.constant 0 : i32
    %72 = arith.addi %c0_i32_19, %c1_i32 : i32
    %73 = arith.index_cast %72 : i32 to index
    %c0_20 = arith.constant 0 : index
    %c0_21 = arith.constant 0 : index
    %74 = vector.load %arg10[%73, %c0_20, %c0_21] : memref<8x8x128xf32, #tpu.memory_space<vmem>>, vector<1x8x128xf32>
    %75 = vector.shape_cast %74 : vector<1x8x128xf32> to vector<8x128xf32>
    %76 = vector.shape_cast %71 : vector<8x128xf32> to vector<1x8x128xf32>
    tpu.vector_store %arg10[%73, %c0_20, %c0_21], %76 {strides = array<i32>} : memref<8x8x128xf32, #tpu.memory_space<vmem>>, vector<1x8x128xf32>,
    %c2_i32 = arith.constant 2 : i32
    %c0_i32_22 = arith.constant 0 : i32
    %77 = arith.addi %c0_i32_22, %c2_i32 : i32
    %78 = arith.index_cast %77 : i32 to index
    %c0_23 = arith.constant 0 : index
    %c0_24 = arith.constant 0 : index
    %79 = vector.load %arg1[%78, %c0_23, %c0_24] : memref<8x8x512xf32, #tpu.memory_space<vmem>>, vector<1x8x512xf32>
    %80 = vector.shape_cast %79 : vector<1x8x512xf32> to vector<8x512xf32>
    %81 = arith.truncf %71 : vector<8x128xf32> to vector<8x128xbf16>
    %cst_25 = arith.constant dense<0.000000e+00> : vector<8x512xf32>
    %82 = tpu.matmul %81, %0, %cst_25 {dimension_numbers = #tpu.dot_dimension_numbers<[1], [0], [0], [1], [0, 0, 1, 1], [], []>} : vector<8x128xbf16>, vector<128x512xbf16>, vector<8x512xf32> -> vector<8x512xf32>
    %83 = arith.addf %80, %82 : vector<8x512xf32>
    %84 = vector.extract_strided_slice %83 {offsets = [0, 0], sizes = [8, 128], strides = [1, 1]} : vector<8x512xf32> to vector<8x128xf32>
    %85 = arith.negf %84 : vector<8x128xf32>
    %86 = math.exp %85 : vector<8x128xf32>
    %cst_26 = arith.constant 1.000000e+00 : f32
    %87 = vector.broadcast %cst_26 : f32 to vector<8x128xf32>
    %88 = arith.addf %87, %86 : vector<8x128xf32>
    %89 = arith.divf %87, %88 : vector<8x128xf32>
    %90 = vector.extract_strided_slice %83 {offsets = [0, 128], sizes = [8, 128], strides = [1, 1]} : vector<8x512xf32> to vector<8x128xf32>
    %91 = arith.negf %90 : vector<8x128xf32>
    %92 = math.exp %91 : vector<8x128xf32>
    %cst_27 = arith.constant 1.000000e+00 : f32
    %93 = vector.broadcast %cst_27 : f32 to vector<8x128xf32>
    %94 = arith.addf %93, %92 : vector<8x128xf32>
    %95 = arith.divf %93, %94 : vector<8x128xf32>
    %96 = vector.extract_strided_slice %83 {offsets = [0, 256], sizes = [8, 128], strides = [1, 1]} : vector<8x512xf32> to vector<8x128xf32>
    %97 = math.tanh %96 : vector<8x128xf32>
    %98 = vector.extract_strided_slice %83 {offsets = [0, 384], sizes = [8, 128], strides = [1, 1]} : vector<8x512xf32> to vector<8x128xf32>
    %99 = arith.negf %98 : vector<8x128xf32>
    %100 = math.exp %99 : vector<8x128xf32>
    %cst_28 = arith.constant 1.000000e+00 : f32
    %101 = vector.broadcast %cst_28 : f32 to vector<8x128xf32>
    %102 = arith.addf %101, %100 : vector<8x128xf32>
    %103 = arith.divf %101, %102 : vector<8x128xf32>
    %104 = arith.mulf %95, %69 : vector<8x128xf32>
    %105 = arith.mulf %89, %97 : vector<8x128xf32>
    %106 = arith.addf %104, %105 : vector<8x128xf32>
    %107 = math.tanh %106 : vector<8x128xf32>
    %108 = arith.mulf %103, %107 : vector<8x128xf32>
    %c0_i32_29 = arith.constant 0 : i32
    %109 = arith.addi %c0_i32_29, %c2_i32 : i32
    %110 = arith.index_cast %109 : i32 to index
    %c0_30 = arith.constant 0 : index
    %c0_31 = arith.constant 0 : index
    %111 = vector.load %arg10[%110, %c0_30, %c0_31] : memref<8x8x128xf32, #tpu.memory_space<vmem>>, vector<1x8x128xf32>
    %112 = vector.shape_cast %111 : vector<1x8x128xf32> to vector<8x128xf32>
    %113 = vector.shape_cast %108 : vector<8x128xf32> to vector<1x8x128xf32>
    tpu.vector_store %arg10[%110, %c0_30, %c0_31], %113 {strides = array<i32>} : memref<8x8x128xf32, #tpu.memory_space<vmem>>, vector<1x8x128xf32>,
    %c3_i32 = arith.constant 3 : i32
    %c0_i32_32 = arith.constant 0 : i32
    %114 = arith.addi %c0_i32_32, %c3_i32 : i32
    %115 = arith.index_cast %114 : i32 to index
    %c0_33 = arith.constant 0 : index
    %c0_34 = arith.constant 0 : index
    %116 = vector.load %arg1[%115, %c0_33, %c0_34] : memref<8x8x512xf32, #tpu.memory_space<vmem>>, vector<1x8x512xf32>
    %117 = vector.shape_cast %116 : vector<1x8x512xf32> to vector<8x512xf32>
    %118 = arith.truncf %108 : vector<8x128xf32> to vector<8x128xbf16>
    %cst_35 = arith.constant dense<0.000000e+00> : vector<8x512xf32>
    %119 = tpu.matmul %118, %0, %cst_35 {dimension_numbers = #tpu.dot_dimension_numbers<[1], [0], [0], [1], [0, 0, 1, 1], [], []>} : vector<8x128xbf16>, vector<128x512xbf16>, vector<8x512xf32> -> vector<8x512xf32>
    %120 = arith.addf %117, %119 : vector<8x512xf32>
    %121 = vector.extract_strided_slice %120 {offsets = [0, 0], sizes = [8, 128], strides = [1, 1]} : vector<8x512xf32> to vector<8x128xf32>
    %122 = arith.negf %121 : vector<8x128xf32>
    %123 = math.exp %122 : vector<8x128xf32>
    %cst_36 = arith.constant 1.000000e+00 : f32
    %124 = vector.broadcast %cst_36 : f32 to vector<8x128xf32>
    %125 = arith.addf %124, %123 : vector<8x128xf32>
    %126 = arith.divf %124, %125 : vector<8x128xf32>
    %127 = vector.extract_strided_slice %120 {offsets = [0, 128], sizes = [8, 128], strides = [1, 1]} : vector<8x512xf32> to vector<8x128xf32>
    %128 = arith.negf %127 : vector<8x128xf32>
    %129 = math.exp %128 : vector<8x128xf32>
    %cst_37 = arith.constant 1.000000e+00 : f32
    %130 = vector.broadcast %cst_37 : f32 to vector<8x128xf32>
    %131 = arith.addf %130, %129 : vector<8x128xf32>
    %132 = arith.divf %130, %131 : vector<8x128xf32>
    %133 = vector.extract_strided_slice %120 {offsets = [0, 256], sizes = [8, 128], strides = [1, 1]} : vector<8x512xf32> to vector<8x128xf32>
    %134 = math.tanh %133 : vector<8x128xf32>
    %135 = vector.extract_strided_slice %120 {offsets = [0, 384], sizes = [8, 128], strides = [1, 1]} : vector<8x512xf32> to vector<8x128xf32>
    %136 = arith.negf %135 : vector<8x128xf32>
    %137 = math.exp %136 : vector<8x128xf32>
    %cst_38 = arith.constant 1.000000e+00 : f32
    %138 = vector.broadcast %cst_38 : f32 to vector<8x128xf32>
    %139 = arith.addf %138, %137 : vector<8x128xf32>
    %140 = arith.divf %138, %139 : vector<8x128xf32>
    %141 = arith.mulf %132, %106 : vector<8x128xf32>
    %142 = arith.mulf %126, %134 : vector<8x128xf32>
    %143 = arith.addf %141, %142 : vector<8x128xf32>
    %144 = math.tanh %143 : vector<8x128xf32>
    %145 = arith.mulf %140, %144 : vector<8x128xf32>
    %c0_i32_39 = arith.constant 0 : i32
    %146 = arith.addi %c0_i32_39, %c3_i32 : i32
    %147 = arith.index_cast %146 : i32 to index
    %c0_40 = arith.constant 0 : index
    %c0_41 = arith.constant 0 : index
    %148 = vector.load %arg10[%147, %c0_40, %c0_41] : memref<8x8x128xf32, #tpu.memory_space<vmem>>, vector<1x8x128xf32>
    %149 = vector.shape_cast %148 : vector<1x8x128xf32> to vector<8x128xf32>
    %150 = vector.shape_cast %145 : vector<8x128xf32> to vector<1x8x128xf32>
    tpu.vector_store %arg10[%147, %c0_40, %c0_41], %150 {strides = array<i32>} : memref<8x8x128xf32, #tpu.memory_space<vmem>>, vector<1x8x128xf32>,
    %c4_i32 = arith.constant 4 : i32
    %c0_i32_42 = arith.constant 0 : i32
    %151 = arith.addi %c0_i32_42, %c4_i32 : i32
    %152 = arith.index_cast %151 : i32 to index
    %c0_43 = arith.constant 0 : index
    %c0_44 = arith.constant 0 : index
    %153 = vector.load %arg1[%152, %c0_43, %c0_44] : memref<8x8x512xf32, #tpu.memory_space<vmem>>, vector<1x8x512xf32>
    %154 = vector.shape_cast %153 : vector<1x8x512xf32> to vector<8x512xf32>
    %155 = arith.truncf %145 : vector<8x128xf32> to vector<8x128xbf16>
    %cst_45 = arith.constant dense<0.000000e+00> : vector<8x512xf32>
    %156 = tpu.matmul %155, %0, %cst_45 {dimension_numbers = #tpu.dot_dimension_numbers<[1], [0], [0], [1], [0, 0, 1, 1], [], []>} : vector<8x128xbf16>, vector<128x512xbf16>, vector<8x512xf32> -> vector<8x512xf32>
    %157 = arith.addf %154, %156 : vector<8x512xf32>
    %158 = vector.extract_strided_slice %157 {offsets = [0, 0], sizes = [8, 128], strides = [1, 1]} : vector<8x512xf32> to vector<8x128xf32>
    %159 = arith.negf %158 : vector<8x128xf32>
    %160 = math.exp %159 : vector<8x128xf32>
    %cst_46 = arith.constant 1.000000e+00 : f32
    %161 = vector.broadcast %cst_46 : f32 to vector<8x128xf32>
    %162 = arith.addf %161, %160 : vector<8x128xf32>
    %163 = arith.divf %161, %162 : vector<8x128xf32>
    %164 = vector.extract_strided_slice %157 {offsets = [0, 128], sizes = [8, 128], strides = [1, 1]} : vector<8x512xf32> to vector<8x128xf32>
    %165 = arith.negf %164 : vector<8x128xf32>
    %166 = math.exp %165 : vector<8x128xf32>
    %cst_47 = arith.constant 1.000000e+00 : f32
    %167 = vector.broadcast %cst_47 : f32 to vector<8x128xf32>
    %168 = arith.addf %167, %166 : vector<8x128xf32>
    %169 = arith.divf %167, %168 : vector<8x128xf32>
    %170 = vector.extract_strided_slice %157 {offsets = [0, 256], sizes = [8, 128], strides = [1, 1]} : vector<8x512xf32> to vector<8x128xf32>
    %171 = math.tanh %170 : vector<8x128xf32>
    %172 = vector.extract_strided_slice %157 {offsets = [0, 384], sizes = [8, 128], strides = [1, 1]} : vector<8x512xf32> to vector<8x128xf32>
    %173 = arith.negf %172 : vector<8x128xf32>
    %174 = math.exp %173 : vector<8x128xf32>
    %cst_48 = arith.constant 1.000000e+00 : f32
    %175 = vector.broadcast %cst_48 : f32 to vector<8x128xf32>
    %176 = arith.addf %175, %174 : vector<8x128xf32>
    %177 = arith.divf %175, %176 : vector<8x128xf32>
    %178 = arith.mulf %169, %143 : vector<8x128xf32>
    %179 = arith.mulf %163, %171 : vector<8x128xf32>
    %180 = arith.addf %178, %179 : vector<8x128xf32>
    %181 = math.tanh %180 : vector<8x128xf32>
    %182 = arith.mulf %177, %181 : vector<8x128xf32>
    %c0_i32_49 = arith.constant 0 : i32
    %183 = arith.addi %c0_i32_49, %c4_i32 : i32
    %184 = arith.index_cast %183 : i32 to index
    %c0_50 = arith.constant 0 : index
    %c0_51 = arith.constant 0 : index
    %185 = vector.load %arg10[%184, %c0_50, %c0_51] : memref<8x8x128xf32, #tpu.memory_space<vmem>>, vector<1x8x128xf32>
    %186 = vector.shape_cast %185 : vector<1x8x128xf32> to vector<8x128xf32>
    %187 = vector.shape_cast %182 : vector<8x128xf32> to vector<1x8x128xf32>
    tpu.vector_store %arg10[%184, %c0_50, %c0_51], %187 {strides = array<i32>} : memref<8x8x128xf32, #tpu.memory_space<vmem>>, vector<1x8x128xf32>,
    %c5_i32 = arith.constant 5 : i32
    %c0_i32_52 = arith.constant 0 : i32
    %188 = arith.addi %c0_i32_52, %c5_i32 : i32
    %189 = arith.index_cast %188 : i32 to index
    %c0_53 = arith.constant 0 : index
    %c0_54 = arith.constant 0 : index
    %190 = vector.load %arg1[%189, %c0_53, %c0_54] : memref<8x8x512xf32, #tpu.memory_space<vmem>>, vector<1x8x512xf32>
    %191 = vector.shape_cast %190 : vector<1x8x512xf32> to vector<8x512xf32>
    %192 = arith.truncf %182 : vector<8x128xf32> to vector<8x128xbf16>
    %cst_55 = arith.constant dense<0.000000e+00> : vector<8x512xf32>
    %193 = tpu.matmul %192, %0, %cst_55 {dimension_numbers = #tpu.dot_dimension_numbers<[1], [0], [0], [1], [0, 0, 1, 1], [], []>} : vector<8x128xbf16>, vector<128x512xbf16>, vector<8x512xf32> -> vector<8x512xf32>
    %194 = arith.addf %191, %193 : vector<8x512xf32>
    %195 = vector.extract_strided_slice %194 {offsets = [0, 0], sizes = [8, 128], strides = [1, 1]} : vector<8x512xf32> to vector<8x128xf32>
    %196 = arith.negf %195 : vector<8x128xf32>
    %197 = math.exp %196 : vector<8x128xf32>
    %cst_56 = arith.constant 1.000000e+00 : f32
    %198 = vector.broadcast %cst_56 : f32 to vector<8x128xf32>
    %199 = arith.addf %198, %197 : vector<8x128xf32>
    %200 = arith.divf %198, %199 : vector<8x128xf32>
    %201 = vector.extract_strided_slice %194 {offsets = [0, 128], sizes = [8, 128], strides = [1, 1]} : vector<8x512xf32> to vector<8x128xf32>
    %202 = arith.negf %201 : vector<8x128xf32>
    %203 = math.exp %202 : vector<8x128xf32>
    %cst_57 = arith.constant 1.000000e+00 : f32
    %204 = vector.broadcast %cst_57 : f32 to vector<8x128xf32>
    %205 = arith.addf %204, %203 : vector<8x128xf32>
    %206 = arith.divf %204, %205 : vector<8x128xf32>
    %207 = vector.extract_strided_slice %194 {offsets = [0, 256], sizes = [8, 128], strides = [1, 1]} : vector<8x512xf32> to vector<8x128xf32>
    %208 = math.tanh %207 : vector<8x128xf32>
    %209 = vector.extract_strided_slice %194 {offsets = [0, 384], sizes = [8, 128], strides = [1, 1]} : vector<8x512xf32> to vector<8x128xf32>
    %210 = arith.negf %209 : vector<8x128xf32>
    %211 = math.exp %210 : vector<8x128xf32>
    %cst_58 = arith.constant 1.000000e+00 : f32
    %212 = vector.broadcast %cst_58 : f32 to vector<8x128xf32>
    %213 = arith.addf %212, %211 : vector<8x128xf32>
    %214 = arith.divf %212, %213 : vector<8x128xf32>
    %215 = arith.mulf %206, %180 : vector<8x128xf32>
    %216 = arith.mulf %200, %208 : vector<8x128xf32>
    %217 = arith.addf %215, %216 : vector<8x128xf32>
    %218 = math.tanh %217 : vector<8x128xf32>
    %219 = arith.mulf %214, %218 : vector<8x128xf32>
    %c0_i32_59 = arith.constant 0 : i32
    %220 = arith.addi %c0_i32_59, %c5_i32 : i32
    %221 = arith.index_cast %220 : i32 to index
    %c0_60 = arith.constant 0 : index
    %c0_61 = arith.constant 0 : index
    %222 = vector.load %arg10[%221, %c0_60, %c0_61] : memref<8x8x128xf32, #tpu.memory_space<vmem>>, vector<1x8x128xf32>
    %223 = vector.shape_cast %222 : vector<1x8x128xf32> to vector<8x128xf32>
    %224 = vector.shape_cast %219 : vector<8x128xf32> to vector<1x8x128xf32>
    tpu.vector_store %arg10[%221, %c0_60, %c0_61], %224 {strides = array<i32>} : memref<8x8x128xf32, #tpu.memory_space<vmem>>, vector<1x8x128xf32>,
    %c6_i32 = arith.constant 6 : i32
    %c0_i32_62 = arith.constant 0 : i32
    %225 = arith.addi %c0_i32_62, %c6_i32 : i32
    %226 = arith.index_cast %225 : i32 to index
    %c0_63 = arith.constant 0 : index
    %c0_64 = arith.constant 0 : index
    %227 = vector.load %arg1[%226, %c0_63, %c0_64] : memref<8x8x512xf32, #tpu.memory_space<vmem>>, vector<1x8x512xf32>
    %228 = vector.shape_cast %227 : vector<1x8x512xf32> to vector<8x512xf32>
    %229 = arith.truncf %219 : vector<8x128xf32> to vector<8x128xbf16>
    %cst_65 = arith.constant dense<0.000000e+00> : vector<8x512xf32>
    %230 = tpu.matmul %229, %0, %cst_65 {dimension_numbers = #tpu.dot_dimension_numbers<[1], [0], [0], [1], [0, 0, 1, 1], [], []>} : vector<8x128xbf16>, vector<128x512xbf16>, vector<8x512xf32> -> vector<8x512xf32>
    %231 = arith.addf %228, %230 : vector<8x512xf32>
    %232 = vector.extract_strided_slice %231 {offsets = [0, 0], sizes = [8, 128], strides = [1, 1]} : vector<8x512xf32> to vector<8x128xf32>
    %233 = arith.negf %232 : vector<8x128xf32>
    %234 = math.exp %233 : vector<8x128xf32>
    %cst_66 = arith.constant 1.000000e+00 : f32
    %235 = vector.broadcast %cst_66 : f32 to vector<8x128xf32>
    %236 = arith.addf %235, %234 : vector<8x128xf32>
    %237 = arith.divf %235, %236 : vector<8x128xf32>
    %238 = vector.extract_strided_slice %231 {offsets = [0, 128], sizes = [8, 128], strides = [1, 1]} : vector<8x512xf32> to vector<8x128xf32>
    %239 = arith.negf %238 : vector<8x128xf32>
    %240 = math.exp %239 : vector<8x128xf32>
    %cst_67 = arith.constant 1.000000e+00 : f32
    %241 = vector.broadcast %cst_67 : f32 to vector<8x128xf32>
    %242 = arith.addf %241, %240 : vector<8x128xf32>
    %243 = arith.divf %241, %242 : vector<8x128xf32>
    %244 = vector.extract_strided_slice %231 {offsets = [0, 256], sizes = [8, 128], strides = [1, 1]} : vector<8x512xf32> to vector<8x128xf32>
    %245 = math.tanh %244 : vector<8x128xf32>
    %246 = vector.extract_strided_slice %231 {offsets = [0, 384], sizes = [8, 128], strides = [1, 1]} : vector<8x512xf32> to vector<8x128xf32>
    %247 = arith.negf %246 : vector<8x128xf32>
    %248 = math.exp %247 : vector<8x128xf32>
    %cst_68 = arith.constant 1.000000e+00 : f32
    %249 = vector.broadcast %cst_68 : f32 to vector<8x128xf32>
    %250 = arith.addf %249, %248 : vector<8x128xf32>
    %251 = arith.divf %249, %250 : vector<8x128xf32>
    %252 = arith.mulf %243, %217 : vector<8x128xf32>
    %253 = arith.mulf %237, %245 : vector<8x128xf32>
    %254 = arith.addf %252, %253 : vector<8x128xf32>
    %255 = math.tanh %254 : vector<8x128xf32>
    %256 = arith.mulf %251, %255 : vector<8x128xf32>
    %c0_i32_69 = arith.constant 0 : i32
    %257 = arith.addi %c0_i32_69, %c6_i32 : i32
    %258 = arith.index_cast %257 : i32 to index
    %c0_70 = arith.constant 0 : index
    %c0_71 = arith.constant 0 : index
    %259 = vector.load %arg10[%258, %c0_70, %c0_71] : memref<8x8x128xf32, #tpu.memory_space<vmem>>, vector<1x8x128xf32>
    %260 = vector.shape_cast %259 : vector<1x8x128xf32> to vector<8x128xf32>
    %261 = vector.shape_cast %256 : vector<8x128xf32> to vector<1x8x128xf32>
    tpu.vector_store %arg10[%258, %c0_70, %c0_71], %261 {strides = array<i32>} : memref<8x8x128xf32, #tpu.memory_space<vmem>>, vector<1x8x128xf32>,
    %c7_i32 = arith.constant 7 : i32
    %c0_i32_72 = arith.constant 0 : i32
    %262 = arith.addi %c0_i32_72, %c7_i32 : i32
    %263 = arith.index_cast %262 : i32 to index
    %c0_73 = arith.constant 0 : index
    %c0_74 = arith.constant 0 : index
    %264 = vector.load %arg1[%263, %c0_73, %c0_74] : memref<8x8x512xf32, #tpu.memory_space<vmem>>, vector<1x8x512xf32>
    %265 = vector.shape_cast %264 : vector<1x8x512xf32> to vector<8x512xf32>
    %266 = arith.truncf %256 : vector<8x128xf32> to vector<8x128xbf16>
    %cst_75 = arith.constant dense<0.000000e+00> : vector<8x512xf32>
    %267 = tpu.matmul %266, %0, %cst_75 {dimension_numbers = #tpu.dot_dimension_numbers<[1], [0], [0], [1], [0, 0, 1, 1], [], []>} : vector<8x128xbf16>, vector<128x512xbf16>, vector<8x512xf32> -> vector<8x512xf32>
    %268 = arith.addf %265, %267 : vector<8x512xf32>
    %269 = vector.extract_strided_slice %268 {offsets = [0, 0], sizes = [8, 128], strides = [1, 1]} : vector<8x512xf32> to vector<8x128xf32>
    %270 = arith.negf %269 : vector<8x128xf32>
    %271 = math.exp %270 : vector<8x128xf32>
    %cst_76 = arith.constant 1.000000e+00 : f32
    %272 = vector.broadcast %cst_76 : f32 to vector<8x128xf32>
    %273 = arith.addf %272, %271 : vector<8x128xf32>
    %274 = arith.divf %272, %273 : vector<8x128xf32>
    %275 = vector.extract_strided_slice %268 {offsets = [0, 128], sizes = [8, 128], strides = [1, 1]} : vector<8x512xf32> to vector<8x128xf32>
    %276 = arith.negf %275 : vector<8x128xf32>
    %277 = math.exp %276 : vector<8x128xf32>
    %cst_77 = arith.constant 1.000000e+00 : f32
    %278 = vector.broadcast %cst_77 : f32 to vector<8x128xf32>
    %279 = arith.addf %278, %277 : vector<8x128xf32>
    %280 = arith.divf %278, %279 : vector<8x128xf32>
    %281 = vector.extract_strided_slice %268 {offsets = [0, 256], sizes = [8, 128], strides = [1, 1]} : vector<8x512xf32> to vector<8x128xf32>
    %282 = math.tanh %281 : vector<8x128xf32>
    %283 = vector.extract_strided_slice %268 {offsets = [0, 384], sizes = [8, 128], strides = [1, 1]} : vector<8x512xf32> to vector<8x128xf32>
    %284 = arith.negf %283 : vector<8x128xf32>
    %285 = math.exp %284 : vector<8x128xf32>
    %cst_78 = arith.constant 1.000000e+00 : f32
    %286 = vector.broadcast %cst_78 : f32 to vector<8x128xf32>
    %287 = arith.addf %286, %285 : vector<8x128xf32>
    %288 = arith.divf %286, %287 : vector<8x128xf32>
    %289 = arith.mulf %280, %254 : vector<8x128xf32>
    %290 = arith.mulf %274, %282 : vector<8x128xf32>
    %291 = arith.addf %289, %290 : vector<8x128xf32>
    %292 = math.tanh %291 : vector<8x128xf32>
    %293 = arith.mulf %288, %292 : vector<8x128xf32>
    %c0_i32_79 = arith.constant 0 : i32
    %294 = arith.addi %c0_i32_79, %c7_i32 : i32
    %295 = arith.index_cast %294 : i32 to index
    %c0_80 = arith.constant 0 : index
    %c0_81 = arith.constant 0 : index
    %296 = vector.load %arg10[%295, %c0_80, %c0_81] : memref<8x8x128xf32, #tpu.memory_space<vmem>>, vector<1x8x128xf32>
    %297 = vector.shape_cast %296 : vector<1x8x128xf32> to vector<8x128xf32>
    %298 = vector.shape_cast %293 : vector<8x128xf32> to vector<1x8x128xf32>
    tpu.vector_store %arg10[%295, %c0_80, %c0_81], %298 {strides = array<i32>} : memref<8x8x128xf32, #tpu.memory_space<vmem>>, vector<1x8x128xf32>,
    %c8_i32 = arith.constant 8 : i32
    %c0_82 = arith.constant 0 : index
    %c0_83 = arith.constant 0 : index
    %299 = vector.load %arg3[%c0_82, %c0_83] : memref<128x512xbf16, #tpu.memory_space<vmem>>, vector<128x512xbf16>
    %c0_84 = arith.constant 0 : index
    %c0_85 = arith.constant 0 : index
    %300 = vector.load %arg4[%c0_84, %c0_85] : memref<128x512xbf16, #tpu.memory_space<vmem>>, vector<128x512xbf16>
    %c0_86 = arith.constant 0 : index
    %c0_87 = arith.constant 0 : index
    %301 = vector.load %arg5[%c0_86, %c0_87] : memref<1x512xf32, #tpu.memory_space<vmem>>, vector<1x512xf32>
    %cst_88 = arith.constant 0.000000e+00 : f32
    %302 = vector.broadcast %cst_88 : f32 to vector<8x128xf32>
    %cst_89 = arith.constant 0.000000e+00 : f32
    %303 = vector.broadcast %cst_89 : f32 to vector<8x128xf32>
    %c0_90 = arith.constant 0 : index
    %c0_91 = arith.constant 0 : index
    %c0_92 = arith.constant 0 : index
    %304 = vector.load %arg10[%c0_90, %c0_91, %c0_92] : memref<8x8x128xf32, #tpu.memory_space<vmem>>, vector<8x8x128xf32>
    %305 = vector.shape_cast %304 : vector<8x8x128xf32> to vector<64x128xf32>
    %306 = arith.truncf %305 : vector<64x128xf32> to vector<64x128xbf16>
    %cst_93 = arith.constant dense<0.000000e+00> : vector<64x512xf32>
    %307 = tpu.matmul %306, %299, %cst_93 {dimension_numbers = #tpu.dot_dimension_numbers<[1], [0], [0], [1], [0, 0, 1, 1], [], []>} : vector<64x128xbf16>, vector<128x512xbf16>, vector<64x512xf32> -> vector<64x512xf32>
    %308 = vector.broadcast %301 : vector<1x512xf32> to vector<64x512xf32>
    %309 = arith.addf %307, %308 : vector<64x512xf32>
    %310 = vector.shape_cast %309 : vector<64x512xf32> to vector<8x8x512xf32>
    %c0_94 = arith.constant 0 : index
    %c0_95 = arith.constant 0 : index
    %c0_96 = arith.constant 0 : index
    %311 = vector.load %arg9[%c0_94, %c0_95, %c0_96] : memref<8x8x512xf32, #tpu.memory_space<vmem>>, vector<8x8x512xf32>
    tpu.vector_store %arg9[%c0_94, %c0_95, %c0_96], %310 {strides = array<i32>} : memref<8x8x512xf32, #tpu.memory_space<vmem>>, vector<8x8x512xf32>,
    %c0_i32_97 = arith.constant 0 : i32
    %312 = arith.index_cast %c0_i32_97 : i32 to index
    %c0_98 = arith.constant 0 : index
    %c0_99 = arith.constant 0 : index
    %313 = vector.load %arg9[%312, %c0_98, %c0_99] : memref<8x8x512xf32, #tpu.memory_space<vmem>>, vector<1x8x512xf32>
    %314 = vector.shape_cast %313 : vector<1x8x512xf32> to vector<8x512xf32>
    %315 = arith.truncf %302 : vector<8x128xf32> to vector<8x128xbf16>
    %cst_100 = arith.constant dense<0.000000e+00> : vector<8x512xf32>
    %316 = tpu.matmul %315, %300, %cst_100 {dimension_numbers = #tpu.dot_dimension_numbers<[1], [0], [0], [1], [0, 0, 1, 1], [], []>} : vector<8x128xbf16>, vector<128x512xbf16>, vector<8x512xf32> -> vector<8x512xf32>
    %317 = arith.addf %314, %316 : vector<8x512xf32>
    %318 = vector.extract_strided_slice %317 {offsets = [0, 0], sizes = [8, 128], strides = [1, 1]} : vector<8x512xf32> to vector<8x128xf32>
    %319 = arith.negf %318 : vector<8x128xf32>
    %320 = math.exp %319 : vector<8x128xf32>
    %cst_101 = arith.constant 1.000000e+00 : f32
    %321 = vector.broadcast %cst_101 : f32 to vector<8x128xf32>
    %322 = arith.addf %321, %320 : vector<8x128xf32>
    %323 = arith.divf %321, %322 : vector<8x128xf32>
    %324 = vector.extract_strided_slice %317 {offsets = [0, 128], sizes = [8, 128], strides = [1, 1]} : vector<8x512xf32> to vector<8x128xf32>
    %325 = arith.negf %324 : vector<8x128xf32>
    %326 = math.exp %325 : vector<8x128xf32>
    %cst_102 = arith.constant 1.000000e+00 : f32
    %327 = vector.broadcast %cst_102 : f32 to vector<8x128xf32>
    %328 = arith.addf %327, %326 : vector<8x128xf32>
    %329 = arith.divf %327, %328 : vector<8x128xf32>
    %330 = vector.extract_strided_slice %317 {offsets = [0, 256], sizes = [8, 128], strides = [1, 1]} : vector<8x512xf32> to vector<8x128xf32>
    %331 = math.tanh %330 : vector<8x128xf32>
    %332 = vector.extract_strided_slice %317 {offsets = [0, 384], sizes = [8, 128], strides = [1, 1]} : vector<8x512xf32> to vector<8x128xf32>
    %333 = arith.negf %332 : vector<8x128xf32>
    %334 = math.exp %333 : vector<8x128xf32>
    %cst_103 = arith.constant 1.000000e+00 : f32
    %335 = vector.broadcast %cst_103 : f32 to vector<8x128xf32>
    %336 = arith.addf %335, %334 : vector<8x128xf32>
    %337 = arith.divf %335, %336 : vector<8x128xf32>
    %338 = arith.mulf %329, %303 : vector<8x128xf32>
    %339 = arith.mulf %323, %331 : vector<8x128xf32>
    %340 = arith.addf %338, %339 : vector<8x128xf32>
    %341 = math.tanh %340 : vector<8x128xf32>
    %342 = arith.mulf %337, %341 : vector<8x128xf32>
    %c1_i32_104 = arith.constant 1 : i32
    %343 = arith.index_cast %c1_i32_104 : i32 to index
    %c0_105 = arith.constant 0 : index
    %c0_106 = arith.constant 0 : index
    %344 = vector.load %arg9[%343, %c0_105, %c0_106] : memref<8x8x512xf32, #tpu.memory_space<vmem>>, vector<1x8x512xf32>
    %345 = vector.shape_cast %344 : vector<1x8x512xf32> to vector<8x512xf32>
    %346 = arith.truncf %342 : vector<8x128xf32> to vector<8x128xbf16>
    %cst_107 = arith.constant dense<0.000000e+00> : vector<8x512xf32>
    %347 = tpu.matmul %346, %300, %cst_107 {dimension_numbers = #tpu.dot_dimension_numbers<[1], [0], [0], [1], [0, 0, 1, 1], [], []>} : vector<8x128xbf16>, vector<128x512xbf16>, vector<8x512xf32> -> vector<8x512xf32>
    %348 = arith.addf %345, %347 : vector<8x512xf32>
    %349 = vector.extract_strided_slice %348 {offsets = [0, 0], sizes = [8, 128], strides = [1, 1]} : vector<8x512xf32> to vector<8x128xf32>
    %350 = arith.negf %349 : vector<8x128xf32>
    %351 = math.exp %350 : vector<8x128xf32>
    %cst_108 = arith.constant 1.000000e+00 : f32
    %352 = vector.broadcast %cst_108 : f32 to vector<8x128xf32>
    %353 = arith.addf %352, %351 : vector<8x128xf32>
    %354 = arith.divf %352, %353 : vector<8x128xf32>
    %355 = vector.extract_strided_slice %348 {offsets = [0, 128], sizes = [8, 128], strides = [1, 1]} : vector<8x512xf32> to vector<8x128xf32>
    %356 = arith.negf %355 : vector<8x128xf32>
    %357 = math.exp %356 : vector<8x128xf32>
    %cst_109 = arith.constant 1.000000e+00 : f32
    %358 = vector.broadcast %cst_109 : f32 to vector<8x128xf32>
    %359 = arith.addf %358, %357 : vector<8x128xf32>
    %360 = arith.divf %358, %359 : vector<8x128xf32>
    %361 = vector.extract_strided_slice %348 {offsets = [0, 256], sizes = [8, 128], strides = [1, 1]} : vector<8x512xf32> to vector<8x128xf32>
    %362 = math.tanh %361 : vector<8x128xf32>
    %363 = vector.extract_strided_slice %348 {offsets = [0, 384], sizes = [8, 128], strides = [1, 1]} : vector<8x512xf32> to vector<8x128xf32>
    %364 = arith.negf %363 : vector<8x128xf32>
    %365 = math.exp %364 : vector<8x128xf32>
    %cst_110 = arith.constant 1.000000e+00 : f32
    %366 = vector.broadcast %cst_110 : f32 to vector<8x128xf32>
    %367 = arith.addf %366, %365 : vector<8x128xf32>
    %368 = arith.divf %366, %367 : vector<8x128xf32>
    %369 = arith.mulf %360, %340 : vector<8x128xf32>
    %370 = arith.mulf %354, %362 : vector<8x128xf32>
    %371 = arith.addf %369, %370 : vector<8x128xf32>
    %372 = math.tanh %371 : vector<8x128xf32>
    %373 = arith.mulf %368, %372 : vector<8x128xf32>
    %c2_i32_111 = arith.constant 2 : i32
    %374 = arith.index_cast %c2_i32_111 : i32 to index
    %c0_112 = arith.constant 0 : index
    %c0_113 = arith.constant 0 : index
    %375 = vector.load %arg9[%374, %c0_112, %c0_113] : memref<8x8x512xf32, #tpu.memory_space<vmem>>, vector<1x8x512xf32>
    %376 = vector.shape_cast %375 : vector<1x8x512xf32> to vector<8x512xf32>
    %377 = arith.truncf %373 : vector<8x128xf32> to vector<8x128xbf16>
    %cst_114 = arith.constant dense<0.000000e+00> : vector<8x512xf32>
    %378 = tpu.matmul %377, %300, %cst_114 {dimension_numbers = #tpu.dot_dimension_numbers<[1], [0], [0], [1], [0, 0, 1, 1], [], []>} : vector<8x128xbf16>, vector<128x512xbf16>, vector<8x512xf32> -> vector<8x512xf32>
    %379 = arith.addf %376, %378 : vector<8x512xf32>
    %380 = vector.extract_strided_slice %379 {offsets = [0, 0], sizes = [8, 128], strides = [1, 1]} : vector<8x512xf32> to vector<8x128xf32>
    %381 = arith.negf %380 : vector<8x128xf32>
    %382 = math.exp %381 : vector<8x128xf32>
    %cst_115 = arith.constant 1.000000e+00 : f32
    %383 = vector.broadcast %cst_115 : f32 to vector<8x128xf32>
    %384 = arith.addf %383, %382 : vector<8x128xf32>
    %385 = arith.divf %383, %384 : vector<8x128xf32>
    %386 = vector.extract_strided_slice %379 {offsets = [0, 128], sizes = [8, 128], strides = [1, 1]} : vector<8x512xf32> to vector<8x128xf32>
    %387 = arith.negf %386 : vector<8x128xf32>
    %388 = math.exp %387 : vector<8x128xf32>
    %cst_116 = arith.constant 1.000000e+00 : f32
    %389 = vector.broadcast %cst_116 : f32 to vector<8x128xf32>
    %390 = arith.addf %389, %388 : vector<8x128xf32>
    %391 = arith.divf %389, %390 : vector<8x128xf32>
    %392 = vector.extract_strided_slice %379 {offsets = [0, 256], sizes = [8, 128], strides = [1, 1]} : vector<8x512xf32> to vector<8x128xf32>
    %393 = math.tanh %392 : vector<8x128xf32>
    %394 = vector.extract_strided_slice %379 {offsets = [0, 384], sizes = [8, 128], strides = [1, 1]} : vector<8x512xf32> to vector<8x128xf32>
    %395 = arith.negf %394 : vector<8x128xf32>
    %396 = math.exp %395 : vector<8x128xf32>
    %cst_117 = arith.constant 1.000000e+00 : f32
    %397 = vector.broadcast %cst_117 : f32 to vector<8x128xf32>
    %398 = arith.addf %397, %396 : vector<8x128xf32>
    %399 = arith.divf %397, %398 : vector<8x128xf32>
    %400 = arith.mulf %391, %371 : vector<8x128xf32>
    %401 = arith.mulf %385, %393 : vector<8x128xf32>
    %402 = arith.addf %400, %401 : vector<8x128xf32>
    %403 = math.tanh %402 : vector<8x128xf32>
    %404 = arith.mulf %399, %403 : vector<8x128xf32>
    %c3_i32_118 = arith.constant 3 : i32
    %405 = arith.index_cast %c3_i32_118 : i32 to index
    %c0_119 = arith.constant 0 : index
    %c0_120 = arith.constant 0 : index
    %406 = vector.load %arg9[%405, %c0_119, %c0_120] : memref<8x8x512xf32, #tpu.memory_space<vmem>>, vector<1x8x512xf32>
    %407 = vector.shape_cast %406 : vector<1x8x512xf32> to vector<8x512xf32>
    %408 = arith.truncf %404 : vector<8x128xf32> to vector<8x128xbf16>
    %cst_121 = arith.constant dense<0.000000e+00> : vector<8x512xf32>
    %409 = tpu.matmul %408, %300, %cst_121 {dimension_numbers = #tpu.dot_dimension_numbers<[1], [0], [0], [1], [0, 0, 1, 1], [], []>} : vector<8x128xbf16>, vector<128x512xbf16>, vector<8x512xf32> -> vector<8x512xf32>
    %410 = arith.addf %407, %409 : vector<8x512xf32>
    %411 = vector.extract_strided_slice %410 {offsets = [0, 0], sizes = [8, 128], strides = [1, 1]} : vector<8x512xf32> to vector<8x128xf32>
    %412 = arith.negf %411 : vector<8x128xf32>
    %413 = math.exp %412 : vector<8x128xf32>
    %cst_122 = arith.constant 1.000000e+00 : f32
    %414 = vector.broadcast %cst_122 : f32 to vector<8x128xf32>
    %415 = arith.addf %414, %413 : vector<8x128xf32>
    %416 = arith.divf %414, %415 : vector<8x128xf32>
    %417 = vector.extract_strided_slice %410 {offsets = [0, 128], sizes = [8, 128], strides = [1, 1]} : vector<8x512xf32> to vector<8x128xf32>
    %418 = arith.negf %417 : vector<8x128xf32>
    %419 = math.exp %418 : vector<8x128xf32>
    %cst_123 = arith.constant 1.000000e+00 : f32
    %420 = vector.broadcast %cst_123 : f32 to vector<8x128xf32>
    %421 = arith.addf %420, %419 : vector<8x128xf32>
    %422 = arith.divf %420, %421 : vector<8x128xf32>
    %423 = vector.extract_strided_slice %410 {offsets = [0, 256], sizes = [8, 128], strides = [1, 1]} : vector<8x512xf32> to vector<8x128xf32>
    %424 = math.tanh %423 : vector<8x128xf32>
    %425 = vector.extract_strided_slice %410 {offsets = [0, 384], sizes = [8, 128], strides = [1, 1]} : vector<8x512xf32> to vector<8x128xf32>
    %426 = arith.negf %425 : vector<8x128xf32>
    %427 = math.exp %426 : vector<8x128xf32>
    %cst_124 = arith.constant 1.000000e+00 : f32
    %428 = vector.broadcast %cst_124 : f32 to vector<8x128xf32>
    %429 = arith.addf %428, %427 : vector<8x128xf32>
    %430 = arith.divf %428, %429 : vector<8x128xf32>
    %431 = arith.mulf %422, %402 : vector<8x128xf32>
    %432 = arith.mulf %416, %424 : vector<8x128xf32>
    %433 = arith.addf %431, %432 : vector<8x128xf32>
    %434 = math.tanh %433 : vector<8x128xf32>
    %435 = arith.mulf %430, %434 : vector<8x128xf32>
    %c4_i32_125 = arith.constant 4 : i32
    %436 = arith.index_cast %c4_i32_125 : i32 to index
    %c0_126 = arith.constant 0 : index
    %c0_127 = arith.constant 0 : index
    %437 = vector.load %arg9[%436, %c0_126, %c0_127] : memref<8x8x512xf32, #tpu.memory_space<vmem>>, vector<1x8x512xf32>
    %438 = vector.shape_cast %437 : vector<1x8x512xf32> to vector<8x512xf32>
    %439 = arith.truncf %435 : vector<8x128xf32> to vector<8x128xbf16>
    %cst_128 = arith.constant dense<0.000000e+00> : vector<8x512xf32>
    %440 = tpu.matmul %439, %300, %cst_128 {dimension_numbers = #tpu.dot_dimension_numbers<[1], [0], [0], [1], [0, 0, 1, 1], [], []>} : vector<8x128xbf16>, vector<128x512xbf16>, vector<8x512xf32> -> vector<8x512xf32>
    %441 = arith.addf %438, %440 : vector<8x512xf32>
    %442 = vector.extract_strided_slice %441 {offsets = [0, 0], sizes = [8, 128], strides = [1, 1]} : vector<8x512xf32> to vector<8x128xf32>
    %443 = arith.negf %442 : vector<8x128xf32>
    %444 = math.exp %443 : vector<8x128xf32>
    %cst_129 = arith.constant 1.000000e+00 : f32
    %445 = vector.broadcast %cst_129 : f32 to vector<8x128xf32>
    %446 = arith.addf %445, %444 : vector<8x128xf32>
    %447 = arith.divf %445, %446 : vector<8x128xf32>
    %448 = vector.extract_strided_slice %441 {offsets = [0, 128], sizes = [8, 128], strides = [1, 1]} : vector<8x512xf32> to vector<8x128xf32>
    %449 = arith.negf %448 : vector<8x128xf32>
    %450 = math.exp %449 : vector<8x128xf32>
    %cst_130 = arith.constant 1.000000e+00 : f32
    %451 = vector.broadcast %cst_130 : f32 to vector<8x128xf32>
    %452 = arith.addf %451, %450 : vector<8x128xf32>
    %453 = arith.divf %451, %452 : vector<8x128xf32>
    %454 = vector.extract_strided_slice %441 {offsets = [0, 256], sizes = [8, 128], strides = [1, 1]} : vector<8x512xf32> to vector<8x128xf32>
    %455 = math.tanh %454 : vector<8x128xf32>
    %456 = vector.extract_strided_slice %441 {offsets = [0, 384], sizes = [8, 128], strides = [1, 1]} : vector<8x512xf32> to vector<8x128xf32>
    %457 = arith.negf %456 : vector<8x128xf32>
    %458 = math.exp %457 : vector<8x128xf32>
    %cst_131 = arith.constant 1.000000e+00 : f32
    %459 = vector.broadcast %cst_131 : f32 to vector<8x128xf32>
    %460 = arith.addf %459, %458 : vector<8x128xf32>
    %461 = arith.divf %459, %460 : vector<8x128xf32>
    %462 = arith.mulf %453, %433 : vector<8x128xf32>
    %463 = arith.mulf %447, %455 : vector<8x128xf32>
    %464 = arith.addf %462, %463 : vector<8x128xf32>
    %465 = math.tanh %464 : vector<8x128xf32>
    %466 = arith.mulf %461, %465 : vector<8x128xf32>
    %c5_i32_132 = arith.constant 5 : i32
    %467 = arith.index_cast %c5_i32_132 : i32 to index
    %c0_133 = arith.constant 0 : index
    %c0_134 = arith.constant 0 : index
    %468 = vector.load %arg9[%467, %c0_133, %c0_134] : memref<8x8x512xf32, #tpu.memory_space<vmem>>, vector<1x8x512xf32>
    %469 = vector.shape_cast %468 : vector<1x8x512xf32> to vector<8x512xf32>
    %470 = arith.truncf %466 : vector<8x128xf32> to vector<8x128xbf16>
    %cst_135 = arith.constant dense<0.000000e+00> : vector<8x512xf32>
    %471 = tpu.matmul %470, %300, %cst_135 {dimension_numbers = #tpu.dot_dimension_numbers<[1], [0], [0], [1], [0, 0, 1, 1], [], []>} : vector<8x128xbf16>, vector<128x512xbf16>, vector<8x512xf32> -> vector<8x512xf32>
    %472 = arith.addf %469, %471 : vector<8x512xf32>
    %473 = vector.extract_strided_slice %472 {offsets = [0, 0], sizes = [8, 128], strides = [1, 1]} : vector<8x512xf32> to vector<8x128xf32>
    %474 = arith.negf %473 : vector<8x128xf32>
    %475 = math.exp %474 : vector<8x128xf32>
    %cst_136 = arith.constant 1.000000e+00 : f32
    %476 = vector.broadcast %cst_136 : f32 to vector<8x128xf32>
    %477 = arith.addf %476, %475 : vector<8x128xf32>
    %478 = arith.divf %476, %477 : vector<8x128xf32>
    %479 = vector.extract_strided_slice %472 {offsets = [0, 128], sizes = [8, 128], strides = [1, 1]} : vector<8x512xf32> to vector<8x128xf32>
    %480 = arith.negf %479 : vector<8x128xf32>
    %481 = math.exp %480 : vector<8x128xf32>
    %cst_137 = arith.constant 1.000000e+00 : f32
    %482 = vector.broadcast %cst_137 : f32 to vector<8x128xf32>
    %483 = arith.addf %482, %481 : vector<8x128xf32>
    %484 = arith.divf %482, %483 : vector<8x128xf32>
    %485 = vector.extract_strided_slice %472 {offsets = [0, 256], sizes = [8, 128], strides = [1, 1]} : vector<8x512xf32> to vector<8x128xf32>
    %486 = math.tanh %485 : vector<8x128xf32>
    %487 = vector.extract_strided_slice %472 {offsets = [0, 384], sizes = [8, 128], strides = [1, 1]} : vector<8x512xf32> to vector<8x128xf32>
    %488 = arith.negf %487 : vector<8x128xf32>
    %489 = math.exp %488 : vector<8x128xf32>
    %cst_138 = arith.constant 1.000000e+00 : f32
    %490 = vector.broadcast %cst_138 : f32 to vector<8x128xf32>
    %491 = arith.addf %490, %489 : vector<8x128xf32>
    %492 = arith.divf %490, %491 : vector<8x128xf32>
    %493 = arith.mulf %484, %464 : vector<8x128xf32>
    %494 = arith.mulf %478, %486 : vector<8x128xf32>
    %495 = arith.addf %493, %494 : vector<8x128xf32>
    %496 = math.tanh %495 : vector<8x128xf32>
    %497 = arith.mulf %492, %496 : vector<8x128xf32>
    %c6_i32_139 = arith.constant 6 : i32
    %498 = arith.index_cast %c6_i32_139 : i32 to index
    %c0_140 = arith.constant 0 : index
    %c0_141 = arith.constant 0 : index
    %499 = vector.load %arg9[%498, %c0_140, %c0_141] : memref<8x8x512xf32, #tpu.memory_space<vmem>>, vector<1x8x512xf32>
    %500 = vector.shape_cast %499 : vector<1x8x512xf32> to vector<8x512xf32>
    %501 = arith.truncf %497 : vector<8x128xf32> to vector<8x128xbf16>
    %cst_142 = arith.constant dense<0.000000e+00> : vector<8x512xf32>
    %502 = tpu.matmul %501, %300, %cst_142 {dimension_numbers = #tpu.dot_dimension_numbers<[1], [0], [0], [1], [0, 0, 1, 1], [], []>} : vector<8x128xbf16>, vector<128x512xbf16>, vector<8x512xf32> -> vector<8x512xf32>
    %503 = arith.addf %500, %502 : vector<8x512xf32>
    %504 = vector.extract_strided_slice %503 {offsets = [0, 0], sizes = [8, 128], strides = [1, 1]} : vector<8x512xf32> to vector<8x128xf32>
    %505 = arith.negf %504 : vector<8x128xf32>
    %506 = math.exp %505 : vector<8x128xf32>
    %cst_143 = arith.constant 1.000000e+00 : f32
    %507 = vector.broadcast %cst_143 : f32 to vector<8x128xf32>
    %508 = arith.addf %507, %506 : vector<8x128xf32>
    %509 = arith.divf %507, %508 : vector<8x128xf32>
    %510 = vector.extract_strided_slice %503 {offsets = [0, 128], sizes = [8, 128], strides = [1, 1]} : vector<8x512xf32> to vector<8x128xf32>
    %511 = arith.negf %510 : vector<8x128xf32>
    %512 = math.exp %511 : vector<8x128xf32>
    %cst_144 = arith.constant 1.000000e+00 : f32
    %513 = vector.broadcast %cst_144 : f32 to vector<8x128xf32>
    %514 = arith.addf %513, %512 : vector<8x128xf32>
    %515 = arith.divf %513, %514 : vector<8x128xf32>
    %516 = vector.extract_strided_slice %503 {offsets = [0, 256], sizes = [8, 128], strides = [1, 1]} : vector<8x512xf32> to vector<8x128xf32>
    %517 = math.tanh %516 : vector<8x128xf32>
    %518 = vector.extract_strided_slice %503 {offsets = [0, 384], sizes = [8, 128], strides = [1, 1]} : vector<8x512xf32> to vector<8x128xf32>
    %519 = arith.negf %518 : vector<8x128xf32>
    %520 = math.exp %519 : vector<8x128xf32>
    %cst_145 = arith.constant 1.000000e+00 : f32
    %521 = vector.broadcast %cst_145 : f32 to vector<8x128xf32>
    %522 = arith.addf %521, %520 : vector<8x128xf32>
    %523 = arith.divf %521, %522 : vector<8x128xf32>
    %524 = arith.mulf %515, %495 : vector<8x128xf32>
    %525 = arith.mulf %509, %517 : vector<8x128xf32>
    %526 = arith.addf %524, %525 : vector<8x128xf32>
    %527 = math.tanh %526 : vector<8x128xf32>
    %528 = arith.mulf %523, %527 : vector<8x128xf32>
    %c7_i32_146 = arith.constant 7 : i32
    %529 = arith.index_cast %c7_i32_146 : i32 to index
    %c0_147 = arith.constant 0 : index
    %c0_148 = arith.constant 0 : index
    %530 = vector.load %arg9[%529, %c0_147, %c0_148] : memref<8x8x512xf32, #tpu.memory_space<vmem>>, vector<1x8x512xf32>
    %531 = vector.shape_cast %530 : vector<1x8x512xf32> to vector<8x512xf32>
    %532 = arith.truncf %528 : vector<8x128xf32> to vector<8x128xbf16>
    %cst_149 = arith.constant dense<0.000000e+00> : vector<8x512xf32>
    %533 = tpu.matmul %532, %300, %cst_149 {dimension_numbers = #tpu.dot_dimension_numbers<[1], [0], [0], [1], [0, 0, 1, 1], [], []>} : vector<8x128xbf16>, vector<128x512xbf16>, vector<8x512xf32> -> vector<8x512xf32>
    %534 = arith.addf %531, %533 : vector<8x512xf32>
    %535 = vector.extract_strided_slice %534 {offsets = [0, 0], sizes = [8, 128], strides = [1, 1]} : vector<8x512xf32> to vector<8x128xf32>
    %536 = arith.negf %535 : vector<8x128xf32>
    %537 = math.exp %536 : vector<8x128xf32>
    %cst_150 = arith.constant 1.000000e+00 : f32
    %538 = vector.broadcast %cst_150 : f32 to vector<8x128xf32>
    %539 = arith.addf %538, %537 : vector<8x128xf32>
    %540 = arith.divf %538, %539 : vector<8x128xf32>
    %541 = vector.extract_strided_slice %534 {offsets = [0, 128], sizes = [8, 128], strides = [1, 1]} : vector<8x512xf32> to vector<8x128xf32>
    %542 = arith.negf %541 : vector<8x128xf32>
    %543 = math.exp %542 : vector<8x128xf32>
    %cst_151 = arith.constant 1.000000e+00 : f32
    %544 = vector.broadcast %cst_151 : f32 to vector<8x128xf32>
    %545 = arith.addf %544, %543 : vector<8x128xf32>
    %546 = arith.divf %544, %545 : vector<8x128xf32>
    %547 = vector.extract_strided_slice %534 {offsets = [0, 256], sizes = [8, 128], strides = [1, 1]} : vector<8x512xf32> to vector<8x128xf32>
    %548 = math.tanh %547 : vector<8x128xf32>
    %549 = vector.extract_strided_slice %534 {offsets = [0, 384], sizes = [8, 128], strides = [1, 1]} : vector<8x512xf32> to vector<8x128xf32>
    %550 = arith.negf %549 : vector<8x128xf32>
    %551 = math.exp %550 : vector<8x128xf32>
    %cst_152 = arith.constant 1.000000e+00 : f32
    %552 = vector.broadcast %cst_152 : f32 to vector<8x128xf32>
    %553 = arith.addf %552, %551 : vector<8x128xf32>
    %554 = arith.divf %552, %553 : vector<8x128xf32>
    %555 = arith.mulf %546, %526 : vector<8x128xf32>
    %556 = arith.mulf %540, %548 : vector<8x128xf32>
    %557 = arith.addf %555, %556 : vector<8x128xf32>
    %558 = math.tanh %557 : vector<8x128xf32>
    %559 = arith.mulf %554, %558 : vector<8x128xf32>
    %c8_i32_153 = arith.constant 8 : i32
    %560 = arith.truncf %559 : vector<8x128xf32> to vector<8x128xbf16>
    %c0_154 = arith.constant 0 : index
    %c0_155 = arith.constant 0 : index
    %561 = vector.load %arg6[%c0_154, %c0_155] : memref<128x128xbf16, #tpu.memory_space<vmem>>, vector<128x128xbf16>
    %cst_156 = arith.constant dense<0.000000e+00> : vector<8x128xf32>
    %562 = tpu.matmul %560, %561, %cst_156 {dimension_numbers = #tpu.dot_dimension_numbers<[1], [0], [0], [1], [0, 0, 1, 1], [], []>} : vector<8x128xbf16>, vector<128x128xbf16>, vector<8x128xf32> -> vector<8x128xf32>
    %c0_157 = arith.constant 0 : index
    %c0_158 = arith.constant 0 : index
    %563 = vector.load %arg7[%c0_157, %c0_158] : memref<1x128xf32, #tpu.memory_space<vmem>>, vector<1x128xf32>
    %564 = vector.broadcast %563 : vector<1x128xf32> to vector<8x128xf32>
    %565 = arith.addf %562, %564 : vector<8x128xf32>
    %c0_159 = arith.constant 0 : index
    %c0_160 = arith.constant 0 : index
    %566 = vector.load %arg8[%c0_159, %c0_160] : memref<8x128xf32, #tpu.memory_space<vmem>>, vector<8x128xf32>
    tpu.vector_store %arg8[%c0_159, %c0_160], %565 {strides = array<i32>} : memref<8x128xf32, #tpu.memory_space<vmem>>, vector<8x128xf32>,
    return
  }
  func.func @transform_0(%arg0: i32) -> (i32, i32, i32) {
    %c0_i32 = arith.constant 0 : i32
    %c0_i32_0 = arith.constant 0 : i32
    %c0_i32_1 = arith.constant 0 : i32
    return %c0_i32, %arg0, %c0_i32_0 : i32, i32, i32
  }
  func.func @transform_1(%arg0: i32) -> (i32, i32) {
    %c0_i32 = arith.constant 0 : i32
    %c0_i32_0 = arith.constant 0 : i32
    %c0_i32_1 = arith.constant 0 : i32
    return %c0_i32, %c0_i32_0 : i32, i32
  }
  func.func @transform_2(%arg0: i32) -> (i32, i32) {
    %c0_i32 = arith.constant 0 : i32
    %c0_i32_0 = arith.constant 0 : i32
    %c0_i32_1 = arith.constant 0 : i32
    return %c0_i32, %c0_i32_0 : i32, i32
  }
  func.func @transform_3(%arg0: i32) -> (i32, i32) {
    %c0_i32 = arith.constant 0 : i32
    %c0_i32_0 = arith.constant 0 : i32
    %c0_i32_1 = arith.constant 0 : i32
    return %c0_i32, %c0_i32_0 : i32, i32
  }
  func.func @transform_4(%arg0: i32) -> (i32, i32) {
    %c0_i32 = arith.constant 0 : i32
    %c0_i32_0 = arith.constant 0 : i32
    %c0_i32_1 = arith.constant 0 : i32
    return %c0_i32, %c0_i32_0 : i32, i32
  }
  func.func @transform_5(%arg0: i32) -> (i32, i32) {
    %c0_i32 = arith.constant 0 : i32
    %c0_i32_0 = arith.constant 0 : i32
    %c0_i32_1 = arith.constant 0 : i32
    return %c0_i32, %c0_i32_0 : i32, i32
  }
  func.func @transform_6(%arg0: i32) -> (i32, i32) {
    %c0_i32 = arith.constant 0 : i32
    %c0_i32_0 = arith.constant 0 : i32
    %c0_i32_1 = arith.constant 0 : i32
    return %c0_i32, %c0_i32_0 : i32, i32
  }
  func.func @transform_7(%arg0: i32) -> (i32, i32) {
    %c0_i32 = arith.constant 0 : i32
    %c0_i32_0 = arith.constant 0 : i32
    return %arg0, %c0_i32 : i32, i32
  }
}

</mosaic_0001>

<bundles_post_ra>
// kernel: tpu_custom_call.1
= control target key start
LH: loop header
LB: loop body
LE: loop exit
PB: predicated region body
PF: predicated region fallthrough
CT: control target
= control target key end

     0   :  { %12 = vsyncpa [#allocation5], 0  ;;  %s5027_s0 = inlined_call_operand.hbm [shape: f32[8,8,512], index: 0, kind: input, shape index: {}]   ;;  %s5028_s1 = inlined_call_operand.hbm [shape: bf16[128,512], index: 1, kind: input, shape index: {}]   ;;  %s5029_s2 = inlined_call_operand.hbm [shape: bf16[128,512], index: 2, kind: input, shape index: {}]   ;;  %s5030_s3 = inlined_call_operand.hbm [shape: bf16[128,512], index: 3, kind: input, shape index: {}]   ;;  %s5031_s4 = inlined_call_operand.hbm [shape: f32[1,512], index: 4, kind: input, shape index: {}]   ;;  %s5032_s5 = inlined_call_operand.hbm [shape: bf16[128,128], index: 5, kind: input, shape index: {}]   ;;  %s5033_s6 = inlined_call_operand.vmem [shape: f32[1,128], index: 6, kind: input, shape index: {}]   ;;  %s5034_s7 = inlined_call_operand.hbm [shape: f32[8,128], index: 7, kind: output, shape index: {}]  }
   0x1   :  { %13 = vsyncpa [#allocation8], 0 }
   0x2   :  { %14 = vsyncpa [#allocation11], 0 }
   0x3   :  { %15 = vsyncpa [#allocation14], 0  ;;  %s34_s26 = sshll.u32 %s5028_s1, 4  ;;  %s35_s26 = int_to_ptr.hbm [resolvable:$true] %s34_s26 }
   0x4   :  { %16 = vsyncpa [#allocation6], 0  ;;  %s3997_s27 = smov [#allocation7]   ;;  %s60_s8 = sshll.u32 %s5030_s3, 4  ;;  %s61_s8 = int_to_ptr.hbm [resolvable:$true] %s60_s8 }
   0x5   :  { %s36_s28 = sshll.u32 %s3997_s27, 4  ;;  %s3998_s9 = smov 256   ;;  %s37_s28 = int_to_ptr.vmem [resolvable:$true] %s36_s28 }
   0x6   :  { %s3999_s10 = smov 16   ;;  %s4000_s11 = smov [#allocation10]  }
   0x7   :  { %42 = dma.hbm_to_vmem [thread:$0]  %s35_s26, 4096, %s37_s28, [#allocation8], %s3998_s9, %s3998_s9, %s3999_s10  }
   0x8   :  { %s62_s12 = sshll.u32 %s4000_s11, 4  ;;  %s21_s15 = sshll.u32 %s5027_s0, 4  ;;  %s63_s12 = int_to_ptr.vmem [resolvable:$true] %s62_s12  ;;  %s22_s15 = int_to_ptr.hbm [resolvable:$true] %s21_s15 }
   0x9   :  { %68 = dma.hbm_to_vmem [thread:$0]  %s61_s8, 4096, %s63_s12, [#allocation11], %s3998_s9, %s3998_s9, %s3999_s10  }
   0xa   :  { %s4001_s1 = smov [#allocation4]   ;;  %s47_s3 = sshll.u32 %s5029_s2, 4  ;;  %s48_s3 = int_to_ptr.hbm [resolvable:$true] %s47_s3 }
   0xb   :  { %s23_s16 = sshll.u32 %s4001_s1, 4  ;;  %s4002_s19 = smov 512   ;;  %s24_s16 = int_to_ptr.vmem [resolvable:$true] %s23_s16 }
   0xc   :  { %s4003_s20 = smov 32   ;;  %s4004_s21 = smov [#allocation9]  }
   0xd   :  { %29 = dma.hbm_to_vmem [thread:$0]  %s22_s15, 4096, %s24_s16, [#allocation5], %s4002_s19, %s4002_s19, %s4003_s20  }
   0xe   :  { %s49_s22 = sshll.u32 %s4004_s21, 4  ;;  %s74_s0 = sshll.u32 %s5031_s4, 4  ;;  %s50_s22 = int_to_ptr.vmem [resolvable:$true] %s49_s22  ;;  %s75_s0 = int_to_ptr.hbm [resolvable:$true] %s74_s0 }
   0xf   :  { %55 = dma.hbm_to_vmem [thread:$0]  %s48_s3, 4096, %s50_s22, [#allocation8], %s3998_s9, %s3998_s9, %s3999_s10  }
  0x10   :  { %s84_s27 = sshll.u32 %s5032_s5, 4  ;;  %s4005_s28 = smov [#allocation12]   ;;  %s85_s27 = int_to_ptr.hbm [resolvable:$true] %s84_s27 }
  0x11   :  { %s76_s29 = sshll.u32 %s4005_s28, 4  ;;  %s4006_s2 = smov [#allocation13]   ;;  %s77_s29 = int_to_ptr.vmem [resolvable:$true] %s76_s29 }
  0x12   :  { %79 = dma.hbm_to_vmem [thread:$0]  %s75_s0, 64, %s77_s29, [#allocation11]  }
  0x13   :  { %s86_s30 = sshll.u32 %s4006_s2, 4  ;;  %s4007_s8 = smov 64   ;;  %s87_s30 = int_to_ptr.vmem [resolvable:$true] %s86_s30 }
  0x14   :  { %s4008_s11 = smov 4  }
  0x15   :  { %92 = dma.hbm_to_vmem [thread:$0]  %s85_s27, 1024, %s87_s30, [#allocation14], %s4007_s8, %s4007_s8, %s4008_s11  }
  0x16   :  { %3987 = dma.done.wait [#allocation5], 4096  }
  0x17   :  { %3988 = vsyncadd [#allocation5], 4294963200 }
  0x18   :  { %3989 = dma.done.wait [#allocation8], 8192  }
  0x19   :  { %3990 = vsyncadd [#allocation8], 4294959104 }
  0x1a   :  { %3991 = dma.done.wait [#allocation11], 4160  }
  0x1b   :  { %3992 = vsyncadd [#allocation11], 4294963136 }
  0x1c   :  { %3993 = dma.done.wait [#allocation14], 1024  }
  0x1d   :  { %3994 = vsyncadd [#allocation14], 4294966272  ;;  %v3094_v0 = vld [vmem:[#allocation7 + $0xe0] sm:$0xf]  ;;  %v3474_v1 = vld [vmem:[#allocation7 + $0xec] sm:$0xf0] }
  0x1e   :  { %v3472_v2 = vld [vmem:[#allocation7 + $0xe4] sm:$0xf]  ;;  %v4069_v3 = vor.u32 %v3474_v1, %v3094_v0  ;;  %v3096_v4 = vld [vmem:[#allocation7 + $0xf0] sm:$0xf0]  ;;  %v3473_v5 = vld [vmem:[#allocation7 + $0xec] sm:$0xf] }
  0x1f   :  { %v3104_v6 = vld [vmem:[#allocation7 + $0xf8] sm:$0xf0]  ;;  %v4071_v7 = vor.u32 %v3472_v2, %v3096_v4  ;;  %v3078_v9 = vld [vmem:[#allocation7 + $0xc0] sm:$0xf]  ;;  %v3470_v10 = vld [vmem:[#allocation7 + $0xcc] sm:$0xf0] }
  0x20   :  { %v4073_v8 = vor.u32 %v3473_v5, %v3104_v6  ;;  %v3468_v11 = vld [vmem:[#allocation7 + $0xc4] sm:$0xf]  ;;  %316 = vmatpush.bf16.msra.mxu0 %v4069_v3  ;;  %v4076_v12 = vor.u32 %v3470_v10, %v3078_v9  ;;  %v3080_v13 = vld [vmem:[#allocation7 + $0xd0] sm:$0xf0]  ;;  %v3469_v14 = vld [vmem:[#allocation7 + $0xcc] sm:$0xf] }
  0x21   :  { %v3088_v15 = vld [vmem:[#allocation7 + $0xd8] sm:$0xf0]  ;;  %329 = vmatpush.bf16.msra.mxu1 %v4071_v7  ;;  %v4080_v16 = vor.u32 %v3468_v11, %v3080_v13  ;;  %v3102_v18 = vld [vmem:[#allocation7 + $0xe8] sm:$0xf]  ;;  %v3475_v19 = vld [vmem:[#allocation7 + $0xf4] sm:$0xf0] }
  0x22   :  { %355 = vmatpush.bf16.msra.mxu3 %v4073_v8  ;;  %v4082_v17 = vor.u32 %v3469_v14, %v3088_v15  ;;  %v3062_v20 = vld [vmem:[#allocation7 + $0xa0] sm:$0xf]  ;;  %v4084_v21 = vor.u32 %v3475_v19, %v3102_v18  ;;  %v3466_v22 = vld [vmem:[#allocation7 + $0xac] sm:$0xf0]  ;;  %v3464_v23 = vld [vmem:[#allocation7 + $0xa4] sm:$0xf] }
  0x23   :  { %v3064_v24 = vld [vmem:[#allocation7 + $0xb0] sm:$0xf0]  ;;  %v3465_v25 = vld [vmem:[#allocation7 + $0xac] sm:$0xf]  ;;  %v3072_v26 = vld [vmem:[#allocation7 + $0xb8] sm:$0xf0]  ;;  %v4088_v28 = vor.u32 %v3466_v22, %v3062_v20 }
  0x24   :  { %v3086_v27 = vld [vmem:[#allocation7 + $0xc8] sm:$0xf]  ;;  %317 = vmatpush.bf16.msra.mxu0 %v4076_v12  ;;  %342 = vmatpush.bf16.msra.mxu2 %v4084_v21  ;;  %v3471_v29 = vld [vmem:[#allocation7 + $0xd4] sm:$0xf0]  ;;  %v3046_v30 = vld [vmem:[#allocation7 + $0x80] sm:$0xf]  ;;  %v4092_v32 = vor.u32 %v3464_v23, %v3064_v24  ;;  %v4094_v33 = vor.u32 %v3465_v25, %v3072_v26 }
  0x25   :  { %v3462_v31 = vld [vmem:[#allocation7 + $0x8c] sm:$0xf0]  ;;  %330 = vmatpush.bf16.msra.mxu1 %v4080_v16  ;;  %v4096_v34 = vor.u32 %v3471_v29, %v3086_v27  ;;  %v3460_v35 = vld [vmem:[#allocation7 + $0x84] sm:$0xf]  ;;  %v3048_v36 = vld [vmem:[#allocation7 + $0x90] sm:$0xf0] }
  0x26   :  { %356 = vmatpush.bf16.msra.mxu3 %v4082_v17  ;;  %v3461_v37 = vld [vmem:[#allocation7 + $0x8c] sm:$0xf]  ;;  %v3056_v38 = vld [vmem:[#allocation7 + $0x98] sm:$0xf0]  ;;  %v3070_v39 = vld [vmem:[#allocation7 + $0xa8] sm:$0xf]  ;;  %v4100_v41 = vor.u32 %v3462_v31, %v3046_v30  ;;  %v4106_v45 = vor.u32 %v3460_v35, %v3048_v36 }
  0x27   :  { %v3467_v40 = vld [vmem:[#allocation7 + $0xb4] sm:$0xf0]  ;;  %v3030_v43 = vld [vmem:[#allocation7 + $0x60] sm:$0xf]  ;;  %v3458_v44 = vld [vmem:[#allocation7 + $0x6c] sm:$0xf0]  ;;  %v4108_v46 = vor.u32 %v3461_v37, %v3056_v38 }
  0x28   :  { %318 = vmatpush.bf16.msra.mxu0 %v4088_v28  ;;  %343 = vmatpush.bf16.msra.mxu2 %v4096_v34  ;;  %v4102_v42 = vor.u32 %v3467_v40, %v3070_v39  ;;  %v3456_v47 = vld [vmem:[#allocation7 + $0x64] sm:$0xf]  ;;  %v3054_v48 = vld [vmem:[#allocation7 + $0x88] sm:$0xf]  ;;  %v3463_v49 = vld [vmem:[#allocation7 + $0x94] sm:$0xf0]  ;;  %v4112_v53 = vor.u32 %v3458_v44, %v3030_v43 }
  0x29   :  { %331 = vmatpush.bf16.msra.mxu1 %v4092_v32  ;;  %v3032_v50 = vld [vmem:[#allocation7 + $0x70] sm:$0xf0]  ;;  %v3457_v51 = vld [vmem:[#allocation7 + $0x6c] sm:$0xf]  ;;  %v3040_v52 = vld [vmem:[#allocation7 + $0x78] sm:$0xf0]  ;;  %v4114_v54 = vor.u32 %v3463_v49, %v3054_v48 }
  0x2a   :  { %357 = vmatpush.bf16.msra.mxu3 %v4094_v33  ;;  %v3014_v55 = vld [vmem:[#allocation7 + $0x40] sm:$0xf]  ;;  %v3454_v56 = vld [vmem:[#allocation7 + $0x4c] sm:$0xf0]  ;;  %v4118_v57 = vor.u32 %v3456_v47, %v3032_v50  ;;  %v4120_v58 = vor.u32 %v3457_v51, %v3040_v52  ;;  %v3452_v59 = vld [vmem:[#allocation7 + $0x44] sm:$0xf] }
  0x2b   :  { %v3038_v60 = vld [vmem:[#allocation7 + $0x68] sm:$0xf]  ;;  %v3459_v61 = vld [vmem:[#allocation7 + $0x74] sm:$0xf0]  ;;  %v3016_v62 = vld [vmem:[#allocation7 + $0x50] sm:$0xf0]  ;;  %v4124_v1 = vor.u32 %v3454_v56, %v3014_v55 }
  0x2c   :  { %319 = vmatpush.bf16.msra.mxu0 %v4100_v41  ;;  %344 = vmatpush.bf16.msra.mxu2 %v4102_v42  ;;  %v3453_v63 = vld [vmem:[#allocation7 + $0x4c] sm:$0xf]  ;;  %v3024_v0 = vld [vmem:[#allocation7 + $0x58] sm:$0xf0]  ;;  %v4126_v2 = vor.u32 %v3459_v61, %v3038_v60  ;;  %v2998_v4 = vld [vmem:[#allocation7 + $0x20] sm:$0xf]  ;;  %v4130_v9 = vor.u32 %v3452_v59, %v3016_v62 }
  0x2d   :  { %332 = vmatpush.bf16.msra.mxu1 %v4106_v45  ;;  %v3450_v5 = vld [vmem:[#allocation7 + $0x2c] sm:$0xf0]  ;;  %v3448_v6 = vld [vmem:[#allocation7 + $0x24] sm:$0xf]  ;;  %v4132_v10 = vor.u32 %v3453_v63, %v3024_v0  ;;  %v3000_v11 = vld [vmem:[#allocation7 + $0x30] sm:$0xf0] }
  0x2e   :  { %358 = vmatpush.bf16.msra.mxu3 %v4108_v46  ;;  %v3022_v13 = vld [vmem:[#allocation7 + $0x48] sm:$0xf]  ;;  %v3455_v14 = vld [vmem:[#allocation7 + $0x54] sm:$0xf0]  ;;  %v3449_v15 = vld [vmem:[#allocation7 + $0x2c] sm:$0xf]  ;;  %v4136_v19 = vor.u32 %v3450_v5, %v2998_v4  ;;  %v4142_v24 = vor.u32 %v3448_v6, %v3000_v11 }
  0x2f   :  { %v3008_v18 = vld [vmem:[#allocation7 + $0x38] sm:$0xf0]  ;;  %v4138_v20 = vor.u32 %v3455_v14, %v3022_v13  ;;  %v2982_v22 = vld [vmem:[#allocation7] sm:$0xf]  ;;  %v3446_v23 = vld [vmem:[#allocation7 + $0xc] sm:$0xf0] }
  0x30   :  { %320 = vmatpush.bf16.msra.mxu0 %v4112_v53  ;;  %345 = vmatpush.bf16.msra.mxu2 %v4114_v54  ;;  %v4144_v25 = vor.u32 %v3449_v15, %v3008_v18  ;;  %v3444_v26 = vld [vmem:[#allocation7 + $0x4] sm:$0xf]  ;;  %v3006_v27 = vld [vmem:[#allocation7 + $0x28] sm:$0xf]  ;;  %v3451_v29 = vld [vmem:[#allocation7 + $0x34] sm:$0xf0]  ;;  %v4148_v36 = vor.u32 %v3446_v23, %v2982_v22 }
  0x31   :  { %333 = vmatpush.bf16.msra.mxu1 %v4118_v57  ;;  %v2984_v30 = vld [vmem:[#allocation7 + $0x10] sm:$0xf0]  ;;  %v3445_v31 = vld [vmem:[#allocation7 + $0xc] sm:$0xf]  ;;  %v2992_v35 = vld [vmem:[#allocation7 + $0x18] sm:$0xf0]  ;;  %v4150_v37 = vor.u32 %v3451_v29, %v3006_v27 }
  0x32   :  { %359 = vmatpush.bf16.msra.mxu3 %v4120_v58  ;;  %v4154_v38 = vor.u32 %v3444_v26, %v2984_v30  ;;  %v4156_v39 = vor.u32 %v3445_v31, %v2992_v35  ;;  %v2990_v40 = vld [vmem:[#allocation7 + $0x8] sm:$0xf]  ;;  %v3447_v43 = vld [vmem:[#allocation7 + $0x14] sm:$0xf0]  ;;  %v4009_v47 = vmov 0   ;;  %v152_v48 = vld [vmem:[#allocation4] sm:$0xff] }
  0x33   :  { %v4162_v44 = vor.u32 %v3447_v43, %v2990_v40  ;;  %v153_v49 = vld [vmem:[#allocation4 + $0x8] sm:$0xff]  ;;  %v155_v60 = vld [vmem:[#allocation4 + $0x18] sm:$0xff]  ;;  %v154_v15 = vld [vmem:[#allocation4 + $0x10] sm:$0xff]  ;;  %s4010_s9 = smov [#allocation15]   ;;  %s2967_s14 = sshll.u32 %s5034_s7, 4  ;;  %s2968_s14 = int_to_ptr.hbm [resolvable:$true] %s2967_s14 }
  0x34   :  { %321 = vmatpush.bf16.msra.mxu0 %v4124_v1  ;;  %346 = vmatpush.bf16.msra.mxu2 %v4126_v2  ;;  %s2965_s10 = sshll.u32 %s4010_s9, 4  ;;  %s2966_s10 = int_to_ptr.vmem [resolvable:$true] %s2965_s10 }
  0x35   :  { %334 = vmatpush.bf16.msra.mxu1 %v4130_v9 }
  0x36   :  { %360 = vmatpush.bf16.msra.mxu3 %v4132_v10 }
  0x38   :  { %322 = vmatpush.bf16.msra.mxu0 %v4136_v19  ;;  %347 = vmatpush.bf16.msra.mxu2 %v4138_v20 }
  0x39   :  { %335 = vmatpush.bf16.msra.mxu1 %v4142_v24 }
  0x3a   :  { %361 = vmatpush.bf16.msra.mxu3 %v4144_v25 }
  0x3c   :  { %323 = vmatpush.bf16.msra.mxu0 %v4148_v36  ;;  %348 = vmatpush.bf16.msra.mxu2 %v4150_v37 }
  0x3d   :  { %336 = vmatpush.bf16.msra.mxu1 %v4154_v38 }
  0x3e   :  { %362 = vmatpush.bf16.msra.mxu3 %v4156_v39 }
  0x3f   :  { %324 = vmatmul.bf16.vlgmr.msra.gmra.mxu0 %v4009_v47 }
  0x40   :  { %442 = vmatpush.bf16.msrb.mxu0 %v4069_v3  ;;  %337 = vmatmul.bf16.vlgmr.msra.gmra.mxu1 %v4009_v47 }
  0x41   :  { %455 = vmatpush.bf16.msrb.mxu1 %v4071_v7  ;;  %363 = vmatmul.bf16.vlgmr.msra.gmra.mxu3 %v4009_v47 }
  0x42   :  { %481 = vmatpush.bf16.msrb.mxu3 %v4073_v8  ;;  %349 = vmatpush.bf16.msra.mxu2 %v4162_v44 }
  0x44   :  { %443 = vmatpush.bf16.msrb.mxu0 %v4076_v12 }
  0x45   :  { %456 = vmatpush.bf16.msrb.mxu1 %v4080_v16  ;;  %350 = vmatmul.bf16.vlgmr.msra.gmra.mxu2 %v4009_v47 }
  0x46   :  { %468 = vmatpush.bf16.msrb.mxu2 %v4084_v21  ;;  %482 = vmatpush.bf16.msrb.mxu3 %v4082_v17 }
  0x48   :  { %444 = vmatpush.bf16.msrb.mxu0 %v4088_v28 }
  0x49   :  { %457 = vmatpush.bf16.msrb.mxu1 %v4092_v32 }
  0x4a   :  { %469 = vmatpush.bf16.msrb.mxu2 %v4096_v34  ;;  %483 = vmatpush.bf16.msrb.mxu3 %v4094_v33 }
  0x4c   :  { %445 = vmatpush.bf16.msrb.mxu0 %v4100_v41 }
  0x4d   :  { %458 = vmatpush.bf16.msrb.mxu1 %v4106_v45 }
  0x4e   :  { %470 = vmatpush.bf16.msrb.mxu2 %v4102_v42  ;;  %484 = vmatpush.bf16.msrb.mxu3 %v4108_v46 }
  0x50   :  { %446 = vmatpush.bf16.msrb.mxu0 %v4112_v53 }
  0x51   :  { %459 = vmatpush.bf16.msrb.mxu1 %v4118_v57 }
  0x52   :  { %471 = vmatpush.bf16.msrb.mxu2 %v4114_v54  ;;  %485 = vmatpush.bf16.msrb.mxu3 %v4120_v58 }
  0x54   :  { %447 = vmatpush.bf16.msrb.mxu0 %v4124_v1 }
  0x55   :  { %460 = vmatpush.bf16.msrb.mxu1 %v4130_v9 }
  0x56   :  { %472 = vmatpush.bf16.msrb.mxu2 %v4126_v2  ;;  %486 = vmatpush.bf16.msrb.mxu3 %v4132_v10 }
  0x58   :  { %448 = vmatpush.bf16.msrb.mxu0 %v4136_v19 }
  0x59   :  { %461 = vmatpush.bf16.msrb.mxu1 %v4142_v24 }
  0x5a   :  { %473 = vmatpush.bf16.msrb.mxu2 %v4138_v20  ;;  %487 = vmatpush.bf16.msrb.mxu3 %v4144_v25 }
  0x5c   :  { %449 = vmatpush.bf16.msrb.mxu0 %v4148_v36 }
  0x5d   :  { %462 = vmatpush.bf16.msrb.mxu1 %v4154_v38 }
  0x5e   :  { %474 = vmatpush.bf16.msrb.mxu2 %v4150_v37  ;;  %488 = vmatpush.bf16.msrb.mxu3 %v4156_v39 }
  0x60   :  { %569 = vmatpush.bf16.msra.mxu0 %v4069_v3 }
  0x61   :  { %582 = vmatpush.bf16.msra.mxu1 %v4071_v7 }
  0x62   :  { %608 = vmatpush.bf16.msra.mxu3 %v4073_v8  ;;  %475 = vmatpush.bf16.msrb.mxu2 %v4162_v44 }
  0x64   :  { %570 = vmatpush.bf16.msra.mxu0 %v4076_v12 }
  0x65   :  { %583 = vmatpush.bf16.msra.mxu1 %v4080_v16 }
  0x66   :  { %595 = vmatpush.bf16.msra.mxu2 %v4084_v21  ;;  %609 = vmatpush.bf16.msra.mxu3 %v4082_v17 }
  0x68   :  { %571 = vmatpush.bf16.msra.mxu0 %v4088_v28 }
  0x69   :  { %584 = vmatpush.bf16.msra.mxu1 %v4092_v32 }
  0x6a   :  { %596 = vmatpush.bf16.msra.mxu2 %v4096_v34  ;;  %610 = vmatpush.bf16.msra.mxu3 %v4094_v33 }
  0x6c   :  { %572 = vmatpush.bf16.msra.mxu0 %v4100_v41 }
  0x6d   :  { %585 = vmatpush.bf16.msra.mxu1 %v4106_v45 }
  0x6e   :  { %597 = vmatpush.bf16.msra.mxu2 %v4102_v42  ;;  %611 = vmatpush.bf16.msra.mxu3 %v4108_v46 }
  0x70   :  { %573 = vmatpush.bf16.msra.mxu0 %v4112_v53 }
  0x71   :  { %586 = vmatpush.bf16.msra.mxu1 %v4118_v57 }
  0x72   :  { %598 = vmatpush.bf16.msra.mxu2 %v4114_v54  ;;  %612 = vmatpush.bf16.msra.mxu3 %v4120_v58 }
  0x74   :  { %574 = vmatpush.bf16.msra.mxu0 %v4124_v1 }
  0x75   :  { %587 = vmatpush.bf16.msra.mxu1 %v4130_v9 }
  0x76   :  { %599 = vmatpush.bf16.msra.mxu2 %v4126_v2  ;;  %613 = vmatpush.bf16.msra.mxu3 %v4132_v10 }
  0x78   :  { %575 = vmatpush.bf16.msra.mxu0 %v4136_v19 }
  0x79   :  { %588 = vmatpush.bf16.msra.mxu1 %v4142_v24 }
  0x7a   :  { %600 = vmatpush.bf16.msra.mxu2 %v4138_v20  ;;  %614 = vmatpush.bf16.msra.mxu3 %v4144_v25 }
  0x7c   :  { %576 = vmatpush.bf16.msra.mxu0 %v4148_v36 }
  0x7d   :  { %589 = vmatpush.bf16.msra.mxu1 %v4154_v38 }
  0x7e   :  { %601 = vmatpush.bf16.msra.mxu2 %v4150_v37  ;;  %615 = vmatpush.bf16.msra.mxu3 %v4156_v39 }
  0x82   :  { %602 = vmatpush.bf16.msra.mxu2 %v4162_v44 }
  0xbc   :  { %v325_v50 = vpop.f32.mrf.mxu0 }
  0xbd   :  { %v368_v51 = vadd.f32 %v325_v50, %v152_v48  ;;  %v338_v52 = vpop.f32.mrf.mxu1 }
  0xbe   :  { %v369_v55 = vadd.f32 %v338_v52, %v153_v49 }
  0xbf   :  { %v3108_v56 = vmul.f32 -1.442695, %v368_v51 }
  0xc0   :  { %v3109_v59 = vmul.f32 -1.442695, %v369_v55 }
  0xc1   :  { %3563 = vpow2.f32 %v3108_v56 }
  0xc2   :  { %3565 = vpow2.f32 %v3109_v59 }
  0xc4   :  { %v364_v61 = vpop.f32.mrf.mxu3  ;;  %v327_v63 = vpop.f32.mrf.mxu0 }
  0xc5   :  { %v371_v62 = vadd.f32 %v364_v61, %v155_v60  ;;  %v340_v0 = vpop.f32.mrf.mxu1 }
  0xc7   :  { %v3110_v4 = vmul.f32 -1.442695, %v371_v62  ;;  %v3564_v5 = vpop.eup %3563 }
  0xc8   :  { %v351_v6 = vpop.f32.mrf.mxu2  ;;  %v3566_v11 = vpop.eup %3565  ;;  %v375_v13 = vadd.f32 1.0, %v3564_v5 }
  0xc9   :  { %3567 = vpow2.f32 %v3110_v4  ;;  %v394_v14 = vadd.f32 1.0, %v3566_v11  ;;  %v370_v23 = vadd.f32 %v351_v6, %v154_v15 }
  0xca   :  { %3569 = vrcp.f32 %v375_v13  ;;  %v387_v48 = vand.u32 2147483648, %v375_v13  ;;  %v385_v51 = vand.u32 2147483647, %v375_v13  ;;  %vm381_vm2 = vweird.f32 %v375_v13 }
  0xcb   :  { %3571 = vrcp.f32 %v394_v14  ;;  %v406_v49 = vand.u32 2147483648, %v394_v14  ;;  %v404_v55 = vand.u32 2147483647, %v394_v14  ;;  %vm400_vm3 = vweird.f32 %v394_v14 }
  0xcc   :  { %v366_v18 = vpop.f32.mrf.mxu3  ;;  %v388_v62 = vor.u32 1.1754944e-38, %v387_v48  ;;  %vm386_vm5 = vcmp.eq.f32.partialorder %v385_v51, 8.507059e+37 }
  0xcd   :  { %v407_v0 = vor.u32 1.1754944e-38, %v406_v49  ;;  %vm405_vm7 = vcmp.eq.f32.partialorder %v404_v55, 8.507059e+37  ;;  %v438_v49 = vld [vmem:[#allocation4 + $0x28] sm:$0xff] }
  0xcf   :  { %v3568_v22 = vpop.eup %3567 }
  0xd0   :  { %v414_v26 = vadd.f32 1.0, %v3568_v22  ;;  %v353_v27 = vpop.f32.mrf.mxu2  ;;  %v3570_v29 = vpop.eup %3569 }
  0xd1   :  { %v3572_v30 = vpop.eup %3571  ;;  %v377_v31 = vmul.f32 %v3570_v29, %v375_v13  ;;  %vm382_vm0 = vweird.f32 %v3570_v29 }
  0xd2   :  { %3573 = vrcp.f32 %v414_v26  ;;  %v396_v35 = vmul.f32 %v3572_v30, %v394_v14  ;;  %vm401_vm1 = vweird.f32 %v3572_v30  ;;  %vm383_vm4 = vmor %vm381_vm2, %vm382_vm0  ;;  %v426_v14 = vand.u32 2147483648, %v414_v26 }
  0xd3   :  { %3575 = vtanh.f32 %v370_v23  ;;  %v378_v40 = vsub.f32 1.0, %v377_v31  ;;  %vm402_vm6 = vmor %vm400_vm3, %vm401_vm1  ;;  %vm420_vm9 = vweird.f32 %v414_v26  ;;  %v424_v31 = vand.u32 2147483647, %v414_v26 }
  0xd4   :  { %v397_v43 = vsub.f32 1.0, %v396_v35  ;;  %v427_v35 = vor.u32 1.1754944e-38, %v426_v14 }
  0xd5   :  { %v379_v50 = vmul.f32 %v3570_v29, %v378_v40  ;;  %vm425_vm11 = vcmp.eq.f32.partialorder %v424_v31, 8.507059e+37 }
  0xd6   :  { %v398_v52 = vmul.f32 %v3572_v30, %v397_v43 }
  0xd7   :  { %v380_v59 = vadd.f32 %v3570_v29, %v379_v50 }
  0xd8   :  { %v3574_v56 = vpop.eup %3573  ;;  %v399_v63 = vadd.f32 %v3572_v30, %v398_v52 }
  0xd9   :  { %v3576_v60 = vpop.eup %3575  ;;  %v416_v61 = vmul.f32 %v3574_v56, %v414_v26  ;;  %v384_v4 = vsel %vm383_vm4, %v3570_v29, %v380_v59  ;;  %vm421_vm8 = vweird.f32 %v3574_v56  ;;  %v437_v26 = vld [vmem:[#allocation4 + $0x20] sm:$0xff] }
  0xda   :  { %v389_v6 = vsel %vm386_vm5, %v388_v62, %v384_v4  ;;  %v403_v11 = vsel %vm402_vm6, %v3572_v30, %v399_v63  ;;  %vm422_vm10 = vmor %vm420_vm9, %vm421_vm8 }
  0xdb   :  { %v417_v5 = vsub.f32 1.0, %v416_v61  ;;  %v408_v15 = vsel %vm405_vm7, %v407_v0, %v403_v11  ;;  %v431_v18 = vmul.f32 %v3576_v60, %v389_v6  ;;  %v440_v60 = vld [vmem:[#allocation4 + $0x38] sm:$0xff] }
  0xdc   :  { %v430_v23 = vmul.f32 0.0, %v408_v15 }
  0xdd   :  { %v418_v22 = vmul.f32 %v3574_v56, %v417_v5 }
  0xde   :  { %v4233_v27 = vadd.f32 %v431_v18, %v430_v23 }
  0xdf   :  { %v419_v13 = vadd.f32 %v3574_v56, %v418_v22 }
  0xe0   :  { %3577 = vtanh.f32 %v4233_v27 }
  0xe1   :  { %v423_v29 = vsel %vm422_vm10, %v3574_v56, %v419_v13  ;;  %v439_v13 = vld [vmem:[#allocation4 + $0x30] sm:$0xff] }
  0xe2   :  { %v428_v30 = vsel %vm425_vm11, %v427_v35, %v423_v29 }
  0xe6   :  { %v3578_v40 = vpop.eup %3577 }
  0xe7   :  { %v4236_v43 = vmul.f32 %v3578_v40, %v428_v30 }
  0xe9   :  { %v441_v48 = vpack.c.bf16 %v4236_v43, %v4236_v43 }
  0xeb   :  { %450 = vmatmul.bf16.vlgmr.msrb.gmra.mxu0 %v441_v48  ;;  %463 = vmatmul.bf16.vlgmr.msrb.gmra.mxu1 %v441_v48 }
  0xec   :  { %476 = vmatmul.bf16.vlgmr.msrb.gmra.mxu2 %v441_v48  ;;  %489 = vmatmul.bf16.vlgmr.msrb.gmra.mxu3 %v441_v48 }
  0xed   :  { %696 = vmatpush.bf16.msrb.mxu0 %v4069_v3  ;;  %709 = vmatpush.bf16.msrb.mxu1 %v4071_v7 }
  0xee   :  { %722 = vmatpush.bf16.msrb.mxu2 %v4084_v21  ;;  %735 = vmatpush.bf16.msrb.mxu3 %v4073_v8 }
  0xf1   :  { %697 = vmatpush.bf16.msrb.mxu0 %v4076_v12  ;;  %710 = vmatpush.bf16.msrb.mxu1 %v4080_v16 }
  0xf2   :  { %723 = vmatpush.bf16.msrb.mxu2 %v4096_v34  ;;  %736 = vmatpush.bf16.msrb.mxu3 %v4082_v17 }
  0xf5   :  { %698 = vmatpush.bf16.msrb.mxu0 %v4088_v28  ;;  %711 = vmatpush.bf16.msrb.mxu1 %v4092_v32 }
  0xf6   :  { %724 = vmatpush.bf16.msrb.mxu2 %v4102_v42  ;;  %737 = vmatpush.bf16.msrb.mxu3 %v4094_v33 }
  0xf9   :  { %699 = vmatpush.bf16.msrb.mxu0 %v4100_v41  ;;  %712 = vmatpush.bf16.msrb.mxu1 %v4106_v45 }
  0xfa   :  { %725 = vmatpush.bf16.msrb.mxu2 %v4114_v54  ;;  %738 = vmatpush.bf16.msrb.mxu3 %v4108_v46 }
  0xfd   :  { %700 = vmatpush.bf16.msrb.mxu0 %v4112_v53  ;;  %713 = vmatpush.bf16.msrb.mxu1 %v4118_v57 }
  0xfe   :  { %726 = vmatpush.bf16.msrb.mxu2 %v4126_v2  ;;  %739 = vmatpush.bf16.msrb.mxu3 %v4120_v58 }
 0x101   :  { %701 = vmatpush.bf16.msrb.mxu0 %v4124_v1  ;;  %714 = vmatpush.bf16.msrb.mxu1 %v4130_v9 }
 0x102   :  { %727 = vmatpush.bf16.msrb.mxu2 %v4138_v20  ;;  %740 = vmatpush.bf16.msrb.mxu3 %v4132_v10 }
 0x105   :  { %702 = vmatpush.bf16.msrb.mxu0 %v4136_v19  ;;  %715 = vmatpush.bf16.msrb.mxu1 %v4142_v24 }
 0x106   :  { %728 = vmatpush.bf16.msrb.mxu2 %v4150_v37  ;;  %741 = vmatpush.bf16.msrb.mxu3 %v4144_v25 }
 0x109   :  { %703 = vmatpush.bf16.msrb.mxu0 %v4148_v36  ;;  %716 = vmatpush.bf16.msrb.mxu1 %v4154_v38 }
 0x10a   :  { %729 = vmatpush.bf16.msrb.mxu2 %v4162_v44  ;;  %742 = vmatpush.bf16.msrb.mxu3 %v4156_v39 }
 0x168   :  { %v451_v50 = vpop.f32.mrf.mxu0  ;;  %v464_v51 = vpop.f32.mrf.mxu1 }
 0x169   :  { %v494_v52 = vadd.f32 %v451_v50, %v437_v26  ;;  %v495_v55 = vadd.f32 %v464_v51, %v438_v49 }
 0x16b   :  { %v3111_v56 = vmul.f32 -1.442695, %v494_v52  ;;  %v3112_v59 = vmul.f32 -1.442695, %v495_v55 }
 0x16d   :  { %3579 = vpow2.f32 %v3111_v56 }
 0x16e   :  { %3581 = vpow2.f32 %v3112_v59 }
 0x16f   :  { %v477_v61 = vpop.f32.mrf.mxu2  ;;  %v490_v62 = vpop.f32.mrf.mxu3 }
 0x170   :  { %v497_v63 = vadd.f32 %v490_v62, %v440_v60  ;;  %v453_v0 = vpop.f32.mrf.mxu0  ;;  %v466_v4 = vpop.f32.mrf.mxu1  ;;  %v496_v35 = vadd.f32 %v477_v61, %v439_v13 }
 0x172   :  { %v3113_v5 = vmul.f32 -1.442695, %v497_v63 }
 0x173   :  { %v3580_v6 = vpop.eup %3579 }
 0x174   :  { %v3582_v11 = vpop.eup %3581  ;;  %v501_v15 = vadd.f32 1.0, %v3580_v6  ;;  %3583 = vpow2.f32 %v3113_v5 }
 0x175   :  { %v520_v18 = vadd.f32 1.0, %v3582_v11 }
 0x176   :  { %3585 = vrcp.f32 %v501_v15  ;;  %v513_v50 = vand.u32 2147483648, %v501_v15  ;;  %v511_v55 = vand.u32 2147483647, %v501_v15  ;;  %vm507_vm14 = vweird.f32 %v501_v15 }
 0x177   :  { %3587 = vrcp.f32 %v520_v18  ;;  %v479_v22 = vpop.f32.mrf.mxu2  ;;  %v492_v23 = vpop.f32.mrf.mxu3  ;;  %v532_v51 = vand.u32 2147483648, %v520_v18  ;;  %v530_v59 = vand.u32 2147483647, %v520_v18  ;;  %vm526_vm15 = vweird.f32 %v520_v18 }
 0x178   :  { %v514_v61 = vor.u32 1.1754944e-38, %v513_v50  ;;  %vm512_vm2 = vcmp.eq.f32.partialorder %v511_v55, 8.507059e+37 }
 0x179   :  { %v533_v4 = vor.u32 1.1754944e-38, %v532_v51  ;;  %vm531_vm3 = vcmp.eq.f32.partialorder %v530_v59, 8.507059e+37 }
 0x17a   :  { %v3584_v14 = vpop.eup %3583 }
 0x17b   :  { %v540_v31 = vadd.f32 1.0, %v3584_v14 }
 0x17c   :  { %v3586_v29 = vpop.eup %3585 }
 0x17d   :  { %v3588_v40 = vpop.eup %3587  ;;  %v503_v30 = vmul.f32 %v3586_v29, %v501_v15  ;;  %3589 = vrcp.f32 %v540_v31  ;;  %vm508_vm12 = vweird.f32 %v3586_v29  ;;  %vm546_vm5 = vweird.f32 %v540_v31 }
 0x17e   :  { %v522_v48 = vmul.f32 %v3588_v40, %v520_v18  ;;  %3591 = vtanh.f32 %v496_v35  ;;  %vm527_vm13 = vweird.f32 %v3588_v40  ;;  %vm509_vm0 = vmor %vm507_vm14, %vm508_vm12 }
 0x17f   :  { %v504_v26 = vsub.f32 1.0, %v503_v30  ;;  %vm528_vm1 = vmor %vm526_vm15, %vm527_vm13 }
 0x180   :  { %v523_v49 = vsub.f32 1.0, %v522_v48  ;;  %v552_v48 = vand.u32 2147483648, %v540_v31 }
 0x181   :  { %v505_v52 = vmul.f32 %v3586_v29, %v504_v26 }
 0x182   :  { %v524_v56 = vmul.f32 %v3588_v40, %v523_v49  ;;  %v553_v49 = vor.u32 1.1754944e-38, %v552_v48  ;;  %v566_v48 = vld [vmem:[#allocation4 + $0x50] sm:$0xff] }
 0x183   :  { %v3590_v60 = vpop.eup %3589  ;;  %v506_v62 = vadd.f32 %v3586_v29, %v505_v52  ;;  %v565_v52 = vld [vmem:[#allocation4 + $0x48] sm:$0xff] }
 0x184   :  { %v525_v63 = vadd.f32 %v3588_v40, %v524_v56  ;;  %v542_v0 = vmul.f32 %v3590_v60, %v540_v31  ;;  %v3592_v6 = vpop.eup %3591  ;;  %vm547_vm4 = vweird.f32 %v3590_v60 }
 0x185   :  { %v510_v5 = vsel %vm509_vm0, %v3586_v29, %v506_v62  ;;  %v550_v29 = vand.u32 2147483647, %v540_v31  ;;  %vm548_vm6 = vmor %vm546_vm5, %vm547_vm4  ;;  %v564_v31 = vld [vmem:[#allocation4 + $0x40] sm:$0xff] }
 0x186   :  { %v515_v11 = vsel %vm512_vm2, %v514_v61, %v510_v5  ;;  %v529_v22 = vsel %vm528_vm1, %v3588_v40, %v525_v63  ;;  %v543_v23 = vsub.f32 1.0, %v542_v0  ;;  %v567_v63 = vld [vmem:[#allocation4 + $0x58] sm:$0xff] }
 0x187   :  { %v534_v13 = vsel %vm531_vm3, %v533_v4, %v529_v22  ;;  %v557_v14 = vmul.f32 %v3592_v6, %v515_v11  ;;  %vm551_vm7 = vcmp.eq.f32.partialorder %v550_v29, 8.507059e+37 }
 0x188   :  { %v556_v35 = vmul.f32 %v534_v13, %v4233_v27  ;;  %v544_v30 = vmul.f32 %v3590_v60, %v543_v23 }
 0x18a   :  { %v4273_v15 = vadd.f32 %v557_v14, %v556_v35  ;;  %v545_v18 = vadd.f32 %v3590_v60, %v544_v30 }
 0x18c   :  { %3593 = vtanh.f32 %v4273_v15  ;;  %v549_v26 = vsel %vm548_vm6, %v3590_v60, %v545_v18 }
 0x18d   :  { %v554_v50 = vsel %vm551_vm7, %v553_v49, %v549_v26 }
 0x192   :  { %v3594_v40 = vpop.eup %3593 }
 0x193   :  { %v4276_v51 = vmul.f32 %v3594_v40, %v554_v50 }
 0x195   :  { %v568_v27 = vpack.c.bf16 %v4276_v51, %v4276_v51 }
 0x197   :  { %577 = vmatmul.bf16.vlgmr.msra.gmra.mxu0 %v568_v27  ;;  %590 = vmatmul.bf16.vlgmr.msra.gmra.mxu1 %v568_v27 }
 0x198   :  { %603 = vmatmul.bf16.vlgmr.msra.gmra.mxu2 %v568_v27  ;;  %616 = vmatmul.bf16.vlgmr.msra.gmra.mxu3 %v568_v27 }
 0x199   :  { %823 = vmatpush.bf16.msra.mxu0 %v4069_v3  ;;  %836 = vmatpush.bf16.msra.mxu1 %v4071_v7 }
 0x19a   :  { %849 = vmatpush.bf16.msra.mxu2 %v4084_v21  ;;  %862 = vmatpush.bf16.msra.mxu3 %v4073_v8 }
 0x19d   :  { %824 = vmatpush.bf16.msra.mxu0 %v4076_v12  ;;  %837 = vmatpush.bf16.msra.mxu1 %v4080_v16 }
 0x19e   :  { %850 = vmatpush.bf16.msra.mxu2 %v4096_v34  ;;  %863 = vmatpush.bf16.msra.mxu3 %v4082_v17 }
 0x1a1   :  { %825 = vmatpush.bf16.msra.mxu0 %v4088_v28  ;;  %838 = vmatpush.bf16.msra.mxu1 %v4092_v32 }
 0x1a2   :  { %851 = vmatpush.bf16.msra.mxu2 %v4102_v42  ;;  %864 = vmatpush.bf16.msra.mxu3 %v4094_v33 }
 0x1a5   :  { %826 = vmatpush.bf16.msra.mxu0 %v4100_v41  ;;  %839 = vmatpush.bf16.msra.mxu1 %v4106_v45 }
 0x1a6   :  { %852 = vmatpush.bf16.msra.mxu2 %v4114_v54  ;;  %865 = vmatpush.bf16.msra.mxu3 %v4108_v46 }
 0x1a9   :  { %827 = vmatpush.bf16.msra.mxu0 %v4112_v53  ;;  %840 = vmatpush.bf16.msra.mxu1 %v4118_v57 }
 0x1aa   :  { %853 = vmatpush.bf16.msra.mxu2 %v4126_v2  ;;  %866 = vmatpush.bf16.msra.mxu3 %v4120_v58 }
 0x1ad   :  { %828 = vmatpush.bf16.msra.mxu0 %v4124_v1  ;;  %841 = vmatpush.bf16.msra.mxu1 %v4130_v9 }
 0x1ae   :  { %854 = vmatpush.bf16.msra.mxu2 %v4138_v20  ;;  %867 = vmatpush.bf16.msra.mxu3 %v4132_v10 }
 0x1b1   :  { %829 = vmatpush.bf16.msra.mxu0 %v4136_v19  ;;  %842 = vmatpush.bf16.msra.mxu1 %v4142_v24 }
 0x1b2   :  { %855 = vmatpush.bf16.msra.mxu2 %v4150_v37  ;;  %868 = vmatpush.bf16.msra.mxu3 %v4144_v25 }
 0x1b5   :  { %830 = vmatpush.bf16.msra.mxu0 %v4148_v36  ;;  %843 = vmatpush.bf16.msra.mxu1 %v4154_v38 }
 0x1b6   :  { %856 = vmatpush.bf16.msra.mxu2 %v4162_v44  ;;  %869 = vmatpush.bf16.msra.mxu3 %v4156_v39 }
 0x214   :  { %v578_v55 = vpop.f32.mrf.mxu0  ;;  %v591_v56 = vpop.f32.mrf.mxu1 }
 0x215   :  { %v621_v59 = vadd.f32 %v578_v55, %v564_v31  ;;  %v622_v60 = vadd.f32 %v591_v56, %v565_v52 }
 0x217   :  { %v3114_v62 = vmul.f32 -1.442695, %v621_v59  ;;  %v3115_v61 = vmul.f32 -1.442695, %v622_v60 }
 0x219   :  { %3595 = vpow2.f32 %v3114_v62 }
 0x21a   :  { %3597 = vpow2.f32 %v3115_v61 }
 0x21b   :  { %v604_v0 = vpop.f32.mrf.mxu2  ;;  %v617_v4 = vpop.f32.mrf.mxu3 }
 0x21c   :  { %v624_v5 = vadd.f32 %v617_v4, %v567_v63  ;;  %v580_v6 = vpop.f32.mrf.mxu0  ;;  %v593_v11 = vpop.f32.mrf.mxu1  ;;  %v623_v40 = vadd.f32 %v604_v0, %v566_v48 }
 0x21e   :  { %v3116_v22 = vmul.f32 -1.442695, %v624_v5 }
 0x21f   :  { %v3596_v23 = vpop.eup %3595 }
 0x220   :  { %v3598_v13 = vpop.eup %3597  ;;  %v628_v14 = vadd.f32 1.0, %v3596_v23  ;;  %3599 = vpow2.f32 %v3116_v22 }
 0x221   :  { %v647_v35 = vadd.f32 1.0, %v3598_v13 }
 0x222   :  { %3601 = vrcp.f32 %v628_v14  ;;  %v640_v56 = vand.u32 2147483648, %v628_v14  ;;  %v638_v62 = vand.u32 2147483647, %v628_v14  ;;  %vm634_vm10 = vweird.f32 %v628_v14 }
 0x223   :  { %3603 = vrcp.f32 %v647_v35  ;;  %v606_v30 = vpop.f32.mrf.mxu2  ;;  %v619_v18 = vpop.f32.mrf.mxu3  ;;  %v659_v59 = vand.u32 2147483648, %v647_v35  ;;  %v657_v63 = vand.u32 2147483647, %v647_v35  ;;  %vm653_vm11 = vweird.f32 %v647_v35 }
 0x224   :  { %v641_v0 = vor.u32 1.1754944e-38, %v640_v56  ;;  %vm639_vm14 = vcmp.eq.f32.partialorder %v638_v62, 8.507059e+37  ;;  %v692_v62 = vld [vmem:[#allocation4 + $0x68] sm:$0xff] }
 0x225   :  { %v660_v22 = vor.u32 1.1754944e-38, %v659_v59  ;;  %vm658_vm15 = vcmp.eq.f32.partialorder %v657_v63, 8.507059e+37 }
 0x226   :  { %v3600_v29 = vpop.eup %3599 }
 0x227   :  { %v667_v26 = vadd.f32 1.0, %v3600_v29 }
 0x228   :  { %v3602_v49 = vpop.eup %3601 }
 0x229   :  { %v3604_v50 = vpop.eup %3603  ;;  %v630_v27 = vmul.f32 %v3602_v49, %v628_v14  ;;  %3605 = vrcp.f32 %v667_v26  ;;  %vm635_vm8 = vweird.f32 %v3602_v49  ;;  %vm673_vm1 = vweird.f32 %v667_v26 }
 0x22a   :  { %v649_v31 = vmul.f32 %v3604_v50, %v647_v35  ;;  %3607 = vtanh.f32 %v623_v40  ;;  %vm654_vm9 = vweird.f32 %v3604_v50  ;;  %vm636_vm12 = vmor %vm634_vm10, %vm635_vm8 }
 0x22b   :  { %v631_v52 = vsub.f32 1.0, %v630_v27  ;;  %vm655_vm13 = vmor %vm653_vm11, %vm654_vm9 }
 0x22c   :  { %v650_v55 = vsub.f32 1.0, %v649_v31 }
 0x22d   :  { %v632_v60 = vmul.f32 %v3602_v49, %v631_v52  ;;  %v679_v52 = vand.u32 2147483648, %v667_v26 }
 0x22e   :  { %v651_v61 = vmul.f32 %v3604_v50, %v650_v55 }
 0x22f   :  { %v3606_v4 = vpop.eup %3605  ;;  %v633_v5 = vadd.f32 %v3602_v49, %v632_v60  ;;  %v680_v56 = vor.u32 1.1754944e-38, %v679_v52 }
 0x230   :  { %v652_v6 = vadd.f32 %v3604_v50, %v651_v61  ;;  %v669_v11 = vmul.f32 %v3606_v4, %v667_v26  ;;  %v3608_v13 = vpop.eup %3607  ;;  %vm674_vm0 = vweird.f32 %v3606_v4 }
 0x231   :  { %v637_v23 = vsel %vm636_vm12, %v3602_v49, %v633_v5  ;;  %v677_v49 = vand.u32 2147483647, %v667_v26  ;;  %vm675_vm2 = vmor %vm673_vm1, %vm674_vm0  ;;  %v691_v26 = vld [vmem:[#allocation4 + $0x60] sm:$0xff] }
 0x232   :  { %v642_v30 = vsel %vm639_vm14, %v641_v0, %v637_v23  ;;  %v656_v18 = vsel %vm655_vm13, %v3604_v50, %v652_v6  ;;  %v670_v48 = vsub.f32 1.0, %v669_v11  ;;  %v694_v11 = vld [vmem:[#allocation4 + $0x78] sm:$0xff] }
 0x233   :  { %v661_v29 = vsel %vm658_vm15, %v660_v22, %v656_v18  ;;  %v684_v40 = vmul.f32 %v3608_v13, %v642_v30  ;;  %vm678_vm3 = vcmp.eq.f32.partialorder %v677_v49, 8.507059e+37  ;;  %v693_v49 = vld [vmem:[#allocation4 + $0x70] sm:$0xff] }
 0x234   :  { %v683_v27 = vmul.f32 %v661_v29, %v4273_v15  ;;  %v671_v31 = vmul.f32 %v3606_v4, %v670_v48 }
 0x236   :  { %v4313_v14 = vadd.f32 %v684_v40, %v683_v27  ;;  %v672_v35 = vadd.f32 %v3606_v4, %v671_v31 }
 0x238   :  { %3609 = vtanh.f32 %v4313_v14  ;;  %v676_v55 = vsel %vm675_vm2, %v3606_v4, %v672_v35 }
 0x239   :  { %v681_v59 = vsel %vm678_vm3, %v680_v56, %v676_v55 }
 0x23e   :  { %v3610_v50 = vpop.eup %3609 }
 0x23f   :  { %v4316_v60 = vmul.f32 %v3610_v50, %v681_v59 }
 0x241   :  { %v695_v15 = vpack.c.bf16 %v4316_v60, %v4316_v60 }
 0x243   :  { %704 = vmatmul.bf16.vlgmr.msrb.gmra.mxu0 %v695_v15  ;;  %717 = vmatmul.bf16.vlgmr.msrb.gmra.mxu1 %v695_v15 }
 0x244   :  { %730 = vmatmul.bf16.vlgmr.msrb.gmra.mxu2 %v695_v15  ;;  %743 = vmatmul.bf16.vlgmr.msrb.gmra.mxu3 %v695_v15 }
 0x245   :  { %950 = vmatpush.bf16.msrb.mxu0 %v4069_v3  ;;  %963 = vmatpush.bf16.msrb.mxu1 %v4071_v7 }
 0x246   :  { %976 = vmatpush.bf16.msrb.mxu2 %v4084_v21  ;;  %989 = vmatpush.bf16.msrb.mxu3 %v4073_v8 }
 0x249   :  { %951 = vmatpush.bf16.msrb.mxu0 %v4076_v12  ;;  %964 = vmatpush.bf16.msrb.mxu1 %v4080_v16 }
 0x24a   :  { %977 = vmatpush.bf16.msrb.mxu2 %v4096_v34  ;;  %990 = vmatpush.bf16.msrb.mxu3 %v4082_v17 }
 0x24d   :  { %952 = vmatpush.bf16.msrb.mxu0 %v4088_v28  ;;  %965 = vmatpush.bf16.msrb.mxu1 %v4092_v32 }
 0x24e   :  { %978 = vmatpush.bf16.msrb.mxu2 %v4102_v42  ;;  %991 = vmatpush.bf16.msrb.mxu3 %v4094_v33 }
 0x251   :  { %953 = vmatpush.bf16.msrb.mxu0 %v4100_v41  ;;  %966 = vmatpush.bf16.msrb.mxu1 %v4106_v45 }
 0x252   :  { %979 = vmatpush.bf16.msrb.mxu2 %v4114_v54  ;;  %992 = vmatpush.bf16.msrb.mxu3 %v4108_v46 }
 0x255   :  { %954 = vmatpush.bf16.msrb.mxu0 %v4112_v53  ;;  %967 = vmatpush.bf16.msrb.mxu1 %v4118_v57 }
 0x256   :  { %980 = vmatpush.bf16.msrb.mxu2 %v4126_v2  ;;  %993 = vmatpush.bf16.msrb.mxu3 %v4120_v58 }
 0x259   :  { %955 = vmatpush.bf16.msrb.mxu0 %v4124_v1  ;;  %968 = vmatpush.bf16.msrb.mxu1 %v4130_v9 }
 0x25a   :  { %981 = vmatpush.bf16.msrb.mxu2 %v4138_v20  ;;  %994 = vmatpush.bf16.msrb.mxu3 %v4132_v10 }
 0x25d   :  { %956 = vmatpush.bf16.msrb.mxu0 %v4136_v19  ;;  %969 = vmatpush.bf16.msrb.mxu1 %v4142_v24 }
 0x25e   :  { %982 = vmatpush.bf16.msrb.mxu2 %v4150_v37  ;;  %995 = vmatpush.bf16.msrb.mxu3 %v4144_v25 }
 0x261   :  { %957 = vmatpush.bf16.msrb.mxu0 %v4148_v36  ;;  %970 = vmatpush.bf16.msrb.mxu1 %v4154_v38 }
 0x262   :  { %983 = vmatpush.bf16.msrb.mxu2 %v4162_v44  ;;  %996 = vmatpush.bf16.msrb.mxu3 %v4156_v39 }
 0x2c0   :  { %v705_v61 = vpop.f32.mrf.mxu0  ;;  %v718_v63 = vpop.f32.mrf.mxu1 }
 0x2c1   :  { %v748_v4 = vadd.f32 %v705_v61, %v691_v26  ;;  %v749_v5 = vadd.f32 %v718_v63, %v692_v62 }
 0x2c3   :  { %v3117_v0 = vmul.f32 -1.442695, %v748_v4  ;;  %v3118_v6 = vmul.f32 -1.442695, %v749_v5 }
 0x2c5   :  { %3611 = vpow2.f32 %v3117_v0 }
 0x2c6   :  { %3613 = vpow2.f32 %v3118_v6 }
 0x2c7   :  { %v731_v22 = vpop.f32.mrf.mxu2  ;;  %v744_v23 = vpop.f32.mrf.mxu3 }
 0x2c8   :  { %v751_v13 = vadd.f32 %v744_v23, %v694_v11  ;;  %v707_v30 = vpop.f32.mrf.mxu0  ;;  %v720_v18 = vpop.f32.mrf.mxu1  ;;  %v750_v59 = vadd.f32 %v731_v22, %v693_v49 }
 0x2ca   :  { %v3119_v48 = vmul.f32 -1.442695, %v751_v13 }
 0x2cb   :  { %v3612_v29 = vpop.eup %3611 }
 0x2cc   :  { %v3614_v40 = vpop.eup %3613  ;;  %v755_v27 = vadd.f32 1.0, %v3612_v29  ;;  %3615 = vpow2.f32 %v3119_v48 }
 0x2cd   :  { %v774_v31 = vadd.f32 1.0, %v3614_v40 }
 0x2ce   :  { %3617 = vrcp.f32 %v755_v27  ;;  %v767_v4 = vand.u32 2147483648, %v755_v27  ;;  %v765_v6 = vand.u32 2147483647, %v755_v27  ;;  %vm761_vm6 = vweird.f32 %v755_v27 }
 0x2cf   :  { %3619 = vrcp.f32 %v774_v31  ;;  %v733_v35 = vpop.f32.mrf.mxu2  ;;  %v746_v52 = vpop.f32.mrf.mxu3  ;;  %v786_v5 = vand.u32 2147483648, %v774_v31  ;;  %v784_v23 = vand.u32 2147483647, %v774_v31  ;;  %vm780_vm7 = vweird.f32 %v774_v31 }
 0x2d0   :  { %v768_v22 = vor.u32 1.1754944e-38, %v767_v4  ;;  %vm766_vm10 = vcmp.eq.f32.partialorder %v765_v6, 8.507059e+37 }
 0x2d1   :  { %v787_v29 = vor.u32 1.1754944e-38, %v786_v5  ;;  %vm785_vm11 = vcmp.eq.f32.partialorder %v784_v23, 8.507059e+37 }
 0x2d2   :  { %v3616_v55 = vpop.eup %3615 }
 0x2d3   :  { %v794_v56 = vadd.f32 1.0, %v3616_v55 }
 0x2d4   :  { %v3618_v50 = vpop.eup %3617 }
 0x2d5   :  { %v3620_v15 = vpop.eup %3619  ;;  %v757_v26 = vmul.f32 %v3618_v50, %v755_v27  ;;  %3621 = vrcp.f32 %v794_v56  ;;  %vm762_vm4 = vweird.f32 %v3618_v50  ;;  %vm800_vm13 = vweird.f32 %v794_v56 }
 0x2d6   :  { %v776_v62 = vmul.f32 %v3620_v15, %v774_v31  ;;  %3623 = vtanh.f32 %v750_v59  ;;  %vm781_vm5 = vweird.f32 %v3620_v15  ;;  %vm763_vm8 = vmor %vm761_vm6, %vm762_vm4 }
 0x2d7   :  { %v758_v61 = vsub.f32 1.0, %v757_v26  ;;  %vm782_vm9 = vmor %vm780_vm7, %vm781_vm5 }
 0x2d8   :  { %v777_v63 = vsub.f32 1.0, %v776_v62 }
 0x2d9   :  { %v759_v0 = vmul.f32 %v3618_v50, %v758_v61 }
 0x2da   :  { %v778_v11 = vmul.f32 %v3620_v15, %v777_v63  ;;  %v806_v63 = vand.u32 2147483648, %v794_v56 }
 0x2db   :  { %v3622_v13 = vpop.eup %3621  ;;  %v760_v30 = vadd.f32 %v3618_v50, %v759_v0 }
 0x2dc   :  { %v779_v18 = vadd.f32 %v3620_v15, %v778_v11  ;;  %v796_v48 = vmul.f32 %v3622_v13, %v794_v56  ;;  %v3624_v35 = vpop.eup %3623  ;;  %vm801_vm12 = vweird.f32 %v3622_v13  ;;  %v807_v5 = vor.u32 1.1754944e-38, %v806_v63  ;;  %v819_v11 = vld [vmem:[#allocation4 + $0x88] sm:$0xff] }
 0x2dd   :  { %v764_v40 = vsel %vm763_vm8, %v3618_v50, %v760_v30  ;;  %v804_v50 = vand.u32 2147483647, %v794_v56  ;;  %vm802_vm14 = vmor %vm800_vm13, %vm801_vm12  ;;  %v818_v56 = vld [vmem:[#allocation4 + $0x80] sm:$0xff] }
 0x2de   :  { %v769_v52 = vsel %vm766_vm10, %v768_v22, %v764_v40  ;;  %v783_v49 = vsel %vm782_vm9, %v3620_v15, %v779_v18  ;;  %v797_v55 = vsub.f32 1.0, %v796_v48 }
 0x2df   :  { %v788_v59 = vsel %vm785_vm11, %v787_v29, %v783_v49  ;;  %v811_v26 = vmul.f32 %v3624_v35, %v769_v52  ;;  %vm805_vm15 = vcmp.eq.f32.partialorder %v804_v50, 8.507059e+37  ;;  %v821_v29 = vld [vmem:[#allocation4 + $0x98] sm:$0xff] }
 0x2e0   :  { %v810_v62 = vmul.f32 %v788_v59, %v4313_v14  ;;  %v798_v61 = vmul.f32 %v3622_v13, %v797_v55 }
 0x2e2   :  { %v4353_v27 = vadd.f32 %v811_v26, %v810_v62  ;;  %v799_v31 = vadd.f32 %v3622_v13, %v798_v61 }
 0x2e4   :  { %3625 = vtanh.f32 %v4353_v27  ;;  %v803_v4 = vsel %vm802_vm14, %v3622_v13, %v799_v31 }
 0x2e5   :  { %v808_v0 = vsel %vm805_vm15, %v807_v5, %v803_v4  ;;  %v820_v4 = vld [vmem:[#allocation4 + $0x90] sm:$0xff] }
 0x2ea   :  { %v3626_v15 = vpop.eup %3625 }
 0x2eb   :  { %v4356_v6 = vmul.f32 %v3626_v15, %v808_v0 }
 0x2ed   :  { %v822_v14 = vpack.c.bf16 %v4356_v6, %v4356_v6 }
 0x2ef   :  { %831 = vmatmul.bf16.vlgmr.msra.gmra.mxu0 %v822_v14  ;;  %844 = vmatmul.bf16.vlgmr.msra.gmra.mxu1 %v822_v14 }
 0x2f0   :  { %857 = vmatmul.bf16.vlgmr.msra.gmra.mxu2 %v822_v14  ;;  %870 = vmatmul.bf16.vlgmr.msra.gmra.mxu3 %v822_v14 }
 0x2f1   :  { %1077 = vmatpush.bf16.msra.mxu0 %v4069_v3  ;;  %1090 = vmatpush.bf16.msra.mxu1 %v4071_v7 }
 0x2f2   :  { %1103 = vmatpush.bf16.msra.mxu2 %v4084_v21  ;;  %1116 = vmatpush.bf16.msra.mxu3 %v4073_v8 }
 0x2f5   :  { %1078 = vmatpush.bf16.msra.mxu0 %v4076_v12  ;;  %1091 = vmatpush.bf16.msra.mxu1 %v4080_v16 }
 0x2f6   :  { %1104 = vmatpush.bf16.msra.mxu2 %v4096_v34  ;;  %1117 = vmatpush.bf16.msra.mxu3 %v4082_v17 }
 0x2f9   :  { %1079 = vmatpush.bf16.msra.mxu0 %v4088_v28  ;;  %1092 = vmatpush.bf16.msra.mxu1 %v4092_v32 }
 0x2fa   :  { %1105 = vmatpush.bf16.msra.mxu2 %v4102_v42  ;;  %1118 = vmatpush.bf16.msra.mxu3 %v4094_v33 }
 0x2fd   :  { %1080 = vmatpush.bf16.msra.mxu0 %v4100_v41  ;;  %1093 = vmatpush.bf16.msra.mxu1 %v4106_v45 }
 0x2fe   :  { %1106 = vmatpush.bf16.msra.mxu2 %v4114_v54  ;;  %1119 = vmatpush.bf16.msra.mxu3 %v4108_v46 }
 0x301   :  { %1081 = vmatpush.bf16.msra.mxu0 %v4112_v53  ;;  %1094 = vmatpush.bf16.msra.mxu1 %v4118_v57 }
 0x302   :  { %1107 = vmatpush.bf16.msra.mxu2 %v4126_v2  ;;  %1120 = vmatpush.bf16.msra.mxu3 %v4120_v58 }
 0x305   :  { %1082 = vmatpush.bf16.msra.mxu0 %v4124_v1  ;;  %1095 = vmatpush.bf16.msra.mxu1 %v4130_v9 }
 0x306   :  { %1108 = vmatpush.bf16.msra.mxu2 %v4138_v20  ;;  %1121 = vmatpush.bf16.msra.mxu3 %v4132_v10 }
 0x309   :  { %1083 = vmatpush.bf16.msra.mxu0 %v4136_v19  ;;  %1096 = vmatpush.bf16.msra.mxu1 %v4142_v24 }
 0x30a   :  { %1109 = vmatpush.bf16.msra.mxu2 %v4150_v37  ;;  %1122 = vmatpush.bf16.msra.mxu3 %v4144_v25 }
 0x30d   :  { %1084 = vmatpush.bf16.msra.mxu0 %v4148_v36  ;;  %1097 = vmatpush.bf16.msra.mxu1 %v4154_v38 }
 0x30e   :  { %1110 = vmatpush.bf16.msra.mxu2 %v4162_v44  ;;  %1123 = vmatpush.bf16.msra.mxu3 %v4156_v39 }
 0x36c   :  { %v832_v23 = vpop.f32.mrf.mxu0  ;;  %v845_v13 = vpop.f32.mrf.mxu1 }
 0x36d   :  { %v875_v30 = vadd.f32 %v832_v23, %v818_v56  ;;  %v876_v22 = vadd.f32 %v845_v13, %v819_v11 }
 0x36f   :  { %v3120_v18 = vmul.f32 -1.442695, %v875_v30  ;;  %v3121_v48 = vmul.f32 -1.442695, %v876_v22 }
 0x371   :  { %3627 = vpow2.f32 %v3120_v18 }
 0x372   :  { %3629 = vpow2.f32 %v3121_v48 }
 0x373   :  { %v858_v40 = vpop.f32.mrf.mxu2  ;;  %v871_v35 = vpop.f32.mrf.mxu3 }
 0x374   :  { %v878_v52 = vadd.f32 %v871_v35, %v821_v29  ;;  %v834_v49 = vpop.f32.mrf.mxu0  ;;  %v847_v55 = vpop.f32.mrf.mxu1  ;;  %v877_v14 = vadd.f32 %v858_v40, %v820_v4 }
 0x376   :  { %v3122_v59 = vmul.f32 -1.442695, %v878_v52 }
 0x377   :  { %v3628_v26 = vpop.eup %3627 }
 0x378   :  { %v3630_v62 = vpop.eup %3629  ;;  %v882_v61 = vadd.f32 1.0, %v3628_v26  ;;  %3631 = vpow2.f32 %v3122_v59 }
 0x379   :  { %v901_v31 = vadd.f32 1.0, %v3630_v62 }
 0x37a   :  { %3633 = vrcp.f32 %v882_v61  ;;  %v894_v22 = vand.u32 2147483648, %v882_v61  ;;  %v892_v29 = vand.u32 2147483647, %v882_v61  ;;  %vm888_vm2 = vweird.f32 %v882_v61 }
 0x37b   :  { %3635 = vrcp.f32 %v901_v31  ;;  %v860_v63 = vpop.f32.mrf.mxu2  ;;  %v873_v50 = vpop.f32.mrf.mxu3  ;;  %v913_v18 = vand.u32 2147483648, %v901_v31  ;;  %v911_v52 = vand.u32 2147483647, %v901_v31  ;;  %vm907_vm3 = vweird.f32 %v901_v31 }
 0x37c   :  { %v895_v40 = vor.u32 1.1754944e-38, %v894_v22  ;;  %vm893_vm6 = vcmp.eq.f32.partialorder %v892_v29, 8.507059e+37 }
 0x37d   :  { %v914_v62 = vor.u32 1.1754944e-38, %v913_v18  ;;  %vm912_vm7 = vcmp.eq.f32.partialorder %v911_v52, 8.507059e+37 }
 0x37e   :  { %v3632_v5 = vpop.eup %3631 }
 0x37f   :  { %v921_v15 = vadd.f32 1.0, %v3632_v5 }
 0x380   :  { %v3634_v0 = vpop.eup %3633 }
 0x381   :  { %v3636_v56 = vpop.eup %3635  ;;  %v884_v11 = vmul.f32 %v3634_v0, %v882_v61  ;;  %3637 = vrcp.f32 %v921_v15  ;;  %vm889_vm0 = vweird.f32 %v3634_v0  ;;  %v933_v22 = vand.u32 2147483648, %v921_v15 }
 0x382   :  { %v903_v23 = vmul.f32 %v3636_v56, %v901_v31  ;;  %3639 = vtanh.f32 %v877_v14  ;;  %vm908_vm1 = vweird.f32 %v3636_v56  ;;  %vm890_vm4 = vmor %vm888_vm2, %vm889_vm0  ;;  %vm927_vm9 = vweird.f32 %v921_v15 }
 0x383   :  { %v885_v13 = vsub.f32 1.0, %v884_v11  ;;  %vm909_vm5 = vmor %vm907_vm3, %vm908_vm1 }
 0x384   :  { %v904_v30 = vsub.f32 1.0, %v903_v23 }
 0x385   :  { %v886_v48 = vmul.f32 %v3634_v0, %v885_v13 }
 0x386   :  { %v905_v35 = vmul.f32 %v3636_v56, %v904_v30 }
 0x387   :  { %v3638_v49 = vpop.eup %3637  ;;  %v887_v55 = vadd.f32 %v3634_v0, %v886_v48  ;;  %v934_v48 = vor.u32 1.1754944e-38, %v933_v22 }
 0x388   :  { %v906_v59 = vadd.f32 %v3636_v56, %v905_v35  ;;  %v923_v26 = vmul.f32 %v3638_v49, %v921_v15  ;;  %v3640_v50 = vpop.eup %3639  ;;  %vm928_vm8 = vweird.f32 %v3638_v49 }
 0x389   :  { %v891_v63 = vsel %vm890_vm4, %v3634_v0, %v887_v55  ;;  %v931_v0 = vand.u32 2147483647, %v921_v15  ;;  %vm929_vm10 = vmor %vm927_vm9, %vm928_vm8 }
 0x38a   :  { %v896_v4 = vsel %vm893_vm6, %v895_v40, %v891_v63  ;;  %v910_v5 = vsel %vm909_vm5, %v3636_v56, %v906_v59  ;;  %v924_v14 = vsub.f32 1.0, %v923_v26 }
 0x38b   :  { %v915_v11 = vsel %vm912_vm7, %v914_v62, %v910_v5  ;;  %v938_v23 = vmul.f32 %v3640_v50, %v896_v4  ;;  %vm932_vm11 = vcmp.eq.f32.partialorder %v931_v0, 8.507059e+37 }
 0x38c   :  { %v937_v13 = vmul.f32 %v915_v11, %v4353_v27  ;;  %v925_v30 = vmul.f32 %v3638_v49, %v924_v14 }
 0x38e   :  { %v4393_v61 = vadd.f32 %v938_v23, %v937_v13  ;;  %v926_v31 = vadd.f32 %v3638_v49, %v925_v30 }
 0x390   :  { %3641 = vtanh.f32 %v4393_v61  ;;  %v930_v18 = vsel %vm929_vm10, %v3638_v49, %v926_v31 }
 0x391   :  { %v935_v29 = vsel %vm932_vm11, %v934_v48, %v930_v18 }
 0x396   :  { %v3642_v56 = vpop.eup %3641 }
 0x397   :  { %v4396_v35 = vmul.f32 %v3642_v56, %v935_v29 }
 0x399   :  { %v949_v27 = vpack.c.bf16 %v4396_v35, %v4396_v35 }
 0x39b   :  { %958 = vmatmul.bf16.vlgmr.msrb.gmra.mxu0 %v949_v27  ;;  %971 = vmatmul.bf16.vlgmr.msrb.gmra.mxu1 %v949_v27 }
 0x39c   :  { %984 = vmatmul.bf16.vlgmr.msrb.gmra.mxu2 %v949_v27  ;;  %997 = vmatmul.bf16.vlgmr.msrb.gmra.mxu3 %v949_v27 }
 0x39d   :  { %1204 = vmatpush.bf16.msrb.mxu0 %v4069_v3  ;;  %1217 = vmatpush.bf16.msrb.mxu1 %v4071_v7  ;;  %v945_v3 = vld [vmem:[#allocation4 + $0xa0] sm:$0xff]  ;;  %v946_v7 = vld [vmem:[#allocation4 + $0xa8] sm:$0xff] }
 0x39e   :  { %1230 = vmatpush.bf16.msrb.mxu2 %v4084_v21  ;;  %1243 = vmatpush.bf16.msrb.mxu3 %v4073_v8 }
 0x3a1   :  { %1205 = vmatpush.bf16.msrb.mxu0 %v4076_v12  ;;  %1218 = vmatpush.bf16.msrb.mxu1 %v4080_v16 }
 0x3a2   :  { %1231 = vmatpush.bf16.msrb.mxu2 %v4096_v34  ;;  %1244 = vmatpush.bf16.msrb.mxu3 %v4082_v17 }
 0x3a5   :  { %1206 = vmatpush.bf16.msrb.mxu0 %v4088_v28  ;;  %1219 = vmatpush.bf16.msrb.mxu1 %v4092_v32  ;;  %v948_v32 = vld [vmem:[#allocation4 + $0xb8] sm:$0xff] }
 0x3a6   :  { %1232 = vmatpush.bf16.msrb.mxu2 %v4102_v42  ;;  %1245 = vmatpush.bf16.msrb.mxu3 %v4094_v33 }
 0x3a9   :  { %1207 = vmatpush.bf16.msrb.mxu0 %v4100_v41  ;;  %1220 = vmatpush.bf16.msrb.mxu1 %v4106_v45 }
 0x3aa   :  { %1233 = vmatpush.bf16.msrb.mxu2 %v4114_v54  ;;  %1246 = vmatpush.bf16.msrb.mxu3 %v4108_v46 }
 0x3ad   :  { %1208 = vmatpush.bf16.msrb.mxu0 %v4112_v53  ;;  %1221 = vmatpush.bf16.msrb.mxu1 %v4118_v57 }
 0x3ae   :  { %1234 = vmatpush.bf16.msrb.mxu2 %v4126_v2  ;;  %1247 = vmatpush.bf16.msrb.mxu3 %v4120_v58 }
 0x3b1   :  { %1209 = vmatpush.bf16.msrb.mxu0 %v4124_v1  ;;  %1222 = vmatpush.bf16.msrb.mxu1 %v4130_v9  ;;  %v947_v9 = vld [vmem:[#allocation4 + $0xb0] sm:$0xff] }
 0x3b2   :  { %1235 = vmatpush.bf16.msrb.mxu2 %v4138_v20  ;;  %1248 = vmatpush.bf16.msrb.mxu3 %v4132_v10 }
 0x3b5   :  { %1210 = vmatpush.bf16.msrb.mxu0 %v4136_v19  ;;  %1223 = vmatpush.bf16.msrb.mxu1 %v4142_v24 }
 0x3b6   :  { %1236 = vmatpush.bf16.msrb.mxu2 %v4150_v37  ;;  %1249 = vmatpush.bf16.msrb.mxu3 %v4144_v25 }
 0x3b9   :  { %1211 = vmatpush.bf16.msrb.mxu0 %v4148_v36  ;;  %1224 = vmatpush.bf16.msrb.mxu1 %v4154_v38 }
 0x3ba   :  { %1237 = vmatpush.bf16.msrb.mxu2 %v4162_v44  ;;  %1250 = vmatpush.bf16.msrb.mxu3 %v4156_v39 }
 0x418   :  { %v959_v8 = vpop.f32.mrf.mxu0  ;;  %v972_v12 = vpop.f32.mrf.mxu1 }
 0x419   :  { %v1002_v16 = vadd.f32 %v959_v8, %v945_v3  ;;  %v1003_v17 = vadd.f32 %v972_v12, %v946_v7 }
 0x41b   :  { %v3123_v21 = vmul.f32 -1.442695, %v1002_v16  ;;  %v3124_v28 = vmul.f32 -1.442695, %v1003_v17  ;;  %v1072_v16 = vld [vmem:[#allocation4 + $0xc0] sm:$0xff]  ;;  %v1073_v17 = vld [vmem:[#allocation4 + $0xc8] sm:$0xff] }
 0x41d   :  { %3643 = vpow2.f32 %v3123_v21  ;;  %v3246_v21 = vld [vmem:[#allocation9 + $0xe0] sm:$0xf] }
 0x41e   :  { %3645 = vpow2.f32 %v3124_v28  ;;  %v3506_v28 = vld [vmem:[#allocation9 + $0xec] sm:$0xf0] }
 0x41f   :  { %v985_v33 = vpop.f32.mrf.mxu2  ;;  %v998_v34 = vpop.f32.mrf.mxu3 }
 0x420   :  { %v1005_v41 = vadd.f32 %v998_v34, %v948_v32  ;;  %v961_v42 = vpop.f32.mrf.mxu0  ;;  %v974_v45 = vpop.f32.mrf.mxu1  ;;  %v1004_v24 = vadd.f32 %v985_v33, %v947_v9  ;;  %v3504_v32 = vld [vmem:[#allocation9 + $0xe4] sm:$0xf]  ;;  %v3247_v33 = vor.u32 %v3506_v28, %v3246_v21  ;;  %v3248_v34 = vld [vmem:[#allocation9 + $0xf0] sm:$0xf0]  ;;  %v3493_v28 = vld [vmem:[#allocation9 + $0x8c] sm:$0xf] }
 0x421   :  { %v3507_v42 = vld [vmem:[#allocation9 + $0xf4] sm:$0xf0]  ;;  %v3251_v45 = vor.u32 %v3504_v32, %v3248_v34  ;;  %v3208_v32 = vld [vmem:[#allocation9 + $0x98] sm:$0xf0] }
 0x422   :  { %v3125_v46 = vmul.f32 -1.442695, %v1005_v41  ;;  %v3254_v41 = vld [vmem:[#allocation9 + $0xe8] sm:$0xf] }
 0x423   :  { %v3644_v53 = vpop.eup %3643 }
 0x424   :  { %v3646_v54 = vpop.eup %3645  ;;  %v1009_v57 = vadd.f32 1.0, %v3644_v53  ;;  %3647 = vpow2.f32 %v3125_v46  ;;  %v3255_v46 = vor.u32 %v3507_v42, %v3254_v41  ;;  %v3505_v53 = vld [vmem:[#allocation9 + $0xec] sm:$0xf]  ;;  %v3211_v41 = vor.u32 %v3493_v28, %v3208_v32  ;;  %v3483_v32 = vld [vmem:[#allocation9 + $0x34] sm:$0xf0] }
 0x425   :  { %v1028_v58 = vadd.f32 1.0, %v3646_v54  ;;  %v3256_v54 = vld [vmem:[#allocation9 + $0xf8] sm:$0xf0] }
 0x426   :  { %3649 = vrcp.f32 %v1009_v57  ;;  %v1021_v44 = vand.u32 2147483648, %v1009_v57  ;;  %v1019_v49 = vand.u32 2147483647, %v1009_v57  ;;  %vm1015_vm14 = vweird.f32 %v1009_v57 }
 0x427   :  { %3651 = vrcp.f32 %v1028_v58  ;;  %v987_v1 = vpop.f32.mrf.mxu2  ;;  %v1000_v2 = vpop.f32.mrf.mxu3  ;;  %v1040_v15 = vand.u32 2147483648, %v1028_v58  ;;  %v1038_v40 = vand.u32 2147483647, %v1028_v58  ;;  %vm1034_vm15 = vweird.f32 %v1028_v58 }
 0x428   :  { %v1022_v62 = vor.u32 1.1754944e-38, %v1021_v44  ;;  %vm1020_vm2 = vcmp.eq.f32.partialorder %v1019_v49, 8.507059e+37  ;;  %v3259_v1 = vor.u32 %v3505_v53, %v3256_v54  ;;  %v1075_v44 = vld [vmem:[#allocation4 + $0xd8] sm:$0xff]  ;;  %v3501_v49 = vld [vmem:[#allocation9 + $0xcc] sm:$0xf]  ;;  %v1074_v54 = vld [vmem:[#allocation4 + $0xd0] sm:$0xff] }
 0x429   :  { %v1041_v4 = vor.u32 1.1754944e-38, %v1040_v15  ;;  %vm1039_vm3 = vcmp.eq.f32.partialorder %v1038_v40, 8.507059e+37  ;;  %v3214_v40 = vld [vmem:[#allocation9 + $0xa0] sm:$0xf] }
 0x42a   :  { %v3648_v10 = vpop.eup %3647  ;;  %v3182_v53 = vld [vmem:[#allocation9 + $0x60] sm:$0xf] }
 0x42b   :  { %v1048_v19 = vadd.f32 1.0, %v3648_v10  ;;  %v3230_v10 = vld [vmem:[#allocation9 + $0xc0] sm:$0xf] }
 0x42c   :  { %v3650_v20 = vpop.eup %3649 }
 0x42d   :  { %v3652_v25 = vpop.eup %3651  ;;  %v1011_v36 = vmul.f32 %v3650_v20, %v1009_v57  ;;  %3653 = vrcp.f32 %v1048_v19  ;;  %vm1016_vm12 = vweird.f32 %v3650_v20  ;;  %v1060_v56 = vand.u32 2147483648, %v1048_v19 }
 0x42e   :  { %v1030_v37 = vmul.f32 %v3652_v25, %v1028_v58  ;;  %3655 = vtanh.f32 %v1004_v24  ;;  %vm1035_vm13 = vweird.f32 %v3652_v25  ;;  %vm1017_vm0 = vmor %vm1015_vm14, %vm1016_vm12  ;;  %vm1054_vm5 = vweird.f32 %v1048_v19 }
 0x42f   :  { %v1012_v38 = vsub.f32 1.0, %v1011_v36  ;;  %vm1036_vm1 = vmor %vm1034_vm15, %vm1035_vm13  ;;  %v1058_v29 = vand.u32 2147483647, %v1048_v19  ;;  %v1061_v3 = vor.u32 1.1754944e-38, %v1060_v56  ;;  %v3238_v36 = vld [vmem:[#allocation9 + $0xc8] sm:$0xf] }
 0x430   :  { %v1031_v39 = vsub.f32 1.0, %v1030_v37  ;;  %v3503_v37 = vld [vmem:[#allocation9 + $0xd4] sm:$0xf0]  ;;  %v3492_v56 = vld [vmem:[#allocation9 + $0x84] sm:$0xf] }
 0x431   :  { %v1013_v52 = vmul.f32 %v3650_v20, %v1012_v38  ;;  %vm1059_vm7 = vcmp.eq.f32.partialorder %v1058_v29, 8.507059e+37 }
 0x432   :  { %v1032_v55 = vmul.f32 %v3652_v25, %v1031_v39 }
 0x433   :  { %v3654_v59 = vpop.eup %3653  ;;  %v1014_v26 = vadd.f32 %v3650_v20, %v1013_v52  ;;  %v3239_v52 = vor.u32 %v3503_v37, %v3238_v36 }
 0x434   :  { %v1033_v63 = vadd.f32 %v3652_v25, %v1032_v55  ;;  %v1050_v50 = vmul.f32 %v3654_v59, %v1048_v19  ;;  %v3656_v14 = vpop.eup %3655  ;;  %vm1055_vm4 = vweird.f32 %v3654_v59  ;;  %v3502_v19 = vld [vmem:[#allocation9 + $0xcc] sm:$0xf0]  ;;  %v3240_v55 = vld [vmem:[#allocation9 + $0xd8] sm:$0xf0] }
 0x435   :  { %v1018_v5 = vsel %vm1017_vm0, %v3650_v20, %v1014_v26  ;;  %vm1056_vm6 = vmor %vm1054_vm5, %vm1055_vm4  ;;  %v3500_v20 = vld [vmem:[#allocation9 + $0xc4] sm:$0xf]  ;;  %v3231_v24 = vor.u32 %v3502_v19, %v3230_v10  ;;  %v3243_v26 = vor.u32 %v3501_v49, %v3240_v55  ;;  %v3184_v10 = vld [vmem:[#allocation9 + $0x70] sm:$0xf0] }
 0x436   :  { %v1023_v11 = vsel %vm1020_vm2, %v1022_v62, %v1018_v5  ;;  %v1037_v23 = vsel %vm1036_vm1, %v3652_v25, %v1033_v63  ;;  %v1051_v13 = vsub.f32 1.0, %v1050_v50  ;;  %v3232_v25 = vld [vmem:[#allocation9 + $0xd0] sm:$0xf0]  ;;  %v3496_v63 = vld [vmem:[#allocation9 + $0xa4] sm:$0xf] }
 0x437   :  { %v1042_v30 = vsel %vm1039_vm3, %v1041_v4, %v1037_v23  ;;  %v1065_v31 = vmul.f32 %v3656_v14, %v1023_v11  ;;  %v3235_v15 = vor.u32 %v3500_v20, %v3232_v25  ;;  %v3216_v50 = vld [vmem:[#allocation9 + $0xb0] sm:$0xf0]  ;;  %v3222_v4 = vld [vmem:[#allocation9 + $0xa8] sm:$0xf]  ;;  %v3499_v14 = vld [vmem:[#allocation9 + $0xb4] sm:$0xf0] }
 0x438   :  { %v1064_v22 = vmul.f32 %v1042_v30, %v4393_v61  ;;  %v1052_v0 = vmul.f32 %v3654_v59, %v1051_v13  ;;  %v3219_v5 = vor.u32 %v3496_v63, %v3216_v50  ;;  %v3497_v11 = vld [vmem:[#allocation9 + $0xac] sm:$0xf]  ;;  %v3224_v23 = vld [vmem:[#allocation9 + $0xb8] sm:$0xf0]  ;;  %v3491_v25 = vld [vmem:[#allocation9 + $0x74] sm:$0xf0] }
 0x439   :  { %v3486_v55 = vld [vmem:[#allocation9 + $0x4c] sm:$0xf0]  ;;  %v3174_v63 = vld [vmem:[#allocation9 + $0x48] sm:$0xf]  ;;  %v3487_v50 = vld [vmem:[#allocation9 + $0x54] sm:$0xf0] }
 0x43a   :  { %v4433_v18 = vadd.f32 %v1065_v31, %v1064_v22  ;;  %v1053_v48 = vadd.f32 %v3654_v59, %v1052_v0  ;;  %v3223_v31 = vor.u32 %v3499_v14, %v3222_v4  ;;  %v3227_v22 = vor.u32 %v3497_v11, %v3224_v23  ;;  %v3198_v0 = vld [vmem:[#allocation9 + $0x80] sm:$0xf]  ;;  %v3485_v14 = vld [vmem:[#allocation9 + $0x4c] sm:$0xf]  ;;  %v3176_v11 = vld [vmem:[#allocation9 + $0x58] sm:$0xf0] }
 0x43b   :  { %v3150_v23 = vld [vmem:[#allocation9 + $0x20] sm:$0xf] }
 0x43c   :  { %3657 = vtanh.f32 %v4433_v18  ;;  %v1057_v27 = vsel %vm1056_vm6, %v3654_v59, %v1053_v48  ;;  %v3498_v59 = vld [vmem:[#allocation9 + $0xac] sm:$0xf0] }
 0x43d   :  { %v1062_v8 = vsel %vm1059_vm7, %v1061_v3, %v1057_v27  ;;  %v3215_v62 = vor.u32 %v3498_v59, %v3214_v40  ;;  %v3494_v48 = vld [vmem:[#allocation9 + $0x8c] sm:$0xf0]  ;;  %v3484_v40 = vld [vmem:[#allocation9 + $0x44] sm:$0xf] }
 0x442   :  { %v3658_v7 = vpop.eup %3657 }
 0x443   :  { %v4436_v12 = vmul.f32 %v3658_v7, %v1062_v8  ;;  %v3199_v7 = vor.u32 %v3494_v48, %v3198_v0  ;;  %v3200_v8 = vld [vmem:[#allocation9 + $0x90] sm:$0xf0] }
 0x445   :  { %v1076_v61 = vpack.c.bf16 %v4436_v12, %v4436_v12 }
 0x447   :  { %1085 = vmatmul.bf16.vlgmr.msra.gmra.mxu0 %v1076_v61  ;;  %1098 = vmatmul.bf16.vlgmr.msra.gmra.mxu1 %v1076_v61 }
 0x448   :  { %1111 = vmatmul.bf16.vlgmr.msra.gmra.mxu2 %v1076_v61  ;;  %1124 = vmatmul.bf16.vlgmr.msra.gmra.mxu3 %v1076_v61  ;;  %v3206_v61 = vld [vmem:[#allocation9 + $0x88] sm:$0xf] }
 0x449   :  { %1571 = vmatpush.bf16.msra.mxu0 %v3247_v33  ;;  %1600 = vmatpush.bf16.msra.mxu1 %v3251_v45 }
 0x44a   :  { %1629 = vmatpush.bf16.msra.mxu2 %v3255_v46  ;;  %1658 = vmatpush.bf16.msra.mxu3 %v3259_v1  ;;  %v3490_v1 = vld [vmem:[#allocation9 + $0x6c] sm:$0xf0] }
 0x44d   :  { %1572 = vmatpush.bf16.msra.mxu0 %v3231_v24  ;;  %1601 = vmatpush.bf16.msra.mxu1 %v3235_v15  ;;  %v3190_v24 = vld [vmem:[#allocation9 + $0x68] sm:$0xf]  ;;  %v3166_v15 = vld [vmem:[#allocation9 + $0x40] sm:$0xf] }
 0x44e   :  { %1630 = vmatpush.bf16.msra.mxu2 %v3239_v52  ;;  %1659 = vmatpush.bf16.msra.mxu3 %v3243_v26  ;;  %v3167_v26 = vor.u32 %v3486_v55, %v3166_v15 }
 0x451   :  { %1573 = vmatpush.bf16.msra.mxu0 %v3215_v62  ;;  %1602 = vmatpush.bf16.msra.mxu1 %v3219_v5  ;;  %v3168_v62 = vld [vmem:[#allocation9 + $0x50] sm:$0xf0] }
 0x452   :  { %1631 = vmatpush.bf16.msra.mxu2 %v3223_v31  ;;  %1660 = vmatpush.bf16.msra.mxu3 %v3227_v22  ;;  %v3482_v22 = vld [vmem:[#allocation9 + $0x2c] sm:$0xf0]  ;;  %v3171_v48 = vor.u32 %v3484_v40, %v3168_v62 }
 0x455   :  { %1574 = vmatpush.bf16.msra.mxu0 %v3199_v7 }
 0x456   :  { %1661 = vmatpush.bf16.msra.mxu3 %v3211_v41 }
 0x4c4   :  { %v1086_v57 = vpop.f32.mrf.mxu0  ;;  %v1099_v58 = vpop.f32.mrf.mxu1 }
 0x4c5   :  { %v1129_v2 = vadd.f32 %v1086_v57, %v1072_v16  ;;  %v1130_v9 = vadd.f32 %v1099_v58, %v1073_v17  ;;  %v3495_v16 = vld [vmem:[#allocation9 + $0x94] sm:$0xf0]  ;;  %v3203_v17 = vor.u32 %v3492_v56, %v3200_v8  ;;  %v3175_v56 = vor.u32 %v3487_v50, %v3174_v63  ;;  %v3384_v8 = vld [vmem:[#allocation10 + $0xf8] sm:$0xf0] }
 0x4c6   :  { %v3207_v21 = vor.u32 %v3495_v16, %v3206_v61  ;;  %v3151_v16 = vor.u32 %v3482_v22, %v3150_v23 }
 0x4c7   :  { %v3126_v38 = vmul.f32 -1.442695, %v1129_v2  ;;  %v3127_v39 = vmul.f32 -1.442695, %v1130_v9  ;;  %1603 = vmatpush.bf16.msra.mxu1 %v3203_v17  ;;  %v3183_v2 = vor.u32 %v3490_v1, %v3182_v53  ;;  %v3488_v9 = vld [vmem:[#allocation9 + $0x64] sm:$0xf] }
 0x4c8   :  { %1632 = vmatpush.bf16.msra.mxu2 %v3207_v21  ;;  %v3187_v20 = vor.u32 %v3488_v9, %v3184_v10  ;;  %v3158_v17 = vld [vmem:[#allocation9 + $0x28] sm:$0xf]  ;;  %v3136_v10 = vld [vmem:[#allocation9 + $0x10] sm:$0xf0] }
 0x4c9   :  { %3659 = vpow2.f32 %v3126_v38  ;;  %1575 = vmatpush.bf16.msra.mxu0 %v3183_v2  ;;  %v3191_v38 = vor.u32 %v3491_v25, %v3190_v24 }
 0x4ca   :  { %3661 = vpow2.f32 %v3127_v39  ;;  %v3489_v39 = vld [vmem:[#allocation9 + $0x6c] sm:$0xf] }
 0x4cb   :  { %v1112_v13 = vpop.f32.mrf.mxu2  ;;  %v1125_v30 = vpop.f32.mrf.mxu3  ;;  %1604 = vmatpush.bf16.msra.mxu1 %v3187_v20  ;;  %v3479_v20 = vld [vmem:[#allocation9 + $0x14] sm:$0xf0] }
 0x4cc   :  { %v1132_v29 = vadd.f32 %v1125_v30, %v1075_v44  ;;  %v1088_v27 = vpop.f32.mrf.mxu0  ;;  %v1101_v3 = vpop.f32.mrf.mxu1  ;;  %v1131_v37 = vadd.f32 %v1112_v13, %v1074_v54  ;;  %v3192_v44 = vld [vmem:[#allocation9 + $0x78] sm:$0xf0]  ;;  %1633 = vmatpush.bf16.msra.mxu2 %v3191_v38  ;;  %v3134_v54 = vld [vmem:[#allocation9] sm:$0xf] }
 0x4cd   :  { %v3195_v49 = vor.u32 %v3489_v39, %v3192_v44  ;;  %1576 = vmatpush.bf16.msra.mxu0 %v3167_v26  ;;  %v3480_v27 = vld [vmem:[#allocation9 + $0x24] sm:$0xf]  ;;  %v3152_v3 = vld [vmem:[#allocation9 + $0x30] sm:$0xf0]  ;;  %v3477_v39 = vld [vmem:[#allocation9 + $0xc] sm:$0xf] }
 0x4ce   :  { %v3128_v33 = vmul.f32 -1.442695, %v1132_v29  ;;  %v3179_v29 = vor.u32 %v3485_v14, %v3176_v11  ;;  %v3155_v28 = vor.u32 %v3480_v27, %v3152_v3  ;;  %v3144_v44 = vld [vmem:[#allocation9 + $0x18] sm:$0xf0]  ;;  %v3376_v27 = vld [vmem:[#allocation10 + $0xf0] sm:$0xf0] }
 0x4cf   :  { %v3660_v34 = vpop.eup %3659  ;;  %1662 = vmatpush.bf16.msra.mxu3 %v3195_v49  ;;  %1605 = vmatpush.bf16.msra.mxu1 %v3171_v48  ;;  %v3147_v62 = vor.u32 %v3477_v39, %v3144_v44  ;;  %v3538_v48 = vld [vmem:[#allocation10 + $0xec] sm:$0xf0]  ;;  %v3352_v39 = vld [vmem:[#allocation10 + $0xb8] sm:$0xf0] }
 0x4d0   :  { %v3662_v42 = vpop.eup %3661  ;;  %v4440_v45 = vadd.f32 1.0, %v3660_v34  ;;  %3663 = vpow2.f32 %v3128_v33  ;;  %1634 = vmatpush.bf16.msra.mxu2 %v3175_v56  ;;  %v3481_v33 = vld [vmem:[#allocation9 + $0x2c] sm:$0xf]  ;;  %v3160_v34 = vld [vmem:[#allocation9 + $0x38] sm:$0xf0] }
 0x4d1   :  { %v4442_v46 = vadd.f32 1.0, %v3662_v42  ;;  %1577 = vmatpush.bf16.msra.mxu0 %v3151_v16  ;;  %v3159_v42 = vor.u32 %v3483_v32, %v3158_v17  ;;  %v3163_v53 = vor.u32 %v3481_v33, %v3160_v34  ;;  %v3536_v56 = vld [vmem:[#allocation10 + $0xe4] sm:$0xf]  ;;  %v3382_v16 = vld [vmem:[#allocation10 + $0xe8] sm:$0xf] }
 0x4d2   :  { %3665 = vrcp.f32 %v4440_v45  ;;  %v1146_v19 = vand.u32 2147483647, %v4440_v45  ;;  %v1148_v31 = vand.u32 2147483648, %v4440_v45  ;;  %vm1142_vm12 = vweird.f32 %v4440_v45  ;;  %v3539_v17 = vld [vmem:[#allocation10 + $0xf4] sm:$0xf0] }
 0x4d3   :  { %3667 = vrcp.f32 %v4442_v46  ;;  %v1114_v57 = vpop.f32.mrf.mxu2  ;;  %v1127_v58 = vpop.f32.mrf.mxu3  ;;  %v1167_v30 = vand.u32 2147483648, %v4442_v46  ;;  %v1165_v61 = vand.u32 2147483647, %v4442_v46  ;;  %1663 = vmatpush.bf16.msra.mxu3 %v3179_v29  ;;  %vm1161_vm11 = vweird.f32 %v4442_v46  ;;  %1606 = vmatpush.bf16.msra.mxu1 %v3155_v28  ;;  %v3358_v33 = vld [vmem:[#allocation10 + $0xc0] sm:$0xf] }
 0x4d4   :  { %vm4460_vm8 = vcmp.eq.f32.partialorder %v1146_v19, 8.507059e+37  ;;  %v3478_v57 = vld [vmem:[#allocation9 + $0xc] sm:$0xf0]  ;;  %v3476_v58 = vld [vmem:[#allocation9 + $0x4] sm:$0xf]  ;;  %1635 = vmatpush.bf16.msra.mxu2 %v3159_v42  ;;  %v4499_v3 = vor.u32 %v3536_v56, %v3376_v27 }
 0x4d5   :  { %v3135_v9 = vor.u32 %v3478_v57, %v3134_v54  ;;  %v3142_v19 = vld [vmem:[#allocation9 + $0x8] sm:$0xf]  ;;  %v1168_v25 = vor.u32 1.1754944e-38, %v1167_v30  ;;  %vm1166_vm15 = vcmp.eq.f32.partialorder %v1165_v61, 8.507059e+37  ;;  %v3139_v15 = vor.u32 %v3476_v58, %v3136_v10  ;;  %v3534_v34 = vld [vmem:[#allocation10 + $0xcc] sm:$0xf0] }
 0x4d6   :  { %v3664_v36 = vpop.eup %3663  ;;  %v3143_v49 = vor.u32 %v3479_v20, %v3142_v19  ;;  %v4513_v42 = vor.u32 %v3534_v34, %v3358_v33  ;;  %v3533_v54 = vld [vmem:[#allocation10 + $0xcc] sm:$0xf]  ;;  %v3368_v57 = vld [vmem:[#allocation10 + $0xd8] sm:$0xf0]  ;;  %v3366_v19 = vld [vmem:[#allocation10 + $0xc8] sm:$0xf] }
 0x4d7   :  { %v4447_v52 = vadd.f32 1.0, %v3664_v36  ;;  %v1149_v36 = vor.u32 1.1754944e-38, %v1148_v31  ;;  %1664 = vmatpush.bf16.msra.mxu3 %v3163_v53  ;;  %1578 = vmatpush.bf16.msra.mxu0 %v3135_v9  ;;  %v3360_v53 = vld [vmem:[#allocation10 + $0xd0] sm:$0xf0]  ;;  %v4517_v10 = vor.u32 %v3533_v54, %v3368_v57  ;;  %v3342_v20 = vld [vmem:[#allocation10 + $0xa0] sm:$0xf] }
 0x4d8   :  { %v4449_v59 = vpop.eup %3665  ;;  %1607 = vmatpush.bf16.msra.mxu1 %v3139_v15  ;;  %1636 = vmatpush.bf16.msra.mxu2 %v3143_v49  ;;  %v3535_v15 = vld [vmem:[#allocation10 + $0xd4] sm:$0xf0]  ;;  %v3326_v49 = vld [vmem:[#allocation10 + $0x80] sm:$0xf]  ;;  %v3518_v34 = vld [vmem:[#allocation10 + $0x4c] sm:$0xf0] }
 0x4d9   :  { %v4451_v4 = vpop.eup %3667  ;;  %v1138_v5 = vmul.f32 %v4449_v59, %v4440_v45  ;;  %3669 = vrcp.f32 %v4447_v52  ;;  %vm1143_vm9 = vweird.f32 %v4449_v59  ;;  %vm1181_vm1 = vweird.f32 %v4447_v52  ;;  %v3294_v33 = vld [vmem:[#allocation10 + $0x40] sm:$0xf]  ;;  %v3296_v54 = vld [vmem:[#allocation10 + $0x50] sm:$0xf0]  ;;  %v3517_v57 = vld [vmem:[#allocation10 + $0x4c] sm:$0xf] }
 0x4da   :  { %v1157_v13 = vmul.f32 %v4451_v4, %v4442_v46  ;;  %3671 = vtanh.f32 %v1131_v37  ;;  %vm1162_vm10 = vweird.f32 %v4451_v4  ;;  %vm1144_vm13 = vmor %vm1142_vm12, %vm1143_vm9  ;;  %v1185_v11 = vand.u32 2147483647, %v4447_v52 }
 0x4db   :  { %v1139_v0 = vsub.f32 1.0, %v1138_v5  ;;  %vm1163_vm14 = vmor %vm1161_vm11, %vm1162_vm10  ;;  %1665 = vmatpush.bf16.msra.mxu3 %v3147_v62  ;;  %v4530_v62 = vor.u32 %v3535_v15, %v3366_v19  ;;  %v4563_v19 = vor.u32 %v3518_v34, %v3294_v33  ;;  %v3514_v15 = vld [vmem:[#allocation10 + $0x2c] sm:$0xf0]  ;;  %v3262_v34 = vld [vmem:[#allocation10] sm:$0xf] }
 0x4dc   :  { %v1158_v7 = vsub.f32 1.0, %v1157_v13  ;;  %vm1186_vm3 = vcmp.eq.f32.partialorder %v1185_v11, 8.507059e+37 }
 0x4dd   :  { %v1140_v21 = vmul.f32 %v4449_v59, %v1139_v0  ;;  %v1398_v0 = vpack.c.bf16 %v4276_v51, %v4236_v43  ;;  %v1400_v43 = vpack.c.bf16 %v4436_v12, %v4396_v35  ;;  %v3537_v51 = vld [vmem:[#allocation10 + $0xec] sm:$0xf] }
 0x4de   :  { %v1159_v41 = vmul.f32 %v4451_v4, %v1158_v7  ;;  %v1399_v7 = vpack.c.bf16 %v4356_v6, %v4316_v60  ;;  %v4507_v61 = vor.u32 %v3537_v51, %v3384_v8  ;;  %v1199_v60 = vld [vmem:[#allocation4 + $0xe0] sm:$0xff]  ;;  %v1200_v6 = vld [vmem:[#allocation4 + $0xe8] sm:$0xff]  ;;  %v3320_v8 = vld [vmem:[#allocation10 + $0x78] sm:$0xf0] }
 0x4df   :  { %v3670_v1 = vpop.eup %3669  ;;  %v1141_v2 = vadd.f32 %v4449_v59, %v1140_v21  ;;  %v4510_v21 = vor.u32 %v3539_v17, %v3382_v16  ;;  %v3334_v16 = vld [vmem:[#allocation10 + $0x88] sm:$0xf]  ;;  %v3527_v17 = vld [vmem:[#allocation10 + $0x94] sm:$0xf0] }
 0x4e0   :  { %v3672_v24 = vpop.eup %3671  ;;  %v1160_v37 = vadd.f32 %v4451_v4, %v1159_v41  ;;  %v1177_v38 = vmul.f32 %v3670_v1, %v4447_v52  ;;  %vm1182_vm0 = vweird.f32 %v3670_v1  ;;  %v3532_v41 = vld [vmem:[#allocation10 + $0xc4] sm:$0xf] }
 0x4e1   :  { %v1145_v45 = vsel %vm1144_vm13, %v4449_v59, %v1141_v2  ;;  %vm1183_vm2 = vmor %vm1181_vm1, %vm1182_vm0  ;;  %v1202_v2 = vld [vmem:[#allocation4 + $0xf8] sm:$0xff]  ;;  %v4515_v9 = vor.u32 %v3532_v41, %v3360_v53  ;;  %v4559_v41 = vor.u32 %v3527_v17, %v3334_v16  ;;  %v3516_v53 = vld [vmem:[#allocation10 + $0x44] sm:$0xf] }
 0x4e2   :  { %v1150_v55 = vsel %vm4460_vm8, %v1149_v36, %v1145_v45  ;;  %v1164_v40 = vsel %vm1163_vm14, %v4451_v4, %v1160_v37  ;;  %v1178_v26 = vsub.f32 1.0, %v1177_v38  ;;  %v1187_v4 = vand.u32 2147483648, %v4447_v52  ;;  %v3374_v52 = vld [vmem:[#allocation10 + $0xe0] sm:$0xf]  ;;  %v3344_v37 = vld [vmem:[#allocation10 + $0xb0] sm:$0xf0] }
 0x4e3   :  { %v1169_v63 = vsel %vm1166_vm15, %v1168_v25, %v1164_v40  ;;  %v1192_v50 = vmul.f32 %v3672_v24, %v1150_v55  ;;  %v4497_v29 = vor.u32 %v3538_v48, %v3374_v52  ;;  %v3530_v24 = vld [vmem:[#allocation10 + $0xac] sm:$0xf0]  ;;  %v3528_v25 = vld [vmem:[#allocation10 + $0xa4] sm:$0xf]  ;;  %v3529_v38 = vld [vmem:[#allocation10 + $0xac] sm:$0xf] }
 0x4e4   :  { %v1191_v46 = vmul.f32 %v1169_v63, %v4433_v18  ;;  %v1179_v5 = vmul.f32 %v3670_v1, %v1178_v26  ;;  %v1188_v13 = vor.u32 1.1754944e-38, %v1187_v4  ;;  %v4522_v36 = vor.u32 %v3530_v24, %v3342_v20  ;;  %v3526_v55 = vld [vmem:[#allocation10 + $0x8c] sm:$0xf0]  ;;  %v3524_v63 = vld [vmem:[#allocation10 + $0x84] sm:$0xf] }
 0x4e5   :  { %v4524_v44 = vor.u32 %v3528_v25, %v3344_v37  ;;  %v4526_v45 = vor.u32 %v3529_v38, %v3352_v39  ;;  %v4533_v11 = vor.u32 %v3526_v55, %v3326_v49  ;;  %v3522_v52 = vld [vmem:[#allocation10 + $0x6c] sm:$0xf0]  ;;  %v3520_v48 = vld [vmem:[#allocation10 + $0x64] sm:$0xf]  ;;  %v3318_v20 = vld [vmem:[#allocation10 + $0x68] sm:$0xf]  ;;  %v4567_v37 = vor.u32 %v3516_v53, %v3296_v54 }
 0x4e6   :  { %v4485_v59 = vadd.f32 %v1192_v50, %v1191_v46  ;;  %v1180_v14 = vadd.f32 %v3670_v1, %v1179_v5  ;;  %v3328_v50 = vld [vmem:[#allocation10 + $0x90] sm:$0xf0]  ;;  %v3525_v46 = vld [vmem:[#allocation10 + $0x8c] sm:$0xf]  ;;  %v3523_v24 = vld [vmem:[#allocation10 + $0x74] sm:$0xf0] }
 0x4e7   :  { %v1201_v25 = vld [vmem:[#allocation4 + $0xf0] sm:$0xff]  ;;  %v3278_v39 = vld [vmem:[#allocation10 + $0x20] sm:$0xf]  ;;  %v4572_v55 = vor.u32 %v3523_v24, %v3318_v20  ;;  %v3286_v16 = vld [vmem:[#allocation10 + $0x28] sm:$0xf] }
 0x4e8   :  { %3673 = vtanh.f32 %v4485_v59  ;;  %v1184_v23 = vsel %vm1183_vm2, %v3670_v1, %v1180_v14  ;;  %v3515_v17 = vld [vmem:[#allocation10 + $0x34] sm:$0xf0]  ;;  %v3510_v53 = vld [vmem:[#allocation10 + $0xc] sm:$0xf0] }
 0x4e9   :  { %v1189_v30 = vsel %vm1186_vm3, %v1188_v13, %v1184_v23  ;;  %v3336_v23 = vld [vmem:[#allocation10 + $0x98] sm:$0xf0]  ;;  %v3350_v13 = vld [vmem:[#allocation10 + $0xa8] sm:$0xf]  ;;  %v4610_v20 = vor.u32 %v3510_v53, %v3262_v34 }
 0x4ee   :  { %v3674_v18 = vpop.eup %3673 }
 0x4ef   :  { %v4491_v31 = vmul.f32 %v3674_v18, %v1189_v30  ;;  %v3531_v18 = vld [vmem:[#allocation10 + $0xb4] sm:$0xf0]  ;;  %v4537_v30 = vor.u32 %v3524_v63, %v3328_v50  ;;  %v3280_v63 = vld [vmem:[#allocation10 + $0x30] sm:$0xf0] }
 0x4f0   :  { %v4542_v27 = vor.u32 %v3531_v18, %v3350_v13  ;;  %v3513_v13 = vld [vmem:[#allocation10 + $0x2c] sm:$0xf]  ;;  %v3288_v18 = vld [vmem:[#allocation10 + $0x38] sm:$0xf0] }
 0x4f1   :  { %v1203_v22 = vpack.c.bf16 %v4491_v31, %v4491_v31 }
 0x4f3   :  { %1212 = vmatmul.bf16.vlgmr.msrb.gmra.mxu0 %v1203_v22  ;;  %1225 = vmatmul.bf16.vlgmr.msrb.gmra.mxu1 %v1203_v22 }
 0x4f4   :  { %1238 = vmatmul.bf16.vlgmr.msrb.gmra.mxu2 %v1203_v22  ;;  %1251 = vmatmul.bf16.vlgmr.msrb.gmra.mxu3 %v1203_v22  ;;  %v4539_v22 = vor.u32 %v3525_v46, %v3336_v23  ;;  %v3302_v46 = vld [vmem:[#allocation10 + $0x48] sm:$0xf]  ;;  %v4580_v23 = vor.u32 %v3514_v15, %v3278_v39  ;;  %v3509_v39 = vld [vmem:[#allocation10 + $0xc] sm:$0xf] }
 0x4f5   :  { %1883 = vmatpush.bf16.msrb.mxu0 %v4497_v29  ;;  %1896 = vmatpush.bf16.msrb.mxu1 %v4499_v3 }
 0x4f6   :  { %1922 = vmatpush.bf16.msrb.mxu3 %v4507_v61  ;;  %1909 = vmatpush.bf16.msrb.mxu2 %v4510_v21 }
 0x4f9   :  { %1884 = vmatpush.bf16.msrb.mxu0 %v4513_v42  ;;  %1897 = vmatpush.bf16.msrb.mxu1 %v4515_v9 }
 0x4fa   :  { %1923 = vmatpush.bf16.msrb.mxu3 %v4517_v10  ;;  %1910 = vmatpush.bf16.msrb.mxu2 %v4530_v62 }
 0x4fd   :  { %1885 = vmatpush.bf16.msrb.mxu0 %v4522_v36  ;;  %1898 = vmatpush.bf16.msrb.mxu1 %v4524_v44 }
 0x4fe   :  { %1924 = vmatpush.bf16.msrb.mxu3 %v4526_v45  ;;  %1911 = vmatpush.bf16.msrb.mxu2 %v4542_v27 }
 0x501   :  { %1886 = vmatpush.bf16.msrb.mxu0 %v4533_v11  ;;  %1899 = vmatpush.bf16.msrb.mxu1 %v4537_v30 }
 0x502   :  { %1925 = vmatpush.bf16.msrb.mxu3 %v4539_v22  ;;  %1912 = vmatpush.bf16.msrb.mxu2 %v4559_v41 }
 0x503   :  { %1579 = vmatmul.bf16.vlgmr.msra.gmra.mxu0 %v1398_v0  ;;  %1608 = vmatmul.bf16.vlgmr.msra.gmra.mxu1 %v1398_v0 }
 0x504   :  { %1637 = vmatmul.bf16.vlgmr.msra.gmra.mxu2 %v1398_v0  ;;  %1666 = vmatmul.bf16.vlgmr.msra.gmra.mxu3 %v1398_v0  ;;  %v3310_v0 = vld [vmem:[#allocation10 + $0x60] sm:$0xf] }
 0x506   :  { %1913 = vmatpush.bf16.msrb.mxu2 %v4572_v55 }
 0x513   :  { %1584 = vmatmul.bf16.gmra.mxu0 %v1399_v7  ;;  %1613 = vmatmul.bf16.gmra.mxu1 %v1399_v7 }
 0x514   :  { %1642 = vmatmul.bf16.gmra.mxu2 %v1399_v7  ;;  %1671 = vmatmul.bf16.gmra.mxu3 %v1399_v7  ;;  %v3312_v7 = vld [vmem:[#allocation10 + $0x70] sm:$0xf0] }
 0x523   :  { %1589 = vmatmul.bf16.gmra.mxu0 %v1400_v43  ;;  %1618 = vmatmul.bf16.gmra.mxu1 %v1400_v43 }
 0x524   :  { %1647 = vmatmul.bf16.gmra.mxu2 %v1400_v43  ;;  %1676 = vmatmul.bf16.gmra.mxu3 %v1400_v43  ;;  %v3521_v43 = vld [vmem:[#allocation10 + $0x6c] sm:$0xf] }
 0x570   :  { %v1213_v28 = vpop.f32.mrf.mxu0  ;;  %v1226_v32 = vpop.f32.mrf.mxu1 }
 0x571   :  { %v1256_v35 = vadd.f32 %v1213_v28, %v1199_v60  ;;  %v1257_v12 = vadd.f32 %v1226_v32, %v1200_v6  ;;  %v4547_v28 = vor.u32 %v3522_v52, %v3310_v0 }
 0x573   :  { %v3129_v58 = vmul.f32 -1.442695, %v1256_v35  ;;  %v3130_v1 = vmul.f32 -1.442695, %v1257_v12  ;;  %v4553_v35 = vor.u32 %v3520_v48, %v3312_v7  ;;  %v4555_v12 = vor.u32 %v3521_v43, %v3320_v8  ;;  %1887 = vmatpush.bf16.msrb.mxu0 %v4547_v28 }
 0x574   :  { %v4598_v8 = vor.u32 %v3513_v13, %v3288_v18 }
 0x575   :  { %3675 = vpow2.f32 %v3129_v58  ;;  %1900 = vmatpush.bf16.msrb.mxu1 %v4553_v35  ;;  %1926 = vmatpush.bf16.msrb.mxu3 %v4555_v12 }
 0x576   :  { %3677 = vpow2.f32 %v3130_v1 }
 0x577   :  { %v4528_v40 = vpop.f32.mrf.mxu2  ;;  %v1252_v26 = vpop.f32.mrf.mxu3  ;;  %1888 = vmatpush.bf16.msrb.mxu0 %v4563_v19 }
 0x578   :  { %v1259_v5 = vadd.f32 %v1252_v26, %v1202_v2  ;;  %v1215_v14 = vpop.f32.mrf.mxu0  ;;  %v1228_v4 = vpop.f32.mrf.mxu1  ;;  %v3304_v2 = vld [vmem:[#allocation10 + $0x58] sm:$0xf0]  ;;  %v3512_v26 = vld [vmem:[#allocation10 + $0x24] sm:$0xf] }
 0x579   :  { %v4569_v38 = vor.u32 %v3517_v57, %v3304_v2  ;;  %v1258_v4 = vadd.f32 %v4528_v40, %v1201_v25  ;;  %1901 = vmatpush.bf16.msrb.mxu1 %v4567_v37  ;;  %v4589_v48 = vor.u32 %v3512_v26, %v3280_v63  ;;  %v4614_v25 = vor.u32 %v3515_v17, %v3286_v16  ;;  %v3270_v26 = vld [vmem:[#allocation10 + $0x8] sm:$0xf]  ;;  %v3511_v63 = vld [vmem:[#allocation10 + $0x14] sm:$0xf0] }
 0x57a   :  { %v3131_v56 = vmul.f32 -1.442695, %v1259_v5  ;;  %v3519_v5 = vld [vmem:[#allocation10 + $0x54] sm:$0xf0]  ;;  %v4633_v16 = vor.u32 %v3511_v63, %v3270_v26 }
 0x57b   :  { %v3676_v51 = vpop.eup %3675  ;;  %1927 = vmatpush.bf16.msrb.mxu3 %v4569_v38  ;;  %v4595_v7 = vor.u32 %v3519_v5, %v3302_v46  ;;  %1889 = vmatpush.bf16.msrb.mxu0 %v4580_v23  ;;  %v3272_v46 = vld [vmem:[#allocation10 + $0x18] sm:$0xf0] }
 0x57c   :  { %v3678_v60 = vpop.eup %3677  ;;  %v4544_v6 = vadd.f32 1.0, %v3676_v51  ;;  %3679 = vpow2.f32 %v3131_v56  ;;  %v4624_v18 = vor.u32 %v3509_v39, %v3272_v46 }
 0x57d   :  { %v4549_v32 = vadd.f32 1.0, %v3678_v60  ;;  %1902 = vmatpush.bf16.msrb.mxu1 %v4589_v48  ;;  %1914 = vmatpush.bf16.msrb.mxu2 %v4595_v7 }
 0x57e   :  { %3681 = vrcp.f32 %v4544_v6  ;;  %v1273_v56 = vand.u32 2147483647, %v4544_v6  ;;  %v1275_v51 = vand.u32 2147483648, %v4544_v6  ;;  %vm1269_vm7 = vweird.f32 %v4544_v6 }
 0x57f   :  { %3683 = vrcp.f32 %v4549_v32  ;;  %v1241_v58 = vpop.f32.mrf.mxu2  ;;  %v1254_v1 = vpop.f32.mrf.mxu3  ;;  %v1294_v33 = vand.u32 2147483648, %v4549_v32  ;;  %v1292_v57 = vand.u32 2147483647, %v4549_v32  ;;  %1928 = vmatpush.bf16.msrb.mxu3 %v4598_v8  ;;  %vm1288_vm6 = vweird.f32 %v4549_v32  ;;  %1890 = vmatpush.bf16.msrb.mxu0 %v4610_v20 }
 0x580   :  { %v3508_v58 = vld [vmem:[#allocation10 + $0x4] sm:$0xf]  ;;  %v3264_v1 = vld [vmem:[#allocation10 + $0x10] sm:$0xf0]  ;;  %v1276_v5 = vor.u32 1.1754944e-38, %v1275_v51  ;;  %vm1274_vm10 = vcmp.eq.f32.partialorder %v1273_v56, 8.507059e+37 }
 0x581   :  { %v4612_v24 = vor.u32 %v3508_v58, %v3264_v1  ;;  %vm1293_vm11 = vcmp.eq.f32.partialorder %v1292_v57, 8.507059e+37  ;;  %1915 = vmatpush.bf16.msrb.mxu2 %v4614_v25 }
 0x582   :  { %v3680_v49 = vpop.eup %3679 }
 0x583   :  { %v4574_v50 = vadd.f32 1.0, %v3680_v49  ;;  %1903 = vmatpush.bf16.msrb.mxu1 %v4612_v24  ;;  %2008 = vmatpush.bf16.msra.mxu0 %v4497_v29 }
 0x584   :  { %v4576_v14 = vpop.eup %3681  ;;  %1929 = vmatpush.bf16.msrb.mxu3 %v4624_v18 }
 0x585   :  { %v4582_v0 = vpop.eup %3683  ;;  %v1265_v52 = vmul.f32 %v4576_v14, %v4544_v6  ;;  %3685 = vrcp.f32 %v4574_v50  ;;  %vm1270_vm5 = vweird.f32 %v4576_v14  ;;  %1916 = vmatpush.bf16.msrb.mxu2 %v4633_v16  ;;  %v1314_v34 = vand.u32 2147483648, %v4574_v50 }
 0x586   :  { %v1284_v40 = vmul.f32 %v4582_v0, %v4549_v32  ;;  %3687 = vtanh.f32 %v1258_v4  ;;  %vm1289_vm4 = vweird.f32 %v4582_v0  ;;  %vm1271_vm8 = vmor %vm1269_vm7, %vm1270_vm5  ;;  %v1295_v32 = vor.u32 1.1754944e-38, %v1294_v33 }
 0x587   :  { %v1266_v43 = vsub.f32 1.0, %v1265_v52  ;;  %vm1290_vm9 = vmor %vm1288_vm6, %vm1289_vm4  ;;  %2021 = vmatpush.bf16.msra.mxu1 %v4499_v3  ;;  %2009 = vmatpush.bf16.msra.mxu0 %v4513_v42  ;;  %vm1308_vm13 = vweird.f32 %v4574_v50  ;;  %v1667_v39 = vpop.f32.mrf.mxu3 }
 0x588   :  { %v1285_v60 = vsub.f32 1.0, %v1284_v40  ;;  %2047 = vmatpush.bf16.msra.mxu3 %v4507_v61 }
 0x589   :  { %v1267_v54 = vmul.f32 %v4576_v14, %v1266_v43  ;;  %2034 = vmatpush.bf16.msra.mxu2 %v4510_v21 }
 0x58a   :  { %v1286_v2 = vmul.f32 %v4582_v0, %v1285_v60 }
 0x58b   :  { %v3686_v15 = vpop.eup %3685  ;;  %v1268_v49 = vadd.f32 %v4576_v14, %v1267_v54  ;;  %2022 = vmatpush.bf16.msra.mxu1 %v4515_v9  ;;  %2010 = vmatpush.bf16.msra.mxu0 %v4522_v36  ;;  %v1315_v54 = vor.u32 1.1754944e-38, %v1314_v34 }
 0x58c   :  { %v1287_v4 = vadd.f32 %v4582_v0, %v1286_v2  ;;  %v1304_v13 = vmul.f32 %v3686_v15, %v4574_v50  ;;  %v3688_v52 = vpop.eup %3687  ;;  %vm1309_vm12 = vweird.f32 %v3686_v15  ;;  %2048 = vmatpush.bf16.msra.mxu3 %v4517_v10  ;;  %v1638_v2 = vpop.f32.mrf.mxu2 }
 0x58d   :  { %v1272_v6 = vsel %vm1271_vm8, %v4576_v14, %v1268_v49  ;;  %vm1310_vm14 = vmor %vm1308_vm13, %vm1309_vm12  ;;  %2035 = vmatpush.bf16.msra.mxu2 %v4530_v62 }
 0x58e   :  { %v1277_v40 = vsel %vm1274_vm10, %v1276_v5, %v1272_v6  ;;  %v1291_v43 = vsel %vm1290_vm9, %v4582_v0, %v1287_v4  ;;  %v1305_v51 = vsub.f32 1.0, %v1304_v13 }
 0x58f   :  { %v1296_v17 = vsel %vm1293_vm11, %v1295_v32, %v1291_v43  ;;  %v1319_v60 = vmul.f32 %v3688_v52, %v1277_v40  ;;  %2023 = vmatpush.bf16.msra.mxu1 %v4524_v44  ;;  %2011 = vmatpush.bf16.msra.mxu0 %v4533_v11  ;;  %v4715_v63 = vpop.f32.mrf.mxu3 }
 0x590   :  { %v1318_v14 = vmul.f32 %v1296_v17, %v4485_v59  ;;  %v1306_v56 = vmul.f32 %v3686_v15, %v1305_v51  ;;  %v1312_v59 = vand.u32 2147483647, %v4574_v50  ;;  %2049 = vmatpush.bf16.msra.mxu3 %v4526_v45 }
 0x591   :  { %2036 = vmatpush.bf16.msra.mxu2 %v4542_v27 }
 0x592   :  { %v1320_v33 = vadd.f32 %v1319_v60, %v1318_v14  ;;  %v1307_v0 = vadd.f32 %v3686_v15, %v1306_v56  ;;  %vm1313_vm15 = vcmp.eq.f32.partialorder %v1312_v59, 8.507059e+37 }
 0x593   :  { %2024 = vmatpush.bf16.msra.mxu1 %v4537_v30  ;;  %2012 = vmatpush.bf16.msra.mxu0 %v4547_v28 }
 0x594   :  { %3689 = vtanh.f32 %v1320_v33  ;;  %v1311_v53 = vsel %vm1310_vm14, %v3686_v15, %v1307_v0  ;;  %2050 = vmatpush.bf16.msra.mxu3 %v4539_v22  ;;  %v4713_v26 = vpop.f32.mrf.mxu2 }
 0x595   :  { %v1316_v58 = vsel %vm1313_vm15, %v1315_v54, %v1311_v53  ;;  %2037 = vmatpush.bf16.msra.mxu2 %v4559_v41  ;;  %5039 = vst [vmem:[#allocation21_spill] sm:$0xff] %v4713_v26 }
 0x597   :  { %2025 = vmatpush.bf16.msra.mxu1 %v4553_v35  ;;  %2013 = vmatpush.bf16.msra.mxu0 %v4563_v19  ;;  %v4723_v13 = vpop.f32.mrf.mxu3 }
 0x598   :  { %2051 = vmatpush.bf16.msra.mxu3 %v4555_v12  ;;  %5043 = vst [vmem:[#allocation25_spill] sm:$0xff] %v4723_v13 }
 0x599   :  { %2038 = vmatpush.bf16.msra.mxu2 %v4572_v55 }
 0x59a   :  { %v3690_v57 = vpop.eup %3689 }
 0x59b   :  { %v1322_v1 = vmul.f32 %v3690_v57, %v1316_v58  ;;  %2026 = vmatpush.bf16.msra.mxu1 %v4567_v37  ;;  %2014 = vmatpush.bf16.msra.mxu0 %v4580_v23  ;;  %v1389_v57 = vld [vmem:[#allocation12] sm:$0xf] }
 0x59c   :  { %2052 = vmatpush.bf16.msra.mxu3 %v4569_v38  ;;  %v4721_v4 = vpop.f32.mrf.mxu2 }
 0x59d   :  { %v1401_v50 = vpack.c.bf16 %v1322_v1, %v4491_v31  ;;  %2039 = vmatpush.bf16.msra.mxu2 %v4595_v7  ;;  %v1609_v31 = vpop.f32.mrf.mxu1  ;;  %5042 = vst [vmem:[#allocation24_spill] sm:$0xff] %v4721_v4 }
 0x59f   :  { %1594 = vmatmul.bf16.gmra.mxu0 %v1401_v50  ;;  %1623 = vmatmul.bf16.gmra.mxu1 %v1401_v50  ;;  %v4731_v40 = vpop.f32.mrf.mxu3 }
 0x5a0   :  { %1652 = vmatmul.bf16.gmra.mxu2 %v1401_v50  ;;  %1681 = vmatmul.bf16.gmra.mxu3 %v1401_v50  ;;  %5047 = vst [vmem:[#allocation29_spill] sm:$0xff] %v4731_v40  ;;  %v4761_v50 = vperm.slane %v1389_v57, 0 }
 0x5a1   :  { %2027 = vmatpush.bf16.msra.mxu1 %v4589_v48  ;;  %2053 = vmatpush.bf16.msra.mxu3 %v4598_v8 }
 0x5a2   :  { %2015 = vmatpush.bf16.msra.mxu0 %v4610_v20  ;;  %2040 = vmatpush.bf16.msra.mxu2 %v4614_v25 }
 0x5a4   :  { %v4729_v52 = vpop.f32.mrf.mxu2 }
 0x5a5   :  { %2028 = vmatpush.bf16.msra.mxu1 %v4612_v24  ;;  %2054 = vmatpush.bf16.msra.mxu3 %v4624_v18  ;;  %v4711_v49 = vpop.f32.mrf.mxu1  ;;  %5046 = vst [vmem:[#allocation28_spill] sm:$0xff] %v4729_v52 }
 0x5a6   :  { %2041 = vmatpush.bf16.msra.mxu2 %v4633_v16 }
 0x5a7   :  { %v4739_v60 = vpop.f32.mrf.mxu3 }
 0x5a8   :  { %5051 = vst [vmem:[#allocation33_spill] sm:$0xff] %v4739_v60  ;;  %v4771_v60 = vperm.slane %v1389_v57, 3 }
 0x5ac   :  { %v4737_v17 = vpop.f32.mrf.mxu2 }
 0x5ad   :  { %v4719_v5 = vpop.f32.mrf.mxu1  ;;  %5050 = vst [vmem:[#allocation32_spill] sm:$0xff] %v4737_v17 }
 0x5ae   :  { %5041 = vst [vmem:[#allocation23_spill] sm:$0xff] %v4719_v5 }
 0x5af   :  { %1891 = vmatmul.bf16.vlgmr.msrb.gmra.mxu0 %v4009_v47  ;;  %1904 = vmatmul.bf16.vlgmr.msrb.gmra.mxu1 %v4009_v47  ;;  %v4747_v0 = vpop.f32.mrf.mxu3 }
 0x5b0   :  { %1917 = vmatmul.bf16.vlgmr.msrb.gmra.mxu2 %v4009_v47  ;;  %1930 = vmatmul.bf16.vlgmr.msrb.gmra.mxu3 %v4009_v47  ;;  %v1580_v47 = vpop.f32.mrf.mxu0  ;;  %5055 = vst [vmem:[#allocation37_spill] sm:$0xff] %v4747_v0 }
 0x5b1   :  { %2133 = vmatpush.bf16.msrb.mxu0 %v4497_v29  ;;  %2146 = vmatpush.bf16.msrb.mxu1 %v4499_v3 }
 0x5b2   :  { %2159 = vmatpush.bf16.msrb.mxu2 %v4510_v21  ;;  %2172 = vmatpush.bf16.msrb.mxu3 %v4507_v61 }
 0x5b4   :  { %v4745_v33 = vpop.f32.mrf.mxu2 }
 0x5b5   :  { %2134 = vmatpush.bf16.msrb.mxu0 %v4513_v42  ;;  %2147 = vmatpush.bf16.msrb.mxu1 %v4515_v9  ;;  %v4727_v6 = vpop.f32.mrf.mxu1  ;;  %5054 = vst [vmem:[#allocation36_spill] sm:$0xff] %v4745_v33  ;;  %v1581_v33 = vadd.f32 %v1580_v47, %v4761_v50 }
 0x5b6   :  { %2160 = vmatpush.bf16.msrb.mxu2 %v4530_v62  ;;  %2173 = vmatpush.bf16.msrb.mxu3 %v4517_v10  ;;  %5045 = vst [vmem:[#allocation27_spill] sm:$0xff] %v4727_v6 }
 0x5b8   :  { %v4709_v15 = vpop.f32.mrf.mxu0 }
 0x5b9   :  { %2135 = vmatpush.bf16.msrb.mxu0 %v4522_v36  ;;  %2148 = vmatpush.bf16.msrb.mxu1 %v4524_v44 }
 0x5ba   :  { %2161 = vmatpush.bf16.msrb.mxu2 %v4542_v27  ;;  %2174 = vmatpush.bf16.msrb.mxu3 %v4526_v45 }
 0x5bd   :  { %2136 = vmatpush.bf16.msrb.mxu0 %v4533_v11  ;;  %2149 = vmatpush.bf16.msrb.mxu1 %v4537_v30  ;;  %v4735_v51 = vpop.f32.mrf.mxu1 }
 0x5be   :  { %2162 = vmatpush.bf16.msrb.mxu2 %v4559_v41  ;;  %2175 = vmatpush.bf16.msrb.mxu3 %v4539_v22  ;;  %5049 = vst [vmem:[#allocation31_spill] sm:$0xff] %v4735_v51  ;;  %v1668_v51 = vadd.f32 %v1667_v39, %v4771_v60 }
 0x5c0   :  { %v4717_v46 = vpop.f32.mrf.mxu0 }
 0x5c1   :  { %2137 = vmatpush.bf16.msrb.mxu0 %v4547_v28  ;;  %2150 = vmatpush.bf16.msrb.mxu1 %v4553_v35  ;;  %5040 = vst [vmem:[#allocation22_spill] sm:$0xff] %v4717_v46 }
 0x5c2   :  { %2163 = vmatpush.bf16.msrb.mxu2 %v4572_v55  ;;  %2176 = vmatpush.bf16.msrb.mxu3 %v4555_v12 }
 0x5c5   :  { %2138 = vmatpush.bf16.msrb.mxu0 %v4563_v19  ;;  %2151 = vmatpush.bf16.msrb.mxu1 %v4567_v37  ;;  %v4743_v56 = vpop.f32.mrf.mxu1 }
 0x5c6   :  { %2164 = vmatpush.bf16.msrb.mxu2 %v4595_v7  ;;  %2177 = vmatpush.bf16.msrb.mxu3 %v4569_v38  ;;  %5053 = vst [vmem:[#allocation35_spill] sm:$0xff] %v4743_v56  ;;  %v4763_v56 = vperm.slane %v1389_v57, 1 }
 0x5c8   :  { %v4725_v32 = vpop.f32.mrf.mxu0  ;;  %v1610_v0 = vadd.f32 %v1609_v31, %v4763_v56 }
 0x5c9   :  { %2139 = vmatpush.bf16.msrb.mxu0 %v4580_v23  ;;  %2152 = vmatpush.bf16.msrb.mxu1 %v4589_v48  ;;  %5044 = vst [vmem:[#allocation26_spill] sm:$0xff] %v4725_v32 }
 0x5ca   :  { %2165 = vmatpush.bf16.msrb.mxu2 %v4614_v25  ;;  %2178 = vmatpush.bf16.msrb.mxu3 %v4598_v8 }
 0x5cd   :  { %2140 = vmatpush.bf16.msrb.mxu0 %v4610_v20  ;;  %2153 = vmatpush.bf16.msrb.mxu1 %v4612_v24 }
 0x5ce   :  { %2166 = vmatpush.bf16.msrb.mxu2 %v4633_v16  ;;  %2179 = vmatpush.bf16.msrb.mxu3 %v4624_v18 }
 0x5d0   :  { %v4733_v43 = vpop.f32.mrf.mxu0 }
 0x5d1   :  { %5048 = vst [vmem:[#allocation30_spill] sm:$0xff] %v4733_v43 }
 0x5d8   :  { %v4741_v14 = vpop.f32.mrf.mxu0 }
 0x5d9   :  { %5052 = vst [vmem:[#allocation34_spill] sm:$0xff] %v4741_v14 }
 0x61c   :  { %v4749_v34 = vpop.f32.mrf.mxu0  ;;  %v4751_v59 = vpop.f32.mrf.mxu1 }
 0x61d   :  { %5056 = vst [vmem:[#allocation38_spill] sm:$0xff] %v4749_v34 }
 0x61e   :  { %5057 = vst [vmem:[#allocation39_spill] sm:$0xff] %v4751_v59 }
 0x623   :  { %v4753_v53 = vpop.f32.mrf.mxu2  ;;  %v4755_v54 = vpop.f32.mrf.mxu3 }
 0x624   :  { %5058 = vst [vmem:[#allocation40_spill] sm:$0xff] %v4753_v53  ;;  %v4757_v58 = vpop.f32.mrf.mxu0  ;;  %v4759_v1 = vpop.f32.mrf.mxu1 }
 0x625   :  { %5059 = vst [vmem:[#allocation41_spill] sm:$0xff] %v4755_v54 }
 0x626   :  { %5060 = vst [vmem:[#allocation42_spill] sm:$0xff] %v4757_v58 }
 0x627   :  { %5061 = vst [vmem:[#allocation43_spill] sm:$0xff] %v4759_v1 }
 0x62b   :  { %v4767_v34 = vpop.f32.mrf.mxu2  ;;  %v4769_v59 = vpop.f32.mrf.mxu3 }
 0x62c   :  { %5062 = vst [vmem:[#allocation44_spill] sm:$0xff] %v4767_v34  ;;  %v1892_v53 = vpop.f32.mrf.mxu0  ;;  %v1905_v14 = vpop.f32.mrf.mxu1 }
 0x62d   :  { %5063 = vst [vmem:[#allocation45_spill] sm:$0xff] %v4769_v59  ;;  %v1935_v54 = vadd.f32 %v1892_v53, %v1581_v33  ;;  %v1936_v17 = vadd.f32 %v1905_v14, %v1610_v0  ;;  %v4774_v14 = vperm.slane %v1389_v57, 2 }
 0x62f   :  { %v3388_v58 = vmul.f32 -1.442695, %v1935_v54  ;;  %v3389_v1 = vmul.f32 -1.442695, %v1936_v17  ;;  %5064 = vst [vmem:[#allocation46_spill] sm:$0xff] %v4774_v14  ;;  %v1639_v39 = vadd.f32 %v1638_v2, %v4774_v14 }
 0x631   :  { %3691 = vpow2.f32 %v3388_v58 }
 0x632   :  { %3693 = vpow2.f32 %v3389_v1 }
 0x633   :  { %v1918_v43 = vpop.f32.mrf.mxu2  ;;  %v1931_v47 = vpop.f32.mrf.mxu3 }
 0x634   :  { %v1938_v52 = vadd.f32 %v1931_v47, %v1668_v51  ;;  %v1894_v31 = vpop.f32.mrf.mxu0  ;;  %v1907_v40 = vpop.f32.mrf.mxu1  ;;  %v1937_v51 = vadd.f32 %v1918_v43, %v1639_v39 }
 0x636   :  { %v3390_v34 = vmul.f32 -1.442695, %v1938_v52 }
 0x637   :  { %v3692_v6 = vpop.eup %3691 }
 0x638   :  { %v3694_v59 = vpop.eup %3693  ;;  %v1942_v32 = vadd.f32 1.0, %v3692_v6  ;;  %3695 = vpow2.f32 %v3390_v34 }
 0x639   :  { %v1961_v33 = vadd.f32 1.0, %v3694_v59 }
 0x63a   :  { %3697 = vrcp.f32 %v1942_v32  ;;  %v1954_v34 = vand.u32 2147483648, %v1942_v32  ;;  %v1952_v31 = vand.u32 2147483647, %v1942_v32  ;;  %vm1948_vm2 = vweird.f32 %v1942_v32 }
 0x63b   :  { %3699 = vrcp.f32 %v1961_v33  ;;  %v1933_v17 = vpop.f32.mrf.mxu3  ;;  %v1920_v0 = vpop.f32.mrf.mxu2  ;;  %v1973_v59 = vand.u32 2147483648, %v1961_v33  ;;  %vm1967_vm3 = vweird.f32 %v1961_v33 }
 0x63c   :  { %v1971_v0 = vand.u32 2147483647, %v1961_v33  ;;  %v1955_v43 = vor.u32 1.1754944e-38, %v1954_v34  ;;  %vm1953_vm5 = vcmp.eq.f32.partialorder %v1952_v31, 8.507059e+37 }
 0x63d   :  { %v1974_v13 = vor.u32 1.1754944e-38, %v1973_v59 }
 0x63e   :  { %v3696_v53 = vpop.eup %3695  ;;  %vm1972_vm7 = vcmp.eq.f32.partialorder %v1971_v0, 8.507059e+37 }
 0x63f   :  { %v1981_v54 = vadd.f32 1.0, %v3696_v53 }
 0x640   :  { %v3698_v58 = vpop.eup %3697 }
 0x641   :  { %v3700_v1 = vpop.eup %3699  ;;  %v1944_v40 = vmul.f32 %v3698_v58, %v1942_v32  ;;  %3701 = vrcp.f32 %v1981_v54  ;;  %vm1949_vm0 = vweird.f32 %v3698_v58  ;;  %vm1987_vm9 = vweird.f32 %v1981_v54 }
 0x642   :  { %v1963_v52 = vmul.f32 %v3700_v1, %v1961_v33  ;;  %3703 = vtanh.f32 %v1937_v51  ;;  %vm1968_vm1 = vweird.f32 %v3700_v1  ;;  %vm1950_vm4 = vmor %vm1948_vm2, %vm1949_vm0  ;;  %v1993_v33 = vand.u32 2147483648, %v1981_v54 }
 0x643   :  { %v1945_v47 = vsub.f32 1.0, %v1944_v40  ;;  %vm1969_vm6 = vmor %vm1967_vm3, %vm1968_vm1 }
 0x644   :  { %v1964_v6 = vsub.f32 1.0, %v1963_v52  ;;  %v1994_v59 = vor.u32 1.1754944e-38, %v1993_v33 }
 0x645   :  { %v1946_v57 = vmul.f32 %v3698_v58, %v1945_v47 }
 0x646   :  { %v1965_v17 = vmul.f32 %v3700_v1, %v1964_v6 }
 0x647   :  { %v3702_v4 = vpop.eup %3701  ;;  %v1947_v2 = vadd.f32 %v3698_v58, %v1946_v57 }
 0x648   :  { %v1966_v53 = vadd.f32 %v3700_v1, %v1965_v17  ;;  %v1983_v39 = vmul.f32 %v3702_v4, %v1981_v54  ;;  %v3704_v51 = vpop.eup %3703  ;;  %vm1988_vm8 = vweird.f32 %v3702_v4 }
 0x649   :  { %v1951_v40 = vsel %vm1950_vm4, %v3698_v58, %v1947_v2  ;;  %v1991_v58 = vand.u32 2147483647, %v1981_v54  ;;  %vm1989_vm10 = vmor %vm1987_vm9, %vm1988_vm8 }
 0x64a   :  { %v1956_v52 = vsel %vm1953_vm5, %v1955_v43, %v1951_v40  ;;  %v1970_v47 = vsel %vm1969_vm6, %v3700_v1, %v1966_v53  ;;  %v1984_v5 = vsub.f32 1.0, %v1983_v39  ;;  %v1670_v43 = vadd.f32 %v4715_v63, %v4771_v60 }
 0x64b   :  { %v1975_v6 = vsel %vm1972_vm7, %v1974_v13, %v1970_v47  ;;  %v1998_v46 = vmul.f32 %v3704_v51, %v1956_v52  ;;  %vm1992_vm11 = vcmp.eq.f32.partialorder %v1991_v58, 8.507059e+37 }
 0x64c   :  { %v1997_v26 = vmul.f32 0.0, %v1975_v6  ;;  %v1985_v14 = vmul.f32 %v3702_v4, %v1984_v5 }
 0x64e   :  { %v4777_v57 = vadd.f32 %v1998_v46, %v1997_v26  ;;  %v1986_v32 = vadd.f32 %v3702_v4, %v1985_v14  ;;  %v1583_v26 = vadd.f32 %v4709_v15, %v4761_v50  ;;  %v1612_v46 = vadd.f32 %v4711_v49, %v4763_v56 }
 0x650   :  { %3705 = vtanh.f32 %v4777_v57  ;;  %v1990_v34 = vsel %vm1989_vm10, %v3702_v4, %v1986_v32 }
 0x651   :  { %v1995_v31 = vsel %vm1992_vm11, %v1994_v59, %v1990_v34  ;;  %v5065_v59 = vld [vmem:[#allocation46_spill] sm:$0xff] }
 0x656   :  { %v3706_v1 = vpop.eup %3705 }
 0x657   :  { %v2001_v17 = vmul.f32 %v3706_v1, %v1995_v31  ;;  %v5066_v1 = vld [vmem:[#allocation21_spill] sm:$0xff] }
 0x658   :  { %v1641_v63 = vadd.f32 %v5066_v1, %v5065_v59 }
 0x659   :  { %v2007_v13 = vpack.c.bf16 %v2001_v17, %v2001_v17 }
 0x65b   :  { %2016 = vmatmul.bf16.vlgmr.msra.gmra.mxu0 %v2007_v13  ;;  %2029 = vmatmul.bf16.vlgmr.msra.gmra.mxu1 %v2007_v13 }
 0x65c   :  { %2042 = vmatmul.bf16.vlgmr.msra.gmra.mxu2 %v2007_v13  ;;  %2055 = vmatmul.bf16.vlgmr.msra.gmra.mxu3 %v2007_v13 }
 0x65d   :  { %2258 = vmatpush.bf16.msra.mxu0 %v4497_v29  ;;  %2271 = vmatpush.bf16.msra.mxu1 %v4499_v3 }
 0x65e   :  { %2284 = vmatpush.bf16.msra.mxu2 %v4510_v21  ;;  %2297 = vmatpush.bf16.msra.mxu3 %v4507_v61 }
 0x661   :  { %2259 = vmatpush.bf16.msra.mxu0 %v4513_v42  ;;  %2272 = vmatpush.bf16.msra.mxu1 %v4515_v9 }
 0x662   :  { %2285 = vmatpush.bf16.msra.mxu2 %v4530_v62  ;;  %2298 = vmatpush.bf16.msra.mxu3 %v4517_v10 }
 0x665   :  { %2260 = vmatpush.bf16.msra.mxu0 %v4522_v36  ;;  %2273 = vmatpush.bf16.msra.mxu1 %v4524_v44 }
 0x666   :  { %2286 = vmatpush.bf16.msra.mxu2 %v4542_v27  ;;  %2299 = vmatpush.bf16.msra.mxu3 %v4526_v45 }
 0x669   :  { %2261 = vmatpush.bf16.msra.mxu0 %v4533_v11  ;;  %2274 = vmatpush.bf16.msra.mxu1 %v4537_v30 }
 0x66a   :  { %2287 = vmatpush.bf16.msra.mxu2 %v4559_v41  ;;  %2300 = vmatpush.bf16.msra.mxu3 %v4539_v22 }
 0x66d   :  { %2262 = vmatpush.bf16.msra.mxu0 %v4547_v28  ;;  %2275 = vmatpush.bf16.msra.mxu1 %v4553_v35 }
 0x66e   :  { %2288 = vmatpush.bf16.msra.mxu2 %v4572_v55  ;;  %2301 = vmatpush.bf16.msra.mxu3 %v4555_v12 }
 0x671   :  { %2263 = vmatpush.bf16.msra.mxu0 %v4563_v19  ;;  %2276 = vmatpush.bf16.msra.mxu1 %v4567_v37 }
 0x672   :  { %2289 = vmatpush.bf16.msra.mxu2 %v4595_v7  ;;  %2302 = vmatpush.bf16.msra.mxu3 %v4569_v38 }
 0x675   :  { %2264 = vmatpush.bf16.msra.mxu0 %v4580_v23  ;;  %2277 = vmatpush.bf16.msra.mxu1 %v4589_v48 }
 0x676   :  { %2290 = vmatpush.bf16.msra.mxu2 %v4614_v25  ;;  %2303 = vmatpush.bf16.msra.mxu3 %v4598_v8 }
 0x679   :  { %2265 = vmatpush.bf16.msra.mxu0 %v4610_v20  ;;  %2278 = vmatpush.bf16.msra.mxu1 %v4612_v24 }
 0x67a   :  { %2291 = vmatpush.bf16.msra.mxu2 %v4633_v16  ;;  %2304 = vmatpush.bf16.msra.mxu3 %v4624_v18 }
 0x6d8   :  { %v2017_v5 = vpop.f32.mrf.mxu0  ;;  %v2030_v4 = vpop.f32.mrf.mxu1 }
 0x6d9   :  { %v2060_v14 = vadd.f32 %v2017_v5, %v1583_v26  ;;  %v2061_v54 = vadd.f32 %v2030_v4, %v1612_v46 }
 0x6db   :  { %v3391_v0 = vmul.f32 -1.442695, %v2060_v14  ;;  %v3392_v2 = vmul.f32 -1.442695, %v2061_v54 }
 0x6dd   :  { %3707 = vpow2.f32 %v3391_v0 }
 0x6de   :  { %3709 = vpow2.f32 %v3392_v2 }
 0x6df   :  { %v2043_v53 = vpop.f32.mrf.mxu2  ;;  %v2056_v39 = vpop.f32.mrf.mxu3 }
 0x6e0   :  { %v2063_v40 = vadd.f32 %v2056_v39, %v1670_v43  ;;  %v2019_v51 = vpop.f32.mrf.mxu0  ;;  %v2032_v52 = vpop.f32.mrf.mxu1  ;;  %v2062_v13 = vadd.f32 %v2043_v53, %v1641_v63 }
 0x6e2   :  { %v3393_v15 = vmul.f32 -1.442695, %v2063_v40 }
 0x6e3   :  { %v3708_v47 = vpop.eup %3707 }
 0x6e4   :  { %v3710_v6 = vpop.eup %3709  ;;  %v2067_v49 = vadd.f32 1.0, %v3708_v47  ;;  %3711 = vpow2.f32 %v3393_v15 }
 0x6e5   :  { %v2086_v32 = vadd.f32 1.0, %v3710_v6 }
 0x6e6   :  { %3713 = vrcp.f32 %v2067_v49  ;;  %v2079_v54 = vand.u32 2147483648, %v2067_v49  ;;  %v2077_v43 = vand.u32 2147483647, %v2067_v49  ;;  %vm2073_vm14 = vweird.f32 %v2067_v49 }
 0x6e7   :  { %3715 = vrcp.f32 %v2086_v32  ;;  %v2045_v33 = vpop.f32.mrf.mxu2  ;;  %v2058_v58 = vpop.f32.mrf.mxu3  ;;  %v2098_v0 = vand.u32 2147483648, %v2086_v32  ;;  %v2096_v40 = vand.u32 2147483647, %v2086_v32  ;;  %vm2092_vm15 = vweird.f32 %v2086_v32 }
 0x6e8   :  { %v2080_v53 = vor.u32 1.1754944e-38, %v2079_v54  ;;  %vm2078_vm2 = vcmp.eq.f32.partialorder %v2077_v43, 8.507059e+37 }
 0x6e9   :  { %v2099_v6 = vor.u32 1.1754944e-38, %v2098_v0  ;;  %vm2097_vm3 = vcmp.eq.f32.partialorder %v2096_v40, 8.507059e+37  ;;  %v5068_v40 = vld [vmem:[#allocation23_spill] sm:$0xff] }
 0x6ea   :  { %v3712_v34 = vpop.eup %3711 }
 0x6eb   :  { %v2106_v31 = vadd.f32 1.0, %v3712_v34 }
 0x6ec   :  { %v3714_v17 = vpop.eup %3713 }
 0x6ed   :  { %v3716_v26 = vpop.eup %3715  ;;  %v2069_v46 = vmul.f32 %v3714_v17, %v2067_v49  ;;  %3717 = vrcp.f32 %v2106_v31  ;;  %vm2074_vm12 = vweird.f32 %v3714_v17  ;;  %vm2112_vm5 = vweird.f32 %v2106_v31 }
 0x6ee   :  { %v2088_v5 = vmul.f32 %v3716_v26, %v2086_v32  ;;  %3719 = vtanh.f32 %v2062_v13  ;;  %vm2093_vm13 = vweird.f32 %v3716_v26  ;;  %vm2075_vm0 = vmor %vm2073_vm14, %vm2074_vm12 }
 0x6ef   :  { %v2070_v4 = vsub.f32 1.0, %v2069_v46  ;;  %vm2094_vm1 = vmor %vm2092_vm15, %vm2093_vm13 }
 0x6f0   :  { %v2089_v14 = vsub.f32 1.0, %v2088_v5 }
 0x6f1   :  { %v2071_v2 = vmul.f32 %v3714_v17, %v2070_v4 }
 0x6f2   :  { %v2090_v39 = vmul.f32 %v3716_v26, %v2089_v14  ;;  %v2118_v14 = vand.u32 2147483648, %v2106_v31 }
 0x6f3   :  { %v3718_v51 = vpop.eup %3717  ;;  %v2072_v52 = vadd.f32 %v3714_v17, %v2071_v2 }
 0x6f4   :  { %v2091_v15 = vadd.f32 %v3716_v26, %v2090_v39  ;;  %v2108_v47 = vmul.f32 %v3718_v51, %v2106_v31  ;;  %v3720_v58 = vpop.eup %3719  ;;  %vm2113_vm4 = vweird.f32 %v3718_v51  ;;  %v2119_v0 = vor.u32 1.1754944e-38, %v2118_v14 }
 0x6f5   :  { %v2076_v33 = vsel %vm2075_vm0, %v3714_v17, %v2072_v52  ;;  %v2116_v17 = vand.u32 2147483647, %v2106_v31  ;;  %vm2114_vm6 = vmor %vm2112_vm5, %vm2113_vm4 }
 0x6f6   :  { %v2081_v34 = vsel %vm2078_vm2, %v2080_v53, %v2076_v33  ;;  %v2095_v1 = vsel %vm2094_vm1, %v3716_v26, %v2091_v15  ;;  %v2109_v63 = vsub.f32 1.0, %v2108_v47 }
 0x6f7   :  { %v2100_v13 = vsel %vm2097_vm3, %v2099_v6, %v2095_v1  ;;  %v2123_v46 = vmul.f32 %v3720_v58, %v2081_v34  ;;  %vm2117_vm7 = vcmp.eq.f32.partialorder %v2116_v17, 8.507059e+37  ;;  %v5069_v58 = vld [vmem:[#allocation25_spill] sm:$0xff] }
 0x6f8   :  { %v2122_v5 = vmul.f32 %v2100_v13, %v4777_v57  ;;  %v2110_v4 = vmul.f32 %v3718_v51, %v2109_v63  ;;  %v5067_v57 = vld [vmem:[#allocation22_spill] sm:$0xff]  ;;  %v1673_v34 = vadd.f32 %v5069_v58, %v4771_v60 }
 0x6f9   :  { %v1586_v31 = vadd.f32 %v5067_v57, %v4761_v50 }
 0x6fa   :  { %v4821_v49 = vadd.f32 %v2123_v46, %v2122_v5  ;;  %v2111_v32 = vadd.f32 %v3718_v51, %v2110_v4 }
 0x6fc   :  { %3721 = vtanh.f32 %v4821_v49  ;;  %v2115_v54 = vsel %vm2114_vm6, %v3718_v51, %v2111_v32  ;;  %v1615_v51 = vadd.f32 %v5068_v40, %v4763_v56 }
 0x6fd   :  { %v2120_v2 = vsel %vm2117_vm7, %v2119_v0, %v2115_v54 }
 0x702   :  { %v3722_v26 = vpop.eup %3721 }
 0x703   :  { %v2126_v43 = vmul.f32 %v3722_v26, %v2120_v2 }
 0x705   :  { %v2132_v39 = vpack.c.bf16 %v2126_v43, %v2126_v43  ;;  %v5070_v43 = vld [vmem:[#allocation24_spill] sm:$0xff] }
 0x707   :  { %2141 = vmatmul.bf16.vlgmr.msrb.gmra.mxu0 %v2132_v39  ;;  %2154 = vmatmul.bf16.vlgmr.msrb.gmra.mxu1 %v2132_v39 }
 0x708   :  { %2167 = vmatmul.bf16.vlgmr.msrb.gmra.mxu2 %v2132_v39  ;;  %2180 = vmatmul.bf16.vlgmr.msrb.gmra.mxu3 %v2132_v39  ;;  %v1644_v39 = vadd.f32 %v5070_v43, %v5065_v59 }
 0x709   :  { %2383 = vmatpush.bf16.msrb.mxu0 %v4497_v29  ;;  %2396 = vmatpush.bf16.msrb.mxu1 %v4499_v3 }
 0x70a   :  { %2409 = vmatpush.bf16.msrb.mxu2 %v4510_v21  ;;  %2422 = vmatpush.bf16.msrb.mxu3 %v4507_v61 }
 0x70d   :  { %2384 = vmatpush.bf16.msrb.mxu0 %v4513_v42  ;;  %2397 = vmatpush.bf16.msrb.mxu1 %v4515_v9 }
 0x70e   :  { %2410 = vmatpush.bf16.msrb.mxu2 %v4530_v62  ;;  %2423 = vmatpush.bf16.msrb.mxu3 %v4517_v10 }
 0x711   :  { %2385 = vmatpush.bf16.msrb.mxu0 %v4522_v36  ;;  %2398 = vmatpush.bf16.msrb.mxu1 %v4524_v44 }
 0x712   :  { %2411 = vmatpush.bf16.msrb.mxu2 %v4542_v27  ;;  %2424 = vmatpush.bf16.msrb.mxu3 %v4526_v45 }
 0x715   :  { %2386 = vmatpush.bf16.msrb.mxu0 %v4533_v11  ;;  %2399 = vmatpush.bf16.msrb.mxu1 %v4537_v30 }
 0x716   :  { %2412 = vmatpush.bf16.msrb.mxu2 %v4559_v41  ;;  %2425 = vmatpush.bf16.msrb.mxu3 %v4539_v22 }
 0x719   :  { %2387 = vmatpush.bf16.msrb.mxu0 %v4547_v28  ;;  %2400 = vmatpush.bf16.msrb.mxu1 %v4553_v35 }
 0x71a   :  { %2413 = vmatpush.bf16.msrb.mxu2 %v4572_v55  ;;  %2426 = vmatpush.bf16.msrb.mxu3 %v4555_v12 }
 0x71d   :  { %2388 = vmatpush.bf16.msrb.mxu0 %v4563_v19  ;;  %2401 = vmatpush.bf16.msrb.mxu1 %v4567_v37 }
 0x71e   :  { %2414 = vmatpush.bf16.msrb.mxu2 %v4595_v7  ;;  %2427 = vmatpush.bf16.msrb.mxu3 %v4569_v38 }
 0x721   :  { %2389 = vmatpush.bf16.msrb.mxu0 %v4580_v23  ;;  %2402 = vmatpush.bf16.msrb.mxu1 %v4589_v48 }
 0x722   :  { %2415 = vmatpush.bf16.msrb.mxu2 %v4614_v25  ;;  %2428 = vmatpush.bf16.msrb.mxu3 %v4598_v8 }
 0x725   :  { %2390 = vmatpush.bf16.msrb.mxu0 %v4610_v20  ;;  %2403 = vmatpush.bf16.msrb.mxu1 %v4612_v24 }
 0x726   :  { %2416 = vmatpush.bf16.msrb.mxu2 %v4633_v16  ;;  %2429 = vmatpush.bf16.msrb.mxu3 %v4624_v18 }
 0x784   :  { %v2142_v52 = vpop.f32.mrf.mxu0  ;;  %v2155_v53 = vpop.f32.mrf.mxu1 }
 0x785   :  { %v2185_v15 = vadd.f32 %v2142_v52, %v1586_v31  ;;  %v2186_v47 = vadd.f32 %v2155_v53, %v1615_v51 }
 0x787   :  { %v3394_v6 = vmul.f32 -1.442695, %v2185_v15  ;;  %v3395_v33 = vmul.f32 -1.442695, %v2186_v47 }
 0x789   :  { %3723 = vpow2.f32 %v3394_v6 }
 0x78a   :  { %3725 = vpow2.f32 %v3395_v33 }
 0x78b   :  { %v2168_v1 = vpop.f32.mrf.mxu2  ;;  %v2181_v63 = vpop.f32.mrf.mxu3 }
 0x78c   :  { %v2188_v13 = vadd.f32 %v2181_v63, %v1673_v34  ;;  %v2144_v46 = vpop.f32.mrf.mxu0  ;;  %v2157_v5 = vpop.f32.mrf.mxu1  ;;  %v2187_v40 = vadd.f32 %v2168_v1, %v1644_v39 }
 0x78e   :  { %v3396_v4 = vmul.f32 -1.442695, %v2188_v13 }
 0x78f   :  { %v3724_v32 = vpop.eup %3723 }
 0x790   :  { %v3726_v14 = vpop.eup %3725  ;;  %v2192_v17 = vadd.f32 1.0, %v3724_v32  ;;  %3727 = vpow2.f32 %v3396_v4 }
 0x791   :  { %v2211_v54 = vadd.f32 1.0, %v3726_v14 }
 0x792   :  { %3729 = vrcp.f32 %v2192_v17  ;;  %v2204_v6 = vand.u32 2147483648, %v2192_v17  ;;  %v2202_v34 = vand.u32 2147483647, %v2192_v17  ;;  %vm2198_vm10 = vweird.f32 %v2192_v17 }
 0x793   :  { %3731 = vrcp.f32 %v2211_v54  ;;  %v2170_v0 = vpop.f32.mrf.mxu2  ;;  %v2183_v26 = vpop.f32.mrf.mxu3  ;;  %v2223_v33 = vand.u32 2147483648, %v2211_v54  ;;  %v2221_v13 = vand.u32 2147483647, %v2211_v54  ;;  %vm2217_vm11 = vweird.f32 %v2211_v54 }
 0x794   :  { %v2205_v1 = vor.u32 1.1754944e-38, %v2204_v6  ;;  %vm2203_vm14 = vcmp.eq.f32.partialorder %v2202_v34, 8.507059e+37 }
 0x795   :  { %v2224_v14 = vor.u32 1.1754944e-38, %v2223_v33  ;;  %vm2222_vm15 = vcmp.eq.f32.partialorder %v2221_v13, 8.507059e+37  ;;  %v5072_v13 = vld [vmem:[#allocation27_spill] sm:$0xff] }
 0x796   :  { %v3728_v2 = vpop.eup %3727 }
 0x797   :  { %v2231_v57 = vadd.f32 1.0, %v3728_v2 }
 0x798   :  { %v3730_v31 = vpop.eup %3729 }
 0x799   :  { %v3732_v51 = vpop.eup %3731  ;;  %v2194_v52 = vmul.f32 %v3730_v31, %v2192_v17  ;;  %3733 = vrcp.f32 %v2231_v57  ;;  %vm2199_vm8 = vweird.f32 %v3730_v31  ;;  %vm2237_vm1 = vweird.f32 %v2231_v57 }
 0x79a   :  { %v2213_v53 = vmul.f32 %v3732_v51, %v2211_v54  ;;  %3735 = vtanh.f32 %v2187_v40  ;;  %vm2218_vm9 = vweird.f32 %v3732_v51  ;;  %vm2200_vm12 = vmor %vm2198_vm10, %vm2199_vm8 }
 0x79b   :  { %v2195_v15 = vsub.f32 1.0, %v2194_v52  ;;  %vm2219_vm13 = vmor %vm2217_vm11, %vm2218_vm9 }
 0x79c   :  { %v2214_v47 = vsub.f32 1.0, %v2213_v53 }
 0x79d   :  { %v2196_v58 = vmul.f32 %v3730_v31, %v2195_v15 }
 0x79e   :  { %v2215_v63 = vmul.f32 %v3732_v51, %v2214_v47  ;;  %v2243_v47 = vand.u32 2147483648, %v2231_v57 }
 0x79f   :  { %v3734_v46 = vpop.eup %3733  ;;  %v2197_v5 = vadd.f32 %v3730_v31, %v2196_v58 }
 0x7a0   :  { %v2216_v4 = vadd.f32 %v3732_v51, %v2215_v63  ;;  %v2233_v32 = vmul.f32 %v3734_v46, %v2231_v57  ;;  %v3736_v26 = vpop.eup %3735  ;;  %vm2238_vm0 = vweird.f32 %v3734_v46  ;;  %v2244_v33 = vor.u32 1.1754944e-38, %v2243_v47 }
 0x7a1   :  { %v2201_v0 = vsel %vm2200_vm12, %v3730_v31, %v2197_v5  ;;  %v2241_v31 = vand.u32 2147483647, %v2231_v57  ;;  %vm2239_vm2 = vmor %vm2237_vm1, %vm2238_vm0 }
 0x7a2   :  { %v2206_v2 = vsel %vm2203_vm14, %v2205_v1, %v2201_v0  ;;  %v2220_v43 = vsel %vm2219_vm13, %v3732_v51, %v2216_v4  ;;  %v2234_v39 = vsub.f32 1.0, %v2233_v32 }
 0x7a3   :  { %v2225_v40 = vsel %vm2222_vm15, %v2224_v14, %v2220_v43  ;;  %v2248_v52 = vmul.f32 %v3736_v26, %v2206_v2  ;;  %vm2242_vm3 = vcmp.eq.f32.partialorder %v2241_v31, 8.507059e+37  ;;  %v5073_v26 = vld [vmem:[#allocation29_spill] sm:$0xff] }
 0x7a4   :  { %v2247_v53 = vmul.f32 %v2225_v40, %v4821_v49  ;;  %v2235_v15 = vmul.f32 %v3734_v46, %v2234_v39  ;;  %v5071_v49 = vld [vmem:[#allocation26_spill] sm:$0xff]  ;;  %v1675_v2 = vadd.f32 %v5073_v26, %v4771_v60 }
 0x7a5   :  { %v1588_v57 = vadd.f32 %v5071_v49, %v4761_v50 }
 0x7a6   :  { %v4865_v17 = vadd.f32 %v2248_v52, %v2247_v53  ;;  %v2236_v54 = vadd.f32 %v3734_v46, %v2235_v15 }
 0x7a8   :  { %3737 = vtanh.f32 %v4865_v17  ;;  %v2240_v6 = vsel %vm2239_vm2, %v3734_v46, %v2236_v54  ;;  %v1617_v46 = vadd.f32 %v5072_v13, %v4763_v56 }
 0x7a9   :  { %v2245_v58 = vsel %vm2242_vm3, %v2244_v33, %v2240_v6 }
 0x7ae   :  { %v3738_v51 = vpop.eup %3737 }
 0x7af   :  { %v2251_v34 = vmul.f32 %v3738_v51, %v2245_v58 }
 0x7b1   :  { %v2257_v63 = vpack.c.bf16 %v2251_v34, %v2251_v34  ;;  %v5074_v34 = vld [vmem:[#allocation28_spill] sm:$0xff] }
 0x7b3   :  { %2266 = vmatmul.bf16.vlgmr.msra.gmra.mxu0 %v2257_v63  ;;  %2279 = vmatmul.bf16.vlgmr.msra.gmra.mxu1 %v2257_v63 }
 0x7b4   :  { %2292 = vmatmul.bf16.vlgmr.msra.gmra.mxu2 %v2257_v63  ;;  %2305 = vmatmul.bf16.vlgmr.msra.gmra.mxu3 %v2257_v63  ;;  %v1646_v63 = vadd.f32 %v5074_v34, %v5065_v59 }
 0x7b5   :  { %2508 = vmatpush.bf16.msra.mxu0 %v4497_v29  ;;  %2521 = vmatpush.bf16.msra.mxu1 %v4499_v3 }
 0x7b6   :  { %2534 = vmatpush.bf16.msra.mxu2 %v4510_v21  ;;  %2547 = vmatpush.bf16.msra.mxu3 %v4507_v61 }
 0x7b9   :  { %2509 = vmatpush.bf16.msra.mxu0 %v4513_v42  ;;  %2522 = vmatpush.bf16.msra.mxu1 %v4515_v9 }
 0x7ba   :  { %2535 = vmatpush.bf16.msra.mxu2 %v4530_v62  ;;  %2548 = vmatpush.bf16.msra.mxu3 %v4517_v10 }
 0x7bd   :  { %2510 = vmatpush.bf16.msra.mxu0 %v4522_v36  ;;  %2523 = vmatpush.bf16.msra.mxu1 %v4524_v44 }
 0x7be   :  { %2536 = vmatpush.bf16.msra.mxu2 %v4542_v27  ;;  %2549 = vmatpush.bf16.msra.mxu3 %v4526_v45 }
 0x7c1   :  { %2511 = vmatpush.bf16.msra.mxu0 %v4533_v11  ;;  %2524 = vmatpush.bf16.msra.mxu1 %v4537_v30 }
 0x7c2   :  { %2537 = vmatpush.bf16.msra.mxu2 %v4559_v41  ;;  %2550 = vmatpush.bf16.msra.mxu3 %v4539_v22 }
 0x7c5   :  { %2512 = vmatpush.bf16.msra.mxu0 %v4547_v28  ;;  %2525 = vmatpush.bf16.msra.mxu1 %v4553_v35 }
 0x7c6   :  { %2538 = vmatpush.bf16.msra.mxu2 %v4572_v55  ;;  %2551 = vmatpush.bf16.msra.mxu3 %v4555_v12 }
 0x7c9   :  { %2513 = vmatpush.bf16.msra.mxu0 %v4563_v19  ;;  %2526 = vmatpush.bf16.msra.mxu1 %v4567_v37 }
 0x7ca   :  { %2539 = vmatpush.bf16.msra.mxu2 %v4595_v7  ;;  %2552 = vmatpush.bf16.msra.mxu3 %v4569_v38 }
 0x7cd   :  { %2514 = vmatpush.bf16.msra.mxu0 %v4580_v23  ;;  %2527 = vmatpush.bf16.msra.mxu1 %v4589_v48 }
 0x7ce   :  { %2540 = vmatpush.bf16.msra.mxu2 %v4614_v25  ;;  %2553 = vmatpush.bf16.msra.mxu3 %v4598_v8 }
 0x7d1   :  { %2515 = vmatpush.bf16.msra.mxu0 %v4610_v20  ;;  %2528 = vmatpush.bf16.msra.mxu1 %v4612_v24 }
 0x7d2   :  { %2541 = vmatpush.bf16.msra.mxu2 %v4633_v16  ;;  %2554 = vmatpush.bf16.msra.mxu3 %v4624_v18 }
 0x830   :  { %v2267_v5 = vpop.f32.mrf.mxu0  ;;  %v2280_v1 = vpop.f32.mrf.mxu1 }
 0x831   :  { %v2310_v4 = vadd.f32 %v2267_v5, %v1588_v57  ;;  %v2311_v32 = vadd.f32 %v2280_v1, %v1617_v46 }
 0x833   :  { %v3397_v14 = vmul.f32 -1.442695, %v2310_v4  ;;  %v3398_v0 = vmul.f32 -1.442695, %v2311_v32 }
 0x835   :  { %3739 = vpow2.f32 %v3397_v14 }
 0x836   :  { %3741 = vpow2.f32 %v3398_v0 }
 0x837   :  { %v2293_v43 = vpop.f32.mrf.mxu2  ;;  %v2306_v39 = vpop.f32.mrf.mxu3 }
 0x838   :  { %v2313_v40 = vadd.f32 %v2306_v39, %v1675_v2  ;;  %v2269_v52 = vpop.f32.mrf.mxu0  ;;  %v2282_v53 = vpop.f32.mrf.mxu1  ;;  %v2312_v13 = vadd.f32 %v2293_v43, %v1646_v63 }
 0x83a   :  { %v3399_v15 = vmul.f32 -1.442695, %v2313_v40 }
 0x83b   :  { %v3740_v54 = vpop.eup %3739 }
 0x83c   :  { %v3742_v47 = vpop.eup %3741  ;;  %v2317_v31 = vadd.f32 1.0, %v3740_v54  ;;  %3743 = vpow2.f32 %v3399_v15 }
 0x83d   :  { %v2336_v6 = vadd.f32 1.0, %v3742_v47 }
 0x83e   :  { %3745 = vrcp.f32 %v2317_v31  ;;  %v2329_v14 = vand.u32 2147483648, %v2317_v31  ;;  %v2327_v2 = vand.u32 2147483647, %v2317_v31  ;;  %vm2323_vm6 = vweird.f32 %v2317_v31 }
 0x83f   :  { %3747 = vrcp.f32 %v2336_v6  ;;  %v2295_v33 = vpop.f32.mrf.mxu2  ;;  %v2308_v51 = vpop.f32.mrf.mxu3  ;;  %v2348_v0 = vand.u32 2147483648, %v2336_v6  ;;  %v2346_v40 = vand.u32 2147483647, %v2336_v6  ;;  %vm2342_vm7 = vweird.f32 %v2336_v6 }
 0x840   :  { %v2330_v43 = vor.u32 1.1754944e-38, %v2329_v14  ;;  %vm2328_vm10 = vcmp.eq.f32.partialorder %v2327_v2, 8.507059e+37 }
 0x841   :  { %v2349_v47 = vor.u32 1.1754944e-38, %v2348_v0  ;;  %vm2347_vm11 = vcmp.eq.f32.partialorder %v2346_v40, 8.507059e+37  ;;  %v5076_v40 = vld [vmem:[#allocation31_spill] sm:$0xff] }
 0x842   :  { %v3744_v58 = vpop.eup %3743 }
 0x843   :  { %v2356_v49 = vadd.f32 1.0, %v3744_v58 }
 0x844   :  { %v3746_v57 = vpop.eup %3745 }
 0x845   :  { %v3748_v46 = vpop.eup %3747  ;;  %v2319_v5 = vmul.f32 %v3746_v57, %v2317_v31  ;;  %3749 = vrcp.f32 %v2356_v49  ;;  %vm2324_vm4 = vweird.f32 %v3746_v57  ;;  %vm2362_vm13 = vweird.f32 %v2356_v49 }
 0x846   :  { %v2338_v1 = vmul.f32 %v3748_v46, %v2336_v6  ;;  %3751 = vtanh.f32 %v2312_v13  ;;  %vm2343_vm5 = vweird.f32 %v3748_v46  ;;  %vm2325_vm8 = vmor %vm2323_vm6, %vm2324_vm4 }
 0x847   :  { %v2320_v4 = vsub.f32 1.0, %v2319_v5  ;;  %vm2344_vm9 = vmor %vm2342_vm7, %vm2343_vm5 }
 0x848   :  { %v2339_v32 = vsub.f32 1.0, %v2338_v1 }
 0x849   :  { %v2321_v26 = vmul.f32 %v3746_v57, %v2320_v4 }
 0x84a   :  { %v2340_v39 = vmul.f32 %v3748_v46, %v2339_v32  ;;  %v2368_v32 = vand.u32 2147483648, %v2356_v49 }
 0x84b   :  { %v3750_v52 = vpop.eup %3749  ;;  %v2322_v53 = vadd.f32 %v3746_v57, %v2321_v26 }
 0x84c   :  { %v2341_v15 = vadd.f32 %v3748_v46, %v2340_v39  ;;  %v2358_v54 = vmul.f32 %v3750_v52, %v2356_v49  ;;  %v3752_v51 = vpop.eup %3751  ;;  %vm2363_vm12 = vweird.f32 %v3750_v52  ;;  %v2369_v0 = vor.u32 1.1754944e-38, %v2368_v32 }
 0x84d   :  { %v2326_v33 = vsel %vm2325_vm8, %v3746_v57, %v2322_v53  ;;  %v2366_v57 = vand.u32 2147483647, %v2356_v49  ;;  %vm2364_vm14 = vmor %vm2362_vm13, %vm2363_vm12 }
 0x84e   :  { %v2331_v58 = vsel %vm2328_vm10, %v2330_v43, %v2326_v33  ;;  %v2345_v34 = vsel %vm2344_vm9, %v3748_v46, %v2341_v15  ;;  %v2359_v63 = vsub.f32 1.0, %v2358_v54 }
 0x84f   :  { %v2350_v13 = vsel %vm2347_vm11, %v2349_v47, %v2345_v34  ;;  %v2373_v5 = vmul.f32 %v3752_v51, %v2331_v58  ;;  %vm2367_vm15 = vcmp.eq.f32.partialorder %v2366_v57, 8.507059e+37  ;;  %v5077_v51 = vld [vmem:[#allocation33_spill] sm:$0xff] }
 0x850   :  { %v2372_v1 = vmul.f32 %v2350_v13, %v4865_v17  ;;  %v2360_v4 = vmul.f32 %v3750_v52, %v2359_v63  ;;  %v5075_v17 = vld [vmem:[#allocation30_spill] sm:$0xff]  ;;  %v1678_v58 = vadd.f32 %v5077_v51, %v4771_v60 }
 0x851   :  { %v1591_v49 = vadd.f32 %v5075_v17, %v4761_v50 }
 0x852   :  { %v4909_v31 = vadd.f32 %v2373_v5, %v2372_v1  ;;  %v2361_v6 = vadd.f32 %v3750_v52, %v2360_v4 }
 0x854   :  { %3753 = vtanh.f32 %v4909_v31  ;;  %v2365_v14 = vsel %vm2364_vm14, %v3750_v52, %v2361_v6  ;;  %v1620_v52 = vadd.f32 %v5076_v40, %v4763_v56 }
 0x855   :  { %v2370_v26 = vsel %vm2367_vm15, %v2369_v0, %v2365_v14 }
 0x85a   :  { %v3754_v46 = vpop.eup %3753 }
 0x85b   :  { %v2376_v2 = vmul.f32 %v3754_v46, %v2370_v26 }
 0x85d   :  { %v2382_v39 = vpack.c.bf16 %v2376_v2, %v2376_v2  ;;  %v5078_v2 = vld [vmem:[#allocation32_spill] sm:$0xff] }
 0x85f   :  { %2391 = vmatmul.bf16.vlgmr.msrb.gmra.mxu0 %v2382_v39  ;;  %2404 = vmatmul.bf16.vlgmr.msrb.gmra.mxu1 %v2382_v39 }
 0x860   :  { %2417 = vmatmul.bf16.vlgmr.msrb.gmra.mxu2 %v2382_v39  ;;  %2430 = vmatmul.bf16.vlgmr.msrb.gmra.mxu3 %v2382_v39  ;;  %v1649_v39 = vadd.f32 %v5078_v2, %v5065_v59 }
 0x861   :  { %2633 = vmatpush.bf16.msrb.mxu0 %v4497_v29  ;;  %2646 = vmatpush.bf16.msrb.mxu1 %v4499_v3 }
 0x862   :  { %2659 = vmatpush.bf16.msrb.mxu2 %v4510_v21  ;;  %2672 = vmatpush.bf16.msrb.mxu3 %v4507_v61 }
 0x865   :  { %2634 = vmatpush.bf16.msrb.mxu0 %v4513_v42  ;;  %2647 = vmatpush.bf16.msrb.mxu1 %v4515_v9 }
 0x866   :  { %2660 = vmatpush.bf16.msrb.mxu2 %v4530_v62  ;;  %2673 = vmatpush.bf16.msrb.mxu3 %v4517_v10 }
 0x869   :  { %2635 = vmatpush.bf16.msrb.mxu0 %v4522_v36  ;;  %2648 = vmatpush.bf16.msrb.mxu1 %v4524_v44 }
 0x86a   :  { %2661 = vmatpush.bf16.msrb.mxu2 %v4542_v27  ;;  %2674 = vmatpush.bf16.msrb.mxu3 %v4526_v45 }
 0x86d   :  { %2636 = vmatpush.bf16.msrb.mxu0 %v4533_v11  ;;  %2649 = vmatpush.bf16.msrb.mxu1 %v4537_v30 }
 0x86e   :  { %2662 = vmatpush.bf16.msrb.mxu2 %v4559_v41  ;;  %2675 = vmatpush.bf16.msrb.mxu3 %v4539_v22 }
 0x871   :  { %2637 = vmatpush.bf16.msrb.mxu0 %v4547_v28  ;;  %2650 = vmatpush.bf16.msrb.mxu1 %v4553_v35 }
 0x872   :  { %2663 = vmatpush.bf16.msrb.mxu2 %v4572_v55  ;;  %2676 = vmatpush.bf16.msrb.mxu3 %v4555_v12 }
 0x875   :  { %2638 = vmatpush.bf16.msrb.mxu0 %v4563_v19  ;;  %2651 = vmatpush.bf16.msrb.mxu1 %v4567_v37 }
 0x876   :  { %2664 = vmatpush.bf16.msrb.mxu2 %v4595_v7  ;;  %2677 = vmatpush.bf16.msrb.mxu3 %v4569_v38 }
 0x879   :  { %2639 = vmatpush.bf16.msrb.mxu0 %v4580_v23  ;;  %2652 = vmatpush.bf16.msrb.mxu1 %v4589_v48 }
 0x87a   :  { %2665 = vmatpush.bf16.msrb.mxu2 %v4614_v25  ;;  %2678 = vmatpush.bf16.msrb.mxu3 %v4598_v8 }
 0x87d   :  { %2640 = vmatpush.bf16.msrb.mxu0 %v4610_v20  ;;  %2653 = vmatpush.bf16.msrb.mxu1 %v4612_v24 }
 0x87e   :  { %2666 = vmatpush.bf16.msrb.mxu2 %v4633_v16  ;;  %2679 = vmatpush.bf16.msrb.mxu3 %v4624_v18 }
 0x8dc   :  { %v2392_v53 = vpop.f32.mrf.mxu0  ;;  %v2405_v43 = vpop.f32.mrf.mxu1 }
 0x8dd   :  { %v2435_v15 = vadd.f32 %v2392_v53, %v1591_v49  ;;  %v2436_v54 = vadd.f32 %v2405_v43, %v1620_v52 }
 0x8df   :  { %v3400_v47 = vmul.f32 -1.442695, %v2435_v15  ;;  %v3401_v33 = vmul.f32 -1.442695, %v2436_v54 }
 0x8e1   :  { %3755 = vpow2.f32 %v3400_v47 }
 0x8e2   :  { %3757 = vpow2.f32 %v3401_v33 }
 0x8e3   :  { %v2418_v34 = vpop.f32.mrf.mxu2  ;;  %v2431_v63 = vpop.f32.mrf.mxu3 }
 0x8e4   :  { %v2438_v13 = vadd.f32 %v2431_v63, %v1678_v58  ;;  %v2394_v5 = vpop.f32.mrf.mxu0  ;;  %v2407_v1 = vpop.f32.mrf.mxu1  ;;  %v2437_v40 = vadd.f32 %v2418_v34, %v1649_v39 }
 0x8e6   :  { %v3402_v4 = vmul.f32 -1.442695, %v2438_v13 }
 0x8e7   :  { %v3756_v6 = vpop.eup %3755 }
 0x8e8   :  { %v3758_v32 = vpop.eup %3757  ;;  %v2442_v57 = vadd.f32 1.0, %v3756_v6  ;;  %3759 = vpow2.f32 %v3402_v4 }
 0x8e9   :  { %v2461_v14 = vadd.f32 1.0, %v3758_v32 }
 0x8ea   :  { %3761 = vrcp.f32 %v2442_v57  ;;  %v2454_v47 = vand.u32 2147483648, %v2442_v57  ;;  %v2452_v58 = vand.u32 2147483647, %v2442_v57  ;;  %vm2448_vm2 = vweird.f32 %v2442_v57 }
 0x8eb   :  { %3763 = vrcp.f32 %v2461_v14  ;;  %v2420_v0 = vpop.f32.mrf.mxu2  ;;  %v2433_v46 = vpop.f32.mrf.mxu3  ;;  %v2473_v33 = vand.u32 2147483648, %v2461_v14  ;;  %v2471_v13 = vand.u32 2147483647, %v2461_v14  ;;  %vm2467_vm3 = vweird.f32 %v2461_v14 }
 0x8ec   :  { %v2455_v34 = vor.u32 1.1754944e-38, %v2454_v47  ;;  %vm2453_vm6 = vcmp.eq.f32.partialorder %v2452_v58, 8.507059e+37 }
 0x8ed   :  { %v2474_v32 = vor.u32 1.1754944e-38, %v2473_v33  ;;  %vm2472_vm7 = vcmp.eq.f32.partialorder %v2471_v13, 8.507059e+37 }
 0x8ee   :  { %v3760_v26 = vpop.eup %3759 }
 0x8ef   :  { %v2481_v17 = vadd.f32 1.0, %v3760_v26 }
 0x8f0   :  { %v3762_v49 = vpop.eup %3761 }
 0x8f1   :  { %v3764_v52 = vpop.eup %3763  ;;  %v2444_v53 = vmul.f32 %v3762_v49, %v2442_v57  ;;  %3765 = vrcp.f32 %v2481_v17  ;;  %vm2449_vm0 = vweird.f32 %v3762_v49  ;;  %vm2487_vm9 = vweird.f32 %v2481_v17 }
 0x8f2   :  { %v2463_v43 = vmul.f32 %v3764_v52, %v2461_v14  ;;  %3767 = vtanh.f32 %v2437_v40  ;;  %vm2468_vm1 = vweird.f32 %v3764_v52  ;;  %vm2450_vm4 = vmor %vm2448_vm2, %vm2449_vm0 }
 0x8f3   :  { %v2445_v15 = vsub.f32 1.0, %v2444_v53  ;;  %vm2469_vm5 = vmor %vm2467_vm3, %vm2468_vm1 }
 0x8f4   :  { %v2464_v54 = vsub.f32 1.0, %v2463_v43 }
 0x8f5   :  { %v2446_v51 = vmul.f32 %v3762_v49, %v2445_v15 }
 0x8f6   :  { %v2465_v63 = vmul.f32 %v3764_v52, %v2464_v54  ;;  %v2493_v54 = vand.u32 2147483648, %v2481_v17 }
 0x8f7   :  { %v3766_v5 = vpop.eup %3765  ;;  %v2447_v1 = vadd.f32 %v3762_v49, %v2446_v51 }
 0x8f8   :  { %v2466_v4 = vadd.f32 %v3764_v52, %v2465_v63  ;;  %v2483_v6 = vmul.f32 %v3766_v5, %v2481_v17  ;;  %v3768_v46 = vpop.eup %3767  ;;  %vm2488_vm8 = vweird.f32 %v3766_v5  ;;  %v2494_v33 = vor.u32 1.1754944e-38, %v2493_v54 }
 0x8f9   :  { %v2451_v0 = vsel %vm2450_vm4, %v3762_v49, %v2447_v1  ;;  %v2491_v49 = vand.u32 2147483647, %v2481_v17  ;;  %vm2489_vm10 = vmor %vm2487_vm9, %vm2488_vm8 }
 0x8fa   :  { %v2456_v26 = vsel %vm2453_vm6, %v2455_v34, %v2451_v0  ;;  %v2470_v2 = vsel %vm2469_vm5, %v3764_v52, %v2466_v4  ;;  %v2484_v39 = vsub.f32 1.0, %v2483_v6 }
 0x8fb   :  { %v2475_v40 = vsel %vm2472_vm7, %v2474_v32, %v2470_v2  ;;  %v2498_v53 = vmul.f32 %v3768_v46, %v2456_v26  ;;  %vm2492_vm11 = vcmp.eq.f32.partialorder %v2491_v49, 8.507059e+37 }
 0x8fc   :  { %v2497_v43 = vmul.f32 %v2475_v40, %v4909_v31  ;;  %v2485_v15 = vmul.f32 %v3766_v5, %v2484_v39 }
 0x8fe   :  { %v4953_v57 = vadd.f32 %v2498_v53, %v2497_v43  ;;  %v2486_v14 = vadd.f32 %v3766_v5, %v2485_v15 }
 0x900   :  { %3769 = vtanh.f32 %v4953_v57  ;;  %v2490_v47 = vsel %vm2489_vm10, %v3766_v5, %v2486_v14 }
 0x901   :  { %v2495_v51 = vsel %vm2492_vm11, %v2494_v33, %v2490_v47 }
 0x906   :  { %v3770_v52 = vpop.eup %3769 }
 0x907   :  { %v2501_v58 = vmul.f32 %v3770_v52, %v2495_v51 }
 0x909   :  { %v2507_v63 = vpack.c.bf16 %v2501_v58, %v2501_v58 }
 0x90b   :  { %2516 = vmatmul.bf16.vlgmr.msra.gmra.mxu0 %v2507_v63  ;;  %2529 = vmatmul.bf16.vlgmr.msra.gmra.mxu1 %v2507_v63 }
 0x90c   :  { %2542 = vmatmul.bf16.vlgmr.msra.gmra.mxu2 %v2507_v63  ;;  %2555 = vmatmul.bf16.vlgmr.msra.gmra.mxu3 %v2507_v63 }
 0x90d   :  { %2758 = vmatpush.bf16.msra.mxu0 %v4497_v29  ;;  %2771 = vmatpush.bf16.msra.mxu1 %v4499_v3  ;;  %v5079_v29 = vld [vmem:[#allocation34_spill] sm:$0xff] }
 0x90e   :  { %2784 = vmatpush.bf16.msra.mxu2 %v4510_v21  ;;  %2797 = vmatpush.bf16.msra.mxu3 %v4507_v61  ;;  %v1593_v3 = vadd.f32 %v5079_v29, %v4761_v50  ;;  %v5080_v61 = vld [vmem:[#allocation35_spill] sm:$0xff] }
 0x90f   :  { %v1622_v21 = vadd.f32 %v5080_v61, %v4763_v56 }
 0x911   :  { %2759 = vmatpush.bf16.msra.mxu0 %v4513_v42  ;;  %2772 = vmatpush.bf16.msra.mxu1 %v4515_v9 }
 0x912   :  { %2785 = vmatpush.bf16.msra.mxu2 %v4530_v62  ;;  %2798 = vmatpush.bf16.msra.mxu3 %v4517_v10  ;;  %v5081_v62 = vld [vmem:[#allocation37_spill] sm:$0xff] }
 0x915   :  { %2760 = vmatpush.bf16.msra.mxu0 %v4522_v36  ;;  %2773 = vmatpush.bf16.msra.mxu1 %v4524_v44 }
 0x916   :  { %2786 = vmatpush.bf16.msra.mxu2 %v4542_v27  ;;  %2799 = vmatpush.bf16.msra.mxu3 %v4526_v45 }
 0x919   :  { %2761 = vmatpush.bf16.msra.mxu0 %v4533_v11  ;;  %2774 = vmatpush.bf16.msra.mxu1 %v4537_v30  ;;  %v1680_v11 = vadd.f32 %v5081_v62, %v4771_v60 }
 0x91a   :  { %2787 = vmatpush.bf16.msra.mxu2 %v4559_v41  ;;  %2800 = vmatpush.bf16.msra.mxu3 %v4539_v22 }
 0x91d   :  { %2762 = vmatpush.bf16.msra.mxu0 %v4547_v28  ;;  %2775 = vmatpush.bf16.msra.mxu1 %v4553_v35 }
 0x91e   :  { %2788 = vmatpush.bf16.msra.mxu2 %v4572_v55  ;;  %2801 = vmatpush.bf16.msra.mxu3 %v4555_v12 }
 0x921   :  { %2763 = vmatpush.bf16.msra.mxu0 %v4563_v19  ;;  %2776 = vmatpush.bf16.msra.mxu1 %v4567_v37 }
 0x922   :  { %2789 = vmatpush.bf16.msra.mxu2 %v4595_v7  ;;  %2802 = vmatpush.bf16.msra.mxu3 %v4569_v38  ;;  %v5082_v7 = vld [vmem:[#allocation36_spill] sm:$0xff] }
 0x925   :  { %2764 = vmatpush.bf16.msra.mxu0 %v4580_v23  ;;  %2777 = vmatpush.bf16.msra.mxu1 %v4589_v48 }
 0x926   :  { %2790 = vmatpush.bf16.msra.mxu2 %v4614_v25  ;;  %2803 = vmatpush.bf16.msra.mxu3 %v4598_v8  ;;  %v1651_v8 = vadd.f32 %v5082_v7, %v5065_v59 }
 0x929   :  { %2765 = vmatpush.bf16.msra.mxu0 %v4610_v20  ;;  %2778 = vmatpush.bf16.msra.mxu1 %v4612_v24 }
 0x92a   :  { %2791 = vmatpush.bf16.msra.mxu2 %v4633_v16  ;;  %2804 = vmatpush.bf16.msra.mxu3 %v4624_v18 }
 0x988   :  { %v2517_v42 = vpop.f32.mrf.mxu0  ;;  %v2530_v9 = vpop.f32.mrf.mxu1 }
 0x989   :  { %v2560_v10 = vadd.f32 %v2517_v42, %v1593_v3  ;;  %v2561_v36 = vadd.f32 %v2530_v9, %v1622_v21 }
 0x98b   :  { %v3403_v44 = vmul.f32 -1.442695, %v2560_v10  ;;  %v3404_v45 = vmul.f32 -1.442695, %v2561_v36 }
 0x98d   :  { %3771 = vpow2.f32 %v3403_v44  ;;  %v5084_v44 = vld [vmem:[#allocation39_spill] sm:$0xff] }
 0x98e   :  { %3773 = vpow2.f32 %v3404_v45  ;;  %v1625_v45 = vadd.f32 %v5084_v44, %v4763_v56 }
 0x98f   :  { %v2543_v30 = vpop.f32.mrf.mxu2  ;;  %v2556_v22 = vpop.f32.mrf.mxu3 }
 0x990   :  { %v2563_v27 = vadd.f32 %v2556_v22, %v1680_v11  ;;  %v2519_v28 = vpop.f32.mrf.mxu0  ;;  %v2532_v35 = vpop.f32.mrf.mxu1  ;;  %v2562_v25 = vadd.f32 %v2543_v30, %v1651_v8 }
 0x991   :  { %v5085_v35 = vld [vmem:[#allocation41_spill] sm:$0xff] }
 0x992   :  { %v3405_v12 = vmul.f32 -1.442695, %v2563_v27 }
 0x993   :  { %v3772_v41 = vpop.eup %3771 }
 0x994   :  { %v3774_v19 = vpop.eup %3773  ;;  %v2567_v37 = vadd.f32 1.0, %v3772_v41  ;;  %3775 = vpow2.f32 %v3405_v12  ;;  %v1683_v12 = vadd.f32 %v5085_v35, %v4771_v60  ;;  %v5087_v35 = vld [vmem:[#allocation42_spill] sm:$0xff] }
 0x995   :  { %v2586_v38 = vadd.f32 1.0, %v3774_v19 }
 0x996   :  { %3777 = vrcp.f32 %v2567_v37  ;;  %v2579_v5 = vand.u32 2147483648, %v2567_v37  ;;  %v2577_v4 = vand.u32 2147483647, %v2567_v37  ;;  %vm2573_vm14 = vweird.f32 %v2567_v37 }
 0x997   :  { %3779 = vrcp.f32 %v2586_v38  ;;  %v2545_v55 = vpop.f32.mrf.mxu2  ;;  %v2558_v23 = vpop.f32.mrf.mxu3  ;;  %v2598_v1 = vand.u32 2147483648, %v2586_v38  ;;  %v2596_v32 = vand.u32 2147483647, %v2586_v38  ;;  %vm2592_vm15 = vweird.f32 %v2586_v38 }
 0x998   :  { %v2580_v26 = vor.u32 1.1754944e-38, %v2579_v5  ;;  %vm2578_vm2 = vcmp.eq.f32.partialorder %v2577_v4, 8.507059e+37 }
 0x999   :  { %v2599_v40 = vor.u32 1.1754944e-38, %v2598_v1  ;;  %vm2597_vm3 = vcmp.eq.f32.partialorder %v2596_v32, 8.507059e+37 }
 0x99a   :  { %v3776_v48 = vpop.eup %3775 }
 0x99b   :  { %v2606_v20 = vadd.f32 1.0, %v3776_v48 }
 0x99c   :  { %v3778_v24 = vpop.eup %3777 }
 0x99d   :  { %v3780_v18 = vpop.eup %3779  ;;  %v2569_v16 = vmul.f32 %v3778_v24, %v2567_v37  ;;  %3781 = vrcp.f32 %v2606_v20  ;;  %vm2574_vm12 = vweird.f32 %v3778_v24  ;;  %v2618_v63 = vand.u32 2147483648, %v2606_v20 }
 0x99e   :  { %v2588_v31 = vmul.f32 %v3780_v18, %v2586_v38  ;;  %3783 = vtanh.f32 %v2562_v25  ;;  %vm2593_vm13 = vweird.f32 %v3780_v18  ;;  %vm2575_vm0 = vmor %vm2573_vm14, %vm2574_vm12  ;;  %vm2612_vm5 = vweird.f32 %v2606_v20 }
 0x99f   :  { %v2570_v17 = vsub.f32 1.0, %v2569_v16  ;;  %vm2594_vm1 = vmor %vm2592_vm15, %vm2593_vm13  ;;  %v2616_v29 = vand.u32 2147483647, %v2606_v20  ;;  %v2619_v61 = vor.u32 1.1754944e-38, %v2618_v63  ;;  %v5086_v16 = vld [vmem:[#allocation40_spill] sm:$0xff] }
 0x9a0   :  { %v2589_v13 = vsub.f32 1.0, %v2588_v31  ;;  %v1654_v31 = vadd.f32 %v5086_v16, %v5065_v59 }
 0x9a1   :  { %v2571_v34 = vmul.f32 %v3778_v24, %v2570_v17  ;;  %vm2617_vm7 = vcmp.eq.f32.partialorder %v2616_v29, 8.507059e+37 }
 0x9a2   :  { %v2590_v6 = vmul.f32 %v3780_v18, %v2589_v13 }
 0x9a3   :  { %v3782_v0 = vpop.eup %3781  ;;  %v2572_v46 = vadd.f32 %v3778_v24, %v2571_v34 }
 0x9a4   :  { %v2591_v2 = vadd.f32 %v3780_v18, %v2590_v6  ;;  %v2608_v39 = vmul.f32 %v3782_v0, %v2606_v20  ;;  %v3784_v43 = vpop.eup %3783  ;;  %vm2613_vm4 = vweird.f32 %v3782_v0 }
 0x9a5   :  { %v2576_v53 = vsel %vm2575_vm0, %v3778_v24, %v2572_v46  ;;  %vm2614_vm6 = vmor %vm2612_vm5, %vm2613_vm4 }
 0x9a6   :  { %v2581_v15 = vsel %vm2578_vm2, %v2580_v26, %v2576_v53  ;;  %v2595_v14 = vsel %vm2594_vm1, %v3780_v18, %v2591_v2  ;;  %v2609_v54 = vsub.f32 1.0, %v2608_v39 }
 0x9a7   :  { %v2600_v49 = vsel %vm2597_vm3, %v2599_v40, %v2595_v14  ;;  %v2623_v47 = vmul.f32 %v3784_v43, %v2581_v15 }
 0x9a8   :  { %v2622_v33 = vmul.f32 %v2600_v49, %v4953_v57  ;;  %v2610_v52 = vmul.f32 %v3782_v0, %v2609_v54  ;;  %v5083_v57 = vld [vmem:[#allocation38_spill] sm:$0xff] }
 0x9a9   :  { %v1596_v36 = vadd.f32 %v5083_v57, %v4761_v50 }
 0x9aa   :  { %v4997_v51 = vadd.f32 %v2623_v47, %v2622_v33  ;;  %v2611_v58 = vadd.f32 %v3782_v0, %v2610_v52 }
 0x9ac   :  { %3785 = vtanh.f32 %v4997_v51  ;;  %v2615_v3 = vsel %vm2614_vm6, %v3782_v0, %v2611_v58 }
 0x9ad   :  { %v2620_v42 = vsel %vm2617_vm7, %v2619_v61, %v2615_v3 }
 0x9b2   :  { %v3786_v21 = vpop.eup %3785 }
 0x9b3   :  { %v2626_v9 = vmul.f32 %v3786_v21, %v2620_v42 }
 0x9b5   :  { %v2632_v10 = vpack.c.bf16 %v2626_v9, %v2626_v9 }
 0x9b7   :  { %2641 = vmatmul.bf16.vlgmr.msrb.gmra.mxu0 %v2632_v10  ;;  %2654 = vmatmul.bf16.vlgmr.msrb.gmra.mxu1 %v2632_v10 }
 0x9b8   :  { %2667 = vmatmul.bf16.vlgmr.msrb.gmra.mxu2 %v2632_v10  ;;  %2680 = vmatmul.bf16.vlgmr.msrb.gmra.mxu3 %v2632_v10 }
 0xa34   :  { %v2642_v62 = vpop.f32.mrf.mxu0  ;;  %v2655_v11 = vpop.f32.mrf.mxu1 }
 0xa35   :  { %v2685_v30 = vadd.f32 %v2642_v62, %v1596_v36  ;;  %v2686_v22 = vadd.f32 %v2655_v11, %v1625_v45 }
 0xa37   :  { %v3406_v27 = vmul.f32 -1.442695, %v2685_v30  ;;  %v3407_v28 = vmul.f32 -1.442695, %v2686_v22  ;;  %v3546_v22 = vld [vmem:[#allocation13 + $0x30] sm:$0xff] }
 0xa39   :  { %3787 = vpow2.f32 %v3406_v27  ;;  %v3545_v27 = vld [vmem:[#allocation13 + $0x28] sm:$0xff] }
 0xa3a   :  { %3789 = vpow2.f32 %v3407_v28  ;;  %v3544_v28 = vld [vmem:[#allocation13 + $0x20] sm:$0xff] }
 0xa3b   :  { %v2668_v41 = vpop.f32.mrf.mxu2  ;;  %v2681_v19 = vpop.f32.mrf.mxu3 }
 0xa3c   :  { %v2688_v37 = vadd.f32 %v2681_v19, %v1683_v12  ;;  %v2644_v38 = vpop.f32.mrf.mxu0  ;;  %v2657_v55 = vpop.f32.mrf.mxu1  ;;  %v2687_v5 = vadd.f32 %v2668_v41, %v1654_v31  ;;  %v1598_v12 = vadd.f32 %v5087_v35, %v4761_v50  ;;  %v5088_v41 = vld [vmem:[#allocation43_spill] sm:$0xff] }
 0xa3d   :  { %v1627_v19 = vadd.f32 %v5088_v41, %v4763_v56 }
 0xa3e   :  { %v3408_v23 = vmul.f32 -1.442695, %v2688_v37  ;;  %v3543_v37 = vld [vmem:[#allocation13 + $0x18] sm:$0xff] }
 0xa3f   :  { %v3788_v48 = vpop.eup %3787 }
 0xa40   :  { %v3790_v7 = vpop.eup %3789  ;;  %v2692_v8 = vadd.f32 1.0, %v3788_v48  ;;  %3791 = vpow2.f32 %v3408_v23 }
 0xa41   :  { %v2711_v20 = vadd.f32 1.0, %v3790_v7 }
 0xa42   :  { %3793 = vrcp.f32 %v2692_v8  ;;  %v2704_v0 = vand.u32 2147483648, %v2692_v8  ;;  %v2702_v2 = vand.u32 2147483647, %v2692_v8  ;;  %vm2698_vm10 = vweird.f32 %v2692_v8 }
 0xa43   :  { %3795 = vrcp.f32 %v2711_v20  ;;  %v2670_v24 = vpop.f32.mrf.mxu2  ;;  %v2683_v25 = vpop.f32.mrf.mxu3  ;;  %v2723_v46 = vand.u32 2147483648, %v2711_v20  ;;  %v2721_v40 = vand.u32 2147483647, %v2711_v20  ;;  %vm2717_vm11 = vweird.f32 %v2711_v20 }
 0xa44   :  { %v2705_v15 = vor.u32 1.1754944e-38, %v2704_v0  ;;  %vm2703_vm14 = vcmp.eq.f32.partialorder %v2702_v2, 8.507059e+37  ;;  %v3541_v24 = vld [vmem:[#allocation13 + $0x8] sm:$0xff] }
 0xa45   :  { %v2724_v49 = vor.u32 1.1754944e-38, %v2723_v46  ;;  %vm2722_vm15 = vcmp.eq.f32.partialorder %v2721_v40, 8.507059e+37  ;;  %v5089_v25 = vld [vmem:[#allocation45_spill] sm:$0xff]  ;;  %v5090_v46 = vld [vmem:[#allocation44_spill] sm:$0xff] }
 0xa46   :  { %v3792_v18 = vpop.eup %3791 }
 0xa47   :  { %v2731_v17 = vadd.f32 1.0, %v3792_v18  ;;  %v1685_v18 = vadd.f32 %v5089_v25, %v4771_v60 }
 0xa48   :  { %v3794_v13 = vpop.eup %3793 }
 0xa49   :  { %v3796_v1 = vpop.eup %3795  ;;  %v2694_v34 = vmul.f32 %v3794_v13, %v2692_v8  ;;  %3797 = vrcp.f32 %v2731_v17  ;;  %vm2699_vm8 = vweird.f32 %v3794_v13  ;;  %v2743_v10 = vand.u32 2147483648, %v2731_v17 }
 0xa4a   :  { %v2713_v4 = vmul.f32 %v3796_v1, %v2711_v20  ;;  %3799 = vtanh.f32 %v2687_v5  ;;  %vm2718_vm9 = vweird.f32 %v3796_v1  ;;  %vm2700_vm12 = vmor %vm2698_vm10, %vm2699_vm8  ;;  %vm2737_vm1 = vweird.f32 %v2731_v17  ;;  %v3542_v20 = vld [vmem:[#allocation13 + $0x10] sm:$0xff] }
 0xa4b   :  { %v2695_v6 = vsub.f32 1.0, %v2694_v34  ;;  %vm2719_vm13 = vmor %vm2717_vm11, %vm2718_vm9  ;;  %v2741_v57 = vand.u32 2147483647, %v2731_v17  ;;  %v2744_v44 = vor.u32 1.1754944e-38, %v2743_v10 }
 0xa4c   :  { %v2714_v32 = vsub.f32 1.0, %v2713_v4 }
 0xa4d   :  { %v2696_v26 = vmul.f32 %v3794_v13, %v2695_v6  ;;  %vm2742_vm3 = vcmp.eq.f32.partialorder %v2741_v57, 8.507059e+37 }
 0xa4e   :  { %v2715_v39 = vmul.f32 %v3796_v1, %v2714_v32 }
 0xa4f   :  { %v3798_v53 = vpop.eup %3797  ;;  %v2697_v43 = vadd.f32 %v3794_v13, %v2696_v26  ;;  %v1656_v26 = vadd.f32 %v5090_v46, %v5065_v59 }
 0xa50   :  { %v2716_v14 = vadd.f32 %v3796_v1, %v2715_v39  ;;  %v2733_v54 = vmul.f32 %v3798_v53, %v2731_v17  ;;  %v3800_v33 = vpop.eup %3799  ;;  %vm2738_vm0 = vweird.f32 %v3798_v53 }
 0xa51   :  { %v2701_v47 = vsel %vm2700_vm12, %v3794_v13, %v2697_v43  ;;  %vm2739_vm2 = vmor %vm2737_vm1, %vm2738_vm0  ;;  %v3540_v13 = vld [vmem:[#allocation13] sm:$0xff] }
 0xa52   :  { %v2706_v52 = vsel %vm2703_vm14, %v2705_v15, %v2701_v47  ;;  %v2720_v58 = vsel %vm2719_vm13, %v3796_v1, %v2716_v14  ;;  %v2734_v63 = vsub.f32 1.0, %v2733_v54 }
 0xa53   :  { %v2725_v29 = vsel %vm2722_vm15, %v2724_v49, %v2720_v58  ;;  %v2748_v3 = vmul.f32 %v3800_v33, %v2706_v52 }
 0xa54   :  { %v2747_v61 = vmul.f32 %v2725_v29, %v4997_v51  ;;  %v2735_v21 = vmul.f32 %v3798_v53, %v2734_v63  ;;  %v3547_v51 = vld [vmem:[#allocation13 + $0x38] sm:$0xff] }
 0xa55   :  { %2946 = vmatpush.bf16.msrb.mxu0 %v3547_v51 }
 0xa56   :  { %v5009_v42 = vadd.f32 %v2748_v3, %v2747_v61  ;;  %v2736_v9 = vadd.f32 %v3798_v53, %v2735_v21 }
 0xa58   :  { %3801 = vtanh.f32 %v5009_v42  ;;  %v2740_v36 = vsel %vm2739_vm2, %v3798_v53, %v2736_v9 }
 0xa59   :  { %v2745_v62 = vsel %vm2742_vm3, %v2744_v44, %v2740_v36  ;;  %2947 = vmatpush.bf16.msrb.mxu0 %v3546_v22 }
 0xa5d   :  { %2948 = vmatpush.bf16.msrb.mxu0 %v3545_v27 }
 0xa5e   :  { %v3802_v45 = vpop.eup %3801 }
 0xa5f   :  { %v2751_v11 = vmul.f32 %v3802_v45, %v2745_v62 }
 0xa61   :  { %v2757_v30 = vpack.c.bf16 %v2751_v11, %v2751_v11  ;;  %2949 = vmatpush.bf16.msrb.mxu0 %v3544_v28 }
 0xa63   :  { %2766 = vmatmul.bf16.vlgmr.msra.gmra.mxu0 %v2757_v30  ;;  %2779 = vmatmul.bf16.vlgmr.msra.gmra.mxu1 %v2757_v30 }
 0xa64   :  { %2792 = vmatmul.bf16.vlgmr.msra.gmra.mxu2 %v2757_v30  ;;  %2805 = vmatmul.bf16.vlgmr.msra.gmra.mxu3 %v2757_v30 }
 0xa65   :  { %2950 = vmatpush.bf16.msrb.mxu0 %v3543_v37 }
 0xa69   :  { %2951 = vmatpush.bf16.msrb.mxu0 %v3542_v20 }
 0xa6d   :  { %2952 = vmatpush.bf16.msrb.mxu0 %v3541_v24 }
 0xa71   :  { %2953 = vmatpush.bf16.msrb.mxu0 %v3540_v13 }
 0xae0   :  { %v2767_v38 = vpop.f32.mrf.mxu0  ;;  %v2780_v55 = vpop.f32.mrf.mxu1 }
 0xae1   :  { %v2810_v23 = vadd.f32 %v2767_v38, %v1598_v12  ;;  %v2811_v48 = vadd.f32 %v2780_v55, %v1627_v19 }
 0xae3   :  { %v3409_v7 = vmul.f32 -1.442695, %v2810_v23  ;;  %v3410_v8 = vmul.f32 -1.442695, %v2811_v48 }
 0xae5   :  { %3803 = vpow2.f32 %v3409_v7 }
 0xae6   :  { %3805 = vpow2.f32 %v3410_v8 }
 0xae7   :  { %v2793_v50 = vpop.f32.mrf.mxu2  ;;  %v2806_v16 = vpop.f32.mrf.mxu3 }
 0xae8   :  { %v2813_v31 = vadd.f32 %v2806_v16, %v1685_v18  ;;  %v2769_v56 = vpop.f32.mrf.mxu0  ;;  %v2782_v17 = vpop.f32.mrf.mxu1  ;;  %v2812_v40 = vadd.f32 %v2793_v50, %v1656_v26 }
 0xaea   :  { %v3411_v5 = vmul.f32 -1.442695, %v2813_v31 }
 0xaeb   :  { %v3804_v1 = vpop.eup %3803 }
 0xaec   :  { %v3806_v34 = vpop.eup %3805  ;;  %v2817_v4 = vadd.f32 1.0, %v3804_v1  ;;  %3807 = vpow2.f32 %v3411_v5 }
 0xaed   :  { %v2836_v6 = vadd.f32 1.0, %v3806_v34 }
 0xaee   :  { %3809 = vrcp.f32 %v2817_v4  ;;  %v2829_v49 = vand.u32 2147483648, %v2817_v4  ;;  %v2827_v52 = vand.u32 2147483647, %v2817_v4  ;;  %vm2823_vm6 = vweird.f32 %v2817_v4 }
 0xaef   :  { %3811 = vrcp.f32 %v2836_v6  ;;  %v2795_v32 = vpop.f32.mrf.mxu2  ;;  %v2808_v0 = vpop.f32.mrf.mxu3  ;;  %v2848_v47 = vand.u32 2147483648, %v2836_v6  ;;  %v2846_v63 = vand.u32 2147483647, %v2836_v6  ;;  %vm2842_vm7 = vweird.f32 %v2836_v6 }
 0xaf0   :  { %v2830_v3 = vor.u32 1.1754944e-38, %v2829_v49  ;;  %vm2828_vm10 = vcmp.eq.f32.partialorder %v2827_v52, 8.507059e+37 }
 0xaf1   :  { %v2849_v9 = vor.u32 1.1754944e-38, %v2848_v47  ;;  %vm2847_vm11 = vcmp.eq.f32.partialorder %v2846_v63, 8.507059e+37 }
 0xaf2   :  { %v3808_v60 = vpop.eup %3807 }
 0xaf3   :  { %v2856_v2 = vadd.f32 1.0, %v3808_v60 }
 0xaf4   :  { %v3810_v39 = vpop.eup %3809 }
 0xaf5   :  { %v3812_v53 = vpop.eup %3811  ;;  %v2819_v43 = vmul.f32 %v3810_v39, %v2817_v4  ;;  %3813 = vrcp.f32 %v2856_v2  ;;  %vm2824_vm4 = vweird.f32 %v3810_v39  ;;  %v2868_v28 = vand.u32 2147483648, %v2856_v2 }
 0xaf6   :  { %v2838_v15 = vmul.f32 %v3812_v53, %v2836_v6  ;;  %3815 = vtanh.f32 %v2812_v40  ;;  %vm2843_vm5 = vweird.f32 %v3812_v53  ;;  %vm2825_vm8 = vmor %vm2823_vm6, %vm2824_vm4  ;;  %vm2862_vm13 = vweird.f32 %v2856_v2 }
 0xaf7   :  { %v2820_v14 = vsub.f32 1.0, %v2819_v43  ;;  %vm2844_vm9 = vmor %vm2842_vm7, %vm2843_vm5  ;;  %v2866_v35 = vand.u32 2147483647, %v2856_v2  ;;  %v2869_v41 = vor.u32 1.1754944e-38, %v2868_v28 }
 0xaf8   :  { %v2839_v54 = vsub.f32 1.0, %v2838_v15 }
 0xaf9   :  { %v2821_v33 = vmul.f32 %v3810_v39, %v2820_v14  ;;  %vm2867_vm15 = vcmp.eq.f32.partialorder %v2866_v35, 8.507059e+37 }
 0xafa   :  { %v2840_v58 = vmul.f32 %v3812_v53, %v2839_v54 }
 0xafb   :  { %v3814_v29 = vpop.eup %3813  ;;  %v2822_v59 = vadd.f32 %v3810_v39, %v2821_v33 }
 0xafc   :  { %v2841_v61 = vadd.f32 %v3812_v53, %v2840_v58  ;;  %v2858_v21 = vmul.f32 %v3814_v29, %v2856_v2  ;;  %v3816_v57 = vpop.eup %3815  ;;  %vm2863_vm12 = vweird.f32 %v3814_v29 }
 0xafd   :  { %v2826_v10 = vsel %vm2825_vm8, %v3810_v39, %v2822_v59  ;;  %vm2864_vm14 = vmor %vm2862_vm13, %vm2863_vm12 }
 0xafe   :  { %v2831_v36 = vsel %vm2828_vm10, %v2830_v3, %v2826_v10  ;;  %v2845_v44 = vsel %vm2844_vm9, %v3812_v53, %v2841_v61  ;;  %v2859_v45 = vsub.f32 1.0, %v2858_v21 }
 0xaff   :  { %v2850_v62 = vsel %vm2847_vm11, %v2849_v9, %v2845_v44  ;;  %v2873_v11 = vmul.f32 %v3816_v57, %v2831_v36 }
 0xb00   :  { %v2872_v30 = vmul.f32 %v2850_v62, %v5009_v42  ;;  %v2860_v51 = vmul.f32 %v3814_v29, %v2859_v45  ;;  %v3562_v42 = vld [vmem:[%s5033_s6] ss:$0 sm:$0xff] }
 0xb02   :  { %v2874_v22 = vadd.f32 %v2873_v11, %v2872_v30  ;;  %v2861_v27 = vadd.f32 %v3814_v29, %v2860_v51 }
 0xb04   :  { %3817 = vtanh.f32 %v2874_v22  ;;  %v2865_v12 = vsel %vm2864_vm14, %v3814_v29, %v2861_v27 }
 0xb05   :  { %v2870_v37 = vsel %vm2867_vm15, %v2869_v41, %v2865_v12 }
 0xb0a   :  { %v3818_v19 = vpop.eup %3817 }
 0xb0b   :  { %v2876_v38 = vmul.f32 %v3818_v19, %v2870_v37 }
 0xb0d   :  { %v2877_v55 = vpack.c.bf16 %v2876_v38, %v2876_v38 }
 0xb0f   :  { %2954 = vmatmul.bf16.vlgmr.msrb.gmra.mxu0 %v2877_v55 }
 0xb8c   :  { %v2955_v23 = vpop.f32.mrf.mxu0 }
 0xb8d   :  { %v2956_v48 = vadd.f32 %v3562_v42, %v2955_v23 }
 0xb8f   :  { %2959 = vst [vmem:[#allocation15] sm:$0xff] %v2956_v48 }
 0xb90   :  { %2970 = dma.vmem_to_hbm [thread:$0]  %s2966_s10, 128, %s2968_s14, [#allocation6]  }
 0xb94   :  { %v2957_v7 = vpop.f32.mrf.mxu0 }
 0xb95   :  { %3995 = dma.done.wait [#allocation6], 128  }
 0xb96   :  { %3996 = vsyncadd [#allocation6], 4294967168 }
 0xb97   :  { %2975 = vsyncpa [#allocation5], 1 }
 0xb98   :  { %2976 = vsyncpa [#allocation8], 1 }
 0xb99   :  { %2977 = vsyncpa [#allocation11], 1 }
 0xb9a   :  { %2978 = vsyncpa [#allocation14], 1 }
 0xb9b   :  { %2979 = vsyncpa [#allocation6], 1 }

// kernel: tpu_custom_call.1
= control target key start
LH: loop header
LB: loop body
LE: loop exit
PB: predicated region body
PF: predicated region fallthrough
CT: control target
= control target key end

     0   :  { %12 = vsyncpa [#allocation5], 0  ;;  %s5027_s0 = inlined_call_operand.hbm [shape: f32[8,8,512], index: 0, kind: input, shape index: {}]   ;;  %s5028_s1 = inlined_call_operand.hbm [shape: bf16[128,512], index: 1, kind: input, shape index: {}]   ;;  %s5029_s2 = inlined_call_operand.hbm [shape: bf16[128,512], index: 2, kind: input, shape index: {}]   ;;  %s5030_s3 = inlined_call_operand.hbm [shape: bf16[128,512], index: 3, kind: input, shape index: {}]   ;;  %s5031_s4 = inlined_call_operand.hbm [shape: f32[1,512], index: 4, kind: input, shape index: {}]   ;;  %s5032_s5 = inlined_call_operand.hbm [shape: bf16[128,128], index: 5, kind: input, shape index: {}]   ;;  %s5033_s6 = inlined_call_operand.vmem [shape: f32[1,128], index: 6, kind: input, shape index: {}]   ;;  %s5034_s7 = inlined_call_operand.hbm [shape: f32[8,128], index: 7, kind: output, shape index: {}]  }
   0x1   :  { %13 = vsyncpa [#allocation8], 0 }
   0x2   :  { %14 = vsyncpa [#allocation11], 0 }
   0x3   :  { %15 = vsyncpa [#allocation14], 0  ;;  %s34_s26 = sshll.u32 %s5028_s1, 4  ;;  %s35_s26 = int_to_ptr.hbm [resolvable:$true] %s34_s26 }
   0x4   :  { %16 = vsyncpa [#allocation6], 0  ;;  %s3997_s27 = smov [#allocation7]   ;;  %s60_s8 = sshll.u32 %s5030_s3, 4  ;;  %s61_s8 = int_to_ptr.hbm [resolvable:$true] %s60_s8 }
   0x5   :  { %s36_s28 = sshll.u32 %s3997_s27, 4  ;;  %s3998_s9 = smov 256   ;;  %s37_s28 = int_to_ptr.vmem [resolvable:$true] %s36_s28 }
   0x6   :  { %s3999_s10 = smov 16   ;;  %s4000_s11 = smov [#allocation10]  }
   0x7   :  { %42 = dma.hbm_to_vmem [thread:$0]  %s35_s26, 4096, %s37_s28, [#allocation8], %s3998_s9, %s3998_s9, %s3999_s10  }
   0x8   :  { %s62_s12 = sshll.u32 %s4000_s11, 4  ;;  %s21_s15 = sshll.u32 %s5027_s0, 4  ;;  %s63_s12 = int_to_ptr.vmem [resolvable:$true] %s62_s12  ;;  %s22_s15 = int_to_ptr.hbm [resolvable:$true] %s21_s15 }
   0x9   :  { %68 = dma.hbm_to_vmem [thread:$0]  %s61_s8, 4096, %s63_s12, [#allocation11], %s3998_s9, %s3998_s9, %s3999_s10  }
   0xa   :  { %s4001_s1 = smov [#allocation4]   ;;  %s47_s3 = sshll.u32 %s5029_s2, 4  ;;  %s48_s3 = int_to_ptr.hbm [resolvable:$true] %s47_s3 }
   0xb   :  { %s23_s16 = sshll.u32 %s4001_s1, 4  ;;  %s4002_s19 = smov 512   ;;  %s24_s16 = int_to_ptr.vmem [resolvable:$true] %s23_s16 }
   0xc   :  { %s4003_s20 = smov 32   ;;  %s4004_s21 = smov [#allocation9]  }
   0xd   :  { %29 = dma.hbm_to_vmem [thread:$0]  %s22_s15, 4096, %s24_s16, [#allocation5], %s4002_s19, %s4002_s19, %s4003_s20  }
   0xe   :  { %s49_s22 = sshll.u32 %s4004_s21, 4  ;;  %s74_s0 = sshll.u32 %s5031_s4, 4  ;;  %s50_s22 = int_to_ptr.vmem [resolvable:$true] %s49_s22  ;;  %s75_s0 = int_to_ptr.hbm [resolvable:$true] %s74_s0 }
   0xf   :  { %55 = dma.hbm_to_vmem [thread:$0]  %s48_s3, 4096, %s50_s22, [#allocation8], %s3998_s9, %s3998_s9, %s3999_s10  }
  0x10   :  { %s84_s27 = sshll.u32 %s5032_s5, 4  ;;  %s4005_s28 = smov [#allocation12]   ;;  %s85_s27 = int_to_ptr.hbm [resolvable:$true] %s84_s27 }
  0x11   :  { %s76_s29 = sshll.u32 %s4005_s28, 4  ;;  %s4006_s2 = smov [#allocation13]   ;;  %s77_s29 = int_to_ptr.vmem [resolvable:$true] %s76_s29 }
  0x12   :  { %79 = dma.hbm_to_vmem [thread:$0]  %s75_s0, 64, %s77_s29, [#allocation11]  }
  0x13   :  { %s86_s30 = sshll.u32 %s4006_s2, 4  ;;  %s4007_s8 = smov 64   ;;  %s87_s30 = int_to_ptr.vmem [resolvable:$true] %s86_s30 }
  0x14   :  { %s4008_s11 = smov 4  }
  0x15   :  { %92 = dma.hbm_to_vmem [thread:$0]  %s85_s27, 1024, %s87_s30, [#allocation14], %s4007_s8, %s4007_s8, %s4008_s11  }
  0x16   :  { %3987 = dma.done.wait [#allocation5], 4096  }
  0x17   :  { %3988 = vsyncadd [#allocation5], 4294963200 }
  0x18   :  { %3989 = dma.done.wait [#allocation8], 8192  }
  0x19   :  { %3990 = vsyncadd [#allocation8], 4294959104 }
  0x1a   :  { %3991 = dma.done.wait [#allocation11], 4160  }
  0x1b   :  { %3992 = vsyncadd [#allocation11], 4294963136 }
  0x1c   :  { %3993 = dma.done.wait [#allocation14], 1024  }
  0x1d   :  { %3994 = vsyncadd [#allocation14], 4294966272  ;;  %v3094_v0 = vld [vmem:[#allocation7 + $0xe0] sm:$0xf]  ;;  %v3474_v1 = vld [vmem:[#allocation7 + $0xec] sm:$0xf0] }
  0x1e   :  { %v3472_v2 = vld [vmem:[#allocation7 + $0xe4] sm:$0xf]  ;;  %v4069_v3 = vor.u32 %v3474_v1, %v3094_v0  ;;  %v3096_v4 = vld [vmem:[#allocation7 + $0xf0] sm:$0xf0]  ;;  %v3473_v5 = vld [vmem:[#allocation7 + $0xec] sm:$0xf] }
  0x1f   :  { %v3104_v6 = vld [vmem:[#allocation7 + $0xf8] sm:$0xf0]  ;;  %v4071_v7 = vor.u32 %v3472_v2, %v3096_v4  ;;  %v3078_v9 = vld [vmem:[#allocation7 + $0xc0] sm:$0xf]  ;;  %v3470_v10 = vld [vmem:[#allocation7 + $0xcc] sm:$0xf0] }
  0x20   :  { %v4073_v8 = vor.u32 %v3473_v5, %v3104_v6  ;;  %v3468_v11 = vld [vmem:[#allocation7 + $0xc4] sm:$0xf]  ;;  %316 = vmatpush.bf16.msra.mxu0 %v4069_v3  ;;  %v4076_v12 = vor.u32 %v3470_v10, %v3078_v9  ;;  %v3080_v13 = vld [vmem:[#allocation7 + $0xd0] sm:$0xf0]  ;;  %v3469_v14 = vld [vmem:[#allocation7 + $0xcc] sm:$0xf] }
  0x21   :  { %v3088_v15 = vld [vmem:[#allocation7 + $0xd8] sm:$0xf0]  ;;  %329 = vmatpush.bf16.msra.mxu1 %v4071_v7  ;;  %v4080_v16 = vor.u32 %v3468_v11, %v3080_v13  ;;  %v3102_v18 = vld [vmem:[#allocation7 + $0xe8] sm:$0xf]  ;;  %v3475_v19 = vld [vmem:[#allocation7 + $0xf4] sm:$0xf0] }
  0x22   :  { %355 = vmatpush.bf16.msra.mxu3 %v4073_v8  ;;  %v4082_v17 = vor.u32 %v3469_v14, %v3088_v15  ;;  %v3062_v20 = vld [vmem:[#allocation7 + $0xa0] sm:$0xf]  ;;  %v4084_v21 = vor.u32 %v3475_v19, %v3102_v18  ;;  %v3466_v22 = vld [vmem:[#allocation7 + $0xac] sm:$0xf0]  ;;  %v3464_v23 = vld [vmem:[#allocation7 + $0xa4] sm:$0xf] }
  0x23   :  { %v3064_v24 = vld [vmem:[#allocation7 + $0xb0] sm:$0xf0]  ;;  %v3465_v25 = vld [vmem:[#allocation7 + $0xac] sm:$0xf]  ;;  %v3072_v26 = vld [vmem:[#allocation7 + $0xb8] sm:$0xf0]  ;;  %v4088_v28 = vor.u32 %v3466_v22, %v3062_v20 }
  0x24   :  { %v3086_v27 = vld [vmem:[#allocation7 + $0xc8] sm:$0xf]  ;;  %317 = vmatpush.bf16.msra.mxu0 %v4076_v12  ;;  %342 = vmatpush.bf16.msra.mxu2 %v4084_v21  ;;  %v3471_v29 = vld [vmem:[#allocation7 + $0xd4] sm:$0xf0]  ;;  %v3046_v30 = vld [vmem:[#allocation7 + $0x80] sm:$0xf]  ;;  %v4092_v32 = vor.u32 %v3464_v23, %v3064_v24  ;;  %v4094_v33 = vor.u32 %v3465_v25, %v3072_v26 }
  0x25   :  { %v3462_v31 = vld [vmem:[#allocation7 + $0x8c] sm:$0xf0]  ;;  %330 = vmatpush.bf16.msra.mxu1 %v4080_v16  ;;  %v4096_v34 = vor.u32 %v3471_v29, %v3086_v27  ;;  %v3460_v35 = vld [vmem:[#allocation7 + $0x84] sm:$0xf]  ;;  %v3048_v36 = vld [vmem:[#allocation7 + $0x90] sm:$0xf0] }
  0x26   :  { %356 = vmatpush.bf16.msra.mxu3 %v4082_v17  ;;  %v3461_v37 = vld [vmem:[#allocation7 + $0x8c] sm:$0xf]  ;;  %v3056_v38 = vld [vmem:[#allocation7 + $0x98] sm:$0xf0]  ;;  %v3070_v39 = vld [vmem:[#allocation7 + $0xa8] sm:$0xf]  ;;  %v4100_v41 = vor.u32 %v3462_v31, %v3046_v30  ;;  %v4106_v45 = vor.u32 %v3460_v35, %v3048_v36 }
  0x27   :  { %v3467_v40 = vld [vmem:[#allocation7 + $0xb4] sm:$0xf0]  ;;  %v3030_v43 = vld [vmem:[#allocation7 + $0x60] sm:$0xf]  ;;  %v3458_v44 = vld [vmem:[#allocation7 + $0x6c] sm:$0xf0]  ;;  %v4108_v46 = vor.u32 %v3461_v37, %v3056_v38 }
  0x28   :  { %318 = vmatpush.bf16.msra.mxu0 %v4088_v28  ;;  %343 = vmatpush.bf16.msra.mxu2 %v4096_v34  ;;  %v4102_v42 = vor.u32 %v3467_v40, %v3070_v39  ;;  %v3456_v47 = vld [vmem:[#allocation7 + $0x64] sm:$0xf]  ;;  %v3054_v48 = vld [vmem:[#allocation7 + $0x88] sm:$0xf]  ;;  %v3463_v49 = vld [vmem:[#allocation7 + $0x94] sm:$0xf0]  ;;  %v4112_v53 = vor.u32 %v3458_v44, %v3030_v43 }
  0x29   :  { %331 = vmatpush.bf16.msra.mxu1 %v4092_v32  ;;  %v3032_v50 = vld [vmem:[#allocation7 + $0x70] sm:$0xf0]  ;;  %v3457_v51 = vld [vmem:[#allocation7 + $0x6c] sm:$0xf]  ;;  %v3040_v52 = vld [vmem:[#allocation7 + $0x78] sm:$0xf0]  ;;  %v4114_v54 = vor.u32 %v3463_v49, %v3054_v48 }
  0x2a   :  { %357 = vmatpush.bf16.msra.mxu3 %v4094_v33  ;;  %v3014_v55 = vld [vmem:[#allocation7 + $0x40] sm:$0xf]  ;;  %v3454_v56 = vld [vmem:[#allocation7 + $0x4c] sm:$0xf0]  ;;  %v4118_v57 = vor.u32 %v3456_v47, %v3032_v50  ;;  %v4120_v58 = vor.u32 %v3457_v51, %v3040_v52  ;;  %v3452_v59 = vld [vmem:[#allocation7 + $0x44] sm:$0xf] }
  0x2b   :  { %v3038_v60 = vld [vmem:[#allocation7 + $0x68] sm:$0xf]  ;;  %v3459_v61 = vld [vmem:[#allocation7 + $0x74] sm:$0xf0]  ;;  %v3016_v62 = vld [vmem:[#allocation7 + $0x50] sm:$0xf0]  ;;  %v4124_v1 = vor.u32 %v3454_v56, %v3014_v55 }
  0x2c   :  { %319 = vmatpush.bf16.msra.mxu0 %v4100_v41  ;;  %344 = vmatpush.bf16.msra.mxu2 %v4102_v42  ;;  %v3453_v63 = vld [vmem:[#allocation7 + $0x4c] sm:$0xf]  ;;  %v3024_v0 = vld [vmem:[#allocation7 + $0x58] sm:$0xf0]  ;;  %v4126_v2 = vor.u32 %v3459_v61, %v3038_v60  ;;  %v2998_v4 = vld [vmem:[#allocation7 + $0x20] sm:$0xf]  ;;  %v4130_v9 = vor.u32 %v3452_v59, %v3016_v62 }
  0x2d   :  { %332 = vmatpush.bf16.msra.mxu1 %v4106_v45  ;;  %v3450_v5 = vld [vmem:[#allocation7 + $0x2c] sm:$0xf0]  ;;  %v3448_v6 = vld [vmem:[#allocation7 + $0x24] sm:$0xf]  ;;  %v4132_v10 = vor.u32 %v3453_v63, %v3024_v0  ;;  %v3000_v11 = vld [vmem:[#allocation7 + $0x30] sm:$0xf0] }
  0x2e   :  { %358 = vmatpush.bf16.msra.mxu3 %v4108_v46  ;;  %v3022_v13 = vld [vmem:[#allocation7 + $0x48] sm:$0xf]  ;;  %v3455_v14 = vld [vmem:[#allocation7 + $0x54] sm:$0xf0]  ;;  %v3449_v15 = vld [vmem:[#allocation7 + $0x2c] sm:$0xf]  ;;  %v4136_v19 = vor.u32 %v3450_v5, %v2998_v4  ;;  %v4142_v24 = vor.u32 %v3448_v6, %v3000_v11 }
  0x2f   :  { %v3008_v18 = vld [vmem:[#allocation7 + $0x38] sm:$0xf0]  ;;  %v4138_v20 = vor.u32 %v3455_v14, %v3022_v13  ;;  %v2982_v22 = vld [vmem:[#allocation7] sm:$0xf]  ;;  %v3446_v23 = vld [vmem:[#allocation7 + $0xc] sm:$0xf0] }
  0x30   :  { %320 = vmatpush.bf16.msra.mxu0 %v4112_v53  ;;  %345 = vmatpush.bf16.msra.mxu2 %v4114_v54  ;;  %v4144_v25 = vor.u32 %v3449_v15, %v3008_v18  ;;  %v3444_v26 = vld [vmem:[#allocation7 + $0x4] sm:$0xf]  ;;  %v3006_v27 = vld [vmem:[#allocation7 + $0x28] sm:$0xf]  ;;  %v3451_v29 = vld [vmem:[#allocation7 + $0x34] sm:$0xf0]  ;;  %v4148_v36 = vor.u32 %v3446_v23, %v2982_v22 }
  0x31   :  { %333 = vmatpush.bf16.msra.mxu1 %v4118_v57  ;;  %v2984_v30 = vld [vmem:[#allocation7 + $0x10] sm:$0xf0]  ;;  %v3445_v31 = vld [vmem:[#allocation7 + $0xc] sm:$0xf]  ;;  %v2992_v35 = vld [vmem:[#allocation7 + $0x18] sm:$0xf0]  ;;  %v4150_v37 = vor.u32 %v3451_v29, %v3006_v27 }
  0x32   :  { %359 = vmatpush.bf16.msra.mxu3 %v4120_v58  ;;  %v4154_v38 = vor.u32 %v3444_v26, %v2984_v30  ;;  %v4156_v39 = vor.u32 %v3445_v31, %v2992_v35  ;;  %v2990_v40 = vld [vmem:[#allocation7 + $0x8] sm:$0xf]  ;;  %v3447_v43 = vld [vmem:[#allocation7 + $0x14] sm:$0xf0]  ;;  %v4009_v47 = vmov 0   ;;  %v152_v48 = vld [vmem:[#allocation4] sm:$0xff] }
  0x33   :  { %v4162_v44 = vor.u32 %v3447_v43, %v2990_v40  ;;  %v153_v49 = vld [vmem:[#allocation4 + $0x8] sm:$0xff]  ;;  %v155_v60 = vld [vmem:[#allocation4 + $0x18] sm:$0xff]  ;;  %v154_v15 = vld [vmem:[#allocation4 + $0x10] sm:$0xff]  ;;  %s4010_s9 = smov [#allocation15]   ;;  %s2967_s14 = sshll.u32 %s5034_s7, 4  ;;  %s2968_s14 = int_to_ptr.hbm [resolvable:$true] %s2967_s14 }
  0x34   :  { %321 = vmatpush.bf16.msra.mxu0 %v4124_v1  ;;  %346 = vmatpush.bf16.msra.mxu2 %v4126_v2  ;;  %s2965_s10 = sshll.u32 %s4010_s9, 4  ;;  %s2966_s10 = int_to_ptr.vmem [resolvable:$true] %s2965_s10 }
  0x35   :  { %334 = vmatpush.bf16.msra.mxu1 %v4130_v9 }
  0x36   :  { %360 = vmatpush.bf16.msra.mxu3 %v4132_v10 }
  0x38   :  { %322 = vmatpush.bf16.msra.mxu0 %v4136_v19  ;;  %347 = vmatpush.bf16.msra.mxu2 %v4138_v20 }
  0x39   :  { %335 = vmatpush.bf16.msra.mxu1 %v4142_v24 }
  0x3a   :  { %361 = vmatpush.bf16.msra.mxu3 %v4144_v25 }
  0x3c   :  { %323 = vmatpush.bf16.msra.mxu0 %v4148_v36  ;;  %348 = vmatpush.bf16.msra.mxu2 %v4150_v37 }
  0x3d   :  { %336 = vmatpush.bf16.msra.mxu1 %v4154_v38 }
  0x3e   :  { %362 = vmatpush.bf16.msra.mxu3 %v4156_v39 }
  0x3f   :  { %324 = vmatmul.bf16.vlgmr.msra.gmra.mxu0 %v4009_v47 }
  0x40   :  { %442 = vmatpush.bf16.msrb.mxu0 %v4069_v3  ;;  %337 = vmatmul.bf16.vlgmr.msra.gmra.mxu1 %v4009_v47 }
  0x41   :  { %455 = vmatpush.bf16.msrb.mxu1 %v4071_v7  ;;  %363 = vmatmul.bf16.vlgmr.msra.gmra.mxu3 %v4009_v47 }
  0x42   :  { %481 = vmatpush.bf16.msrb.mxu3 %v4073_v8  ;;  %349 = vmatpush.bf16.msra.mxu2 %v4162_v44 }
  0x44   :  { %443 = vmatpush.bf16.msrb.mxu0 %v4076_v12 }
  0x45   :  { %456 = vmatpush.bf16.msrb.mxu1 %v4080_v16  ;;  %350 = vmatmul.bf16.vlgmr.msra.gmra.mxu2 %v4009_v47 }
  0x46   :  { %468 = vmatpush.bf16.msrb.mxu2 %v4084_v21  ;;  %482 = vmatpush.bf16.msrb.mxu3 %v4082_v17 }
  0x48   :  { %444 = vmatpush.bf16.msrb.mxu0 %v4088_v28 }
  0x49   :  { %457 = vmatpush.bf16.msrb.mxu1 %v4092_v32 }
  0x4a   :  { %469 = vmatpush.bf16.msrb.mxu2 %v4096_v34  ;;  %483 = vmatpush.bf16.msrb.mxu3 %v4094_v33 }
  0x4c   :  { %445 = vmatpush.bf16.msrb.mxu0 %v4100_v41 }
  0x4d   :  { %458 = vmatpush.bf16.msrb.mxu1 %v4106_v45 }
  0x4e   :  { %470 = vmatpush.bf16.msrb.mxu2 %v4102_v42  ;;  %484 = vmatpush.bf16.msrb.mxu3 %v4108_v46 }
  0x50   :  { %446 = vmatpush.bf16.msrb.mxu0 %v4112_v53 }
  0x51   :  { %459 = vmatpush.bf16.msrb.mxu1 %v4118_v57 }
  0x52   :  { %471 = vmatpush.bf16.msrb.mxu2 %v4114_v54  ;;  %485 = vmatpush.bf16.msrb.mxu3 %v4120_v58 }
  0x54   :  { %447 = vmatpush.bf16.msrb.mxu0 %v4124_v1 }
  0x55   :  { %460 = vmatpush.bf16.msrb.mxu1 %v4130_v9 }
  0x56   :  { %472 = vmatpush.bf16.msrb.mxu2 %v4126_v2  ;;  %486 = vmatpush.bf16.msrb.mxu3 %v4132_v10 }
  0x58   :  { %448 = vmatpush.bf16.msrb.mxu0 %v4136_v19 }
  0x59   :  { %461 = vmatpush.bf16.msrb.mxu1 %v4142_v24 }
  0x5a   :  { %473 = vmatpush.bf16.msrb.mxu2 %v4138_v20  ;;  %487 = vmatpush.bf16.msrb.mxu3 %v4144_v25 }
  0x5c   :  { %449 = vmatpush.bf16.msrb.mxu0 %v4148_v36 }
  0x5d   :  { %462 = vmatpush.bf16.msrb.mxu1 %v4154_v38 }
  0x5e   :  { %474 = vmatpush.bf16.msrb.mxu2 %v4150_v37  ;;  %488 = vmatpush.bf16.msrb.mxu3 %v4156_v39 }
  0x60   :  { %569 = vmatpush.bf16.msra.mxu0 %v4069_v3 }
  0x61   :  { %582 = vmatpush.bf16.msra.mxu1 %v4071_v7 }
  0x62   :  { %608 = vmatpush.bf16.msra.mxu3 %v4073_v8  ;;  %475 = vmatpush.bf16.msrb.mxu2 %v4162_v44 }
  0x64   :  { %570 = vmatpush.bf16.msra.mxu0 %v4076_v12 }
  0x65   :  { %583 = vmatpush.bf16.msra.mxu1 %v4080_v16 }
  0x66   :  { %595 = vmatpush.bf16.msra.mxu2 %v4084_v21  ;;  %609 = vmatpush.bf16.msra.mxu3 %v4082_v17 }
  0x68   :  { %571 = vmatpush.bf16.msra.mxu0 %v4088_v28 }
  0x69   :  { %584 = vmatpush.bf16.msra.mxu1 %v4092_v32 }
  0x6a   :  { %596 = vmatpush.bf16.msra.mxu2 %v4096_v34  ;;  %610 = vmatpush.bf16.msra.mxu3 %v4094_v33 }
  0x6c   :  { %572 = vmatpush.bf16.msra.mxu0 %v4100_v41 }
  0x6d   :  { %585 = vmatpush.bf16.msra.mxu1 %v4106_v45 }
  0x6e   :  { %597 = vmatpush.bf16.msra.mxu2 %v4102_v42  ;;  %611 = vmatpush.bf16.msra.mxu3 %v4108_v46 }
  0x70   :  { %573 = vmatpush.bf16.msra.mxu0 %v4112_v53 }
  0x71   :  { %586 = vmatpush.bf16.msra.mxu1 %v4118_v57 }
  0x72   :  { %598 = vmatpush.bf16.msra.mxu2 %v4114_v54  ;;  %612 = vmatpush.bf16.msra.mxu3 %v4120_v58 }
  0x74   :  { %574 = vmatpush.bf16.msra.mxu0 %v4124_v1 }
  0x75   :  { %587 = vmatpush.bf16.msra.mxu1 %v4130_v9 }
  0x76   :  { %599 = vmatpush.bf16.msra.mxu2 %v4126_v2  ;;  %613 = vmatpush.bf16.msra.mxu3 %v4132_v10 }
  0x78   :  { %575 = vmatpush.bf16.msra.mxu0 %v4136_v19 }
  0x79   :  { %588 = vmatpush.bf16.msra.mxu1 %v4142_v24 }
  0x7a   :  { %600 = vmatpush.bf16.msra.mxu2 %v4138_v20  ;;  %614 = vmatpush.bf16.msra.mxu3 %v4144_v25 }
  0x7c   :  { %576 = vmatpush.bf16.msra.mxu0 %v4148_v36 }
  0x7d   :  { %589 = vmatpush.bf16.msra.mxu1 %v4154_v38 }
  0x7e   :  { %601 = vmatpush.bf16.msra.mxu2 %v4150_v37  ;;  %615 = vmatpush.bf16.msra.mxu3 %v4156_v39 }
  0x82   :  { %602 = vmatpush.bf16.msra.mxu2 %v4162_v44 }
  0xbc   :  { %v325_v50 = vpop.f32.mrf.mxu0 }
  0xbd   :  { %v368_v51 = vadd.f32 %v325_v50, %v152_v48  ;;  %v338_v52 = vpop.f32.mrf.mxu1 }
  0xbe   :  { %v369_v55 = vadd.f32 %v338_v52, %v153_v49 }
  0xbf   :  { %v3108_v56 = vmul.f32 -1.442695, %v368_v51 }
  0xc0   :  { %v3109_v59 = vmul.f32 -1.442695, %v369_v55 }
  0xc1   :  { %3563 = vpow2.f32 %v3108_v56 }
  0xc2   :  { %3565 = vpow2.f32 %v3109_v59 }
  0xc4   :  { %v364_v61 = vpop.f32.mrf.mxu3  ;;  %v327_v63 = vpop.f32.mrf.mxu0 }
  0xc5   :  { %v371_v62 = vadd.f32 %v364_v61, %v155_v60  ;;  %v340_v0 = vpop.f32.mrf.mxu1 }
  0xc7   :  { %v3110_v4 = vmul.f32 -1.442695, %v371_v62  ;;  %v3564_v5 = vpop.eup %3563 }
  0xc8   :  { %v351_v6 = vpop.f32.mrf.mxu2  ;;  %v3566_v11 = vpop.eup %3565  ;;  %v375_v13 = vadd.f32 1.0, %v3564_v5 }
  0xc9   :  { %3567 = vpow2.f32 %v3110_v4  ;;  %v394_v14 = vadd.f32 1.0, %v3566_v11  ;;  %v370_v23 = vadd.f32 %v351_v6, %v154_v15 }
  0xca   :  { %3569 = vrcp.f32 %v375_v13  ;;  %v387_v48 = vand.u32 2147483648, %v375_v13  ;;  %v385_v51 = vand.u32 2147483647, %v375_v13  ;;  %vm381_vm2 = vweird.f32 %v375_v13 }
  0xcb   :  { %3571 = vrcp.f32 %v394_v14  ;;  %v406_v49 = vand.u32 2147483648, %v394_v14  ;;  %v404_v55 = vand.u32 2147483647, %v394_v14  ;;  %vm400_vm3 = vweird.f32 %v394_v14 }
  0xcc   :  { %v366_v18 = vpop.f32.mrf.mxu3  ;;  %v388_v62 = vor.u32 1.1754944e-38, %v387_v48  ;;  %vm386_vm5 = vcmp.eq.f32.partialorder %v385_v51, 8.507059e+37 }
  0xcd   :  { %v407_v0 = vor.u32 1.1754944e-38, %v406_v49  ;;  %vm405_vm7 = vcmp.eq.f32.partialorder %v404_v55, 8.507059e+37  ;;  %v438_v49 = vld [vmem:[#allocation4 + $0x28] sm:$0xff] }
  0xcf   :  { %v3568_v22 = vpop.eup %3567 }
  0xd0   :  { %v414_v26 = vadd.f32 1.0, %v3568_v22  ;;  %v353_v27 = vpop.f32.mrf.mxu2  ;;  %v3570_v29 = vpop.eup %3569 }
  0xd1   :  { %v3572_v30 = vpop.eup %3571  ;;  %v377_v31 = vmul.f32 %v3570_v29, %v375_v13  ;;  %vm382_vm0 = vweird.f32 %v3570_v29 }
  0xd2   :  { %3573 = vrcp.f32 %v414_v26  ;;  %v396_v35 = vmul.f32 %v3572_v30, %v394_v14  ;;  %vm401_vm1 = vweird.f32 %v3572_v30  ;;  %vm383_vm4 = vmor %vm381_vm2, %vm382_vm0  ;;  %v426_v14 = vand.u32 2147483648, %v414_v26 }
  0xd3   :  { %3575 = vtanh.f32 %v370_v23  ;;  %v378_v40 = vsub.f32 1.0, %v377_v31  ;;  %vm402_vm6 = vmor %vm400_vm3, %vm401_vm1  ;;  %vm420_vm9 = vweird.f32 %v414_v26  ;;  %v424_v31 = vand.u32 2147483647, %v414_v26 }
  0xd4   :  { %v397_v43 = vsub.f32 1.0, %v396_v35  ;;  %v427_v35 = vor.u32 1.1754944e-38, %v426_v14 }
  0xd5   :  { %v379_v50 = vmul.f32 %v3570_v29, %v378_v40  ;;  %vm425_vm11 = vcmp.eq.f32.partialorder %v424_v31, 8.507059e+37 }
  0xd6   :  { %v398_v52 = vmul.f32 %v3572_v30, %v397_v43 }
  0xd7   :  { %v380_v59 = vadd.f32 %v3570_v29, %v379_v50 }
  0xd8   :  { %v3574_v56 = vpop.eup %3573  ;;  %v399_v63 = vadd.f32 %v3572_v30, %v398_v52 }
  0xd9   :  { %v3576_v60 = vpop.eup %3575  ;;  %v416_v61 = vmul.f32 %v3574_v56, %v414_v26  ;;  %v384_v4 = vsel %vm383_vm4, %v3570_v29, %v380_v59  ;;  %vm421_vm8 = vweird.f32 %v3574_v56  ;;  %v437_v26 = vld [vmem:[#allocation4 + $0x20] sm:$0xff] }
  0xda   :  { %v389_v6 = vsel %vm386_vm5, %v388_v62, %v384_v4  ;;  %v403_v11 = vsel %vm402_vm6, %v3572_v30, %v399_v63  ;;  %vm422_vm10 = vmor %vm420_vm9, %vm421_vm8 }
  0xdb   :  { %v417_v5 = vsub.f32 1.0, %v416_v61  ;;  %v408_v15 = vsel %vm405_vm7, %v407_v0, %v403_v11  ;;  %v431_v18 = vmul.f32 %v3576_v60, %v389_v6  ;;  %v440_v60 = vld [vmem:[#allocation4 + $0x38] sm:$0xff] }
  0xdc   :  { %v430_v23 = vmul.f32 0.0, %v408_v15 }
  0xdd   :  { %v418_v22 = vmul.f32 %v3574_v56, %v417_v5 }
  0xde   :  { %v4233_v27 = vadd.f32 %v431_v18, %v430_v23 }
  0xdf   :  { %v419_v13 = vadd.f32 %v3574_v56, %v418_v22 }
  0xe0   :  { %3577 = vtanh.f32 %v4233_v27 }
  0xe1   :  { %v423_v29 = vsel %vm422_vm10, %v3574_v56, %v419_v13  ;;  %v439_v13 = vld [vmem:[#allocation4 + $0x30] sm:$0xff] }
  0xe2   :  { %v428_v30 = vsel %vm425_vm11, %v427_v35, %v423_v29 }
  0xe6   :  { %v3578_v40 = vpop.eup %3577 }
  0xe7   :  { %v4236_v43 = vmul.f32 %v3578_v40, %v428_v30 }
  0xe9   :  { %v441_v48 = vpack.c.bf16 %v4236_v43, %v4236_v43 }
  0xeb   :  { %450 = vmatmul.bf16.vlgmr.msrb.gmra.mxu0 %v441_v48  ;;  %463 = vmatmul.bf16.vlgmr.msrb.gmra.mxu1 %v441_v48 }
  0xec   :  { %476 = vmatmul.bf16.vlgmr.msrb.gmra.mxu2 %v441_v48  ;;  %489 = vmatmul.bf16.vlgmr.msrb.gmra.mxu3 %v441_v48 }
  0xed   :  { %696 = vmatpush.bf16.msrb.mxu0 %v4069_v3  ;;  %709 = vmatpush.bf16.msrb.mxu1 %v4071_v7 }
  0xee   :  { %722 = vmatpush.bf16.msrb.mxu2 %v4084_v21  ;;  %735 = vmatpush.bf16.msrb.mxu3 %v4073_v8 }
  0xf1   :  { %697 = vmatpush.bf16.msrb.mxu0 %v4076_v12  ;;  %710 = vmatpush.bf16.msrb.mxu1 %v4080_v16 }
  0xf2   :  { %723 = vmatpush.bf16.msrb.mxu2 %v4096_v34  ;;  %736 = vmatpush.bf16.msrb.mxu3 %v4082_v17 }
  0xf5   :  { %698 = vmatpush.bf16.msrb.mxu0 %v4088_v28  ;;  %711 = vmatpush.bf16.msrb.mxu1 %v4092_v32 }
  0xf6   :  { %724 = vmatpush.bf16.msrb.mxu2 %v4102_v42  ;;  %737 = vmatpush.bf16.msrb.mxu3 %v4094_v33 }
  0xf9   :  { %699 = vmatpush.bf16.msrb.mxu0 %v4100_v41  ;;  %712 = vmatpush.bf16.msrb.mxu1 %v4106_v45 }
  0xfa   :  { %725 = vmatpush.bf16.msrb.mxu2 %v4114_v54  ;;  %738 = vmatpush.bf16.msrb.mxu3 %v4108_v46 }
  0xfd   :  { %700 = vmatpush.bf16.msrb.mxu0 %v4112_v53  ;;  %713 = vmatpush.bf16.msrb.mxu1 %v4118_v57 }
  0xfe   :  { %726 = vmatpush.bf16.msrb.mxu2 %v4126_v2  ;;  %739 = vmatpush.bf16.msrb.mxu3 %v4120_v58 }
 0x101   :  { %701 = vmatpush.bf16.msrb.mxu0 %v4124_v1  ;;  %714 = vmatpush.bf16.msrb.mxu1 %v4130_v9 }
 0x102   :  { %727 = vmatpush.bf16.msrb.mxu2 %v4138_v20  ;;  %740 = vmatpush.bf16.msrb.mxu3 %v4132_v10 }
 0x105   :  { %702 = vmatpush.bf16.msrb.mxu0 %v4136_v19  ;;  %715 = vmatpush.bf16.msrb.mxu1 %v4142_v24 }
 0x106   :  { %728 = vmatpush.bf16.msrb.mxu2 %v4150_v37  ;;  %741 = vmatpush.bf16.msrb.mxu3 %v4144_v25 }
 0x109   :  { %703 = vmatpush.bf16.msrb.mxu0 %v4148_v36  ;;  %716 = vmatpush.bf16.msrb.mxu1 %v4154_v38 }
 0x10a   :  { %729 = vmatpush.bf16.msrb.mxu2 %v4162_v44  ;;  %742 = vmatpush.bf16.msrb.mxu3 %v4156_v39 }
 0x168   :  { %v451_v50 = vpop.f32.mrf.mxu0  ;;  %v464_v51 = vpop.f32.mrf.mxu1 }
 0x169   :  { %v494_v52 = vadd.f32 %v451_v50, %v437_v26  ;;  %v495_v55 = vadd.f32 %v464_v51, %v438_v49 }
 0x16b   :  { %v3111_v56 = vmul.f32 -1.442695, %v494_v52  ;;  %v3112_v59 = vmul.f32 -1.442695, %v495_v55 }
 0x16d   :  { %3579 = vpow2.f32 %v3111_v56 }
 0x16e   :  { %3581 = vpow2.f32 %v3112_v59 }
 0x16f   :  { %v477_v61 = vpop.f32.mrf.mxu2  ;;  %v490_v62 = vpop.f32.mrf.mxu3 }
 0x170   :  { %v497_v63 = vadd.f32 %v490_v62, %v440_v60  ;;  %v453_v0 = vpop.f32.mrf.mxu0  ;;  %v466_v4 = vpop.f32.mrf.mxu1  ;;  %v496_v35 = vadd.f32 %v477_v61, %v439_v13 }
 0x172   :  { %v3113_v5 = vmul.f32 -1.442695, %v497_v63 }
 0x173   :  { %v3580_v6 = vpop.eup %3579 }
 0x174   :  { %v3582_v11 = vpop.eup %3581  ;;  %v501_v15 = vadd.f32 1.0, %v3580_v6  ;;  %3583 = vpow2.f32 %v3113_v5 }
 0x175   :  { %v520_v18 = vadd.f32 1.0, %v3582_v11 }
 0x176   :  { %3585 = vrcp.f32 %v501_v15  ;;  %v513_v50 = vand.u32 2147483648, %v501_v15  ;;  %v511_v55 = vand.u32 2147483647, %v501_v15  ;;  %vm507_vm14 = vweird.f32 %v501_v15 }
 0x177   :  { %3587 = vrcp.f32 %v520_v18  ;;  %v479_v22 = vpop.f32.mrf.mxu2  ;;  %v492_v23 = vpop.f32.mrf.mxu3  ;;  %v532_v51 = vand.u32 2147483648, %v520_v18  ;;  %v530_v59 = vand.u32 2147483647, %v520_v18  ;;  %vm526_vm15 = vweird.f32 %v520_v18 }
 0x178   :  { %v514_v61 = vor.u32 1.1754944e-38, %v513_v50  ;;  %vm512_vm2 = vcmp.eq.f32.partialorder %v511_v55, 8.507059e+37 }
 0x179   :  { %v533_v4 = vor.u32 1.1754944e-38, %v532_v51  ;;  %vm531_vm3 = vcmp.eq.f32.partialorder %v530_v59, 8.507059e+37 }
 0x17a   :  { %v3584_v14 = vpop.eup %3583 }
 0x17b   :  { %v540_v31 = vadd.f32 1.0, %v3584_v14 }
 0x17c   :  { %v3586_v29 = vpop.eup %3585 }
 0x17d   :  { %v3588_v40 = vpop.eup %3587  ;;  %v503_v30 = vmul.f32 %v3586_v29, %v501_v15  ;;  %3589 = vrcp.f32 %v540_v31  ;;  %vm508_vm12 = vweird.f32 %v3586_v29  ;;  %vm546_vm5 = vweird.f32 %v540_v31 }
 0x17e   :  { %v522_v48 = vmul.f32 %v3588_v40, %v520_v18  ;;  %3591 = vtanh.f32 %v496_v35  ;;  %vm527_vm13 = vweird.f32 %v3588_v40  ;;  %vm509_vm0 = vmor %vm507_vm14, %vm508_vm12 }
 0x17f   :  { %v504_v26 = vsub.f32 1.0, %v503_v30  ;;  %vm528_vm1 = vmor %vm526_vm15, %vm527_vm13 }
 0x180   :  { %v523_v49 = vsub.f32 1.0, %v522_v48  ;;  %v552_v48 = vand.u32 2147483648, %v540_v31 }
 0x181   :  { %v505_v52 = vmul.f32 %v3586_v29, %v504_v26 }
 0x182   :  { %v524_v56 = vmul.f32 %v3588_v40, %v523_v49  ;;  %v553_v49 = vor.u32 1.1754944e-38, %v552_v48  ;;  %v566_v48 = vld [vmem:[#allocation4 + $0x50] sm:$0xff] }
 0x183   :  { %v3590_v60 = vpop.eup %3589  ;;  %v506_v62 = vadd.f32 %v3586_v29, %v505_v52  ;;  %v565_v52 = vld [vmem:[#allocation4 + $0x48] sm:$0xff] }
 0x184   :  { %v525_v63 = vadd.f32 %v3588_v40, %v524_v56  ;;  %v542_v0 = vmul.f32 %v3590_v60, %v540_v31  ;;  %v3592_v6 = vpop.eup %3591  ;;  %vm547_vm4 = vweird.f32 %v3590_v60 }
 0x185   :  { %v510_v5 = vsel %vm509_vm0, %v3586_v29, %v506_v62  ;;  %v550_v29 = vand.u32 2147483647, %v540_v31  ;;  %vm548_vm6 = vmor %vm546_vm5, %vm547_vm4  ;;  %v564_v31 = vld [vmem:[#allocation4 + $0x40] sm:$0xff] }
 0x186   :  { %v515_v11 = vsel %vm512_vm2, %v514_v61, %v510_v5  ;;  %v529_v22 = vsel %vm528_vm1, %v3588_v40, %v525_v63  ;;  %v543_v23 = vsub.f32 1.0, %v542_v0  ;;  %v567_v63 = vld [vmem:[#allocation4 + $0x58] sm:$0xff] }
 0x187   :  { %v534_v13 = vsel %vm531_vm3, %v533_v4, %v529_v22  ;;  %v557_v14 = vmul.f32 %v3592_v6, %v515_v11  ;;  %vm551_vm7 = vcmp.eq.f32.partialorder %v550_v29, 8.507059e+37 }
 0x188   :  { %v556_v35 = vmul.f32 %v534_v13, %v4233_v27  ;;  %v544_v30 = vmul.f32 %v3590_v60, %v543_v23 }
 0x18a   :  { %v4273_v15 = vadd.f32 %v557_v14, %v556_v35  ;;  %v545_v18 = vadd.f32 %v3590_v60, %v544_v30 }
 0x18c   :  { %3593 = vtanh.f32 %v4273_v15  ;;  %v549_v26 = vsel %vm548_vm6, %v3590_v60, %v545_v18 }
 0x18d   :  { %v554_v50 = vsel %vm551_vm7, %v553_v49, %v549_v26 }
 0x192   :  { %v3594_v40 = vpop.eup %3593 }
 0x193   :  { %v4276_v51 = vmul.f32 %v3594_v40, %v554_v50 }
 0x195   :  { %v568_v27 = vpack.c.bf16 %v4276_v51, %v4276_v51 }
 0x197   :  { %577 = vmatmul.bf16.vlgmr.msra.gmra.mxu0 %v568_v27  ;;  %590 = vmatmul.bf16.vlgmr.msra.gmra.mxu1 %v568_v27 }
 0x198   :  { %603 = vmatmul.bf16.vlgmr.msra.gmra.mxu2 %v568_v27  ;;  %616 = vmatmul.bf16.vlgmr.msra.gmra.mxu3 %v568_v27 }
 0x199   :  { %823 = vmatpush.bf16.msra.mxu0 %v4069_v3  ;;  %836 = vmatpush.bf16.msra.mxu1 %v4071_v7 }
 0x19a   :  { %849 = vmatpush.bf16.msra.mxu2 %v4084_v21  ;;  %862 = vmatpush.bf16.msra.mxu3 %v4073_v8 }
 0x19d   :  { %824 = vmatpush.bf16.msra.mxu0 %v4076_v12  ;;  %837 = vmatpush.bf16.msra.mxu1 %v4080_v16 }
 0x19e   :  { %850 = vmatpush.bf16.msra.mxu2 %v4096_v34  ;;  %863 = vmatpush.bf16.msra.mxu3 %v4082_v17 }
 0x1a1   :  { %825 = vmatpush.bf16.msra.mxu0 %v4088_v28  ;;  %838 = vmatpush.bf16.msra.mxu1 %v4092_v32 }
 0x1a2   :  { %851 = vmatpush.bf16.msra.mxu2 %v4102_v42  ;;  %864 = vmatpush.bf16.msra.mxu3 %v4094_v33 }
 0x1a5   :  { %826 = vmatpush.bf16.msra.mxu0 %v4100_v41  ;;  %839 = vmatpush.bf16.msra.mxu1 %v4106_v45 }
 0x1a6   :  { %852 = vmatpush.bf16.msra.mxu2 %v4114_v54  ;;  %865 = vmatpush.bf16.msra.mxu3 %v4108_v46 }
 0x1a9   :  { %827 = vmatpush.bf16.msra.mxu0 %v4112_v53  ;;  %840 = vmatpush.bf16.msra.mxu1 %v4118_v57 }
 0x1aa   :  { %853 = vmatpush.bf16.msra.mxu2 %v4126_v2  ;;  %866 = vmatpush.bf16.msra.mxu3 %v4120_v58 }
 0x1ad   :  { %828 = vmatpush.bf16.msra.mxu0 %v4124_v1  ;;  %841 = vmatpush.bf16.msra.mxu1 %v4130_v9 }
 0x1ae   :  { %854 = vmatpush.bf16.msra.mxu2 %v4138_v20  ;;  %867 = vmatpush.bf16.msra.mxu3 %v4132_v10 }
 0x1b1   :  { %829 = vmatpush.bf16.msra.mxu0 %v4136_v19  ;;  %842 = vmatpush.bf16.msra.mxu1 %v4142_v24 }
 0x1b2   :  { %855 = vmatpush.bf16.msra.mxu2 %v4150_v37  ;;  %868 = vmatpush.bf16.msra.mxu3 %v4144_v25 }
 0x1b5   :  { %830 = vmatpush.bf16.msra.mxu0 %v4148_v36  ;;  %843 = vmatpush.bf16.msra.mxu1 %v4154_v38 }
 0x1b6   :  { %856 = vmatpush.bf16.msra.mxu2 %v4162_v44  ;;  %869 = vmatpush.bf16.msra.mxu3 %v4156_v39 }
 0x214   :  { %v578_v55 = vpop.f32.mrf.mxu0  ;;  %v591_v56 = vpop.f32.mrf.mxu1 }
 0x215   :  { %v621_v59 = vadd.f32 %v578_v55, %v564_v31  ;;  %v622_v60 = vadd.f32 %v591_v56, %v565_v52 }
 0x217   :  { %v3114_v62 = vmul.f32 -1.442695, %v621_v59  ;;  %v3115_v61 = vmul.f32 -1.442695, %v622_v60 }
 0x219   :  { %3595 = vpow2.f32 %v3114_v62 }
 0x21a   :  { %3597 = vpow2.f32 %v3115_v61 }
 0x21b   :  { %v604_v0 = vpop.f32.mrf.mxu2  ;;  %v617_v4 = vpop.f32.mrf.mxu3 }
 0x21c   :  { %v624_v5 = vadd.f32 %v617_v4, %v567_v63  ;;  %v580_v6 = vpop.f32.mrf.mxu0  ;;  %v593_v11 = vpop.f32.mrf.mxu1  ;;  %v623_v40 = vadd.f32 %v604_v0, %v566_v48 }
 0x21e   :  { %v3116_v22 = vmul.f32 -1.442695, %v624_v5 }
 0x21f   :  { %v3596_v23 = vpop.eup %3595 }
 0x220   :  { %v3598_v13 = vpop.eup %3597  ;;  %v628_v14 = vadd.f32 1.0, %v3596_v23  ;;  %3599 = vpow2.f32 %v3116_v22 }
 0x221   :  { %v647_v35 = vadd.f32 1.0, %v3598_v13 }
 0x222   :  { %3601 = vrcp.f32 %v628_v14  ;;  %v640_v56 = vand.u32 2147483648, %v628_v14  ;;  %v638_v62 = vand.u32 2147483647, %v628_v14  ;;  %vm634_vm10 = vweird.f32 %v628_v14 }
 0x223   :  { %3603 = vrcp.f32 %v647_v35  ;;  %v606_v30 = vpop.f32.mrf.mxu2  ;;  %v619_v18 = vpop.f32.mrf.mxu3  ;;  %v659_v59 = vand.u32 2147483648, %v647_v35  ;;  %v657_v63 = vand.u32 2147483647, %v647_v35  ;;  %vm653_vm11 = vweird.f32 %v647_v35 }
 0x224   :  { %v641_v0 = vor.u32 1.1754944e-38, %v640_v56  ;;  %vm639_vm14 = vcmp.eq.f32.partialorder %v638_v62, 8.507059e+37  ;;  %v692_v62 = vld [vmem:[#allocation4 + $0x68] sm:$0xff] }
 0x225   :  { %v660_v22 = vor.u32 1.1754944e-38, %v659_v59  ;;  %vm658_vm15 = vcmp.eq.f32.partialorder %v657_v63, 8.507059e+37 }
 0x226   :  { %v3600_v29 = vpop.eup %3599 }
 0x227   :  { %v667_v26 = vadd.f32 1.0, %v3600_v29 }
 0x228   :  { %v3602_v49 = vpop.eup %3601 }
 0x229   :  { %v3604_v50 = vpop.eup %3603  ;;  %v630_v27 = vmul.f32 %v3602_v49, %v628_v14  ;;  %3605 = vrcp.f32 %v667_v26  ;;  %vm635_vm8 = vweird.f32 %v3602_v49  ;;  %vm673_vm1 = vweird.f32 %v667_v26 }
 0x22a   :  { %v649_v31 = vmul.f32 %v3604_v50, %v647_v35  ;;  %3607 = vtanh.f32 %v623_v40  ;;  %vm654_vm9 = vweird.f32 %v3604_v50  ;;  %vm636_vm12 = vmor %vm634_vm10, %vm635_vm8 }
 0x22b   :  { %v631_v52 = vsub.f32 1.0, %v630_v27  ;;  %vm655_vm13 = vmor %vm653_vm11, %vm654_vm9 }
 0x22c   :  { %v650_v55 = vsub.f32 1.0, %v649_v31 }
 0x22d   :  { %v632_v60 = vmul.f32 %v3602_v49, %v631_v52  ;;  %v679_v52 = vand.u32 2147483648, %v667_v26 }
 0x22e   :  { %v651_v61 = vmul.f32 %v3604_v50, %v650_v55 }
 0x22f   :  { %v3606_v4 = vpop.eup %3605  ;;  %v633_v5 = vadd.f32 %v3602_v49, %v632_v60  ;;  %v680_v56 = vor.u32 1.1754944e-38, %v679_v52 }
 0x230   :  { %v652_v6 = vadd.f32 %v3604_v50, %v651_v61  ;;  %v669_v11 = vmul.f32 %v3606_v4, %v667_v26  ;;  %v3608_v13 = vpop.eup %3607  ;;  %vm674_vm0 = vweird.f32 %v3606_v4 }
 0x231   :  { %v637_v23 = vsel %vm636_vm12, %v3602_v49, %v633_v5  ;;  %v677_v49 = vand.u32 2147483647, %v667_v26  ;;  %vm675_vm2 = vmor %vm673_vm1, %vm674_vm0  ;;  %v691_v26 = vld [vmem:[#allocation4 + $0x60] sm:$0xff] }
 0x232   :  { %v642_v30 = vsel %vm639_vm14, %v641_v0, %v637_v23  ;;  %v656_v18 = vsel %vm655_vm13, %v3604_v50, %v652_v6  ;;  %v670_v48 = vsub.f32 1.0, %v669_v11  ;;  %v694_v11 = vld [vmem:[#allocation4 + $0x78] sm:$0xff] }
 0x233   :  { %v661_v29 = vsel %vm658_vm15, %v660_v22, %v656_v18  ;;  %v684_v40 = vmul.f32 %v3608_v13, %v642_v30  ;;  %vm678_vm3 = vcmp.eq.f32.partialorder %v677_v49, 8.507059e+37  ;;  %v693_v49 = vld [vmem:[#allocation4 + $0x70] sm:$0xff] }
 0x234   :  { %v683_v27 = vmul.f32 %v661_v29, %v4273_v15  ;;  %v671_v31 = vmul.f32 %v3606_v4, %v670_v48 }
 0x236   :  { %v4313_v14 = vadd.f32 %v684_v40, %v683_v27  ;;  %v672_v35 = vadd.f32 %v3606_v4, %v671_v31 }
 0x238   :  { %3609 = vtanh.f32 %v4313_v14  ;;  %v676_v55 = vsel %vm675_vm2, %v3606_v4, %v672_v35 }
 0x239   :  { %v681_v59 = vsel %vm678_vm3, %v680_v56, %v676_v55 }
 0x23e   :  { %v3610_v50 = vpop.eup %3609 }
 0x23f   :  { %v4316_v60 = vmul.f32 %v3610_v50, %v681_v59 }
 0x241   :  { %v695_v15 = vpack.c.bf16 %v4316_v60, %v4316_v60 }
 0x243   :  { %704 = vmatmul.bf16.vlgmr.msrb.gmra.mxu0 %v695_v15  ;;  %717 = vmatmul.bf16.vlgmr.msrb.gmra.mxu1 %v695_v15 }
 0x244   :  { %730 = vmatmul.bf16.vlgmr.msrb.gmra.mxu2 %v695_v15  ;;  %743 = vmatmul.bf16.vlgmr.msrb.gmra.mxu3 %v695_v15 }
 0x245   :  { %950 = vmatpush.bf16.msrb.mxu0 %v4069_v3  ;;  %963 = vmatpush.bf16.msrb.mxu1 %v4071_v7 }
 0x246   :  { %976 = vmatpush.bf16.msrb.mxu2 %v4084_v21  ;;  %989 = vmatpush.bf16.msrb.mxu3 %v4073_v8 }
 0x249   :  { %951 = vmatpush.bf16.msrb.mxu0 %v4076_v12  ;;  %964 = vmatpush.bf16.msrb.mxu1 %v4080_v16 }
 0x24a   :  { %977 = vmatpush.bf16.msrb.mxu2 %v4096_v34  ;;  %990 = vmatpush.bf16.msrb.mxu3 %v4082_v17 }
 0x24d   :  { %952 = vmatpush.bf16.msrb.mxu0 %v4088_v28  ;;  %965 = vmatpush.bf16.msrb.mxu1 %v4092_v32 }
 0x24e   :  { %978 = vmatpush.bf16.msrb.mxu2 %v4102_v42  ;;  %991 = vmatpush.bf16.msrb.mxu3 %v4094_v33 }
 0x251   :  { %953 = vmatpush.bf16.msrb.mxu0 %v4100_v41  ;;  %966 = vmatpush.bf16.msrb.mxu1 %v4106_v45 }
 0x252   :  { %979 = vmatpush.bf16.msrb.mxu2 %v4114_v54  ;;  %992 = vmatpush.bf16.msrb.mxu3 %v4108_v46 }
 0x255   :  { %954 = vmatpush.bf16.msrb.mxu0 %v4112_v53  ;;  %967 = vmatpush.bf16.msrb.mxu1 %v4118_v57 }
 0x256   :  { %980 = vmatpush.bf16.msrb.mxu2 %v4126_v2  ;;  %993 = vmatpush.bf16.msrb.mxu3 %v4120_v58 }
 0x259   :  { %955 = vmatpush.bf16.msrb.mxu0 %v4124_v1  ;;  %968 = vmatpush.bf16.msrb.mxu1 %v4130_v9 }
 0x25a   :  { %981 = vmatpush.bf16.msrb.mxu2 %v4138_v20  ;;  %994 = vmatpush.bf16.msrb.mxu3 %v4132_v10 }
 0x25d   :  { %956 = vmatpush.bf16.msrb.mxu0 %v4136_v19  ;;  %969 = vmatpush.bf16.msrb.mxu1 %v4142_v24 }
 0x25e   :  { %982 = vmatpush.bf16.msrb.mxu2 %v4150_v37  ;;  %995 = vmatpush.bf16.msrb.mxu3 %v4144_v25 }
 0x261   :  { %957 = vmatpush.bf16.msrb.mxu0 %v4148_v36  ;;  %970 = vmatpush.bf16.msrb.mxu1 %v4154_v38 }
 0x262   :  { %983 = vmatpush.bf16.msrb.mxu2 %v4162_v44  ;;  %996 = vmatpush.bf16.msrb.mxu3 %v4156_v39 }
 0x2c0   :  { %v705_v61 = vpop.f32.mrf.mxu0  ;;  %v718_v63 = vpop.f32.mrf.mxu1 }
 0x2c1   :  { %v748_v4 = vadd.f32 %v705_v61, %v691_v26  ;;  %v749_v5 = vadd.f32 %v718_v63, %v692_v62 }
 0x2c3   :  { %v3117_v0 = vmul.f32 -1.442695, %v748_v4  ;;  %v3118_v6 = vmul.f32 -1.442695, %v749_v5 }
 0x2c5   :  { %3611 = vpow2.f32 %v3117_v0 }
 0x2c6   :  { %3613 = vpow2.f32 %v3118_v6 }
 0x2c7   :  { %v731_v22 = vpop.f32.mrf.mxu2  ;;  %v744_v23 = vpop.f32.mrf.mxu3 }
 0x2c8   :  { %v751_v13 = vadd.f32 %v744_v23, %v694_v11  ;;  %v707_v30 = vpop.f32.mrf.mxu0  ;;  %v720_v18 = vpop.f32.mrf.mxu1  ;;  %v750_v59 = vadd.f32 %v731_v22, %v693_v49 }
 0x2ca   :  { %v3119_v48 = vmul.f32 -1.442695, %v751_v13 }
 0x2cb   :  { %v3612_v29 = vpop.eup %3611 }
 0x2cc   :  { %v3614_v40 = vpop.eup %3613  ;;  %v755_v27 = vadd.f32 1.0, %v3612_v29  ;;  %3615 = vpow2.f32 %v3119_v48 }
 0x2cd   :  { %v774_v31 = vadd.f32 1.0, %v3614_v40 }
 0x2ce   :  { %3617 = vrcp.f32 %v755_v27  ;;  %v767_v4 = vand.u32 2147483648, %v755_v27  ;;  %v765_v6 = vand.u32 2147483647, %v755_v27  ;;  %vm761_vm6 = vweird.f32 %v755_v27 }
 0x2cf   :  { %3619 = vrcp.f32 %v774_v31  ;;  %v733_v35 = vpop.f32.mrf.mxu2  ;;  %v746_v52 = vpop.f32.mrf.mxu3  ;;  %v786_v5 = vand.u32 2147483648, %v774_v31  ;;  %v784_v23 = vand.u32 2147483647, %v774_v31  ;;  %vm780_vm7 = vweird.f32 %v774_v31 }
 0x2d0   :  { %v768_v22 = vor.u32 1.1754944e-38, %v767_v4  ;;  %vm766_vm10 = vcmp.eq.f32.partialorder %v765_v6, 8.507059e+37 }
 0x2d1   :  { %v787_v29 = vor.u32 1.1754944e-38, %v786_v5  ;;  %vm785_vm11 = vcmp.eq.f32.partialorder %v784_v23, 8.507059e+37 }
 0x2d2   :  { %v3616_v55 = vpop.eup %3615 }
 0x2d3   :  { %v794_v56 = vadd.f32 1.0, %v3616_v55 }
 0x2d4   :  { %v3618_v50 = vpop.eup %3617 }
 0x2d5   :  { %v3620_v15 = vpop.eup %3619  ;;  %v757_v26 = vmul.f32 %v3618_v50, %v755_v27  ;;  %3621 = vrcp.f32 %v794_v56  ;;  %vm762_vm4 = vweird.f32 %v3618_v50  ;;  %vm800_vm13 = vweird.f32 %v794_v56 }
 0x2d6   :  { %v776_v62 = vmul.f32 %v3620_v15, %v774_v31  ;;  %3623 = vtanh.f32 %v750_v59  ;;  %vm781_vm5 = vweird.f32 %v3620_v15  ;;  %vm763_vm8 = vmor %vm761_vm6, %vm762_vm4 }
 0x2d7   :  { %v758_v61 = vsub.f32 1.0, %v757_v26  ;;  %vm782_vm9 = vmor %vm780_vm7, %vm781_vm5 }
 0x2d8   :  { %v777_v63 = vsub.f32 1.0, %v776_v62 }
 0x2d9   :  { %v759_v0 = vmul.f32 %v3618_v50, %v758_v61 }
 0x2da   :  { %v778_v11 = vmul.f32 %v3620_v15, %v777_v63  ;;  %v806_v63 = vand.u32 2147483648, %v794_v56 }
 0x2db   :  { %v3622_v13 = vpop.eup %3621  ;;  %v760_v30 = vadd.f32 %v3618_v50, %v759_v0 }
 0x2dc   :  { %v779_v18 = vadd.f32 %v3620_v15, %v778_v11  ;;  %v796_v48 = vmul.f32 %v3622_v13, %v794_v56  ;;  %v3624_v35 = vpop.eup %3623  ;;  %vm801_vm12 = vweird.f32 %v3622_v13  ;;  %v807_v5 = vor.u32 1.1754944e-38, %v806_v63  ;;  %v819_v11 = vld [vmem:[#allocation4 + $0x88] sm:$0xff] }
 0x2dd   :  { %v764_v40 = vsel %vm763_vm8, %v3618_v50, %v760_v30  ;;  %v804_v50 = vand.u32 2147483647, %v794_v56  ;;  %vm802_vm14 = vmor %vm800_vm13, %vm801_vm12  ;;  %v818_v56 = vld [vmem:[#allocation4 + $0x80] sm:$0xff] }
 0x2de   :  { %v769_v52 = vsel %vm766_vm10, %v768_v22, %v764_v40  ;;  %v783_v49 = vsel %vm782_vm9, %v3620_v15, %v779_v18  ;;  %v797_v55 = vsub.f32 1.0, %v796_v48 }
 0x2df   :  { %v788_v59 = vsel %vm785_vm11, %v787_v29, %v783_v49  ;;  %v811_v26 = vmul.f32 %v3624_v35, %v769_v52  ;;  %vm805_vm15 = vcmp.eq.f32.partialorder %v804_v50, 8.507059e+37  ;;  %v821_v29 = vld [vmem:[#allocation4 + $0x98] sm:$0xff] }
 0x2e0   :  { %v810_v62 = vmul.f32 %v788_v59, %v4313_v14  ;;  %v798_v61 = vmul.f32 %v3622_v13, %v797_v55 }
 0x2e2   :  { %v4353_v27 = vadd.f32 %v811_v26, %v810_v62  ;;  %v799_v31 = vadd.f32 %v3622_v13, %v798_v61 }
 0x2e4   :  { %3625 = vtanh.f32 %v4353_v27  ;;  %v803_v4 = vsel %vm802_vm14, %v3622_v13, %v799_v31 }
 0x2e5   :  { %v808_v0 = vsel %vm805_vm15, %v807_v5, %v803_v4  ;;  %v820_v4 = vld [vmem:[#allocation4 + $0x90] sm:$0xff] }
 0x2ea   :  { %v3626_v15 = vpop.eup %3625 }
 0x2eb   :  { %v4356_v6 = vmul.f32 %v3626_v15, %v808_v0 }
 0x2ed   :  { %v822_v14 = vpack.c.bf16 %v4356_v6, %v4356_v6 }
 0x2ef   :  { %831 = vmatmul.bf16.vlgmr.msra.gmra.mxu0 %v822_v14  ;;  %844 = vmatmul.bf16.vlgmr.msra.gmra.mxu1 %v822_v14 }
 0x2f0   :  { %857 = vmatmul.bf16.vlgmr.msra.gmra.mxu2 %v822_v14  ;;  %870 = vmatmul.bf16.vlgmr.msra.gmra.mxu3 %v822_v14 }
 0x2f1   :  { %1077 = vmatpush.bf16.msra.mxu0 %v4069_v3  ;;  %1090 = vmatpush.bf16.msra.mxu1 %v4071_v7 }
 0x2f2   :  { %1103 = vmatpush.bf16.msra.mxu2 %v4084_v21  ;;  %1116 = vmatpush.bf16.msra.mxu3 %v4073_v8 }
 0x2f5   :  { %1078 = vmatpush.bf16.msra.mxu0 %v4076_v12  ;;  %1091 = vmatpush.bf16.msra.mxu1 %v4080_v16 }
 0x2f6   :  { %1104 = vmatpush.bf16.msra.mxu2 %v4096_v34  ;;  %1117 = vmatpush.bf16.msra.mxu3 %v4082_v17 }
 0x2f9   :  { %1079 = vmatpush.bf16.msra.mxu0 %v4088_v28  ;;  %1092 = vmatpush.bf16.msra.mxu1 %v4092_v32 }
 0x2fa   :  { %1105 = vmatpush.bf16.msra.mxu2 %v4102_v42  ;;  %1118 = vmatpush.bf16.msra.mxu3 %v4094_v33 }
 0x2fd   :  { %1080 = vmatpush.bf16.msra.mxu0 %v4100_v41  ;;  %1093 = vmatpush.bf16.msra.mxu1 %v4106_v45 }
 0x2fe   :  { %1106 = vmatpush.bf16.msra.mxu2 %v4114_v54  ;;  %1119 = vmatpush.bf16.msra.mxu3 %v4108_v46 }
 0x301   :  { %1081 = vmatpush.bf16.msra.mxu0 %v4112_v53  ;;  %1094 = vmatpush.bf16.msra.mxu1 %v4118_v57 }
 0x302   :  { %1107 = vmatpush.bf16.msra.mxu2 %v4126_v2  ;;  %1120 = vmatpush.bf16.msra.mxu3 %v4120_v58 }
 0x305   :  { %1082 = vmatpush.bf16.msra.mxu0 %v4124_v1  ;;  %1095 = vmatpush.bf16.msra.mxu1 %v4130_v9 }
 0x306   :  { %1108 = vmatpush.bf16.msra.mxu2 %v4138_v20  ;;  %1121 = vmatpush.bf16.msra.mxu3 %v4132_v10 }
 0x309   :  { %1083 = vmatpush.bf16.msra.mxu0 %v4136_v19  ;;  %1096 = vmatpush.bf16.msra.mxu1 %v4142_v24 }
 0x30a   :  { %1109 = vmatpush.bf16.msra.mxu2 %v4150_v37  ;;  %1122 = vmatpush.bf16.msra.mxu3 %v4144_v25 }
 0x30d   :  { %1084 = vmatpush.bf16.msra.mxu0 %v4148_v36  ;;  %1097 = vmatpush.bf16.msra.mxu1 %v4154_v38 }
 0x30e   :  { %1110 = vmatpush.bf16.msra.mxu2 %v4162_v44  ;;  %1123 = vmatpush.bf16.msra.mxu3 %v4156_v39 }
 0x36c   :  { %v832_v23 = vpop.f32.mrf.mxu0  ;;  %v845_v13 = vpop.f32.mrf.mxu1 }
 0x36d   :  { %v875_v30 = vadd.f32 %v832_v23, %v818_v56  ;;  %v876_v22 = vadd.f32 %v845_v13, %v819_v11 }
 0x36f   :  { %v3120_v18 = vmul.f32 -1.442695, %v875_v30  ;;  %v3121_v48 = vmul.f32 -1.442695, %v876_v22 }
 0x371   :  { %3627 = vpow2.f32 %v3120_v18 }
 0x372   :  { %3629 = vpow2.f32 %v3121_v48 }
 0x373   :  { %v858_v40 = vpop.f32.mrf.mxu2  ;;  %v871_v35 = vpop.f32.mrf.mxu3 }
 0x374   :  { %v878_v52 = vadd.f32 %v871_v35, %v821_v29  ;;  %v834_v49 = vpop.f32.mrf.mxu0  ;;  %v847_v55 = vpop.f32.mrf.mxu1  ;;  %v877_v14 = vadd.f32 %v858_v40, %v820_v4 }
 0x376   :  { %v3122_v59 = vmul.f32 -1.442695, %v878_v52 }
 0x377   :  { %v3628_v26 = vpop.eup %3627 }
 0x378   :  { %v3630_v62 = vpop.eup %3629  ;;  %v882_v61 = vadd.f32 1.0, %v3628_v26  ;;  %3631 = vpow2.f32 %v3122_v59 }
 0x379   :  { %v901_v31 = vadd.f32 1.0, %v3630_v62 }
 0x37a   :  { %3633 = vrcp.f32 %v882_v61  ;;  %v894_v22 = vand.u32 2147483648, %v882_v61  ;;  %v892_v29 = vand.u32 2147483647, %v882_v61  ;;  %vm888_vm2 = vweird.f32 %v882_v61 }
 0x37b   :  { %3635 = vrcp.f32 %v901_v31  ;;  %v860_v63 = vpop.f32.mrf.mxu2  ;;  %v873_v50 = vpop.f32.mrf.mxu3  ;;  %v913_v18 = vand.u32 2147483648, %v901_v31  ;;  %v911_v52 = vand.u32 2147483647, %v901_v31  ;;  %vm907_vm3 = vweird.f32 %v901_v31 }
 0x37c   :  { %v895_v40 = vor.u32 1.1754944e-38, %v894_v22  ;;  %vm893_vm6 = vcmp.eq.f32.partialorder %v892_v29, 8.507059e+37 }
 0x37d   :  { %v914_v62 = vor.u32 1.1754944e-38, %v913_v18  ;;  %vm912_vm7 = vcmp.eq.f32.partialorder %v911_v52, 8.507059e+37 }
 0x37e   :  { %v3632_v5 = vpop.eup %3631 }
 0x37f   :  { %v921_v15 = vadd.f32 1.0, %v3632_v5 }
 0x380   :  { %v3634_v0 = vpop.eup %3633 }
 0x381   :  { %v3636_v56 = vpop.eup %3635  ;;  %v884_v11 = vmul.f32 %v3634_v0, %v882_v61  ;;  %3637 = vrcp.f32 %v921_v15  ;;  %vm889_vm0 = vweird.f32 %v3634_v0  ;;  %v933_v22 = vand.u32 2147483648, %v921_v15 }
 0x382   :  { %v903_v23 = vmul.f32 %v3636_v56, %v901_v31  ;;  %3639 = vtanh.f32 %v877_v14  ;;  %vm908_vm1 = vweird.f32 %v3636_v56  ;;  %vm890_vm4 = vmor %vm888_vm2, %vm889_vm0  ;;  %vm927_vm9 = vweird.f32 %v921_v15 }
 0x383   :  { %v885_v13 = vsub.f32 1.0, %v884_v11  ;;  %vm909_vm5 = vmor %vm907_vm3, %vm908_vm1 }
 0x384   :  { %v904_v30 = vsub.f32 1.0, %v903_v23 }
 0x385   :  { %v886_v48 = vmul.f32 %v3634_v0, %v885_v13 }
 0x386   :  { %v905_v35 = vmul.f32 %v3636_v56, %v904_v30 }
 0x387   :  { %v3638_v49 = vpop.eup %3637  ;;  %v887_v55 = vadd.f32 %v3634_v0, %v886_v48  ;;  %v934_v48 = vor.u32 1.1754944e-38, %v933_v22 }
 0x388   :  { %v906_v59 = vadd.f32 %v3636_v56, %v905_v35  ;;  %v923_v26 = vmul.f32 %v3638_v49, %v921_v15  ;;  %v3640_v50 = vpop.eup %3639  ;;  %vm928_vm8 = vweird.f32 %v3638_v49 }
 0x389   :  { %v891_v63 = vsel %vm890_vm4, %v3634_v0, %v887_v55  ;;  %v931_v0 = vand.u32 2147483647, %v921_v15  ;;  %vm929_vm10 = vmor %vm927_vm9, %vm928_vm8 }
 0x38a   :  { %v896_v4 = vsel %vm893_vm6, %v895_v40, %v891_v63  ;;  %v910_v5 = vsel %vm909_vm5, %v3636_v56, %v906_v59  ;;  %v924_v14 = vsub.f32 1.0, %v923_v26 }
 0x38b   :  { %v915_v11 = vsel %vm912_vm7, %v914_v62, %v910_v5  ;;  %v938_v23 = vmul.f32 %v3640_v50, %v896_v4  ;;  %vm932_vm11 = vcmp.eq.f32.partialorder %v931_v0, 8.507059e+37 }
 0x38c   :  { %v937_v13 = vmul.f32 %v915_v11, %v4353_v27  ;;  %v925_v30 = vmul.f32 %v3638_v49, %v924_v14 }
 0x38e   :  { %v4393_v61 = vadd.f32 %v938_v23, %v937_v13  ;;  %v926_v31 = vadd.f32 %v3638_v49, %v925_v30 }
 0x390   :  { %3641 = vtanh.f32 %v4393_v61  ;;  %v930_v18 = vsel %vm929_vm10, %v3638_v49, %v926_v31 }
 0x391   :  { %v935_v29 = vsel %vm932_vm11, %v934_v48, %v930_v18 }
 0x396   :  { %v3642_v56 = vpop.eup %3641 }
 0x397   :  { %v4396_v35 = vmul.f32 %v3642_v56, %v935_v29 }
 0x399   :  { %v949_v27 = vpack.c.bf16 %v4396_v35, %v4396_v35 }
 0x39b   :  { %958 = vmatmul.bf16.vlgmr.msrb.gmra.mxu0 %v949_v27  ;;  %971 = vmatmul.bf16.vlgmr.msrb.gmra.mxu1 %v949_v27 }
 0x39c   :  { %984 = vmatmul.bf16.vlgmr.msrb.gmra.mxu2 %v949_v27  ;;  %997 = vmatmul.bf16.vlgmr.msrb.gmra.mxu3 %v949_v27 }
 0x39d   :  { %1204 = vmatpush.bf16.msrb.mxu0 %v4069_v3  ;;  %1217 = vmatpush.bf16.msrb.mxu1 %v4071_v7  ;;  %v945_v3 = vld [vmem:[#allocation4 + $0xa0] sm:$0xff]  ;;  %v946_v7 = vld [vmem:[#allocation4 + $0xa8] sm:$0xff] }
 0x39e   :  { %1230 = vmatpush.bf16.msrb.mxu2 %v4084_v21  ;;  %1243 = vmatpush.bf16.msrb.mxu3 %v4073_v8 }
 0x3a1   :  { %1205 = vmatpush.bf16.msrb.mxu0 %v4076_v12  ;;  %1218 = vmatpush.bf16.msrb.mxu1 %v4080_v16 }
 0x3a2   :  { %1231 = vmatpush.bf16.msrb.mxu2 %v4096_v34  ;;  %1244 = vmatpush.bf16.msrb.mxu3 %v4082_v17 }
 0x3a5   :  { %1206 = vmatpush.bf16.msrb.mxu0 %v4088_v28  ;;  %1219 = vmatpush.bf16.msrb.mxu1 %v4092_v32  ;;  %v948_v32 = vld [vmem:[#allocation4 + $0xb8] sm:$0xff] }
 0x3a6   :  { %1232 = vmatpush.bf16.msrb.mxu2 %v4102_v42  ;;  %1245 = vmatpush.bf16.msrb.mxu3 %v4094_v33 }
 0x3a9   :  { %1207 = vmatpush.bf16.msrb.mxu0 %v4100_v41  ;;  %1220 = vmatpush.bf16.msrb.mxu1 %v4106_v45 }
 0x3aa   :  { %1233 = vmatpush.bf16.msrb.mxu2 %v4114_v54  ;;  %1246 = vmatpush.bf16.msrb.mxu3 %v4108_v46 }
 0x3ad   :  { %1208 = vmatpush.bf16.msrb.mxu0 %v4112_v53  ;;  %1221 = vmatpush.bf16.msrb.mxu1 %v4118_v57 }
 0x3ae   :  { %1234 = vmatpush.bf16.msrb.mxu2 %v4126_v2  ;;  %1247 = vmatpush.bf16.msrb.mxu3 %v4120_v58 }
 0x3b1   :  { %1209 = vmatpush.bf16.msrb.mxu0 %v4124_v1  ;;  %1222 = vmatpush.bf16.msrb.mxu1 %v4130_v9  ;;  %v947_v9 = vld [vmem:[#allocation4 + $0xb0] sm:$0xff] }
 0x3b2   :  { %1235 = vmatpush.bf16.msrb.mxu2 %v4138_v20  ;;  %1248 = vmatpush.bf16.msrb.mxu3 %v4132_v10 }
 0x3b5   :  { %1210 = vmatpush.bf16.msrb.mxu0 %v4136_v19  ;;  %1223 = vmatpush.bf16.msrb.mxu1 %v4142_v24 }
 0x3b6   :  { %1236 = vmatpush.bf16.msrb.mxu2 %v4150_v37  ;;  %1249 = vmatpush.bf16.msrb.mxu3 %v4144_v25 }
 0x3b9   :  { %1211 = vmatpush.bf16.msrb.mxu0 %v4148_v36  ;;  %1224 = vmatpush.bf16.msrb.mxu1 %v4154_v38 }
 0x3ba   :  { %1237 = vmatpush.bf16.msrb.mxu2 %v4162_v44  ;;  %1250 = vmatpush.bf16.msrb.mxu3 %v4156_v39 }
 0x418   :  { %v959_v8 = vpop.f32.mrf.mxu0  ;;  %v972_v12 = vpop.f32.mrf.mxu1 }
 0x419   :  { %v1002_v16 = vadd.f32 %v959_v8, %v945_v3  ;;  %v1003_v17 = vadd.f32 %v972_v12, %v946_v7 }
 0x41b   :  { %v3123_v21 = vmul.f32 -1.442695, %v1002_v16  ;;  %v3124_v28 = vmul.f32 -1.442695, %v1003_v17  ;;  %v1072_v16 = vld [vmem:[#allocation4 + $0xc0] sm:$0xff]  ;;  %v1073_v17 = vld [vmem:[#allocation4 + $0xc8] sm:$0xff] }
 0x41d   :  { %3643 = vpow2.f32 %v3123_v21  ;;  %v3246_v21 = vld [vmem:[#allocation9 + $0xe0] sm:$0xf] }
 0x41e   :  { %3645 = vpow2.f32 %v3124_v28  ;;  %v3506_v28 = vld [vmem:[#allocation9 + $0xec] sm:$0xf0] }
 0x41f   :  { %v985_v33 = vpop.f32.mrf.mxu2  ;;  %v998_v34 = vpop.f32.mrf.mxu3 }
 0x420   :  { %v1005_v41 = vadd.f32 %v998_v34, %v948_v32  ;;  %v961_v42 = vpop.f32.mrf.mxu0  ;;  %v974_v45 = vpop.f32.mrf.mxu1  ;;  %v1004_v24 = vadd.f32 %v985_v33, %v947_v9  ;;  %v3504_v32 = vld [vmem:[#allocation9 + $0xe4] sm:$0xf]  ;;  %v3247_v33 = vor.u32 %v3506_v28, %v3246_v21  ;;  %v3248_v34 = vld [vmem:[#allocation9 + $0xf0] sm:$0xf0]  ;;  %v3493_v28 = vld [vmem:[#allocation9 + $0x8c] sm:$0xf] }
 0x421   :  { %v3507_v42 = vld [vmem:[#allocation9 + $0xf4] sm:$0xf0]  ;;  %v3251_v45 = vor.u32 %v3504_v32, %v3248_v34  ;;  %v3208_v32 = vld [vmem:[#allocation9 + $0x98] sm:$0xf0] }
 0x422   :  { %v3125_v46 = vmul.f32 -1.442695, %v1005_v41  ;;  %v3254_v41 = vld [vmem:[#allocation9 + $0xe8] sm:$0xf] }
 0x423   :  { %v3644_v53 = vpop.eup %3643 }
 0x424   :  { %v3646_v54 = vpop.eup %3645  ;;  %v1009_v57 = vadd.f32 1.0, %v3644_v53  ;;  %3647 = vpow2.f32 %v3125_v46  ;;  %v3255_v46 = vor.u32 %v3507_v42, %v3254_v41  ;;  %v3505_v53 = vld [vmem:[#allocation9 + $0xec] sm:$0xf]  ;;  %v3211_v41 = vor.u32 %v3493_v28, %v3208_v32  ;;  %v3483_v32 = vld [vmem:[#allocation9 + $0x34] sm:$0xf0] }
 0x425   :  { %v1028_v58 = vadd.f32 1.0, %v3646_v54  ;;  %v3256_v54 = vld [vmem:[#allocation9 + $0xf8] sm:$0xf0] }
 0x426   :  { %3649 = vrcp.f32 %v1009_v57  ;;  %v1021_v44 = vand.u32 2147483648, %v1009_v57  ;;  %v1019_v49 = vand.u32 2147483647, %v1009_v57  ;;  %vm1015_vm14 = vweird.f32 %v1009_v57 }
 0x427   :  { %3651 = vrcp.f32 %v1028_v58  ;;  %v987_v1 = vpop.f32.mrf.mxu2  ;;  %v1000_v2 = vpop.f32.mrf.mxu3  ;;  %v1040_v15 = vand.u32 2147483648, %v1028_v58  ;;  %v1038_v40 = vand.u32 2147483647, %v1028_v58  ;;  %vm1034_vm15 = vweird.f32 %v1028_v58 }
 0x428   :  { %v1022_v62 = vor.u32 1.1754944e-38, %v1021_v44  ;;  %vm1020_vm2 = vcmp.eq.f32.partialorder %v1019_v49, 8.507059e+37  ;;  %v3259_v1 = vor.u32 %v3505_v53, %v3256_v54  ;;  %v1075_v44 = vld [vmem:[#allocation4 + $0xd8] sm:$0xff]  ;;  %v3501_v49 = vld [vmem:[#allocation9 + $0xcc] sm:$0xf]  ;;  %v1074_v54 = vld [vmem:[#allocation4 + $0xd0] sm:$0xff] }
 0x429   :  { %v1041_v4 = vor.u32 1.1754944e-38, %v1040_v15  ;;  %vm1039_vm3 = vcmp.eq.f32.partialorder %v1038_v40, 8.507059e+37  ;;  %v3214_v40 = vld [vmem:[#allocation9 + $0xa0] sm:$0xf] }
 0x42a   :  { %v3648_v10 = vpop.eup %3647  ;;  %v3182_v53 = vld [vmem:[#allocation9 + $0x60] sm:$0xf] }
 0x42b   :  { %v1048_v19 = vadd.f32 1.0, %v3648_v10  ;;  %v3230_v10 = vld [vmem:[#allocation9 + $0xc0] sm:$0xf] }
 0x42c   :  { %v3650_v20 = vpop.eup %3649 }
 0x42d   :  { %v3652_v25 = vpop.eup %3651  ;;  %v1011_v36 = vmul.f32 %v3650_v20, %v1009_v57  ;;  %3653 = vrcp.f32 %v1048_v19  ;;  %vm1016_vm12 = vweird.f32 %v3650_v20  ;;  %v1060_v56 = vand.u32 2147483648, %v1048_v19 }
 0x42e   :  { %v1030_v37 = vmul.f32 %v3652_v25, %v1028_v58  ;;  %3655 = vtanh.f32 %v1004_v24  ;;  %vm1035_vm13 = vweird.f32 %v3652_v25  ;;  %vm1017_vm0 = vmor %vm1015_vm14, %vm1016_vm12  ;;  %vm1054_vm5 = vweird.f32 %v1048_v19 }
 0x42f   :  { %v1012_v38 = vsub.f32 1.0, %v1011_v36  ;;  %vm1036_vm1 = vmor %vm1034_vm15, %vm1035_vm13  ;;  %v1058_v29 = vand.u32 2147483647, %v1048_v19  ;;  %v1061_v3 = vor.u32 1.1754944e-38, %v1060_v56  ;;  %v3238_v36 = vld [vmem:[#allocation9 + $0xc8] sm:$0xf] }
 0x430   :  { %v1031_v39 = vsub.f32 1.0, %v1030_v37  ;;  %v3503_v37 = vld [vmem:[#allocation9 + $0xd4] sm:$0xf0]  ;;  %v3492_v56 = vld [vmem:[#allocation9 + $0x84] sm:$0xf] }
 0x431   :  { %v1013_v52 = vmul.f32 %v3650_v20, %v1012_v38  ;;  %vm1059_vm7 = vcmp.eq.f32.partialorder %v1058_v29, 8.507059e+37 }
 0x432   :  { %v1032_v55 = vmul.f32 %v3652_v25, %v1031_v39 }
 0x433   :  { %v3654_v59 = vpop.eup %3653  ;;  %v1014_v26 = vadd.f32 %v3650_v20, %v1013_v52  ;;  %v3239_v52 = vor.u32 %v3503_v37, %v3238_v36 }
 0x434   :  { %v1033_v63 = vadd.f32 %v3652_v25, %v1032_v55  ;;  %v1050_v50 = vmul.f32 %v3654_v59, %v1048_v19  ;;  %v3656_v14 = vpop.eup %3655  ;;  %vm1055_vm4 = vweird.f32 %v3654_v59  ;;  %v3502_v19 = vld [vmem:[#allocation9 + $0xcc] sm:$0xf0]  ;;  %v3240_v55 = vld [vmem:[#allocation9 + $0xd8] sm:$0xf0] }
 0x435   :  { %v1018_v5 = vsel %vm1017_vm0, %v3650_v20, %v1014_v26  ;;  %vm1056_vm6 = vmor %vm1054_vm5, %vm1055_vm4  ;;  %v3500_v20 = vld [vmem:[#allocation9 + $0xc4] sm:$0xf]  ;;  %v3231_v24 = vor.u32 %v3502_v19, %v3230_v10  ;;  %v3243_v26 = vor.u32 %v3501_v49, %v3240_v55  ;;  %v3184_v10 = vld [vmem:[#allocation9 + $0x70] sm:$0xf0] }
 0x436   :  { %v1023_v11 = vsel %vm1020_vm2, %v1022_v62, %v1018_v5  ;;  %v1037_v23 = vsel %vm1036_vm1, %v3652_v25, %v1033_v63  ;;  %v1051_v13 = vsub.f32 1.0, %v1050_v50  ;;  %v3232_v25 = vld [vmem:[#allocation9 + $0xd0] sm:$0xf0]  ;;  %v3496_v63 = vld [vmem:[#allocation9 + $0xa4] sm:$0xf] }
 0x437   :  { %v1042_v30 = vsel %vm1039_vm3, %v1041_v4, %v1037_v23  ;;  %v1065_v31 = vmul.f32 %v3656_v14, %v1023_v11  ;;  %v3235_v15 = vor.u32 %v3500_v20, %v3232_v25  ;;  %v3216_v50 = vld [vmem:[#allocation9 + $0xb0] sm:$0xf0]  ;;  %v3222_v4 = vld [vmem:[#allocation9 + $0xa8] sm:$0xf]  ;;  %v3499_v14 = vld [vmem:[#allocation9 + $0xb4] sm:$0xf0] }
 0x438   :  { %v1064_v22 = vmul.f32 %v1042_v30, %v4393_v61  ;;  %v1052_v0 = vmul.f32 %v3654_v59, %v1051_v13  ;;  %v3219_v5 = vor.u32 %v3496_v63, %v3216_v50  ;;  %v3497_v11 = vld [vmem:[#allocation9 + $0xac] sm:$0xf]  ;;  %v3224_v23 = vld [vmem:[#allocation9 + $0xb8] sm:$0xf0]  ;;  %v3491_v25 = vld [vmem:[#allocation9 + $0x74] sm:$0xf0] }
 0x439   :  { %v3486_v55 = vld [vmem:[#allocation9 + $0x4c] sm:$0xf0]  ;;  %v3174_v63 = vld [vmem:[#allocation9 + $0x48] sm:$0xf]  ;;  %v3487_v50 = vld [vmem:[#allocation9 + $0x54] sm:$0xf0] }
 0x43a   :  { %v4433_v18 = vadd.f32 %v1065_v31, %v1064_v22  ;;  %v1053_v48 = vadd.f32 %v3654_v59, %v1052_v0  ;;  %v3223_v31 = vor.u32 %v3499_v14, %v3222_v4  ;;  %v3227_v22 = vor.u32 %v3497_v11, %v3224_v23  ;;  %v3198_v0 = vld [vmem:[#allocation9 + $0x80] sm:$0xf]  ;;  %v3485_v14 = vld [vmem:[#allocation9 + $0x4c] sm:$0xf]  ;;  %v3176_v11 = vld [vmem:[#allocation9 + $0x58] sm:$0xf0] }
 0x43b   :  { %v3150_v23 = vld [vmem:[#allocation9 + $0x20] sm:$0xf] }
 0x43c   :  { %3657 = vtanh.f32 %v4433_v18  ;;  %v1057_v27 = vsel %vm1056_vm6, %v3654_v59, %v1053_v48  ;;  %v3498_v59 = vld [vmem:[#allocation9 + $0xac] sm:$0xf0] }
 0x43d   :  { %v1062_v8 = vsel %vm1059_vm7, %v1061_v3, %v1057_v27  ;;  %v3215_v62 = vor.u32 %v3498_v59, %v3214_v40  ;;  %v3494_v48 = vld [vmem:[#allocation9 + $0x8c] sm:$0xf0]  ;;  %v3484_v40 = vld [vmem:[#allocation9 + $0x44] sm:$0xf] }
 0x442   :  { %v3658_v7 = vpop.eup %3657 }
 0x443   :  { %v4436_v12 = vmul.f32 %v3658_v7, %v1062_v8  ;;  %v3199_v7 = vor.u32 %v3494_v48, %v3198_v0  ;;  %v3200_v8 = vld [vmem:[#allocation9 + $0x90] sm:$0xf0] }
 0x445   :  { %v1076_v61 = vpack.c.bf16 %v4436_v12, %v4436_v12 }
 0x447   :  { %1085 = vmatmul.bf16.vlgmr.msra.gmra.mxu0 %v1076_v61  ;;  %1098 = vmatmul.bf16.vlgmr.msra.gmra.mxu1 %v1076_v61 }
 0x448   :  { %1111 = vmatmul.bf16.vlgmr.msra.gmra.mxu2 %v1076_v61  ;;  %1124 = vmatmul.bf16.vlgmr.msra.gmra.mxu3 %v1076_v61  ;;  %v3206_v61 = vld [vmem:[#allocation9 + $0x88] sm:$0xf] }
 0x449   :  { %1571 = vmatpush.bf16.msra.mxu0 %v3247_v33  ;;  %1600 = vmatpush.bf16.msra.mxu1 %v3251_v45 }
 0x44a   :  { %1629 = vmatpush.bf16.msra.mxu2 %v3255_v46  ;;  %1658 = vmatpush.bf16.msra.mxu3 %v3259_v1  ;;  %v3490_v1 = vld [vmem:[#allocation9 + $0x6c] sm:$0xf0] }
 0x44d   :  { %1572 = vmatpush.bf16.msra.mxu0 %v3231_v24  ;;  %1601 = vmatpush.bf16.msra.mxu1 %v3235_v15  ;;  %v3190_v24 = vld [vmem:[#allocation9 + $0x68] sm:$0xf]  ;;  %v3166_v15 = vld [vmem:[#allocation9 + $0x40] sm:$0xf] }
 0x44e   :  { %1630 = vmatpush.bf16.msra.mxu2 %v3239_v52  ;;  %1659 = vmatpush.bf16.msra.mxu3 %v3243_v26  ;;  %v3167_v26 = vor.u32 %v3486_v55, %v3166_v15 }
 0x451   :  { %1573 = vmatpush.bf16.msra.mxu0 %v3215_v62  ;;  %1602 = vmatpush.bf16.msra.mxu1 %v3219_v5  ;;  %v3168_v62 = vld [vmem:[#allocation9 + $0x50] sm:$0xf0] }
 0x452   :  { %1631 = vmatpush.bf16.msra.mxu2 %v3223_v31  ;;  %1660 = vmatpush.bf16.msra.mxu3 %v3227_v22  ;;  %v3482_v22 = vld [vmem:[#allocation9 + $0x2c] sm:$0xf0]  ;;  %v3171_v48 = vor.u32 %v3484_v40, %v3168_v62 }
 0x455   :  { %1574 = vmatpush.bf16.msra.mxu0 %v3199_v7 }
 0x456   :  { %1661 = vmatpush.bf16.msra.mxu3 %v3211_v41 }
 0x4c4   :  { %v1086_v57 = vpop.f32.mrf.mxu0  ;;  %v1099_v58 = vpop.f32.mrf.mxu1 }
 0x4c5   :  { %v1129_v2 = vadd.f32 %v1086_v57, %v1072_v16  ;;  %v1130_v9 = vadd.f32 %v1099_v58, %v1073_v17  ;;  %v3495_v16 = vld [vmem:[#allocation9 + $0x94] sm:$0xf0]  ;;  %v3203_v17 = vor.u32 %v3492_v56, %v3200_v8  ;;  %v3175_v56 = vor.u32 %v3487_v50, %v3174_v63  ;;  %v3384_v8 = vld [vmem:[#allocation10 + $0xf8] sm:$0xf0] }
 0x4c6   :  { %v3207_v21 = vor.u32 %v3495_v16, %v3206_v61  ;;  %v3151_v16 = vor.u32 %v3482_v22, %v3150_v23 }
 0x4c7   :  { %v3126_v38 = vmul.f32 -1.442695, %v1129_v2  ;;  %v3127_v39 = vmul.f32 -1.442695, %v1130_v9  ;;  %1603 = vmatpush.bf16.msra.mxu1 %v3203_v17  ;;  %v3183_v2 = vor.u32 %v3490_v1, %v3182_v53  ;;  %v3488_v9 = vld [vmem:[#allocation9 + $0x64] sm:$0xf] }
 0x4c8   :  { %1632 = vmatpush.bf16.msra.mxu2 %v3207_v21  ;;  %v3187_v20 = vor.u32 %v3488_v9, %v3184_v10  ;;  %v3158_v17 = vld [vmem:[#allocation9 + $0x28] sm:$0xf]  ;;  %v3136_v10 = vld [vmem:[#allocation9 + $0x10] sm:$0xf0] }
 0x4c9   :  { %3659 = vpow2.f32 %v3126_v38  ;;  %1575 = vmatpush.bf16.msra.mxu0 %v3183_v2  ;;  %v3191_v38 = vor.u32 %v3491_v25, %v3190_v24 }
 0x4ca   :  { %3661 = vpow2.f32 %v3127_v39  ;;  %v3489_v39 = vld [vmem:[#allocation9 + $0x6c] sm:$0xf] }
 0x4cb   :  { %v1112_v13 = vpop.f32.mrf.mxu2  ;;  %v1125_v30 = vpop.f32.mrf.mxu3  ;;  %1604 = vmatpush.bf16.msra.mxu1 %v3187_v20  ;;  %v3479_v20 = vld [vmem:[#allocation9 + $0x14] sm:$0xf0] }
 0x4cc   :  { %v1132_v29 = vadd.f32 %v1125_v30, %v1075_v44  ;;  %v1088_v27 = vpop.f32.mrf.mxu0  ;;  %v1101_v3 = vpop.f32.mrf.mxu1  ;;  %v1131_v37 = vadd.f32 %v1112_v13, %v1074_v54  ;;  %v3192_v44 = vld [vmem:[#allocation9 + $0x78] sm:$0xf0]  ;;  %1633 = vmatpush.bf16.msra.mxu2 %v3191_v38  ;;  %v3134_v54 = vld [vmem:[#allocation9] sm:$0xf] }
 0x4cd   :  { %v3195_v49 = vor.u32 %v3489_v39, %v3192_v44  ;;  %1576 = vmatpush.bf16.msra.mxu0 %v3167_v26  ;;  %v3480_v27 = vld [vmem:[#allocation9 + $0x24] sm:$0xf]  ;;  %v3152_v3 = vld [vmem:[#allocation9 + $0x30] sm:$0xf0]  ;;  %v3477_v39 = vld [vmem:[#allocation9 + $0xc] sm:$0xf] }
 0x4ce   :  { %v3128_v33 = vmul.f32 -1.442695, %v1132_v29  ;;  %v3179_v29 = vor.u32 %v3485_v14, %v3176_v11  ;;  %v3155_v28 = vor.u32 %v3480_v27, %v3152_v3  ;;  %v3144_v44 = vld [vmem:[#allocation9 + $0x18] sm:$0xf0]  ;;  %v3376_v27 = vld [vmem:[#allocation10 + $0xf0] sm:$0xf0] }
 0x4cf   :  { %v3660_v34 = vpop.eup %3659  ;;  %1662 = vmatpush.bf16.msra.mxu3 %v3195_v49  ;;  %1605 = vmatpush.bf16.msra.mxu1 %v3171_v48  ;;  %v3147_v62 = vor.u32 %v3477_v39, %v3144_v44  ;;  %v3538_v48 = vld [vmem:[#allocation10 + $0xec] sm:$0xf0]  ;;  %v3352_v39 = vld [vmem:[#allocation10 + $0xb8] sm:$0xf0] }
 0x4d0   :  { %v3662_v42 = vpop.eup %3661  ;;  %v4440_v45 = vadd.f32 1.0, %v3660_v34  ;;  %3663 = vpow2.f32 %v3128_v33  ;;  %1634 = vmatpush.bf16.msra.mxu2 %v3175_v56  ;;  %v3481_v33 = vld [vmem:[#allocation9 + $0x2c] sm:$0xf]  ;;  %v3160_v34 = vld [vmem:[#allocation9 + $0x38] sm:$0xf0] }
 0x4d1   :  { %v4442_v46 = vadd.f32 1.0, %v3662_v42  ;;  %1577 = vmatpush.bf16.msra.mxu0 %v3151_v16  ;;  %v3159_v42 = vor.u32 %v3483_v32, %v3158_v17  ;;  %v3163_v53 = vor.u32 %v3481_v33, %v3160_v34  ;;  %v3536_v56 = vld [vmem:[#allocation10 + $0xe4] sm:$0xf]  ;;  %v3382_v16 = vld [vmem:[#allocation10 + $0xe8] sm:$0xf] }
 0x4d2   :  { %3665 = vrcp.f32 %v4440_v45  ;;  %v1146_v19 = vand.u32 2147483647, %v4440_v45  ;;  %v1148_v31 = vand.u32 2147483648, %v4440_v45  ;;  %vm1142_vm12 = vweird.f32 %v4440_v45  ;;  %v3539_v17 = vld [vmem:[#allocation10 + $0xf4] sm:$0xf0] }
 0x4d3   :  { %3667 = vrcp.f32 %v4442_v46  ;;  %v1114_v57 = vpop.f32.mrf.mxu2  ;;  %v1127_v58 = vpop.f32.mrf.mxu3  ;;  %v1167_v30 = vand.u32 2147483648, %v4442_v46  ;;  %v1165_v61 = vand.u32 2147483647, %v4442_v46  ;;  %1663 = vmatpush.bf16.msra.mxu3 %v3179_v29  ;;  %vm1161_vm11 = vweird.f32 %v4442_v46  ;;  %1606 = vmatpush.bf16.msra.mxu1 %v3155_v28  ;;  %v3358_v33 = vld [vmem:[#allocation10 + $0xc0] sm:$0xf] }
 0x4d4   :  { %vm4460_vm8 = vcmp.eq.f32.partialorder %v1146_v19, 8.507059e+37  ;;  %v3478_v57 = vld [vmem:[#allocation9 + $0xc] sm:$0xf0]  ;;  %v3476_v58 = vld [vmem:[#allocation9 + $0x4] sm:$0xf]  ;;  %1635 = vmatpush.bf16.msra.mxu2 %v3159_v42  ;;  %v4499_v3 = vor.u32 %v3536_v56, %v3376_v27 }
 0x4d5   :  { %v3135_v9 = vor.u32 %v3478_v57, %v3134_v54  ;;  %v3142_v19 = vld [vmem:[#allocation9 + $0x8] sm:$0xf]  ;;  %v1168_v25 = vor.u32 1.1754944e-38, %v1167_v30  ;;  %vm1166_vm15 = vcmp.eq.f32.partialorder %v1165_v61, 8.507059e+37  ;;  %v3139_v15 = vor.u32 %v3476_v58, %v3136_v10  ;;  %v3534_v34 = vld [vmem:[#allocation10 + $0xcc] sm:$0xf0] }
 0x4d6   :  { %v3664_v36 = vpop.eup %3663  ;;  %v3143_v49 = vor.u32 %v3479_v20, %v3142_v19  ;;  %v4513_v42 = vor.u32 %v3534_v34, %v3358_v33  ;;  %v3533_v54 = vld [vmem:[#allocation10 + $0xcc] sm:$0xf]  ;;  %v3368_v57 = vld [vmem:[#allocation10 + $0xd8] sm:$0xf0]  ;;  %v3366_v19 = vld [vmem:[#allocation10 + $0xc8] sm:$0xf] }
 0x4d7   :  { %v4447_v52 = vadd.f32 1.0, %v3664_v36  ;;  %v1149_v36 = vor.u32 1.1754944e-38, %v1148_v31  ;;  %1664 = vmatpush.bf16.msra.mxu3 %v3163_v53  ;;  %1578 = vmatpush.bf16.msra.mxu0 %v3135_v9  ;;  %v3360_v53 = vld [vmem:[#allocation10 + $0xd0] sm:$0xf0]  ;;  %v4517_v10 = vor.u32 %v3533_v54, %v3368_v57  ;;  %v3342_v20 = vld [vmem:[#allocation10 + $0xa0] sm:$0xf] }
 0x4d8   :  { %v4449_v59 = vpop.eup %3665  ;;  %1607 = vmatpush.bf16.msra.mxu1 %v3139_v15  ;;  %1636 = vmatpush.bf16.msra.mxu2 %v3143_v49  ;;  %v3535_v15 = vld [vmem:[#allocation10 + $0xd4] sm:$0xf0]  ;;  %v3326_v49 = vld [vmem:[#allocation10 + $0x80] sm:$0xf]  ;;  %v3518_v34 = vld [vmem:[#allocation10 + $0x4c] sm:$0xf0] }
 0x4d9   :  { %v4451_v4 = vpop.eup %3667  ;;  %v1138_v5 = vmul.f32 %v4449_v59, %v4440_v45  ;;  %3669 = vrcp.f32 %v4447_v52  ;;  %vm1143_vm9 = vweird.f32 %v4449_v59  ;;  %vm1181_vm1 = vweird.f32 %v4447_v52  ;;  %v3294_v33 = vld [vmem:[#allocation10 + $0x40] sm:$0xf]  ;;  %v3296_v54 = vld [vmem:[#allocation10 + $0x50] sm:$0xf0]  ;;  %v3517_v57 = vld [vmem:[#allocation10 + $0x4c] sm:$0xf] }
 0x4da   :  { %v1157_v13 = vmul.f32 %v4451_v4, %v4442_v46  ;;  %3671 = vtanh.f32 %v1131_v37  ;;  %vm1162_vm10 = vweird.f32 %v4451_v4  ;;  %vm1144_vm13 = vmor %vm1142_vm12, %vm1143_vm9  ;;  %v1185_v11 = vand.u32 2147483647, %v4447_v52 }
 0x4db   :  { %v1139_v0 = vsub.f32 1.0, %v1138_v5  ;;  %vm1163_vm14 = vmor %vm1161_vm11, %vm1162_vm10  ;;  %1665 = vmatpush.bf16.msra.mxu3 %v3147_v62  ;;  %v4530_v62 = vor.u32 %v3535_v15, %v3366_v19  ;;  %v4563_v19 = vor.u32 %v3518_v34, %v3294_v33  ;;  %v3514_v15 = vld [vmem:[#allocation10 + $0x2c] sm:$0xf0]  ;;  %v3262_v34 = vld [vmem:[#allocation10] sm:$0xf] }
 0x4dc   :  { %v1158_v7 = vsub.f32 1.0, %v1157_v13  ;;  %vm1186_vm3 = vcmp.eq.f32.partialorder %v1185_v11, 8.507059e+37 }
 0x4dd   :  { %v1140_v21 = vmul.f32 %v4449_v59, %v1139_v0  ;;  %v1398_v0 = vpack.c.bf16 %v4276_v51, %v4236_v43  ;;  %v1400_v43 = vpack.c.bf16 %v4436_v12, %v4396_v35  ;;  %v3537_v51 = vld [vmem:[#allocation10 + $0xec] sm:$0xf] }
 0x4de   :  { %v1159_v41 = vmul.f32 %v4451_v4, %v1158_v7  ;;  %v1399_v7 = vpack.c.bf16 %v4356_v6, %v4316_v60  ;;  %v4507_v61 = vor.u32 %v3537_v51, %v3384_v8  ;;  %v1199_v60 = vld [vmem:[#allocation4 + $0xe0] sm:$0xff]  ;;  %v1200_v6 = vld [vmem:[#allocation4 + $0xe8] sm:$0xff]  ;;  %v3320_v8 = vld [vmem:[#allocation10 + $0x78] sm:$0xf0] }
 0x4df   :  { %v3670_v1 = vpop.eup %3669  ;;  %v1141_v2 = vadd.f32 %v4449_v59, %v1140_v21  ;;  %v4510_v21 = vor.u32 %v3539_v17, %v3382_v16  ;;  %v3334_v16 = vld [vmem:[#allocation10 + $0x88] sm:$0xf]  ;;  %v3527_v17 = vld [vmem:[#allocation10 + $0x94] sm:$0xf0] }
 0x4e0   :  { %v3672_v24 = vpop.eup %3671  ;;  %v1160_v37 = vadd.f32 %v4451_v4, %v1159_v41  ;;  %v1177_v38 = vmul.f32 %v3670_v1, %v4447_v52  ;;  %vm1182_vm0 = vweird.f32 %v3670_v1  ;;  %v3532_v41 = vld [vmem:[#allocation10 + $0xc4] sm:$0xf] }
 0x4e1   :  { %v1145_v45 = vsel %vm1144_vm13, %v4449_v59, %v1141_v2  ;;  %vm1183_vm2 = vmor %vm1181_vm1, %vm1182_vm0  ;;  %v1202_v2 = vld [vmem:[#allocation4 + $0xf8] sm:$0xff]  ;;  %v4515_v9 = vor.u32 %v3532_v41, %v3360_v53  ;;  %v4559_v41 = vor.u32 %v3527_v17, %v3334_v16  ;;  %v3516_v53 = vld [vmem:[#allocation10 + $0x44] sm:$0xf] }
 0x4e2   :  { %v1150_v55 = vsel %vm4460_vm8, %v1149_v36, %v1145_v45  ;;  %v1164_v40 = vsel %vm1163_vm14, %v4451_v4, %v1160_v37  ;;  %v1178_v26 = vsub.f32 1.0, %v1177_v38  ;;  %v1187_v4 = vand.u32 2147483648, %v4447_v52  ;;  %v3374_v52 = vld [vmem:[#allocation10 + $0xe0] sm:$0xf]  ;;  %v3344_v37 = vld [vmem:[#allocation10 + $0xb0] sm:$0xf0] }
 0x4e3   :  { %v1169_v63 = vsel %vm1166_vm15, %v1168_v25, %v1164_v40  ;;  %v1192_v50 = vmul.f32 %v3672_v24, %v1150_v55  ;;  %v4497_v29 = vor.u32 %v3538_v48, %v3374_v52  ;;  %v3530_v24 = vld [vmem:[#allocation10 + $0xac] sm:$0xf0]  ;;  %v3528_v25 = vld [vmem:[#allocation10 + $0xa4] sm:$0xf]  ;;  %v3529_v38 = vld [vmem:[#allocation10 + $0xac] sm:$0xf] }
 0x4e4   :  { %v1191_v46 = vmul.f32 %v1169_v63, %v4433_v18  ;;  %v1179_v5 = vmul.f32 %v3670_v1, %v1178_v26  ;;  %v1188_v13 = vor.u32 1.1754944e-38, %v1187_v4  ;;  %v4522_v36 = vor.u32 %v3530_v24, %v3342_v20  ;;  %v3526_v55 = vld [vmem:[#allocation10 + $0x8c] sm:$0xf0]  ;;  %v3524_v63 = vld [vmem:[#allocation10 + $0x84] sm:$0xf] }
 0x4e5   :  { %v4524_v44 = vor.u32 %v3528_v25, %v3344_v37  ;;  %v4526_v45 = vor.u32 %v3529_v38, %v3352_v39  ;;  %v4533_v11 = vor.u32 %v3526_v55, %v3326_v49  ;;  %v3522_v52 = vld [vmem:[#allocation10 + $0x6c] sm:$0xf0]  ;;  %v3520_v48 = vld [vmem:[#allocation10 + $0x64] sm:$0xf]  ;;  %v3318_v20 = vld [vmem:[#allocation10 + $0x68] sm:$0xf]  ;;  %v4567_v37 = vor.u32 %v3516_v53, %v3296_v54 }
 0x4e6   :  { %v4485_v59 = vadd.f32 %v1192_v50, %v1191_v46  ;;  %v1180_v14 = vadd.f32 %v3670_v1, %v1179_v5  ;;  %v3328_v50 = vld [vmem:[#allocation10 + $0x90] sm:$0xf0]  ;;  %v3525_v46 = vld [vmem:[#allocation10 + $0x8c] sm:$0xf]  ;;  %v3523_v24 = vld [vmem:[#allocation10 + $0x74] sm:$0xf0] }
 0x4e7   :  { %v1201_v25 = vld [vmem:[#allocation4 + $0xf0] sm:$0xff]  ;;  %v3278_v39 = vld [vmem:[#allocation10 + $0x20] sm:$0xf]  ;;  %v4572_v55 = vor.u32 %v3523_v24, %v3318_v20  ;;  %v3286_v16 = vld [vmem:[#allocation10 + $0x28] sm:$0xf] }
 0x4e8   :  { %3673 = vtanh.f32 %v4485_v59  ;;  %v1184_v23 = vsel %vm1183_vm2, %v3670_v1, %v1180_v14  ;;  %v3515_v17 = vld [vmem:[#allocation10 + $0x34] sm:$0xf0]  ;;  %v3510_v53 = vld [vmem:[#allocation10 + $0xc] sm:$0xf0] }
 0x4e9   :  { %v1189_v30 = vsel %vm1186_vm3, %v1188_v13, %v1184_v23  ;;  %v3336_v23 = vld [vmem:[#allocation10 + $0x98] sm:$0xf0]  ;;  %v3350_v13 = vld [vmem:[#allocation10 + $0xa8] sm:$0xf]  ;;  %v4610_v20 = vor.u32 %v3510_v53, %v3262_v34 }
 0x4ee   :  { %v3674_v18 = vpop.eup %3673 }
 0x4ef   :  { %v4491_v31 = vmul.f32 %v3674_v18, %v1189_v30  ;;  %v3531_v18 = vld [vmem:[#allocation10 + $0xb4] sm:$0xf0]  ;;  %v4537_v30 = vor.u32 %v3524_v63, %v3328_v50  ;;  %v3280_v63 = vld [vmem:[#allocation10 + $0x30] sm:$0xf0] }
 0x4f0   :  { %v4542_v27 = vor.u32 %v3531_v18, %v3350_v13  ;;  %v3513_v13 = vld [vmem:[#allocation10 + $0x2c] sm:$0xf]  ;;  %v3288_v18 = vld [vmem:[#allocation10 + $0x38] sm:$0xf0] }
 0x4f1   :  { %v1203_v22 = vpack.c.bf16 %v4491_v31, %v4491_v31 }
 0x4f3   :  { %1212 = vmatmul.bf16.vlgmr.msrb.gmra.mxu0 %v1203_v22  ;;  %1225 = vmatmul.bf16.vlgmr.msrb.gmra.mxu1 %v1203_v22 }
 0x4f4   :  { %1238 = vmatmul.bf16.vlgmr.msrb.gmra.mxu2 %v1203_v22  ;;  %1251 = vmatmul.bf16.vlgmr.msrb.gmra.mxu3 %v1203_v22  ;;  %v4539_v22 = vor.u32 %v3525_v46, %v3336_v23  ;;  %v3302_v46 = vld [vmem:[#allocation10 + $0x48] sm:$0xf]  ;;  %v4580_v23 = vor.u32 %v3514_v15, %v3278_v39  ;;  %v3509_v39 = vld [vmem:[#allocation10 + $0xc] sm:$0xf] }
 0x4f5   :  { %1883 = vmatpush.bf16.msrb.mxu0 %v4497_v29  ;;  %1896 = vmatpush.bf16.msrb.mxu1 %v4499_v3 }
 0x4f6   :  { %1922 = vmatpush.bf16.msrb.mxu3 %v4507_v61  ;;  %1909 = vmatpush.bf16.msrb.mxu2 %v4510_v21 }
 0x4f9   :  { %1884 = vmatpush.bf16.msrb.mxu0 %v4513_v42  ;;  %1897 = vmatpush.bf16.msrb.mxu1 %v4515_v9 }
 0x4fa   :  { %1923 = vmatpush.bf16.msrb.mxu3 %v4517_v10  ;;  %1910 = vmatpush.bf16.msrb.mxu2 %v4530_v62 }
 0x4fd   :  { %1885 = vmatpush.bf16.msrb.mxu0 %v4522_v36  ;;  %1898 = vmatpush.bf16.msrb.mxu1 %v4524_v44 }
 0x4fe   :  { %1924 = vmatpush.bf16.msrb.mxu3 %v4526_v45  ;;  %1911 = vmatpush.bf16.msrb.mxu2 %v4542_v27 }
 0x501   :  { %1886 = vmatpush.bf16.msrb.mxu0 %v4533_v11  ;;  %1899 = vmatpush.bf16.msrb.mxu1 %v4537_v30 }
 0x502   :  { %1925 = vmatpush.bf16.msrb.mxu3 %v4539_v22  ;;  %1912 = vmatpush.bf16.msrb.mxu2 %v4559_v41 }
 0x503   :  { %1579 = vmatmul.bf16.vlgmr.msra.gmra.mxu0 %v1398_v0  ;;  %1608 = vmatmul.bf16.vlgmr.msra.gmra.mxu1 %v1398_v0 }
 0x504   :  { %1637 = vmatmul.bf16.vlgmr.msra.gmra.mxu2 %v1398_v0  ;;  %1666 = vmatmul.bf16.vlgmr.msra.gmra.mxu3 %v1398_v0  ;;  %v3310_v0 = vld [vmem:[#allocation10 + $0x60] sm:$0xf] }
 0x506   :  { %1913 = vmatpush.bf16.msrb.mxu2 %v4572_v55 }
 0x513   :  { %1584 = vmatmul.bf16.gmra.mxu0 %v1399_v7  ;;  %1613 = vmatmul.bf16.gmra.mxu1 %v1399_v7 }
 0x514   :  { %1642 = vmatmul.bf16.gmra.mxu2 %v1399_v7  ;;  %1671 = vmatmul.bf16.gmra.mxu3 %v1399_v7  ;;  %v3312_v7 = vld [vmem:[#allocation10 + $0x70] sm:$0xf0] }
 0x523   :  { %1589 = vmatmul.bf16.gmra.mxu0 %v1400_v43  ;;  %1618 = vmatmul.bf16.gmra.mxu1 %v1400_v43 }
 0x524   :  { %1647 = vmatmul.bf16.gmra.mxu2 %v1400_v43  ;;  %1676 = vmatmul.bf16.gmra.mxu3 %v1400_v43  ;;  %v3521_v43 = vld [vmem:[#allocation10 + $0x6c] sm:$0xf] }
 0x570   :  { %v1213_v28 = vpop.f32.mrf.mxu0  ;;  %v1226_v32 = vpop.f32.mrf.mxu1 }
 0x571   :  { %v1256_v35 = vadd.f32 %v1213_v28, %v1199_v60  ;;  %v1257_v12 = vadd.f32 %v1226_v32, %v1200_v6  ;;  %v4547_v28 = vor.u32 %v3522_v52, %v3310_v0 }
 0x573   :  { %v3129_v58 = vmul.f32 -1.442695, %v1256_v35  ;;  %v3130_v1 = vmul.f32 -1.442695, %v1257_v12  ;;  %v4553_v35 = vor.u32 %v3520_v48, %v3312_v7  ;;  %v4555_v12 = vor.u32 %v3521_v43, %v3320_v8  ;;  %1887 = vmatpush.bf16.msrb.mxu0 %v4547_v28 }
 0x574   :  { %v4598_v8 = vor.u32 %v3513_v13, %v3288_v18 }
 0x575   :  { %3675 = vpow2.f32 %v3129_v58  ;;  %1900 = vmatpush.bf16.msrb.mxu1 %v4553_v35  ;;  %1926 = vmatpush.bf16.msrb.mxu3 %v4555_v12 }
 0x576   :  { %3677 = vpow2.f32 %v3130_v1 }
 0x577   :  { %v4528_v40 = vpop.f32.mrf.mxu2  ;;  %v1252_v26 = vpop.f32.mrf.mxu3  ;;  %1888 = vmatpush.bf16.msrb.mxu0 %v4563_v19 }
 0x578   :  { %v1259_v5 = vadd.f32 %v1252_v26, %v1202_v2  ;;  %v1215_v14 = vpop.f32.mrf.mxu0  ;;  %v1228_v4 = vpop.f32.mrf.mxu1  ;;  %v3304_v2 = vld [vmem:[#allocation10 + $0x58] sm:$0xf0]  ;;  %v3512_v26 = vld [vmem:[#allocation10 + $0x24] sm:$0xf] }
 0x579   :  { %v4569_v38 = vor.u32 %v3517_v57, %v3304_v2  ;;  %v1258_v4 = vadd.f32 %v4528_v40, %v1201_v25  ;;  %1901 = vmatpush.bf16.msrb.mxu1 %v4567_v37  ;;  %v4589_v48 = vor.u32 %v3512_v26, %v3280_v63  ;;  %v4614_v25 = vor.u32 %v3515_v17, %v3286_v16  ;;  %v3270_v26 = vld [vmem:[#allocation10 + $0x8] sm:$0xf]  ;;  %v3511_v63 = vld [vmem:[#allocation10 + $0x14] sm:$0xf0] }
 0x57a   :  { %v3131_v56 = vmul.f32 -1.442695, %v1259_v5  ;;  %v3519_v5 = vld [vmem:[#allocation10 + $0x54] sm:$0xf0]  ;;  %v4633_v16 = vor.u32 %v3511_v63, %v3270_v26 }
 0x57b   :  { %v3676_v51 = vpop.eup %3675  ;;  %1927 = vmatpush.bf16.msrb.mxu3 %v4569_v38  ;;  %v4595_v7 = vor.u32 %v3519_v5, %v3302_v46  ;;  %1889 = vmatpush.bf16.msrb.mxu0 %v4580_v23  ;;  %v3272_v46 = vld [vmem:[#allocation10 + $0x18] sm:$0xf0] }
 0x57c   :  { %v3678_v60 = vpop.eup %3677  ;;  %v4544_v6 = vadd.f32 1.0, %v3676_v51  ;;  %3679 = vpow2.f32 %v3131_v56  ;;  %v4624_v18 = vor.u32 %v3509_v39, %v3272_v46 }
 0x57d   :  { %v4549_v32 = vadd.f32 1.0, %v3678_v60  ;;  %1902 = vmatpush.bf16.msrb.mxu1 %v4589_v48  ;;  %1914 = vmatpush.bf16.msrb.mxu2 %v4595_v7 }
 0x57e   :  { %3681 = vrcp.f32 %v4544_v6  ;;  %v1273_v56 = vand.u32 2147483647, %v4544_v6  ;;  %v1275_v51 = vand.u32 2147483648, %v4544_v6  ;;  %vm1269_vm7 = vweird.f32 %v4544_v6 }
 0x57f   :  { %3683 = vrcp.f32 %v4549_v32  ;;  %v1241_v58 = vpop.f32.mrf.mxu2  ;;  %v1254_v1 = vpop.f32.mrf.mxu3  ;;  %v1294_v33 = vand.u32 2147483648, %v4549_v32  ;;  %v1292_v57 = vand.u32 2147483647, %v4549_v32  ;;  %1928 = vmatpush.bf16.msrb.mxu3 %v4598_v8  ;;  %vm1288_vm6 = vweird.f32 %v4549_v32  ;;  %1890 = vmatpush.bf16.msrb.mxu0 %v4610_v20 }
 0x580   :  { %v3508_v58 = vld [vmem:[#allocation10 + $0x4] sm:$0xf]  ;;  %v3264_v1 = vld [vmem:[#allocation10 + $0x10] sm:$0xf0]  ;;  %v1276_v5 = vor.u32 1.1754944e-38, %v1275_v51  ;;  %vm1274_vm10 = vcmp.eq.f32.partialorder %v1273_v56, 8.507059e+37 }
 0x581   :  { %v4612_v24 = vor.u32 %v3508_v58, %v3264_v1  ;;  %vm1293_vm11 = vcmp.eq.f32.partialorder %v1292_v57, 8.507059e+37  ;;  %1915 = vmatpush.bf16.msrb.mxu2 %v4614_v25 }
 0x582   :  { %v3680_v49 = vpop.eup %3679 }
 0x583   :  { %v4574_v50 = vadd.f32 1.0, %v3680_v49  ;;  %1903 = vmatpush.bf16.msrb.mxu1 %v4612_v24  ;;  %2008 = vmatpush.bf16.msra.mxu0 %v4497_v29 }
 0x584   :  { %v4576_v14 = vpop.eup %3681  ;;  %1929 = vmatpush.bf16.msrb.mxu3 %v4624_v18 }
 0x585   :  { %v4582_v0 = vpop.eup %3683  ;;  %v1265_v52 = vmul.f32 %v4576_v14, %v4544_v6  ;;  %3685 = vrcp.f32 %v4574_v50  ;;  %vm1270_vm5 = vweird.f32 %v4576_v14  ;;  %1916 = vmatpush.bf16.msrb.mxu2 %v4633_v16  ;;  %v1314_v34 = vand.u32 2147483648, %v4574_v50 }
 0x586   :  { %v1284_v40 = vmul.f32 %v4582_v0, %v4549_v32  ;;  %3687 = vtanh.f32 %v1258_v4  ;;  %vm1289_vm4 = vweird.f32 %v4582_v0  ;;  %vm1271_vm8 = vmor %vm1269_vm7, %vm1270_vm5  ;;  %v1295_v32 = vor.u32 1.1754944e-38, %v1294_v33 }
 0x587   :  { %v1266_v43 = vsub.f32 1.0, %v1265_v52  ;;  %vm1290_vm9 = vmor %vm1288_vm6, %vm1289_vm4  ;;  %2021 = vmatpush.bf16.msra.mxu1 %v4499_v3  ;;  %2009 = vmatpush.bf16.msra.mxu0 %v4513_v42  ;;  %vm1308_vm13 = vweird.f32 %v4574_v50  ;;  %v1667_v39 = vpop.f32.mrf.mxu3 }
 0x588   :  { %v1285_v60 = vsub.f32 1.0, %v1284_v40  ;;  %2047 = vmatpush.bf16.msra.mxu3 %v4507_v61 }
 0x589   :  { %v1267_v54 = vmul.f32 %v4576_v14, %v1266_v43  ;;  %2034 = vmatpush.bf16.msra.mxu2 %v4510_v21 }
 0x58a   :  { %v1286_v2 = vmul.f32 %v4582_v0, %v1285_v60 }
 0x58b   :  { %v3686_v15 = vpop.eup %3685  ;;  %v1268_v49 = vadd.f32 %v4576_v14, %v1267_v54  ;;  %2022 = vmatpush.bf16.msra.mxu1 %v4515_v9  ;;  %2010 = vmatpush.bf16.msra.mxu0 %v4522_v36  ;;  %v1315_v54 = vor.u32 1.1754944e-38, %v1314_v34 }
 0x58c   :  { %v1287_v4 = vadd.f32 %v4582_v0, %v1286_v2  ;;  %v1304_v13 = vmul.f32 %v3686_v15, %v4574_v50  ;;  %v3688_v52 = vpop.eup %3687  ;;  %vm1309_vm12 = vweird.f32 %v3686_v15  ;;  %2048 = vmatpush.bf16.msra.mxu3 %v4517_v10  ;;  %v1638_v2 = vpop.f32.mrf.mxu2 }
 0x58d   :  { %v1272_v6 = vsel %vm1271_vm8, %v4576_v14, %v1268_v49  ;;  %vm1310_vm14 = vmor %vm1308_vm13, %vm1309_vm12  ;;  %2035 = vmatpush.bf16.msra.mxu2 %v4530_v62 }
 0x58e   :  { %v1277_v40 = vsel %vm1274_vm10, %v1276_v5, %v1272_v6  ;;  %v1291_v43 = vsel %vm1290_vm9, %v4582_v0, %v1287_v4  ;;  %v1305_v51 = vsub.f32 1.0, %v1304_v13 }
 0x58f   :  { %v1296_v17 = vsel %vm1293_vm11, %v1295_v32, %v1291_v43  ;;  %v1319_v60 = vmul.f32 %v3688_v52, %v1277_v40  ;;  %2023 = vmatpush.bf16.msra.mxu1 %v4524_v44  ;;  %2011 = vmatpush.bf16.msra.mxu0 %v4533_v11  ;;  %v4715_v63 = vpop.f32.mrf.mxu3 }
 0x590   :  { %v1318_v14 = vmul.f32 %v1296_v17, %v4485_v59  ;;  %v1306_v56 = vmul.f32 %v3686_v15, %v1305_v51  ;;  %v1312_v59 = vand.u32 2147483647, %v4574_v50  ;;  %2049 = vmatpush.bf16.msra.mxu3 %v4526_v45 }
 0x591   :  { %2036 = vmatpush.bf16.msra.mxu2 %v4542_v27 }
 0x592   :  { %v1320_v33 = vadd.f32 %v1319_v60, %v1318_v14  ;;  %v1307_v0 = vadd.f32 %v3686_v15, %v1306_v56  ;;  %vm1313_vm15 = vcmp.eq.f32.partialorder %v1312_v59, 8.507059e+37 }
 0x593   :  { %2024 = vmatpush.bf16.msra.mxu1 %v4537_v30  ;;  %2012 = vmatpush.bf16.msra.mxu0 %v4547_v28 }
 0x594   :  { %3689 = vtanh.f32 %v1320_v33  ;;  %v1311_v53 = vsel %vm1310_vm14, %v3686_v15, %v1307_v0  ;;  %2050 = vmatpush.bf16.msra.mxu3 %v4539_v22  ;;  %v4713_v26 = vpop.f32.mrf.mxu2 }
 0x595   :  { %v1316_v58 = vsel %vm1313_vm15, %v1315_v54, %v1311_v53  ;;  %2037 = vmatpush.bf16.msra.mxu2 %v4559_v41  ;;  %5039 = vst [vmem:[#allocation21_spill] sm:$0xff] %v4713_v26 }
 0x597   :  { %2025 = vmatpush.bf16.msra.mxu1 %v4553_v35  ;;  %2013 = vmatpush.bf16.msra.mxu0 %v4563_v19  ;;  %v4723_v13 = vpop.f32.mrf.mxu3 }
 0x598   :  { %2051 = vmatpush.bf16.msra.mxu3 %v4555_v12  ;;  %5043 = vst [vmem:[#allocation25_spill] sm:$0xff] %v4723_v13 }
 0x599   :  { %2038 = vmatpush.bf16.msra.mxu2 %v4572_v55 }
 0x59a   :  { %v3690_v57 = vpop.eup %3689 }
 0x59b   :  { %v1322_v1 = vmul.f32 %v3690_v57, %v1316_v58  ;;  %2026 = vmatpush.bf16.msra.mxu1 %v4567_v37  ;;  %2014 = vmatpush.bf16.msra.mxu0 %v4580_v23  ;;  %v1389_v57 = vld [vmem:[#allocation12] sm:$0xf] }
 0x59c   :  { %2052 = vmatpush.bf16.msra.mxu3 %v4569_v38  ;;  %v4721_v4 = vpop.f32.mrf.mxu2 }
 0x59d   :  { %v1401_v50 = vpack.c.bf16 %v1322_v1, %v4491_v31  ;;  %2039 = vmatpush.bf16.msra.mxu2 %v4595_v7  ;;  %v1609_v31 = vpop.f32.mrf.mxu1  ;;  %5042 = vst [vmem:[#allocation24_spill] sm:$0xff] %v4721_v4 }
 0x59f   :  { %1594 = vmatmul.bf16.gmra.mxu0 %v1401_v50  ;;  %1623 = vmatmul.bf16.gmra.mxu1 %v1401_v50  ;;  %v4731_v40 = vpop.f32.mrf.mxu3 }
 0x5a0   :  { %1652 = vmatmul.bf16.gmra.mxu2 %v1401_v50  ;;  %1681 = vmatmul.bf16.gmra.mxu3 %v1401_v50  ;;  %5047 = vst [vmem:[#allocation29_spill] sm:$0xff] %v4731_v40  ;;  %v4761_v50 = vperm.slane %v1389_v57, 0 }
 0x5a1   :  { %2027 = vmatpush.bf16.msra.mxu1 %v4589_v48  ;;  %2053 = vmatpush.bf16.msra.mxu3 %v4598_v8 }
 0x5a2   :  { %2015 = vmatpush.bf16.msra.mxu0 %v4610_v20  ;;  %2040 = vmatpush.bf16.msra.mxu2 %v4614_v25 }
 0x5a4   :  { %v4729_v52 = vpop.f32.mrf.mxu2 }
 0x5a5   :  { %2028 = vmatpush.bf16.msra.mxu1 %v4612_v24  ;;  %2054 = vmatpush.bf16.msra.mxu3 %v4624_v18  ;;  %v4711_v49 = vpop.f32.mrf.mxu1  ;;  %5046 = vst [vmem:[#allocation28_spill] sm:$0xff] %v4729_v52 }
 0x5a6   :  { %2041 = vmatpush.bf16.msra.mxu2 %v4633_v16 }
 0x5a7   :  { %v4739_v60 = vpop.f32.mrf.mxu3 }
 0x5a8   :  { %5051 = vst [vmem:[#allocation33_spill] sm:$0xff] %v4739_v60  ;;  %v4771_v60 = vperm.slane %v1389_v57, 3 }
 0x5ac   :  { %v4737_v17 = vpop.f32.mrf.mxu2 }
 0x5ad   :  { %v4719_v5 = vpop.f32.mrf.mxu1  ;;  %5050 = vst [vmem:[#allocation32_spill] sm:$0xff] %v4737_v17 }
 0x5ae   :  { %5041 = vst [vmem:[#allocation23_spill] sm:$0xff] %v4719_v5 }
 0x5af   :  { %1891 = vmatmul.bf16.vlgmr.msrb.gmra.mxu0 %v4009_v47  ;;  %1904 = vmatmul.bf16.vlgmr.msrb.gmra.mxu1 %v4009_v47  ;;  %v4747_v0 = vpop.f32.mrf.mxu3 }
 0x5b0   :  { %1917 = vmatmul.bf16.vlgmr.msrb.gmra.mxu2 %v4009_v47  ;;  %1930 = vmatmul.bf16.vlgmr.msrb.gmra.mxu3 %v4009_v47  ;;  %v1580_v47 = vpop.f32.mrf.mxu0  ;;  %5055 = vst [vmem:[#allocation37_spill] sm:$0xff] %v4747_v0 }
 0x5b1   :  { %2133 = vmatpush.bf16.msrb.mxu0 %v4497_v29  ;;  %2146 = vmatpush.bf16.msrb.mxu1 %v4499_v3 }
 0x5b2   :  { %2159 = vmatpush.bf16.msrb.mxu2 %v4510_v21  ;;  %2172 = vmatpush.bf16.msrb.mxu3 %v4507_v61 }
 0x5b4   :  { %v4745_v33 = vpop.f32.mrf.mxu2 }
 0x5b5   :  { %2134 = vmatpush.bf16.msrb.mxu0 %v4513_v42  ;;  %2147 = vmatpush.bf16.msrb.mxu1 %v4515_v9  ;;  %v4727_v6 = vpop.f32.mrf.mxu1  ;;  %5054 = vst [vmem:[#allocation36_spill] sm:$0xff] %v4745_v33  ;;  %v1581_v33 = vadd.f32 %v1580_v47, %v4761_v50 }
 0x5b6   :  { %2160 = vmatpush.bf16.msrb.mxu2 %v4530_v62  ;;  %2173 = vmatpush.bf16.msrb.mxu3 %v4517_v10  ;;  %5045 = vst [vmem:[#allocation27_spill] sm:$0xff] %v4727_v6 }
 0x5b8   :  { %v4709_v15 = vpop.f32.mrf.mxu0 }
 0x5b9   :  { %2135 = vmatpush.bf16.msrb.mxu0 %v4522_v36  ;;  %2148 = vmatpush.bf16.msrb.mxu1 %v4524_v44 }
 0x5ba   :  { %2161 = vmatpush.bf16.msrb.mxu2 %v4542_v27  ;;  %2174 = vmatpush.bf16.msrb.mxu3 %v4526_v45 }
 0x5bd   :  { %2136 = vmatpush.bf16.msrb.mxu0 %v4533_v11  ;;  %2149 = vmatpush.bf16.msrb.mxu1 %v4537_v30  ;;  %v4735_v51 = vpop.f32.mrf.mxu1 }
 0x5be   :  { %2162 = vmatpush.bf16.msrb.mxu2 %v4559_v41  ;;  %2175 = vmatpush.bf16.msrb.mxu3 %v4539_v22  ;;  %5049 = vst [vmem:[#allocation31_spill] sm:$0xff] %v4735_v51  ;;  %v1668_v51 = vadd.f32 %v1667_v39, %v4771_v60 }
 0x5c0   :  { %v4717_v46 = vpop.f32.mrf.mxu0 }
 0x5c1   :  { %2137 = vmatpush.bf16.msrb.mxu0 %v4547_v28  ;;  %2150 = vmatpush.bf16.msrb.mxu1 %v4553_v35  ;;  %5040 = vst [vmem:[#allocation22_spill] sm:$0xff] %v4717_v46 }
 0x5c2   :  { %2163 = vmatpush.bf16.msrb.mxu2 %v4572_v55  ;;  %2176 = vmatpush.bf16.msrb.mxu3 %v4555_v12 }
 0x5c5   :  { %2138 = vmatpush.bf16.msrb.mxu0 %v4563_v19  ;;  %2151 = vmatpush.bf16.msrb.mxu1 %v4567_v37  ;;  %v4743_v56 = vpop.f32.mrf.mxu1 }
 0x5c6   :  { %2164 = vmatpush.bf16.msrb.mxu2 %v4595_v7  ;;  %2177 = vmatpush.bf16.msrb.mxu3 %v4569_v38  ;;  %5053 = vst [vmem:[#allocation35_spill] sm:$0xff] %v4743_v56  ;;  %v4763_v56 = vperm.slane %v1389_v57, 1 }
 0x5c8   :  { %v4725_v32 = vpop.f32.mrf.mxu0  ;;  %v1610_v0 = vadd.f32 %v1609_v31, %v4763_v56 }
 0x5c9   :  { %2139 = vmatpush.bf16.msrb.mxu0 %v4580_v23  ;;  %2152 = vmatpush.bf16.msrb.mxu1 %v4589_v48  ;;  %5044 = vst [vmem:[#allocation26_spill] sm:$0xff] %v4725_v32 }
 0x5ca   :  { %2165 = vmatpush.bf16.msrb.mxu2 %v4614_v25  ;;  %2178 = vmatpush.bf16.msrb.mxu3 %v4598_v8 }
 0x5cd   :  { %2140 = vmatpush.bf16.msrb.mxu0 %v4610_v20  ;;  %2153 = vmatpush.bf16.msrb.mxu1 %v4612_v24 }
 0x5ce   :  { %2166 = vmatpush.bf16.msrb.mxu2 %v4633_v16  ;;  %2179 = vmatpush.bf16.msrb.mxu3 %v4624_v18 }
 0x5d0   :  { %v4733_v43 = vpop.f32.mrf.mxu0 }
 0x5d1   :  { %5048 = vst [vmem:[#allocation30_spill] sm:$0xff] %v4733_v43 }
 0x5d8   :  { %v4741_v14 = vpop.f32.mrf.mxu0 }
 0x5d9   :  { %5052 = vst [vmem:[#allocation34_spill] sm:$0xff] %v4741_v14 }
 0x61c   :  { %v4749_v34 = vpop.f32.mrf.mxu0  ;;  %v4751_v59 = vpop.f32.mrf.mxu1 }
 0x61d   :  { %5056 = vst [vmem:[#allocation38_spill] sm:$0xff] %v4749_v34 }
 0x61e   :  { %5057 = vst [vmem:[#allocation39_spill] sm:$0xff] %v4751_v59 }
 0x623   :  { %v4753_v53 = vpop.f32.mrf.mxu2  ;;  %v4755_v54 = vpop.f32.mrf.mxu3 }
 0x624   :  { %5058 = vst [vmem:[#allocation40_spill] sm:$0xff] %v4753_v53  ;;  %v4757_v58 = vpop.f32.mrf.mxu0  ;;  %v4759_v1 = vpop.f32.mrf.mxu1 }
 0x625   :  { %5059 = vst [vmem:[#allocation41_spill] sm:$0xff] %v4755_v54 }
 0x626   :  { %5060 = vst [vmem:[#allocation42_spill] sm:$0xff] %v4757_v58 }
 0x627   :  { %5061 = vst [vmem:[#allocation43_spill] sm:$0xff] %v4759_v1 }
 0x62b   :  { %v4767_v34 = vpop.f32.mrf.mxu2  ;;  %v4769_v59 = vpop.f32.mrf.mxu3 }
 0x62c   :  { %5062 = vst [vmem:[#allocation44_spill] sm:$0xff] %v4767_v34  ;;  %v1892_v53 = vpop.f32.mrf.mxu0  ;;  %v1905_v14 = vpop.f32.mrf.mxu1 }
 0x62d   :  { %5063 = vst [vmem:[#allocation45_spill] sm:$0xff] %v4769_v59  ;;  %v1935_v54 = vadd.f32 %v1892_v53, %v1581_v33  ;;  %v1936_v17 = vadd.f32 %v1905_v14, %v1610_v0  ;;  %v4774_v14 = vperm.slane %v1389_v57, 2 }
 0x62f   :  { %v3388_v58 = vmul.f32 -1.442695, %v1935_v54  ;;  %v3389_v1 = vmul.f32 -1.442695, %v1936_v17  ;;  %5064 = vst [vmem:[#allocation46_spill] sm:$0xff] %v4774_v14  ;;  %v1639_v39 = vadd.f32 %v1638_v2, %v4774_v14 }
 0x631   :  { %3691 = vpow2.f32 %v3388_v58 }
 0x632   :  { %3693 = vpow2.f32 %v3389_v1 }
 0x633   :  { %v1918_v43 = vpop.f32.mrf.mxu2  ;;  %v1931_v47 = vpop.f32.mrf.mxu3 }
 0x634   :  { %v1938_v52 = vadd.f32 %v1931_v47, %v1668_v51  ;;  %v1894_v31 = vpop.f32.mrf.mxu0  ;;  %v1907_v40 = vpop.f32.mrf.mxu1  ;;  %v1937_v51 = vadd.f32 %v1918_v43, %v1639_v39 }
 0x636   :  { %v3390_v34 = vmul.f32 -1.442695, %v1938_v52 }
 0x637   :  { %v3692_v6 = vpop.eup %3691 }
 0x638   :  { %v3694_v59 = vpop.eup %3693  ;;  %v1942_v32 = vadd.f32 1.0, %v3692_v6  ;;  %3695 = vpow2.f32 %v3390_v34 }
 0x639   :  { %v1961_v33 = vadd.f32 1.0, %v3694_v59 }
 0x63a   :  { %3697 = vrcp.f32 %v1942_v32  ;;  %v1954_v34 = vand.u32 2147483648, %v1942_v32  ;;  %v1952_v31 = vand.u32 2147483647, %v1942_v32  ;;  %vm1948_vm2 = vweird.f32 %v1942_v32 }
 0x63b   :  { %3699 = vrcp.f32 %v1961_v33  ;;  %v1933_v17 = vpop.f32.mrf.mxu3  ;;  %v1920_v0 = vpop.f32.mrf.mxu2  ;;  %v1973_v59 = vand.u32 2147483648, %v1961_v33  ;;  %vm1967_vm3 = vweird.f32 %v1961_v33 }
 0x63c   :  { %v1971_v0 = vand.u32 2147483647, %v1961_v33  ;;  %v1955_v43 = vor.u32 1.1754944e-38, %v1954_v34  ;;  %vm1953_vm5 = vcmp.eq.f32.partialorder %v1952_v31, 8.507059e+37 }
 0x63d   :  { %v1974_v13 = vor.u32 1.1754944e-38, %v1973_v59 }
 0x63e   :  { %v3696_v53 = vpop.eup %3695  ;;  %vm1972_vm7 = vcmp.eq.f32.partialorder %v1971_v0, 8.507059e+37 }
 0x63f   :  { %v1981_v54 = vadd.f32 1.0, %v3696_v53 }
 0x640   :  { %v3698_v58 = vpop.eup %3697 }
 0x641   :  { %v3700_v1 = vpop.eup %3699  ;;  %v1944_v40 = vmul.f32 %v3698_v58, %v1942_v32  ;;  %3701 = vrcp.f32 %v1981_v54  ;;  %vm1949_vm0 = vweird.f32 %v3698_v58  ;;  %vm1987_vm9 = vweird.f32 %v1981_v54 }
 0x642   :  { %v1963_v52 = vmul.f32 %v3700_v1, %v1961_v33  ;;  %3703 = vtanh.f32 %v1937_v51  ;;  %vm1968_vm1 = vweird.f32 %v3700_v1  ;;  %vm1950_vm4 = vmor %vm1948_vm2, %vm1949_vm0  ;;  %v1993_v33 = vand.u32 2147483648, %v1981_v54 }
 0x643   :  { %v1945_v47 = vsub.f32 1.0, %v1944_v40  ;;  %vm1969_vm6 = vmor %vm1967_vm3, %vm1968_vm1 }
 0x644   :  { %v1964_v6 = vsub.f32 1.0, %v1963_v52  ;;  %v1994_v59 = vor.u32 1.1754944e-38, %v1993_v33 }
 0x645   :  { %v1946_v57 = vmul.f32 %v3698_v58, %v1945_v47 }
 0x646   :  { %v1965_v17 = vmul.f32 %v3700_v1, %v1964_v6 }
 0x647   :  { %v3702_v4 = vpop.eup %3701  ;;  %v1947_v2 = vadd.f32 %v3698_v58, %v1946_v57 }
 0x648   :  { %v1966_v53 = vadd.f32 %v3700_v1, %v1965_v17  ;;  %v1983_v39 = vmul.f32 %v3702_v4, %v1981_v54  ;;  %v3704_v51 = vpop.eup %3703  ;;  %vm1988_vm8 = vweird.f32 %v3702_v4 }
 0x649   :  { %v1951_v40 = vsel %vm1950_vm4, %v3698_v58, %v1947_v2  ;;  %v1991_v58 = vand.u32 2147483647, %v1981_v54  ;;  %vm1989_vm10 = vmor %vm1987_vm9, %vm1988_vm8 }
 0x64a   :  { %v1956_v52 = vsel %vm1953_vm5, %v1955_v43, %v1951_v40  ;;  %v1970_v47 = vsel %vm1969_vm6, %v3700_v1, %v1966_v53  ;;  %v1984_v5 = vsub.f32 1.0, %v1983_v39  ;;  %v1670_v43 = vadd.f32 %v4715_v63, %v4771_v60 }
 0x64b   :  { %v1975_v6 = vsel %vm1972_vm7, %v1974_v13, %v1970_v47  ;;  %v1998_v46 = vmul.f32 %v3704_v51, %v1956_v52  ;;  %vm1992_vm11 = vcmp.eq.f32.partialorder %v1991_v58, 8.507059e+37 }
 0x64c   :  { %v1997_v26 = vmul.f32 0.0, %v1975_v6  ;;  %v1985_v14 = vmul.f32 %v3702_v4, %v1984_v5 }
 0x64e   :  { %v4777_v57 = vadd.f32 %v1998_v46, %v1997_v26  ;;  %v1986_v32 = vadd.f32 %v3702_v4, %v1985_v14  ;;  %v1583_v26 = vadd.f32 %v4709_v15, %v4761_v50  ;;  %v1612_v46 = vadd.f32 %v4711_v49, %v4763_v56 }
 0x650   :  { %3705 = vtanh.f32 %v4777_v57  ;;  %v1990_v34 = vsel %vm1989_vm10, %v3702_v4, %v1986_v32 }
 0x651   :  { %v1995_v31 = vsel %vm1992_vm11, %v1994_v59, %v1990_v34  ;;  %v5065_v59 = vld [vmem:[#allocation46_spill] sm:$0xff] }
 0x656   :  { %v3706_v1 = vpop.eup %3705 }
 0x657   :  { %v2001_v17 = vmul.f32 %v3706_v1, %v1995_v31  ;;  %v5066_v1 = vld [vmem:[#allocation21_spill] sm:$0xff] }
 0x658   :  { %v1641_v63 = vadd.f32 %v5066_v1, %v5065_v59 }
 0x659   :  { %v2007_v13 = vpack.c.bf16 %v2001_v17, %v2001_v17 }
 0x65b   :  { %2016 = vmatmul.bf16.vlgmr.msra.gmra.mxu0 %v2007_v13  ;;  %2029 = vmatmul.bf16.vlgmr.msra.gmra.mxu1 %v2007_v13 }
 0x65c   :  { %2042 = vmatmul.bf16.vlgmr.msra.gmra.mxu2 %v2007_v13  ;;  %2055 = vmatmul.bf16.vlgmr.msra.gmra.mxu3 %v2007_v13 }
 0x65d   :  { %2258 = vmatpush.bf16.msra.mxu0 %v4497_v29  ;;  %2271 = vmatpush.bf16.msra.mxu1 %v4499_v3 }
 0x65e   :  { %2284 = vmatpush.bf16.msra.mxu2 %v4510_v21  ;;  %2297 = vmatpush.bf16.msra.mxu3 %v4507_v61 }
 0x661   :  { %2259 = vmatpush.bf16.msra.mxu0 %v4513_v42  ;;  %2272 = vmatpush.bf16.msra.mxu1 %v4515_v9 }
 0x662   :  { %2285 = vmatpush.bf16.msra.mxu2 %v4530_v62  ;;  %2298 = vmatpush.bf16.msra.mxu3 %v4517_v10 }
 0x665   :  { %2260 = vmatpush.bf16.msra.mxu0 %v4522_v36  ;;  %2273 = vmatpush.bf16.msra.mxu1 %v4524_v44 }
 0x666   :  { %2286 = vmatpush.bf16.msra.mxu2 %v4542_v27  ;;  %2299 = vmatpush.bf16.msra.mxu3 %v4526_v45 }
 0x669   :  { %2261 = vmatpush.bf16.msra.mxu0 %v4533_v11  ;;  %2274 = vmatpush.bf16.msra.mxu1 %v4537_v30 }
 0x66a   :  { %2287 = vmatpush.bf16.msra.mxu2 %v4559_v41  ;;  %2300 = vmatpush.bf16.msra.mxu3 %v4539_v22 }
 0x66d   :  { %2262 = vmatpush.bf16.msra.mxu0 %v4547_v28  ;;  %2275 = vmatpush.bf16.msra.mxu1 %v4553_v35 }
 0x66e   :  { %2288 = vmatpush.bf16.msra.mxu2 %v4572_v55  ;;  %2301 = vmatpush.bf16.msra.mxu3 %v4555_v12 }
 0x671   :  { %2263 = vmatpush.bf16.msra.mxu0 %v4563_v19  ;;  %2276 = vmatpush.bf16.msra.mxu1 %v4567_v37 }
 0x672   :  { %2289 = vmatpush.bf16.msra.mxu2 %v4595_v7  ;;  %2302 = vmatpush.bf16.msra.mxu3 %v4569_v38 }
 0x675   :  { %2264 = vmatpush.bf16.msra.mxu0 %v4580_v23  ;;  %2277 = vmatpush.bf16.msra.mxu1 %v4589_v48 }
 0x676   :  { %2290 = vmatpush.bf16.msra.mxu2 %v4614_v25  ;;  %2303 = vmatpush.bf16.msra.mxu3 %v4598_v8 }
 0x679   :  { %2265 = vmatpush.bf16.msra.mxu0 %v4610_v20  ;;  %2278 = vmatpush.bf16.msra.mxu1 %v4612_v24 }
 0x67a   :  { %2291 = vmatpush.bf16.msra.mxu2 %v4633_v16  ;;  %2304 = vmatpush.bf16.msra.mxu3 %v4624_v18 }
 0x6d8   :  { %v2017_v5 = vpop.f32.mrf.mxu0  ;;  %v2030_v4 = vpop.f32.mrf.mxu1 }
 0x6d9   :  { %v2060_v14 = vadd.f32 %v2017_v5, %v1583_v26  ;;  %v2061_v54 = vadd.f32 %v2030_v4, %v1612_v46 }
 0x6db   :  { %v3391_v0 = vmul.f32 -1.442695, %v2060_v14  ;;  %v3392_v2 = vmul.f32 -1.442695, %v2061_v54 }
 0x6dd   :  { %3707 = vpow2.f32 %v3391_v0 }
 0x6de   :  { %3709 = vpow2.f32 %v3392_v2 }
 0x6df   :  { %v2043_v53 = vpop.f32.mrf.mxu2  ;;  %v2056_v39 = vpop.f32.mrf.mxu3 }
 0x6e0   :  { %v2063_v40 = vadd.f32 %v2056_v39, %v1670_v43  ;;  %v2019_v51 = vpop.f32.mrf.mxu0  ;;  %v2032_v52 = vpop.f32.mrf.mxu1  ;;  %v2062_v13 = vadd.f32 %v2043_v53, %v1641_v63 }
 0x6e2   :  { %v3393_v15 = vmul.f32 -1.442695, %v2063_v40 }
 0x6e3   :  { %v3708_v47 = vpop.eup %3707 }
 0x6e4   :  { %v3710_v6 = vpop.eup %3709  ;;  %v2067_v49 = vadd.f32 1.0, %v3708_v47  ;;  %3711 = vpow2.f32 %v3393_v15 }
 0x6e5   :  { %v2086_v32 = vadd.f32 1.0, %v3710_v6 }
 0x6e6   :  { %3713 = vrcp.f32 %v2067_v49  ;;  %v2079_v54 = vand.u32 2147483648, %v2067_v49  ;;  %v2077_v43 = vand.u32 2147483647, %v2067_v49  ;;  %vm2073_vm14 = vweird.f32 %v2067_v49 }
 0x6e7   :  { %3715 = vrcp.f32 %v2086_v32  ;;  %v2045_v33 = vpop.f32.mrf.mxu2  ;;  %v2058_v58 = vpop.f32.mrf.mxu3  ;;  %v2098_v0 = vand.u32 2147483648, %v2086_v32  ;;  %v2096_v40 = vand.u32 2147483647, %v2086_v32  ;;  %vm2092_vm15 = vweird.f32 %v2086_v32 }
 0x6e8   :  { %v2080_v53 = vor.u32 1.1754944e-38, %v2079_v54  ;;  %vm2078_vm2 = vcmp.eq.f32.partialorder %v2077_v43, 8.507059e+37 }
 0x6e9   :  { %v2099_v6 = vor.u32 1.1754944e-38, %v2098_v0  ;;  %vm2097_vm3 = vcmp.eq.f32.partialorder %v2096_v40, 8.507059e+37  ;;  %v5068_v40 = vld [vmem:[#allocation23_spill] sm:$0xff] }
 0x6ea   :  { %v3712_v34 = vpop.eup %3711 }
 0x6eb   :  { %v2106_v31 = vadd.f32 1.0, %v3712_v34 }
 0x6ec   :  { %v3714_v17 = vpop.eup %3713 }
 0x6ed   :  { %v3716_v26 = vpop.eup %3715  ;;  %v2069_v46 = vmul.f32 %v3714_v17, %v2067_v49  ;;  %3717 = vrcp.f32 %v2106_v31  ;;  %vm2074_vm12 = vweird.f32 %v3714_v17  ;;  %vm2112_vm5 = vweird.f32 %v2106_v31 }
 0x6ee   :  { %v2088_v5 = vmul.f32 %v3716_v26, %v2086_v32  ;;  %3719 = vtanh.f32 %v2062_v13  ;;  %vm2093_vm13 = vweird.f32 %v3716_v26  ;;  %vm2075_vm0 = vmor %vm2073_vm14, %vm2074_vm12 }
 0x6ef   :  { %v2070_v4 = vsub.f32 1.0, %v2069_v46  ;;  %vm2094_vm1 = vmor %vm2092_vm15, %vm2093_vm13 }
 0x6f0   :  { %v2089_v14 = vsub.f32 1.0, %v2088_v5 }
 0x6f1   :  { %v2071_v2 = vmul.f32 %v3714_v17, %v2070_v4 }
 0x6f2   :  { %v2090_v39 = vmul.f32 %v3716_v26, %v2089_v14  ;;  %v2118_v14 = vand.u32 2147483648, %v2106_v31 }
 0x6f3   :  { %v3718_v51 = vpop.eup %3717  ;;  %v2072_v52 = vadd.f32 %v3714_v17, %v2071_v2 }
 0x6f4   :  { %v2091_v15 = vadd.f32 %v3716_v26, %v2090_v39  ;;  %v2108_v47 = vmul.f32 %v3718_v51, %v2106_v31  ;;  %v3720_v58 = vpop.eup %3719  ;;  %vm2113_vm4 = vweird.f32 %v3718_v51  ;;  %v2119_v0 = vor.u32 1.1754944e-38, %v2118_v14 }
 0x6f5   :  { %v2076_v33 = vsel %vm2075_vm0, %v3714_v17, %v2072_v52  ;;  %v2116_v17 = vand.u32 2147483647, %v2106_v31  ;;  %vm2114_vm6 = vmor %vm2112_vm5, %vm2113_vm4 }
 0x6f6   :  { %v2081_v34 = vsel %vm2078_vm2, %v2080_v53, %v2076_v33  ;;  %v2095_v1 = vsel %vm2094_vm1, %v3716_v26, %v2091_v15  ;;  %v2109_v63 = vsub.f32 1.0, %v2108_v47 }
 0x6f7   :  { %v2100_v13 = vsel %vm2097_vm3, %v2099_v6, %v2095_v1  ;;  %v2123_v46 = vmul.f32 %v3720_v58, %v2081_v34  ;;  %vm2117_vm7 = vcmp.eq.f32.partialorder %v2116_v17, 8.507059e+37  ;;  %v5069_v58 = vld [vmem:[#allocation25_spill] sm:$0xff] }
 0x6f8   :  { %v2122_v5 = vmul.f32 %v2100_v13, %v4777_v57  ;;  %v2110_v4 = vmul.f32 %v3718_v51, %v2109_v63  ;;  %v5067_v57 = vld [vmem:[#allocation22_spill] sm:$0xff]  ;;  %v1673_v34 = vadd.f32 %v5069_v58, %v4771_v60 }
 0x6f9   :  { %v1586_v31 = vadd.f32 %v5067_v57, %v4761_v50 }
 0x6fa   :  { %v4821_v49 = vadd.f32 %v2123_v46, %v2122_v5  ;;  %v2111_v32 = vadd.f32 %v3718_v51, %v2110_v4 }
 0x6fc   :  { %3721 = vtanh.f32 %v4821_v49  ;;  %v2115_v54 = vsel %vm2114_vm6, %v3718_v51, %v2111_v32  ;;  %v1615_v51 = vadd.f32 %v5068_v40, %v4763_v56 }
 0x6fd   :  { %v2120_v2 = vsel %vm2117_vm7, %v2119_v0, %v2115_v54 }
 0x702   :  { %v3722_v26 = vpop.eup %3721 }
 0x703   :  { %v2126_v43 = vmul.f32 %v3722_v26, %v2120_v2 }
 0x705   :  { %v2132_v39 = vpack.c.bf16 %v2126_v43, %v2126_v43  ;;  %v5070_v43 = vld [vmem:[#allocation24_spill] sm:$0xff] }
 0x707   :  { %2141 = vmatmul.bf16.vlgmr.msrb.gmra.mxu0 %v2132_v39  ;;  %2154 = vmatmul.bf16.vlgmr.msrb.gmra.mxu1 %v2132_v39 }
 0x708   :  { %2167 = vmatmul.bf16.vlgmr.msrb.gmra.mxu2 %v2132_v39  ;;  %2180 = vmatmul.bf16.vlgmr.msrb.gmra.mxu3 %v2132_v39  ;;  %v1644_v39 = vadd.f32 %v5070_v43, %v5065_v59 }
 0x709   :  { %2383 = vmatpush.bf16.msrb.mxu0 %v4497_v29  ;;  %2396 = vmatpush.bf16.msrb.mxu1 %v4499_v3 }
 0x70a   :  { %2409 = vmatpush.bf16.msrb.mxu2 %v4510_v21  ;;  %2422 = vmatpush.bf16.msrb.mxu3 %v4507_v61 }
 0x70d   :  { %2384 = vmatpush.bf16.msrb.mxu0 %v4513_v42  ;;  %2397 = vmatpush.bf16.msrb.mxu1 %v4515_v9 }
 0x70e   :  { %2410 = vmatpush.bf16.msrb.mxu2 %v4530_v62  ;;  %2423 = vmatpush.bf16.msrb.mxu3 %v4517_v10 }
 0x711   :  { %2385 = vmatpush.bf16.msrb.mxu0 %v4522_v36  ;;  %2398 = vmatpush.bf16.msrb.mxu1 %v4524_v44 }
 0x712   :  { %2411 = vmatpush.bf16.msrb.mxu2 %v4542_v27  ;;  %2424 = vmatpush.bf16.msrb.mxu3 %v4526_v45 }
 0x715   :  { %2386 = vmatpush.bf16.msrb.mxu0 %v4533_v11  ;;  %2399 = vmatpush.bf16.msrb.mxu1 %v4537_v30 }
 0x716   :  { %2412 = vmatpush.bf16.msrb.mxu2 %v4559_v41  ;;  %2425 = vmatpush.bf16.msrb.mxu3 %v4539_v22 }
 0x719   :  { %2387 = vmatpush.bf16.msrb.mxu0 %v4547_v28  ;;  %2400 = vmatpush.bf16.msrb.mxu1 %v4553_v35 }
 0x71a   :  { %2413 = vmatpush.bf16.msrb.mxu2 %v4572_v55  ;;  %2426 = vmatpush.bf16.msrb.mxu3 %v4555_v12 }
 0x71d   :  { %2388 = vmatpush.bf16.msrb.mxu0 %v4563_v19  ;;  %2401 = vmatpush.bf16.msrb.mxu1 %v4567_v37 }
 0x71e   :  { %2414 = vmatpush.bf16.msrb.mxu2 %v4595_v7  ;;  %2427 = vmatpush.bf16.msrb.mxu3 %v4569_v38 }
 0x721   :  { %2389 = vmatpush.bf16.msrb.mxu0 %v4580_v23  ;;  %2402 = vmatpush.bf16.msrb.mxu1 %v4589_v48 }
 0x722   :  { %2415 = vmatpush.bf16.msrb.mxu2 %v4614_v25  ;;  %2428 = vmatpush.bf16.msrb.mxu3 %v4598_v8 }
 0x725   :  { %2390 = vmatpush.bf16.msrb.mxu0 %v4610_v20  ;;  %2403 = vmatpush.bf16.msrb.mxu1 %v4612_v24 }
 0x726   :  { %2416 = vmatpush.bf16.msrb.mxu2 %v4633_v16  ;;  %2429 = vmatpush.bf16.msrb.mxu3 %v4624_v18 }
 0x784   :  { %v2142_v52 = vpop.f32.mrf.mxu0  ;;  %v2155_v53 = vpop.f32.mrf.mxu1 }
 0x785   :  { %v2185_v15 = vadd.f32 %v2142_v52, %v1586_v31  ;;  %v2186_v47 = vadd.f32 %v2155_v53, %v1615_v51 }
 0x787   :  { %v3394_v6 = vmul.f32 -1.442695, %v2185_v15  ;;  %v3395_v33 = vmul.f32 -1.442695, %v2186_v47 }
 0x789   :  { %3723 = vpow2.f32 %v3394_v6 }
 0x78a   :  { %3725 = vpow2.f32 %v3395_v33 }
 0x78b   :  { %v2168_v1 = vpop.f32.mrf.mxu2  ;;  %v2181_v63 = vpop.f32.mrf.mxu3 }
 0x78c   :  { %v2188_v13 = vadd.f32 %v2181_v63, %v1673_v34  ;;  %v2144_v46 = vpop.f32.mrf.mxu0  ;;  %v2157_v5 = vpop.f32.mrf.mxu1  ;;  %v2187_v40 = vadd.f32 %v2168_v1, %v1644_v39 }
 0x78e   :  { %v3396_v4 = vmul.f32 -1.442695, %v2188_v13 }
 0x78f   :  { %v3724_v32 = vpop.eup %3723 }
 0x790   :  { %v3726_v14 = vpop.eup %3725  ;;  %v2192_v17 = vadd.f32 1.0, %v3724_v32  ;;  %3727 = vpow2.f32 %v3396_v4 }
 0x791   :  { %v2211_v54 = vadd.f32 1.0, %v3726_v14 }
 0x792   :  { %3729 = vrcp.f32 %v2192_v17  ;;  %v2204_v6 = vand.u32 2147483648, %v2192_v17  ;;  %v2202_v34 = vand.u32 2147483647, %v2192_v17  ;;  %vm2198_vm10 = vweird.f32 %v2192_v17 }
 0x793   :  { %3731 = vrcp.f32 %v2211_v54  ;;  %v2170_v0 = vpop.f32.mrf.mxu2  ;;  %v2183_v26 = vpop.f32.mrf.mxu3  ;;  %v2223_v33 = vand.u32 2147483648, %v2211_v54  ;;  %v2221_v13 = vand.u32 2147483647, %v2211_v54  ;;  %vm2217_vm11 = vweird.f32 %v2211_v54 }
 0x794   :  { %v2205_v1 = vor.u32 1.1754944e-38, %v2204_v6  ;;  %vm2203_vm14 = vcmp.eq.f32.partialorder %v2202_v34, 8.507059e+37 }
 0x795   :  { %v2224_v14 = vor.u32 1.1754944e-38, %v2223_v33  ;;  %vm2222_vm15 = vcmp.eq.f32.partialorder %v2221_v13, 8.507059e+37  ;;  %v5072_v13 = vld [vmem:[#allocation27_spill] sm:$0xff] }
 0x796   :  { %v3728_v2 = vpop.eup %3727 }
 0x797   :  { %v2231_v57 = vadd.f32 1.0, %v3728_v2 }
 0x798   :  { %v3730_v31 = vpop.eup %3729 }
 0x799   :  { %v3732_v51 = vpop.eup %3731  ;;  %v2194_v52 = vmul.f32 %v3730_v31, %v2192_v17  ;;  %3733 = vrcp.f32 %v2231_v57  ;;  %vm2199_vm8 = vweird.f32 %v3730_v31  ;;  %vm2237_vm1 = vweird.f32 %v2231_v57 }
 0x79a   :  { %v2213_v53 = vmul.f32 %v3732_v51, %v2211_v54  ;;  %3735 = vtanh.f32 %v2187_v40  ;;  %vm2218_vm9 = vweird.f32 %v3732_v51  ;;  %vm2200_vm12 = vmor %vm2198_vm10, %vm2199_vm8 }
 0x79b   :  { %v2195_v15 = vsub.f32 1.0, %v2194_v52  ;;  %vm2219_vm13 = vmor %vm2217_vm11, %vm2218_vm9 }
 0x79c   :  { %v2214_v47 = vsub.f32 1.0, %v2213_v53 }
 0x79d   :  { %v2196_v58 = vmul.f32 %v3730_v31, %v2195_v15 }
 0x79e   :  { %v2215_v63 = vmul.f32 %v3732_v51, %v2214_v47  ;;  %v2243_v47 = vand.u32 2147483648, %v2231_v57 }
 0x79f   :  { %v3734_v46 = vpop.eup %3733  ;;  %v2197_v5 = vadd.f32 %v3730_v31, %v2196_v58 }
 0x7a0   :  { %v2216_v4 = vadd.f32 %v3732_v51, %v2215_v63  ;;  %v2233_v32 = vmul.f32 %v3734_v46, %v2231_v57  ;;  %v3736_v26 = vpop.eup %3735  ;;  %vm2238_vm0 = vweird.f32 %v3734_v46  ;;  %v2244_v33 = vor.u32 1.1754944e-38, %v2243_v47 }
 0x7a1   :  { %v2201_v0 = vsel %vm2200_vm12, %v3730_v31, %v2197_v5  ;;  %v2241_v31 = vand.u32 2147483647, %v2231_v57  ;;  %vm2239_vm2 = vmor %vm2237_vm1, %vm2238_vm0 }
 0x7a2   :  { %v2206_v2 = vsel %vm2203_vm14, %v2205_v1, %v2201_v0  ;;  %v2220_v43 = vsel %vm2219_vm13, %v3732_v51, %v2216_v4  ;;  %v2234_v39 = vsub.f32 1.0, %v2233_v32 }
 0x7a3   :  { %v2225_v40 = vsel %vm2222_vm15, %v2224_v14, %v2220_v43  ;;  %v2248_v52 = vmul.f32 %v3736_v26, %v2206_v2  ;;  %vm2242_vm3 = vcmp.eq.f32.partialorder %v2241_v31, 8.507059e+37  ;;  %v5073_v26 = vld [vmem:[#allocation29_spill] sm:$0xff] }
 0x7a4   :  { %v2247_v53 = vmul.f32 %v2225_v40, %v4821_v49  ;;  %v2235_v15 = vmul.f32 %v3734_v46, %v2234_v39  ;;  %v5071_v49 = vld [vmem:[#allocation26_spill] sm:$0xff]  ;;  %v1675_v2 = vadd.f32 %v5073_v26, %v4771_v60 }
 0x7a5   :  { %v1588_v57 = vadd.f32 %v5071_v49, %v4761_v50 }
 0x7a6   :  { %v4865_v17 = vadd.f32 %v2248_v52, %v2247_v53  ;;  %v2236_v54 = vadd.f32 %v3734_v46, %v2235_v15 }
 0x7a8   :  { %3737 = vtanh.f32 %v4865_v17  ;;  %v2240_v6 = vsel %vm2239_vm2, %v3734_v46, %v2236_v54  ;;  %v1617_v46 = vadd.f32 %v5072_v13, %v4763_v56 }
 0x7a9   :  { %v2245_v58 = vsel %vm2242_vm3, %v2244_v33, %v2240_v6 }
 0x7ae   :  { %v3738_v51 = vpop.eup %3737 }
 0x7af   :  { %v2251_v34 = vmul.f32 %v3738_v51, %v2245_v58 }
 0x7b1   :  { %v2257_v63 = vpack.c.bf16 %v2251_v34, %v2251_v34  ;;  %v5074_v34 = vld [vmem:[#allocation28_spill] sm:$0xff] }
 0x7b3   :  { %2266 = vmatmul.bf16.vlgmr.msra.gmra.mxu0 %v2257_v63  ;;  %2279 = vmatmul.bf16.vlgmr.msra.gmra.mxu1 %v2257_v63 }
 0x7b4   :  { %2292 = vmatmul.bf16.vlgmr.msra.gmra.mxu2 %v2257_v63  ;;  %2305 = vmatmul.bf16.vlgmr.msra.gmra.mxu3 %v2257_v63  ;;  %v1646_v63 = vadd.f32 %v5074_v34, %v5065_v59 }
 0x7b5   :  { %2508 = vmatpush.bf16.msra.mxu0 %v4497_v29  ;;  %2521 = vmatpush.bf16.msra.mxu1 %v4499_v3 }
 0x7b6   :  { %2534 = vmatpush.bf16.msra.mxu2 %v4510_v21  ;;  %2547 = vmatpush.bf16.msra.mxu3 %v4507_v61 }
 0x7b9   :  { %2509 = vmatpush.bf16.msra.mxu0 %v4513_v42  ;;  %2522 = vmatpush.bf16.msra.mxu1 %v4515_v9 }
 0x7ba   :  { %2535 = vmatpush.bf16.msra.mxu2 %v4530_v62  ;;  %2548 = vmatpush.bf16.msra.mxu3 %v4517_v10 }
 0x7bd   :  { %2510 = vmatpush.bf16.msra.mxu0 %v4522_v36  ;;  %2523 = vmatpush.bf16.msra.mxu1 %v4524_v44 }
 0x7be   :  { %2536 = vmatpush.bf16.msra.mxu2 %v4542_v27  ;;  %2549 = vmatpush.bf16.msra.mxu3 %v4526_v45 }
 0x7c1   :  { %2511 = vmatpush.bf16.msra.mxu0 %v4533_v11  ;;  %2524 = vmatpush.bf16.msra.mxu1 %v4537_v30 }
 0x7c2   :  { %2537 = vmatpush.bf16.msra.mxu2 %v4559_v41  ;;  %2550 = vmatpush.bf16.msra.mxu3 %v4539_v22 }
 0x7c5   :  { %2512 = vmatpush.bf16.msra.mxu0 %v4547_v28  ;;  %2525 = vmatpush.bf16.msra.mxu1 %v4553_v35 }
 0x7c6   :  { %2538 = vmatpush.bf16.msra.mxu2 %v4572_v55  ;;  %2551 = vmatpush.bf16.msra.mxu3 %v4555_v12 }
 0x7c9   :  { %2513 = vmatpush.bf16.msra.mxu0 %v4563_v19  ;;  %2526 = vmatpush.bf16.msra.mxu1 %v4567_v37 }
 0x7ca   :  { %2539 = vmatpush.bf16.msra.mxu2 %v4595_v7  ;;  %2552 = vmatpush.bf16.msra.mxu3 %v4569_v38 }
 0x7cd   :  { %2514 = vmatpush.bf16.msra.mxu0 %v4580_v23  ;;  %2527 = vmatpush.bf16.msra.mxu1 %v4589_v48 }
 0x7ce   :  { %2540 = vmatpush.bf16.msra.mxu2 %v4614_v25  ;;  %2553 = vmatpush.bf16.msra.mxu3 %v4598_v8 }
 0x7d1   :  { %2515 = vmatpush.bf16.msra.mxu0 %v4610_v20  ;;  %2528 = vmatpush.bf16.msra.mxu1 %v4612_v24 }
 0x7d2   :  { %2541 = vmatpush.bf16.msra.mxu2 %v4633_v16  ;;  %2554 = vmatpush.bf16.msra.mxu3 %v4624_v18 }
 0x830   :  { %v2267_v5 = vpop.f32.mrf.mxu0  ;;  %v2280_v1 = vpop.f32.mrf.mxu1 }
 0x831   :  { %v2310_v4 = vadd.f32 %v2267_v5, %v1588_v57  ;;  %v2311_v32 = vadd.f32 %v2280_v1, %v1617_v46 }
 0x833   :  { %v3397_v14 = vmul.f32 -1.442695, %v2310_v4  ;;  %v3398_v0 = vmul.f32 -1.442695, %v2311_v32 }
 0x835   :  { %3739 = vpow2.f32 %v3397_v14 }
 0x836   :  { %3741 = vpow2.f32 %v3398_v0 }
 0x837   :  { %v2293_v43 = vpop.f32.mrf.mxu2  ;;  %v2306_v39 = vpop.f32.mrf.mxu3 }
 0x838   :  { %v2313_v40 = vadd.f32 %v2306_v39, %v1675_v2  ;;  %v2269_v52 = vpop.f32.mrf.mxu0  ;;  %v2282_v53 = vpop.f32.mrf.mxu1  ;;  %v2312_v13 = vadd.f32 %v2293_v43, %v1646_v63 }
 0x83a   :  { %v3399_v15 = vmul.f32 -1.442695, %v2313_v40 }
 0x83b   :  { %v3740_v54 = vpop.eup %3739 }
 0x83c   :  { %v3742_v47 = vpop.eup %3741  ;;  %v2317_v31 = vadd.f32 1.0, %v3740_v54  ;;  %3743 = vpow2.f32 %v3399_v15 }
 0x83d   :  { %v2336_v6 = vadd.f32 1.0, %v3742_v47 }
 0x83e   :  { %3745 = vrcp.f32 %v2317_v31  ;;  %v2329_v14 = vand.u32 2147483648, %v2317_v31  ;;  %v2327_v2 = vand.u32 2147483647, %v2317_v31  ;;  %vm2323_vm6 = vweird.f32 %v2317_v31 }
 0x83f   :  { %3747 = vrcp.f32 %v2336_v6  ;;  %v2295_v33 = vpop.f32.mrf.mxu2  ;;  %v2308_v51 = vpop.f32.mrf.mxu3  ;;  %v2348_v0 = vand.u32 2147483648, %v2336_v6  ;;  %v2346_v40 = vand.u32 2147483647, %v2336_v6  ;;  %vm2342_vm7 = vweird.f32 %v2336_v6 }
 0x840   :  { %v2330_v43 = vor.u32 1.1754944e-38, %v2329_v14  ;;  %vm2328_vm10 = vcmp.eq.f32.partialorder %v2327_v2, 8.507059e+37 }
 0x841   :  { %v2349_v47 = vor.u32 1.1754944e-38, %v2348_v0  ;;  %vm2347_vm11 = vcmp.eq.f32.partialorder %v2346_v40, 8.507059e+37  ;;  %v5076_v40 = vld [vmem:[#allocation31_spill] sm:$0xff] }
 0x842   :  { %v3744_v58 = vpop.eup %3743 }
 0x843   :  { %v2356_v49 = vadd.f32 1.0, %v3744_v58 }
 0x844   :  { %v3746_v57 = vpop.eup %3745 }
 0x845   :  { %v3748_v46 = vpop.eup %3747  ;;  %v2319_v5 = vmul.f32 %v3746_v57, %v2317_v31  ;;  %3749 = vrcp.f32 %v2356_v49  ;;  %vm2324_vm4 = vweird.f32 %v3746_v57  ;;  %vm2362_vm13 = vweird.f32 %v2356_v49 }
 0x846   :  { %v2338_v1 = vmul.f32 %v3748_v46, %v2336_v6  ;;  %3751 = vtanh.f32 %v2312_v13  ;;  %vm2343_vm5 = vweird.f32 %v3748_v46  ;;  %vm2325_vm8 = vmor %vm2323_vm6, %vm2324_vm4 }
 0x847   :  { %v2320_v4 = vsub.f32 1.0, %v2319_v5  ;;  %vm2344_vm9 = vmor %vm2342_vm7, %vm2343_vm5 }
 0x848   :  { %v2339_v32 = vsub.f32 1.0, %v2338_v1 }
 0x849   :  { %v2321_v26 = vmul.f32 %v3746_v57, %v2320_v4 }
 0x84a   :  { %v2340_v39 = vmul.f32 %v3748_v46, %v2339_v32  ;;  %v2368_v32 = vand.u32 2147483648, %v2356_v49 }
 0x84b   :  { %v3750_v52 = vpop.eup %3749  ;;  %v2322_v53 = vadd.f32 %v3746_v57, %v2321_v26 }
 0x84c   :  { %v2341_v15 = vadd.f32 %v3748_v46, %v2340_v39  ;;  %v2358_v54 = vmul.f32 %v3750_v52, %v2356_v49  ;;  %v3752_v51 = vpop.eup %3751  ;;  %vm2363_vm12 = vweird.f32 %v3750_v52  ;;  %v2369_v0 = vor.u32 1.1754944e-38, %v2368_v32 }
 0x84d   :  { %v2326_v33 = vsel %vm2325_vm8, %v3746_v57, %v2322_v53  ;;  %v2366_v57 = vand.u32 2147483647, %v2356_v49  ;;  %vm2364_vm14 = vmor %vm2362_vm13, %vm2363_vm12 }
 0x84e   :  { %v2331_v58 = vsel %vm2328_vm10, %v2330_v43, %v2326_v33  ;;  %v2345_v34 = vsel %vm2344_vm9, %v3748_v46, %v2341_v15  ;;  %v2359_v63 = vsub.f32 1.0, %v2358_v54 }
 0x84f   :  { %v2350_v13 = vsel %vm2347_vm11, %v2349_v47, %v2345_v34  ;;  %v2373_v5 = vmul.f32 %v3752_v51, %v2331_v58  ;;  %vm2367_vm15 = vcmp.eq.f32.partialorder %v2366_v57, 8.507059e+37  ;;  %v5077_v51 = vld [vmem:[#allocation33_spill] sm:$0xff] }
 0x850   :  { %v2372_v1 = vmul.f32 %v2350_v13, %v4865_v17  ;;  %v2360_v4 = vmul.f32 %v3750_v52, %v2359_v63  ;;  %v5075_v17 = vld [vmem:[#allocation30_spill] sm:$0xff]  ;;  %v1678_v58 = vadd.f32 %v5077_v51, %v4771_v60 }
 0x851   :  { %v1591_v49 = vadd.f32 %v5075_v17, %v4761_v50 }
 0x852   :  { %v4909_v31 = vadd.f32 %v2373_v5, %v2372_v1  ;;  %v2361_v6 = vadd.f32 %v3750_v52, %v2360_v4 }
 0x854   :  { %3753 = vtanh.f32 %v4909_v31  ;;  %v2365_v14 = vsel %vm2364_vm14, %v3750_v52, %v2361_v6  ;;  %v1620_v52 = vadd.f32 %v5076_v40, %v4763_v56 }
 0x855   :  { %v2370_v26 = vsel %vm2367_vm15, %v2369_v0, %v2365_v14 }
 0x85a   :  { %v3754_v46 = vpop.eup %3753 }
 0x85b   :  { %v2376_v2 = vmul.f32 %v3754_v46, %v2370_v26 }
 0x85d   :  { %v2382_v39 = vpack.c.bf16 %v2376_v2, %v2376_v2  ;;  %v5078_v2 = vld [vmem:[#allocation32_spill] sm:$0xff] }
 0x85f   :  { %2391 = vmatmul.bf16.vlgmr.msrb.gmra.mxu0 %v2382_v39  ;;  %2404 = vmatmul.bf16.vlgmr.msrb.gmra.mxu1 %v2382_v39 }
 0x860   :  { %2417 = vmatmul.bf16.vlgmr.msrb.gmra.mxu2 %v2382_v39  ;;  %2430 = vmatmul.bf16.vlgmr.msrb.gmra.mxu3 %v2382_v39  ;;  %v1649_v39 = vadd.f32 %v5078_v2, %v5065_v59 }
 0x861   :  { %2633 = vmatpush.bf16.msrb.mxu0 %v4497_v29  ;;  %2646 = vmatpush.bf16.msrb.mxu1 %v4499_v3 }
 0x862   :  { %2659 = vmatpush.bf16.msrb.mxu2 %v4510_v21  ;;  %2672 = vmatpush.bf16.msrb.mxu3 %v4507_v61 }
 0x865   :  { %2634 = vmatpush.bf16.msrb.mxu0 %v4513_v42  ;;  %2647 = vmatpush.bf16.msrb.mxu1 %v4515_v9 }
 0x866   :  { %2660 = vmatpush.bf16.msrb.mxu2 %v4530_v62  ;;  %2673 = vmatpush.bf16.msrb.mxu3 %v4517_v10 }
 0x869   :  { %2635 = vmatpush.bf16.msrb.mxu0 %v4522_v36  ;;  %2648 = vmatpush.bf16.msrb.mxu1 %v4524_v44 }
 0x86a   :  { %2661 = vmatpush.bf16.msrb.mxu2 %v4542_v27  ;;  %2674 = vmatpush.bf16.msrb.mxu3 %v4526_v45 }
 0x86d   :  { %2636 = vmatpush.bf16.msrb.mxu0 %v4533_v11  ;;  %2649 = vmatpush.bf16.msrb.mxu1 %v4537_v30 }
 0x86e   :  { %2662 = vmatpush.bf16.msrb.mxu2 %v4559_v41  ;;  %2675 = vmatpush.bf16.msrb.mxu3 %v4539_v22 }
 0x871   :  { %2637 = vmatpush.bf16.msrb.mxu0 %v4547_v28  ;;  %2650 = vmatpush.bf16.msrb.mxu1 %v4553_v35 }
 0x872   :  { %2663 = vmatpush.bf16.msrb.mxu2 %v4572_v55  ;;  %2676 = vmatpush.bf16.msrb.mxu3 %v4555_v12 }
 0x875   :  { %2638 = vmatpush.bf16.msrb.mxu0 %v4563_v19  ;;  %2651 = vmatpush.bf16.msrb.mxu1 %v4567_v37 }
 0x876   :  { %2664 = vmatpush.bf16.msrb.mxu2 %v4595_v7  ;;  %2677 = vmatpush.bf16.msrb.mxu3 %v4569_v38 }
 0x879   :  { %2639 = vmatpush.bf16.msrb.mxu0 %v4580_v23  ;;  %2652 = vmatpush.bf16.msrb.mxu1 %v4589_v48 }
 0x87a   :  { %2665 = vmatpush.bf16.msrb.mxu2 %v4614_v25  ;;  %2678 = vmatpush.bf16.msrb.mxu3 %v4598_v8 }
 0x87d   :  { %2640 = vmatpush.bf16.msrb.mxu0 %v4610_v20  ;;  %2653 = vmatpush.bf16.msrb.mxu1 %v4612_v24 }
 0x87e   :  { %2666 = vmatpush.bf16.msrb.mxu2 %v4633_v16  ;;  %2679 = vmatpush.bf16.msrb.mxu3 %v4624_v18 }
 0x8dc   :  { %v2392_v53 = vpop.f32.mrf.mxu0  ;;  %v2405_v43 = vpop.f32.mrf.mxu1 }
 0x8dd   :  { %v2435_v15 = vadd.f32 %v2392_v53, %v1591_v49  ;;  %v2436_v54 = vadd.f32 %v2405_v43, %v1620_v52 }
 0x8df   :  { %v3400_v47 = vmul.f32 -1.442695, %v2435_v15  ;;  %v3401_v33 = vmul.f32 -1.442695, %v2436_v54 }
 0x8e1   :  { %3755 = vpow2.f32 %v3400_v47 }
 0x8e2   :  { %3757 = vpow2.f32 %v3401_v33 }
 0x8e3   :  { %v2418_v34 = vpop.f32.mrf.mxu2  ;;  %v2431_v63 = vpop.f32.mrf.mxu3 }
 0x8e4   :  { %v2438_v13 = vadd.f32 %v2431_v63, %v1678_v58  ;;  %v2394_v5 = vpop.f32.mrf.mxu0  ;;  %v2407_v1 = vpop.f32.mrf.mxu1  ;;  %v2437_v40 = vadd.f32 %v2418_v34, %v1649_v39 }
 0x8e6   :  { %v3402_v4 = vmul.f32 -1.442695, %v2438_v13 }
 0x8e7   :  { %v3756_v6 = vpop.eup %3755 }
 0x8e8   :  { %v3758_v32 = vpop.eup %3757  ;;  %v2442_v57 = vadd.f32 1.0, %v3756_v6  ;;  %3759 = vpow2.f32 %v3402_v4 }
 0x8e9   :  { %v2461_v14 = vadd.f32 1.0, %v3758_v32 }
 0x8ea   :  { %3761 = vrcp.f32 %v2442_v57  ;;  %v2454_v47 = vand.u32 2147483648, %v2442_v57  ;;  %v2452_v58 = vand.u32 2147483647, %v2442_v57  ;;  %vm2448_vm2 = vweird.f32 %v2442_v57 }
 0x8eb   :  { %3763 = vrcp.f32 %v2461_v14  ;;  %v2420_v0 = vpop.f32.mrf.mxu2  ;;  %v2433_v46 = vpop.f32.mrf.mxu3  ;;  %v2473_v33 = vand.u32 2147483648, %v2461_v14  ;;  %v2471_v13 = vand.u32 2147483647, %v2461_v14  ;;  %vm2467_vm3 = vweird.f32 %v2461_v14 }
 0x8ec   :  { %v2455_v34 = vor.u32 1.1754944e-38, %v2454_v47  ;;  %vm2453_vm6 = vcmp.eq.f32.partialorder %v2452_v58, 8.507059e+37 }
 0x8ed   :  { %v2474_v32 = vor.u32 1.1754944e-38, %v2473_v33  ;;  %vm2472_vm7 = vcmp.eq.f32.partialorder %v2471_v13, 8.507059e+37 }
 0x8ee   :  { %v3760_v26 = vpop.eup %3759 }
 0x8ef   :  { %v2481_v17 = vadd.f32 1.0, %v3760_v26 }
 0x8f0   :  { %v3762_v49 = vpop.eup %3761 }
 0x8f1   :  { %v3764_v52 = vpop.eup %3763  ;;  %v2444_v53 = vmul.f32 %v3762_v49, %v2442_v57  ;;  %3765 = vrcp.f32 %v2481_v17  ;;  %vm2449_vm0 = vweird.f32 %v3762_v49  ;;  %vm2487_vm9 = vweird.f32 %v2481_v17 }
 0x8f2   :  { %v2463_v43 = vmul.f32 %v3764_v52, %v2461_v14  ;;  %3767 = vtanh.f32 %v2437_v40  ;;  %vm2468_vm1 = vweird.f32 %v3764_v52  ;;  %vm2450_vm4 = vmor %vm2448_vm2, %vm2449_vm0 }
 0x8f3   :  { %v2445_v15 = vsub.f32 1.0, %v2444_v53  ;;  %vm2469_vm5 = vmor %vm2467_vm3, %vm2468_vm1 }
 0x8f4   :  { %v2464_v54 = vsub.f32 1.0, %v2463_v43 }
 0x8f5   :  { %v2446_v51 = vmul.f32 %v3762_v49, %v2445_v15 }
 0x8f6   :  { %v2465_v63 = vmul.f32 %v3764_v52, %v2464_v54  ;;  %v2493_v54 = vand.u32 2147483648, %v2481_v17 }
 0x8f7   :  { %v3766_v5 = vpop.eup %3765  ;;  %v2447_v1 = vadd.f32 %v3762_v49, %v2446_v51 }
 0x8f8   :  { %v2466_v4 = vadd.f32 %v3764_v52, %v2465_v63  ;;  %v2483_v6 = vmul.f32 %v3766_v5, %v2481_v17  ;;  %v3768_v46 = vpop.eup %3767  ;;  %vm2488_vm8 = vweird.f32 %v3766_v5  ;;  %v2494_v33 = vor.u32 1.1754944e-38, %v2493_v54 }
 0x8f9   :  { %v2451_v0 = vsel %vm2450_vm4, %v3762_v49, %v2447_v1  ;;  %v2491_v49 = vand.u32 2147483647, %v2481_v17  ;;  %vm2489_vm10 = vmor %vm2487_vm9, %vm2488_vm8 }
 0x8fa   :  { %v2456_v26 = vsel %vm2453_vm6, %v2455_v34, %v2451_v0  ;;  %v2470_v2 = vsel %vm2469_vm5, %v3764_v52, %v2466_v4  ;;  %v2484_v39 = vsub.f32 1.0, %v2483_v6 }
 0x8fb   :  { %v2475_v40 = vsel %vm2472_vm7, %v2474_v32, %v2470_v2  ;;  %v2498_v53 = vmul.f32 %v3768_v46, %v2456_v26  ;;  %vm2492_vm11 = vcmp.eq.f32.partialorder %v2491_v49, 8.507059e+37 }
 0x8fc   :  { %v2497_v43 = vmul.f32 %v2475_v40, %v4909_v31  ;;  %v2485_v15 = vmul.f32 %v3766_v5, %v2484_v39 }
 0x8fe   :  { %v4953_v57 = vadd.f32 %v2498_v53, %v2497_v43  ;;  %v2486_v14 = vadd.f32 %v3766_v5, %v2485_v15 }
 0x900   :  { %3769 = vtanh.f32 %v4953_v57  ;;  %v2490_v47 = vsel %vm2489_vm10, %v3766_v5, %v2486_v14 }
 0x901   :  { %v2495_v51 = vsel %vm2492_vm11, %v2494_v33, %v2490_v47 }
 0x906   :  { %v3770_v52 = vpop.eup %3769 }
 0x907   :  { %v2501_v58 = vmul.f32 %v3770_v52, %v2495_v51 }
 0x909   :  { %v2507_v63 = vpack.c.bf16 %v2501_v58, %v2501_v58 }
 0x90b   :  { %2516 = vmatmul.bf16.vlgmr.msra.gmra.mxu0 %v2507_v63  ;;  %2529 = vmatmul.bf16.vlgmr.msra.gmra.mxu1 %v2507_v63 }
 0x90c   :  { %2542 = vmatmul.bf16.vlgmr.msra.gmra.mxu2 %v2507_v63  ;;  %2555 = vmatmul.bf16.vlgmr.msra.gmra.mxu3 %v2507_v63 }
 0x90d   :  { %2758 = vmatpush.bf16.msra.mxu0 %v4497_v29  ;;  %2771 = vmatpush.bf16.msra.mxu1 %v4499_v3  ;;  %v5079_v29 = vld [vmem:[#allocation34_spill] sm:$0xff] }
 0x90e   :  { %2784 = vmatpush.bf16.msra.mxu2 %v4510_v21  ;;  %2797 = vmatpush.bf16.msra.mxu3 %v4507_v61  ;;  %v1593_v3 = vadd.f32 %v5079_v29, %v4761_v50  ;;  %v5080_v61 = vld [vmem:[#allocation35_spill] sm:$0xff] }
 0x90f   :  { %v1622_v21 = vadd.f32 %v5080_v61, %v4763_v56 }
 0x911   :  { %2759 = vmatpush.bf16.msra.mxu0 %v4513_v42  ;;  %2772 = vmatpush.bf16.msra.mxu1 %v4515_v9 }
 0x912   :  { %2785 = vmatpush.bf16.msra.mxu2 %v4530_v62  ;;  %2798 = vmatpush.bf16.msra.mxu3 %v4517_v10  ;;  %v5081_v62 = vld [vmem:[#allocation37_spill] sm:$0xff] }
 0x915   :  { %2760 = vmatpush.bf16.msra.mxu0 %v4522_v36  ;;  %2773 = vmatpush.bf16.msra.mxu1 %v4524_v44 }
 0x916   :  { %2786 = vmatpush.bf16.msra.mxu2 %v4542_v27  ;;  %2799 = vmatpush.bf16.msra.mxu3 %v4526_v45 }
 0x919   :  { %2761 = vmatpush.bf16.msra.mxu0 %v4533_v11  ;;  %2774 = vmatpush.bf16.msra.mxu1 %v4537_v30  ;;  %v1680_v11 = vadd.f32 %v5081_v62, %v4771_v60 }
 0x91a   :  { %2787 = vmatpush.bf16.msra.mxu2 %v4559_v41  ;;  %2800 = vmatpush.bf16.msra.mxu3 %v4539_v22 }
 0x91d   :  { %2762 = vmatpush.bf16.msra.mxu0 %v4547_v28  ;;  %2775 = vmatpush.bf16.msra.mxu1 %v4553_v35 }
 0x91e   :  { %2788 = vmatpush.bf16.msra.mxu2 %v4572_v55  ;;  %2801 = vmatpush.bf16.msra.mxu3 %v4555_v12 }
 0x921   :  { %2763 = vmatpush.bf16.msra.mxu0 %v4563_v19  ;;  %2776 = vmatpush.bf16.msra.mxu1 %v4567_v37 }
 0x922   :  { %2789 = vmatpush.bf16.msra.mxu2 %v4595_v7  ;;  %2802 = vmatpush.bf16.msra.mxu3 %v4569_v38  ;;  %v5082_v7 = vld [vmem:[#allocation36_spill] sm:$0xff] }
 0x925   :  { %2764 = vmatpush.bf16.msra.mxu0 %v4580_v23  ;;  %2777 = vmatpush.bf16.msra.mxu1 %v4589_v48 }
 0x926   :  { %2790 = vmatpush.bf16.msra.mxu2 %v4614_v25  ;;  %2803 = vmatpush.bf16.msra.mxu3 %v4598_v8  ;;  %v1651_v8 = vadd.f32 %v5082_v7, %v5065_v59 }
 0x929   :  { %2765 = vmatpush.bf16.msra.mxu0 %v4610_v20  ;;  %2778 = vmatpush.bf16.msra.mxu1 %v4612_v24 }
 0x92a   :  { %2791 = vmatpush.bf16.msra.mxu2 %v4633_v16  ;;  %2804 = vmatpush.bf16.msra.mxu3 %v4624_v18 }
 0x988   :  { %v2517_v42 = vpop.f32.mrf.mxu0  ;;  %v2530_v9 = vpop.f32.mrf.mxu1 }
 0x989   :  { %v2560_v10 = vadd.f32 %v2517_v42, %v1593_v3  ;;  %v2561_v36 = vadd.f32 %v2530_v9, %v1622_v21 }
 0x98b   :  { %v3403_v44 = vmul.f32 -1.442695, %v2560_v10  ;;  %v3404_v45 = vmul.f32 -1.442695, %v2561_v36 }
 0x98d   :  { %3771 = vpow2.f32 %v3403_v44  ;;  %v5084_v44 = vld [vmem:[#allocation39_spill] sm:$0xff] }
 0x98e   :  { %3773 = vpow2.f32 %v3404_v45  ;;  %v1625_v45 = vadd.f32 %v5084_v44, %v4763_v56 }
 0x98f   :  { %v2543_v30 = vpop.f32.mrf.mxu2  ;;  %v2556_v22 = vpop.f32.mrf.mxu3 }
 0x990   :  { %v2563_v27 = vadd.f32 %v2556_v22, %v1680_v11  ;;  %v2519_v28 = vpop.f32.mrf.mxu0  ;;  %v2532_v35 = vpop.f32.mrf.mxu1  ;;  %v2562_v25 = vadd.f32 %v2543_v30, %v1651_v8 }
 0x991   :  { %v5085_v35 = vld [vmem:[#allocation41_spill] sm:$0xff] }
 0x992   :  { %v3405_v12 = vmul.f32 -1.442695, %v2563_v27 }
 0x993   :  { %v3772_v41 = vpop.eup %3771 }
 0x994   :  { %v3774_v19 = vpop.eup %3773  ;;  %v2567_v37 = vadd.f32 1.0, %v3772_v41  ;;  %3775 = vpow2.f32 %v3405_v12  ;;  %v1683_v12 = vadd.f32 %v5085_v35, %v4771_v60  ;;  %v5087_v35 = vld [vmem:[#allocation42_spill] sm:$0xff] }
 0x995   :  { %v2586_v38 = vadd.f32 1.0, %v3774_v19 }
 0x996   :  { %3777 = vrcp.f32 %v2567_v37  ;;  %v2579_v5 = vand.u32 2147483648, %v2567_v37  ;;  %v2577_v4 = vand.u32 2147483647, %v2567_v37  ;;  %vm2573_vm14 = vweird.f32 %v2567_v37 }
 0x997   :  { %3779 = vrcp.f32 %v2586_v38  ;;  %v2545_v55 = vpop.f32.mrf.mxu2  ;;  %v2558_v23 = vpop.f32.mrf.mxu3  ;;  %v2598_v1 = vand.u32 2147483648, %v2586_v38  ;;  %v2596_v32 = vand.u32 2147483647, %v2586_v38  ;;  %vm2592_vm15 = vweird.f32 %v2586_v38 }
 0x998   :  { %v2580_v26 = vor.u32 1.1754944e-38, %v2579_v5  ;;  %vm2578_vm2 = vcmp.eq.f32.partialorder %v2577_v4, 8.507059e+37 }
 0x999   :  { %v2599_v40 = vor.u32 1.1754944e-38, %v2598_v1  ;;  %vm2597_vm3 = vcmp.eq.f32.partialorder %v2596_v32, 8.507059e+37 }
 0x99a   :  { %v3776_v48 = vpop.eup %3775 }
 0x99b   :  { %v2606_v20 = vadd.f32 1.0, %v3776_v48 }
 0x99c   :  { %v3778_v24 = vpop.eup %3777 }
 0x99d   :  { %v3780_v18 = vpop.eup %3779  ;;  %v2569_v16 = vmul.f32 %v3778_v24, %v2567_v37  ;;  %3781 = vrcp.f32 %v2606_v20  ;;  %vm2574_vm12 = vweird.f32 %v3778_v24  ;;  %v2618_v63 = vand.u32 2147483648, %v2606_v20 }
 0x99e   :  { %v2588_v31 = vmul.f32 %v3780_v18, %v2586_v38  ;;  %3783 = vtanh.f32 %v2562_v25  ;;  %vm2593_vm13 = vweird.f32 %v3780_v18  ;;  %vm2575_vm0 = vmor %vm2573_vm14, %vm2574_vm12  ;;  %vm2612_vm5 = vweird.f32 %v2606_v20 }
 0x99f   :  { %v2570_v17 = vsub.f32 1.0, %v2569_v16  ;;  %vm2594_vm1 = vmor %vm2592_vm15, %vm2593_vm13  ;;  %v2616_v29 = vand.u32 2147483647, %v2606_v20  ;;  %v2619_v61 = vor.u32 1.1754944e-38, %v2618_v63  ;;  %v5086_v16 = vld [vmem:[#allocation40_spill] sm:$0xff] }
 0x9a0   :  { %v2589_v13 = vsub.f32 1.0, %v2588_v31  ;;  %v1654_v31 = vadd.f32 %v5086_v16, %v5065_v59 }
 0x9a1   :  { %v2571_v34 = vmul.f32 %v3778_v24, %v2570_v17  ;;  %vm2617_vm7 = vcmp.eq.f32.partialorder %v2616_v29, 8.507059e+37 }
 0x9a2   :  { %v2590_v6 = vmul.f32 %v3780_v18, %v2589_v13 }
 0x9a3   :  { %v3782_v0 = vpop.eup %3781  ;;  %v2572_v46 = vadd.f32 %v3778_v24, %v2571_v34 }
 0x9a4   :  { %v2591_v2 = vadd.f32 %v3780_v18, %v2590_v6  ;;  %v2608_v39 = vmul.f32 %v3782_v0, %v2606_v20  ;;  %v3784_v43 = vpop.eup %3783  ;;  %vm2613_vm4 = vweird.f32 %v3782_v0 }
 0x9a5   :  { %v2576_v53 = vsel %vm2575_vm0, %v3778_v24, %v2572_v46  ;;  %vm2614_vm6 = vmor %vm2612_vm5, %vm2613_vm4 }
 0x9a6   :  { %v2581_v15 = vsel %vm2578_vm2, %v2580_v26, %v2576_v53  ;;  %v2595_v14 = vsel %vm2594_vm1, %v3780_v18, %v2591_v2  ;;  %v2609_v54 = vsub.f32 1.0, %v2608_v39 }
 0x9a7   :  { %v2600_v49 = vsel %vm2597_vm3, %v2599_v40, %v2595_v14  ;;  %v2623_v47 = vmul.f32 %v3784_v43, %v2581_v15 }
 0x9a8   :  { %v2622_v33 = vmul.f32 %v2600_v49, %v4953_v57  ;;  %v2610_v52 = vmul.f32 %v3782_v0, %v2609_v54  ;;  %v5083_v57 = vld [vmem:[#allocation38_spill] sm:$0xff] }
 0x9a9   :  { %v1596_v36 = vadd.f32 %v5083_v57, %v4761_v50 }
 0x9aa   :  { %v4997_v51 = vadd.f32 %v2623_v47, %v2622_v33  ;;  %v2611_v58 = vadd.f32 %v3782_v0, %v2610_v52 }
 0x9ac   :  { %3785 = vtanh.f32 %v4997_v51  ;;  %v2615_v3 = vsel %vm2614_vm6, %v3782_v0, %v2611_v58 }
 0x9ad   :  { %v2620_v42 = vsel %vm2617_vm7, %v2619_v61, %v2615_v3 }
 0x9b2   :  { %v3786_v21 = vpop.eup %3785 }
 0x9b3   :  { %v2626_v9 = vmul.f32 %v3786_v21, %v2620_v42 }
 0x9b5   :  { %v2632_v10 = vpack.c.bf16 %v2626_v9, %v2626_v9 }
 0x9b7   :  { %2641 = vmatmul.bf16.vlgmr.msrb.gmra.mxu0 %v2632_v10  ;;  %2654 = vmatmul.bf16.vlgmr.msrb.gmra.mxu1 %v2632_v10 }
 0x9b8   :  { %2667 = vmatmul.bf16.vlgmr.msrb.gmra.mxu2 %v2632_v10  ;;  %2680 = vmatmul.bf16.vlgmr.msrb.gmra.mxu3 %v2632_v10 }
 0xa34   :  { %v2642_v62 = vpop.f32.mrf.mxu0  ;;  %v2655_v11 = vpop.f32.mrf.mxu1 }
 0xa35   :  { %v2685_v30 = vadd.f32 %v2642_v62, %v1596_v36  ;;  %v2686_v22 = vadd.f32 %v2655_v11, %v1625_v45 }
 0xa37   :  { %v3406_v27 = vmul.f32 -1.442695, %v2685_v30  ;;  %v3407_v28 = vmul.f32 -1.442695, %v2686_v22  ;;  %v3546_v22 = vld [vmem:[#allocation13 + $0x30] sm:$0xff] }
 0xa39   :  { %3787 = vpow2.f32 %v3406_v27  ;;  %v3545_v27 = vld [vmem:[#allocation13 + $0x28] sm:$0xff] }
 0xa3a   :  { %3789 = vpow2.f32 %v3407_v28  ;;  %v3544_v28 = vld [vmem:[#allocation13 + $0x20] sm:$0xff] }
 0xa3b   :  { %v2668_v41 = vpop.f32.mrf.mxu2  ;;  %v2681_v19 = vpop.f32.mrf.mxu3 }
 0xa3c   :  { %v2688_v37 = vadd.f32 %v2681_v19, %v1683_v12  ;;  %v2644_v38 = vpop.f32.mrf.mxu0  ;;  %v2657_v55 = vpop.f32.mrf.mxu1  ;;  %v2687_v5 = vadd.f32 %v2668_v41, %v1654_v31  ;;  %v1598_v12 = vadd.f32 %v5087_v35, %v4761_v50  ;;  %v5088_v41 = vld [vmem:[#allocation43_spill] sm:$0xff] }
 0xa3d   :  { %v1627_v19 = vadd.f32 %v5088_v41, %v4763_v56 }
 0xa3e   :  { %v3408_v23 = vmul.f32 -1.442695, %v2688_v37  ;;  %v3543_v37 = vld [vmem:[#allocation13 + $0x18] sm:$0xff] }
 0xa3f   :  { %v3788_v48 = vpop.eup %3787 }
 0xa40   :  { %v3790_v7 = vpop.eup %3789  ;;  %v2692_v8 = vadd.f32 1.0, %v3788_v48  ;;  %3791 = vpow2.f32 %v3408_v23 }
 0xa41   :  { %v2711_v20 = vadd.f32 1.0, %v3790_v7 }
 0xa42   :  { %3793 = vrcp.f32 %v2692_v8  ;;  %v2704_v0 = vand.u32 2147483648, %v2692_v8  ;;  %v2702_v2 = vand.u32 2147483647, %v2692_v8  ;;  %vm2698_vm10 = vweird.f32 %v2692_v8 }
 0xa43   :  { %3795 = vrcp.f32 %v2711_v20  ;;  %v2670_v24 = vpop.f32.mrf.mxu2  ;;  %v2683_v25 = vpop.f32.mrf.mxu3  ;;  %v2723_v46 = vand.u32 2147483648, %v2711_v20  ;;  %v2721_v40 = vand.u32 2147483647, %v2711_v20  ;;  %vm2717_vm11 = vweird.f32 %v2711_v20 }
 0xa44   :  { %v2705_v15 = vor.u32 1.1754944e-38, %v2704_v0  ;;  %vm2703_vm14 = vcmp.eq.f32.partialorder %v2702_v2, 8.507059e+37  ;;  %v3541_v24 = vld [vmem:[#allocation13 + $0x8] sm:$0xff] }
 0xa45   :  { %v2724_v49 = vor.u32 1.1754944e-38, %v2723_v46  ;;  %vm2722_vm15 = vcmp.eq.f32.partialorder %v2721_v40, 8.507059e+37  ;;  %v5089_v25 = vld [vmem:[#allocation45_spill] sm:$0xff]  ;;  %v5090_v46 = vld [vmem:[#allocation44_spill] sm:$0xff] }
 0xa46   :  { %v3792_v18 = vpop.eup %3791 }
 0xa47   :  { %v2731_v17 = vadd.f32 1.0, %v3792_v18  ;;  %v1685_v18 = vadd.f32 %v5089_v25, %v4771_v60 }
 0xa48   :  { %v3794_v13 = vpop.eup %3793 }
 0xa49   :  { %v3796_v1 = vpop.eup %3795  ;;  %v2694_v34 = vmul.f32 %v3794_v13, %v2692_v8  ;;  %3797 = vrcp.f32 %v2731_v17  ;;  %vm2699_vm8 = vweird.f32 %v3794_v13  ;;  %v2743_v10 = vand.u32 2147483648, %v2731_v17 }
 0xa4a   :  { %v2713_v4 = vmul.f32 %v3796_v1, %v2711_v20  ;;  %3799 = vtanh.f32 %v2687_v5  ;;  %vm2718_vm9 = vweird.f32 %v3796_v1  ;;  %vm2700_vm12 = vmor %vm2698_vm10, %vm2699_vm8  ;;  %vm2737_vm1 = vweird.f32 %v2731_v17  ;;  %v3542_v20 = vld [vmem:[#allocation13 + $0x10] sm:$0xff] }
 0xa4b   :  { %v2695_v6 = vsub.f32 1.0, %v2694_v34  ;;  %vm2719_vm13 = vmor %vm2717_vm11, %vm2718_vm9  ;;  %v2741_v57 = vand.u32 2147483647, %v2731_v17  ;;  %v2744_v44 = vor.u32 1.1754944e-38, %v2743_v10 }
 0xa4c   :  { %v2714_v32 = vsub.f32 1.0, %v2713_v4 }
 0xa4d   :  { %v2696_v26 = vmul.f32 %v3794_v13, %v2695_v6  ;;  %vm2742_vm3 = vcmp.eq.f32.partialorder %v2741_v57, 8.507059e+37 }
 0xa4e   :  { %v2715_v39 = vmul.f32 %v3796_v1, %v2714_v32 }
 0xa4f   :  { %v3798_v53 = vpop.eup %3797  ;;  %v2697_v43 = vadd.f32 %v3794_v13, %v2696_v26  ;;  %v1656_v26 = vadd.f32 %v5090_v46, %v5065_v59 }
 0xa50   :  { %v2716_v14 = vadd.f32 %v3796_v1, %v2715_v39  ;;  %v2733_v54 = vmul.f32 %v3798_v53, %v2731_v17  ;;  %v3800_v33 = vpop.eup %3799  ;;  %vm2738_vm0 = vweird.f32 %v3798_v53 }
 0xa51   :  { %v2701_v47 = vsel %vm2700_vm12, %v3794_v13, %v2697_v43  ;;  %vm2739_vm2 = vmor %vm2737_vm1, %vm2738_vm0  ;;  %v3540_v13 = vld [vmem:[#allocation13] sm:$0xff] }
 0xa52   :  { %v2706_v52 = vsel %vm2703_vm14, %v2705_v15, %v2701_v47  ;;  %v2720_v58 = vsel %vm2719_vm13, %v3796_v1, %v2716_v14  ;;  %v2734_v63 = vsub.f32 1.0, %v2733_v54 }
 0xa53   :  { %v2725_v29 = vsel %vm2722_vm15, %v2724_v49, %v2720_v58  ;;  %v2748_v3 = vmul.f32 %v3800_v33, %v2706_v52 }
 0xa54   :  { %v2747_v61 = vmul.f32 %v2725_v29, %v4997_v51  ;;  %v2735_v21 = vmul.f32 %v3798_v53, %v2734_v63  ;;  %v3547_v51 = vld [vmem:[#allocation13 + $0x38] sm:$0xff] }
 0xa55   :  { %2946 = vmatpush.bf16.msrb.mxu0 %v3547_v51 }
 0xa56   :  { %v5009_v42 = vadd.f32 %v2748_v3, %v2747_v61  ;;  %v2736_v9 = vadd.f32 %v3798_v53, %v2735_v21 }
 0xa58   :  { %3801 = vtanh.f32 %v5009_v42  ;;  %v2740_v36 = vsel %vm2739_vm2, %v3798_v53, %v2736_v9 }
 0xa59   :  { %v2745_v62 = vsel %vm2742_vm3, %v2744_v44, %v2740_v36  ;;  %2947 = vmatpush.bf16.msrb.mxu0 %v3546_v22 }
 0xa5d   :  { %2948 = vmatpush.bf16.msrb.mxu0 %v3545_v27 }
 0xa5e   :  { %v3802_v45 = vpop.eup %3801 }
 0xa5f   :  { %v2751_v11 = vmul.f32 %v3802_v45, %v2745_v62 }
 0xa61   :  { %v2757_v30 = vpack.c.bf16 %v2751_v11, %v2751_v11  ;;  %2949 = vmatpush.bf16.msrb.mxu0 %v3544_v28 }
 0xa63   :  { %2766 = vmatmul.bf16.vlgmr.msra.gmra.mxu0 %v2757_v30  ;;  %2779 = vmatmul.bf16.vlgmr.msra.gmra.mxu1 %v2757_v30 }
 0xa64   :  { %2792 = vmatmul.bf16.vlgmr.msra.gmra.mxu2 %v2757_v30  ;;  %2805 = vmatmul.bf16.vlgmr.msra.gmra.mxu3 %v2757_v30 }
 0xa65   :  { %2950 = vmatpush.bf16.msrb.mxu0 %v3543_v37 }
 0xa69   :  { %2951 = vmatpush.bf16.msrb.mxu0 %v3542_v20 }
 0xa6d   :  { %2952 = vmatpush.bf16.msrb.mxu0 %v3541_v24 }
 0xa71   :  { %2953 = vmatpush.bf16.msrb.mxu0 %v3540_v13 }
 0xae0   :  { %v2767_v38 = vpop.f32.mrf.mxu0  ;;  %v2780_v55 = vpop.f32.mrf.mxu1 }
 0xae1   :  { %v2810_v23 = vadd.f32 %v2767_v38, %v1598_v12  ;;  %v2811_v48 = vadd.f32 %v2780_v55, %v1627_v19 }
 0xae3   :  { %v3409_v7 = vmul.f32 -1.442695, %v2810_v23  ;;  %v3410_v8 = vmul.f32 -1.442695, %v2811_v48 }
 0xae5   :  { %3803 = vpow2.f32 %v3409_v7 }
 0xae6   :  { %3805 = vpow2.f32 %v3410_v8 }
 0xae7   :  { %v2793_v50 = vpop.f32.mrf.mxu2  ;;  %v2806_v16 = vpop.f32.mrf.mxu3 }
 0xae8   :  { %v2813_v31 = vadd.f32 %v2806_v16, %v1685_v18  ;;  %v2769_v56 = vpop.f32.mrf.mxu0  ;;  %v2782_v17 = vpop.f32.mrf.mxu1  ;;  %v2812_v40 = vadd.f32 %v2793_v50, %v1656_v26 }
 0xaea   :  { %v3411_v5 = vmul.f32 -1.442695, %v2813_v31 }
 0xaeb   :  { %v3804_v1 = vpop.eup %3803 }
 0xaec   :  { %v3806_v34 = vpop.eup %3805  ;;  %v2817_v4 = vadd.f32 1.0, %v3804_v1  ;;  %3807 = vpow2.f32 %v3411_v5 }
 0xaed   :  { %v2836_v6 = vadd.f32 1.0, %v3806_v34 }
 0xaee   :  { %3809 = vrcp.f32 %v2817_v4  ;;  %v2829_v49 = vand.u32 2147483648, %v2817_v4  ;;  %v2827_v52 = vand.u32 2147483647, %v2817_v4  ;;  %vm2823_vm6 = vweird.f32 %v2817_v4 }
 0xaef   :  { %3811 = vrcp.f32 %v2836_v6  ;;  %v2795_v32 = vpop.f32.mrf.mxu2  ;;  %v2808_v0 = vpop.f32.mrf.mxu3  ;;  %v2848_v47 = vand.u32 2147483648, %v2836_v6  ;;  %v2846_v63 = vand.u32 2147483647, %v2836_v6  ;;  %vm2842_vm7 = vweird.f32 %v2836_v6 }
 0xaf0   :  { %v2830_v3 = vor.u32 1.1754944e-38, %v2829_v49  ;;  %vm2828_vm10 = vcmp.eq.f32.partialorder %v2827_v52, 8.507059e+37 }
 0xaf1   :  { %v2849_v9 = vor.u32 1.1754944e-38, %v2848_v47  ;;  %vm2847_vm11 = vcmp.eq.f32.partialorder %v2846_v63, 8.507059e+37 }
 0xaf2   :  { %v3808_v60 = vpop.eup %3807 }
 0xaf3   :  { %v2856_v2 = vadd.f32 1.0, %v3808_v60 }
 0xaf4   :  { %v3810_v39 = vpop.eup %3809 }
 0xaf5   :  { %v3812_v53 = vpop.eup %3811  ;;  %v2819_v43 = vmul.f32 %v3810_v39, %v2817_v4  ;;  %3813 = vrcp.f32 %v2856_v2  ;;  %vm2824_vm4 = vweird.f32 %v3810_v39  ;;  %v2868_v28 = vand.u32 2147483648, %v2856_v2 }
 0xaf6   :  { %v2838_v15 = vmul.f32 %v3812_v53, %v2836_v6  ;;  %3815 = vtanh.f32 %v2812_v40  ;;  %vm2843_vm5 = vweird.f32 %v3812_v53  ;;  %vm2825_vm8 = vmor %vm2823_vm6, %vm2824_vm4  ;;  %vm2862_vm13 = vweird.f32 %v2856_v2 }
 0xaf7   :  { %v2820_v14 = vsub.f32 1.0, %v2819_v43  ;;  %vm2844_vm9 = vmor %vm2842_vm7, %vm2843_vm5  ;;  %v2866_v35 = vand.u32 2147483647, %v2856_v2  ;;  %v2869_v41 = vor.u32 1.1754944e-38, %v2868_v28 }
 0xaf8   :  { %v2839_v54 = vsub.f32 1.0, %v2838_v15 }
 0xaf9   :  { %v2821_v33 = vmul.f32 %v3810_v39, %v2820_v14  ;;  %vm2867_vm15 = vcmp.eq.f32.partialorder %v2866_v35, 8.507059e+37 }
 0xafa   :  { %v2840_v58 = vmul.f32 %v3812_v53, %v2839_v54 }
 0xafb   :  { %v3814_v29 = vpop.eup %3813  ;;  %v2822_v59 = vadd.f32 %v3810_v39, %v2821_v33 }
 0xafc   :  { %v2841_v61 = vadd.f32 %v3812_v53, %v2840_v58  ;;  %v2858_v21 = vmul.f32 %v3814_v29, %v2856_v2  ;;  %v3816_v57 = vpop.eup %3815  ;;  %vm2863_vm12 = vweird.f32 %v3814_v29 }
 0xafd   :  { %v2826_v10 = vsel %vm2825_vm8, %v3810_v39, %v2822_v59  ;;  %vm2864_vm14 = vmor %vm2862_vm13, %vm2863_vm12 }
 0xafe   :  { %v2831_v36 = vsel %vm2828_vm10, %v2830_v3, %v2826_v10  ;;  %v2845_v44 = vsel %vm2844_vm9, %v3812_v53, %v2841_v61  ;;  %v2859_v45 = vsub.f32 1.0, %v2858_v21 }
 0xaff   :  { %v2850_v62 = vsel %vm2847_vm11, %v2849_v9, %v2845_v44  ;;  %v2873_v11 = vmul.f32 %v3816_v57, %v2831_v36 }
 0xb00   :  { %v2872_v30 = vmul.f32 %v2850_v62, %v5009_v42  ;;  %v2860_v51 = vmul.f32 %v3814_v29, %v2859_v45  ;;  %v3562_v42 = vld [vmem:[%s5033_s6] ss:$0 sm:$0xff] }
 0xb02   :  { %v2874_v22 = vadd.f32 %v2873_v11, %v2872_v30  ;;  %v2861_v27 = vadd.f32 %v3814_v29, %v2860_v51 }
 0xb04   :  { %3817 = vtanh.f32 %v2874_v22  ;;  %v2865_v12 = vsel %vm2864_vm14, %v3814_v29, %v2861_v27 }
 0xb05   :  { %v2870_v37 = vsel %vm2867_vm15, %v2869_v41, %v2865_v12 }
 0xb0a   :  { %v3818_v19 = vpop.eup %3817 }
 0xb0b   :  { %v2876_v38 = vmul.f32 %v3818_v19, %v2870_v37 }
 0xb0d   :  { %v2877_v55 = vpack.c.bf16 %v2876_v38, %v2876_v38 }
 0xb0f   :  { %2954 = vmatmul.bf16.vlgmr.msrb.gmra.mxu0 %v2877_v55 }
 0xb8c   :  { %v2955_v23 = vpop.f32.mrf.mxu0 }
 0xb8d   :  { %v2956_v48 = vadd.f32 %v3562_v42, %v2955_v23 }
 0xb8f   :  { %2959 = vst [vmem:[#allocation15] sm:$0xff] %v2956_v48 }
 0xb90   :  { %2970 = dma.vmem_to_hbm [thread:$0]  %s2966_s10, 128, %s2968_s14, [#allocation6]  }
 0xb94   :  { %v2957_v7 = vpop.f32.mrf.mxu0 }
 0xb95   :  { %3995 = dma.done.wait [#allocation6], 128  }
 0xb96   :  { %3996 = vsyncadd [#allocation6], 4294967168 }
 0xb97   :  { %2975 = vsyncpa [#allocation5], 1 }
 0xb98   :  { %2976 = vsyncpa [#allocation8], 1 }
 0xb99   :  { %2977 = vsyncpa [#allocation11], 1 }
 0xb9a   :  { %2978 = vsyncpa [#allocation14], 1 }
 0xb9b   :  { %2979 = vsyncpa [#allocation6], 1 }

</bundles_post_ra>
